<compile_context>
chip_gen: v6e
topology: v6e:2x2x1
jax: 0.10.0
libtpu: 0.0.40
codegen_flags: <defaults>
</compile_context>

<pallas_src>
import jax
import jax.numpy as jnp
from jax.experimental import pallas as pl
from jax.experimental.pallas import tpu as pltpu


KSIZE = 5
STRIDE = 2


def _round_up(n, m):
    return ((n + m - 1) // m) * m


def _conv_out(n):
    return (n - KSIZE) // STRIDE + 1


# ------------------------------- fused kernel --------------------------------
def _dqn_fused_kernel(x_ref,
                      s1_ref, t1_ref, bi1_ref,
                      s2_ref, t2_ref, bi2_ref,
                      s3_ref, t3_ref, bi3_ref,
                      selfc_ref, wfc_ref, bfc_ref,
                      out_ref,
                      y1_ref, y2_ref, y3_ref):
    """Whole DQN forward in one kernel.

    Activations are 2-D slabs [B*H (padded to 8), W*C] kept in VMEM scratch.
    Every matmul is a plain 2-D MXU dot (bf16 inputs, f32 accumulation); the
    bias/ReLU epilogue runs in f32 (BN scale is pre-folded into the weights).
    """

    def conv_block(x_bf16, s_ref, t_ref, bi_ref, y_ref):
        acc = jnp.zeros(y_ref.shape, jnp.float32)
        for kh in range(KSIZE):                            # static unroll (5)
            rows = jnp.dot(s_ref[kh], x_bf16,
                           preferred_element_type=jnp.float32)
            # rows holds exact bf16 values (0/1 selection of bf16 input) -> lossless cast
            acc = acc + jnp.dot(rows.astype(jnp.bfloat16), t_ref[kh],
                                preferred_element_type=jnp.float32)
        y_ref[...] = jnp.maximum(acc + bi_ref[...], 0.0)

    conv_block(x_ref[...], s1_ref, t1_ref, bi1_ref, y1_ref)
    conv_block(y1_ref[...].astype(jnp.bfloat16), s2_ref, t2_ref, bi2_ref, y2_ref)
    conv_block(y2_ref[...].astype(jnp.bfloat16), s3_ref, t3_ref, bi3_ref, y3_ref)

    # Final Linear(448, 2); the NCHW flatten order lives in the pre-permuted wfc_ref.
    a3 = y3_ref[...].astype(jnp.bfloat16)
    acc = jnp.zeros(out_ref.shape, jnp.float32)
    for r in range(selfc_ref.shape[0]):                    # static unroll (Ho3 = 2)
        rows = jnp.dot(selfc_ref[r], a3, preferred_element_type=jnp.float32)
        acc = acc + jnp.dot(rows.astype(jnp.bfloat16), wfc_ref[r],
                            preferred_element_type=jnp.float32)
    out_ref[...] = acc + bfc_ref[...]


# ----------------------------- wrapper / prep ---------------------------------
def _toeplitz_weights(conv_w, w_in):
    """conv_w: [Cout, Cin, 5, 5] -> T[kh]: [w_in*Cin, Wo*Cout].

    T[kh][w*Cin + ci, wo*Cout + co] = conv_w[co, ci, kh, w - 2*wo] (0 if invalid),
    i.e. the dense block-Toeplitz matrix realizing the stride-2 'valid' conv along W.
    """
    co, ci, _, _ = conv_w.shape
    wo = _conv_out(w_in)
    wt = jnp.transpose(conv_w, (2, 3, 1, 0))                               # [kh,kw,ci,co]
    kw = jnp.arange(w_in)[:, None] - STRIDE * jnp.arange(wo)[None, :]      # [w_in, wo]
    valid = (kw >= 0) & (kw < KSIZE)
    g = wt[:, jnp.clip(kw, 0, KSIZE - 1)]                                  # [kh,w_in,wo,ci,co]
    g = jnp.where(valid[None, :, :, None, None], g, 0.0)
    return jnp.transpose(g, (0, 1, 3, 2, 4)).reshape(KSIZE, w_in * ci, wo * co)


def _row_select(batch, h_in, ho, rows_pad, cols_pad):
    """S[kh]: [rows_pad, cols_pad]; S[kh, b*ho + o, b*h_in + 2*o + kh] = 1."""
    r = jnp.arange(rows_pad)
    c = jnp.arange(cols_pad)
    rb, ro = r // ho, r % ho
    cb, ch = c // h_in, c % h_in
    kh = jnp.arange(KSIZE)
    s = ((rb[None, :, None] == cb[None, None, :])
         & (rb[None, :, None] < batch)
         & (cb[None, None, :] < batch)
         & (ch[None, None, :] == STRIDE * ro[None, :, None] + kh[:, None, None]))
    return s


def _fold_bn_into_weights(conv_w, conv_b, gamma, beta, mean, var, w_in, eps=1e-5):
    """Fold inference-mode BN into the conv: scale goes into the Toeplitz weight
    columns (f32 multiply before the bf16 cast), bias stays as a per-column f32 slab."""
    wo = _conv_out(w_in)
    scale = gamma / jnp.sqrt(var + eps)
    bias = (conv_b - mean) * scale + beta
    t = _toeplitz_weights(conv_w * scale[:, None, None, None], w_in)
    # tile bias across wo so indices line up with slab columns (wo*Cout + cout)
    return t, jnp.tile(bias, wo)[None, :].astype(jnp.float32)


def dqn_forward(params, x_nchw):
    mm_dtype = jnp.bfloat16

    batch, c0, h0, w0 = x_nchw.shape
    ho1, wo1 = _conv_out(h0), _conv_out(w0)
    ho2, wo2 = _conv_out(ho1), _conv_out(wo1)
    ho3, wo3 = _conv_out(ho2), _conv_out(wo2)

    w1, b1, g1, be1, m1, v1 = params["block1"]
    w2, b2, g2, be2, m2, v2 = params["block2"]
    w3, b3, g3, be3, m3, v3 = params["block3"]
    wfc, bfc = params["move"]
    c1, c2, c3 = w1.shape[0], w2.shape[0], w3.shape[0]
    nout = wfc.shape[0]

    # padded slab row counts (sublane dim -> multiple of 8)
    r0 = _round_up(batch * h0, 8)
    r1 = _round_up(batch * ho1, 8)
    r2 = _round_up(batch * ho2, 8)
    r3 = _round_up(batch * ho3, 8)

    # input slab [B*H0, W0*C0] (NHWC flatten of the NCHW input)
    x_slab = jnp.transpose(x_nchw, (0, 2, 3, 1)).reshape(batch * h0, w0 * c0)
    x_slab = jnp.pad(x_slab, ((0, r0 - batch * h0), (0, 0))).astype(mm_dtype)

    # row-selection matrices (stride-2 over H)
    s1 = _row_select(batch, h0, ho1, r1, r0).astype(mm_dtype)
    s2 = _row_select(batch, ho1, ho2, r2, r1).astype(mm_dtype)
    s3 = _row_select(batch, ho2, ho3, r3, r2).astype(mm_dtype)

    # Toeplitz weights (stride-2 over W) with BN scale folded in + f32 bias slabs
    t1, bi1 = _fold_bn_into_weights(w1, b1, g1, be1, m1, v1, w0)
    t2, bi2 = _fold_bn_into_weights(w2, b2, g2, be2, m2, v2, wo1)
    t3, bi3 = _fold_bn_into_weights(w3, b3, g3, be3, m3, v3, wo2)
    t1, t2, t3 = t1.astype(mm_dtype), t2.astype(mm_dtype), t3.astype(mm_dtype)

    # final Linear: reorder the PyTorch [nout, C3*Ho3*Wo3] (NCHW .view) weight into
    # per-output-row weights matching the layer-3 slab layout [wo*C3 + c].
    wfc_r = (wfc.reshape(nout, c3, ho3, wo3)
                .transpose(2, 3, 1, 0)
                .reshape(ho3, wo3 * c3, nout).astype(mm_dtype))
    selfc = (jnp.arange(r3)[None, None, :]
             == (ho3 * jnp.arange(batch)[None, :, None]
                 + jnp.arange(ho3)[:, None, None])).astype(mm_dtype)
    bfc_row = bfc[None, :].astype(jnp.float32)

    return pl.pallas_call(
        _dqn_fused_kernel,
        out_shape=jax.ShapeDtypeStruct((batch, nout), jnp.float32),
        scratch_shapes=[
            pltpu.VMEM((r1, wo1 * c1), jnp.float32),   # layer-1 activation slab
            pltpu.VMEM((r2, wo2 * c2), jnp.float32),   # layer-2 activation slab
            pltpu.VMEM((r3, wo3 * c3), jnp.float32),   # layer-3 activation slab
        ],
    )(x_slab,
      s1, t1, bi1,
      s2, t2, bi2,
      s3, t3, bi3,
      selfc, wfc_r, bfc_row)


# --------------------------- deterministic params -----------------------------
def init_params(key):
    ks = jax.random.split(key, 12)

    def conv_block(kw_key, kb_key, bn_key, cout, cin):
        w = 0.05 * jax.random.normal(kw_key, (cout, cin, 5, 5), jnp.float32)
        b = 0.05 * jax.random.normal(kb_key, (cout,), jnp.float32)
        g1, g2, g3, g4 = jax.random.split(bn_key, 4)
        gamma = 1.0 + 0.1 * jax.random.normal(g1, (cout,), jnp.float32)
        beta = 0.1 * jax.random.normal(g2, (cout,), jnp.float32)
        mean = 0.1 * jax.random.normal(g3, (cout,), jnp.float32)
        var = 0.5 + jnp.abs(jax.random.normal(g4, (cout,), jnp.float32))
        return (w, b, gamma, beta, mean, var)

    return {
        "block1": conv_block(ks[0], ks[1], ks[2], 16, 3),
        "block2": conv_block(ks[3], ks[4], ks[5], 32, 16),
        "block3": conv_block(ks[6], ks[7], ks[8], 32, 32),
        "move": (
            0.05 * jax.random.normal(ks[9], (2, 448), jnp.float32),
            0.05 * jax.random.normal(ks[10], (2,), jnp.float32),
        ),
    }


if __name__ == "__main__":
    key = jax.random.PRNGKey(0)
    pkey, xkey = jax.random.split(key)
    params = init_params(pkey)
    # Input 3x40x80 so that three stride-2 5x5 convs give 32*2*7 = 448 features,
    # matching the Linear(448, 2) head of the PyTorch module.
    x = jax.random.normal(xkey, (2, 3, 40, 80), jnp.float32)  # NCHW like PyTorch
    out = jax.jit(dqn_forward)(params, x)
    out = jax.block_until_ready(out)
    assert out.shape == (2, 2) and out.dtype == jnp.float32
    assert bool(jnp.all(jnp.isfinite(out)))
    print("KERNEL_OK")
</pallas_src>

<mosaic_0001>
module attributes {stable_mosaic.version = 11 : i64} {
  func.func @_dqn_fused_kernel(%arg0: memref<80x240xbf16, #tpu.memory_space<vmem>>, %arg1: memref<5x40x80xbf16, #tpu.memory_space<vmem>>, %arg2: memref<5x240x608xbf16, #tpu.memory_space<vmem>>, %arg3: memref<1x608xf32, #tpu.memory_space<vmem>>, %arg4: memref<5x16x40xbf16, #tpu.memory_space<vmem>>, %arg5: memref<5x608x544xbf16, #tpu.memory_space<vmem>>, %arg6: memref<1x544xf32, #tpu.memory_space<vmem>>, %arg7: memref<5x8x16xbf16, #tpu.memory_space<vmem>>, %arg8: memref<5x544x224xbf16, #tpu.memory_space<vmem>>, %arg9: memref<1x224xf32, #tpu.memory_space<vmem>>, %arg10: memref<2x2x8xbf16, #tpu.memory_space<vmem>>, %arg11: memref<2x224x2xbf16, #tpu.memory_space<vmem>>, %arg12: memref<1x2xf32, #tpu.memory_space<vmem>>, %arg13: memref<2x2xf32, #tpu.memory_space<vmem>>, %arg14: memref<40x608xf32, #tpu.memory_space<vmem>>, %arg15: memref<16x544xf32, #tpu.memory_space<vmem>>, %arg16: memref<8x224xf32, #tpu.memory_space<vmem>>) attributes {dimension_semantics = [], scalar_prefetch = 0 : i64, scratch_operands = 3 : i64, tpu.core_type = #tpu.core_type<tc>} {
    %c0 = arith.constant 0 : index
    %c0_0 = arith.constant 0 : index
    %0 = vector.load %arg0[%c0, %c0_0] : memref<80x240xbf16, #tpu.memory_space<vmem>>, vector<80x240xbf16>
    %cst = arith.constant 0.000000e+00 : f32
    %1 = vector.broadcast %cst : f32 to vector<40x608xf32>
    %c0_1 = arith.constant 0 : index
    %c0_2 = arith.constant 0 : index
    %c0_3 = arith.constant 0 : index
    %2 = vector.load %arg1[%c0_1, %c0_2, %c0_3] : memref<5x40x80xbf16, #tpu.memory_space<vmem>>, vector<1x40x80xbf16>
    %3 = vector.shape_cast %2 : vector<1x40x80xbf16> to vector<40x80xbf16>
    %cst_4 = arith.constant dense<0.000000e+00> : vector<40x240xf32>
    %4 = tpu.matmul %3, %0, %cst_4 {dimension_numbers = #tpu.dot_dimension_numbers<[1], [0], [0], [1], [0, 0, 1, 1], [], []>} : vector<40x80xbf16>, vector<80x240xbf16>, vector<40x240xf32> -> vector<40x240xf32>
    %5 = arith.truncf %4 : vector<40x240xf32> to vector<40x240xbf16>
    %c0_5 = arith.constant 0 : index
    %c0_6 = arith.constant 0 : index
    %c0_7 = arith.constant 0 : index
    %6 = vector.load %arg2[%c0_5, %c0_6, %c0_7] : memref<5x240x608xbf16, #tpu.memory_space<vmem>>, vector<1x240x608xbf16>
    %7 = vector.shape_cast %6 : vector<1x240x608xbf16> to vector<240x608xbf16>
    %cst_8 = arith.constant dense<0.000000e+00> : vector<40x608xf32>
    %8 = tpu.matmul %5, %7, %cst_8 {dimension_numbers = #tpu.dot_dimension_numbers<[1], [0], [0], [1], [0, 0, 1, 1], [], []>} : vector<40x240xbf16>, vector<240x608xbf16>, vector<40x608xf32> -> vector<40x608xf32>
    %9 = arith.addf %1, %8 : vector<40x608xf32>
    %c1 = arith.constant 1 : index
    %c0_9 = arith.constant 0 : index
    %c0_10 = arith.constant 0 : index
    %10 = vector.load %arg1[%c1, %c0_9, %c0_10] : memref<5x40x80xbf16, #tpu.memory_space<vmem>>, vector<1x40x80xbf16>
    %11 = vector.shape_cast %10 : vector<1x40x80xbf16> to vector<40x80xbf16>
    %cst_11 = arith.constant dense<0.000000e+00> : vector<40x240xf32>
    %12 = tpu.matmul %11, %0, %cst_11 {dimension_numbers = #tpu.dot_dimension_numbers<[1], [0], [0], [1], [0, 0, 1, 1], [], []>} : vector<40x80xbf16>, vector<80x240xbf16>, vector<40x240xf32> -> vector<40x240xf32>
    %13 = arith.truncf %12 : vector<40x240xf32> to vector<40x240xbf16>
    %c1_12 = arith.constant 1 : index
    %c0_13 = arith.constant 0 : index
    %c0_14 = arith.constant 0 : index
    %14 = vector.load %arg2[%c1_12, %c0_13, %c0_14] : memref<5x240x608xbf16, #tpu.memory_space<vmem>>, vector<1x240x608xbf16>
    %15 = vector.shape_cast %14 : vector<1x240x608xbf16> to vector<240x608xbf16>
    %cst_15 = arith.constant dense<0.000000e+00> : vector<40x608xf32>
    %16 = tpu.matmul %13, %15, %cst_15 {dimension_numbers = #tpu.dot_dimension_numbers<[1], [0], [0], [1], [0, 0, 1, 1], [], []>} : vector<40x240xbf16>, vector<240x608xbf16>, vector<40x608xf32> -> vector<40x608xf32>
    %17 = arith.addf %9, %16 : vector<40x608xf32>
    %c2 = arith.constant 2 : index
    %c0_16 = arith.constant 0 : index
    %c0_17 = arith.constant 0 : index
    %18 = vector.load %arg1[%c2, %c0_16, %c0_17] : memref<5x40x80xbf16, #tpu.memory_space<vmem>>, vector<1x40x80xbf16>
    %19 = vector.shape_cast %18 : vector<1x40x80xbf16> to vector<40x80xbf16>
    %cst_18 = arith.constant dense<0.000000e+00> : vector<40x240xf32>
    %20 = tpu.matmul %19, %0, %cst_18 {dimension_numbers = #tpu.dot_dimension_numbers<[1], [0], [0], [1], [0, 0, 1, 1], [], []>} : vector<40x80xbf16>, vector<80x240xbf16>, vector<40x240xf32> -> vector<40x240xf32>
    %21 = arith.truncf %20 : vector<40x240xf32> to vector<40x240xbf16>
    %c2_19 = arith.constant 2 : index
    %c0_20 = arith.constant 0 : index
    %c0_21 = arith.constant 0 : index
    %22 = vector.load %arg2[%c2_19, %c0_20, %c0_21] : memref<5x240x608xbf16, #tpu.memory_space<vmem>>, vector<1x240x608xbf16>
    %23 = vector.shape_cast %22 : vector<1x240x608xbf16> to vector<240x608xbf16>
    %cst_22 = arith.constant dense<0.000000e+00> : vector<40x608xf32>
    %24 = tpu.matmul %21, %23, %cst_22 {dimension_numbers = #tpu.dot_dimension_numbers<[1], [0], [0], [1], [0, 0, 1, 1], [], []>} : vector<40x240xbf16>, vector<240x608xbf16>, vector<40x608xf32> -> vector<40x608xf32>
    %25 = arith.addf %17, %24 : vector<40x608xf32>
    %c3 = arith.constant 3 : index
    %c0_23 = arith.constant 0 : index
    %c0_24 = arith.constant 0 : index
    %26 = vector.load %arg1[%c3, %c0_23, %c0_24] : memref<5x40x80xbf16, #tpu.memory_space<vmem>>, vector<1x40x80xbf16>
    %27 = vector.shape_cast %26 : vector<1x40x80xbf16> to vector<40x80xbf16>
    %cst_25 = arith.constant dense<0.000000e+00> : vector<40x240xf32>
    %28 = tpu.matmul %27, %0, %cst_25 {dimension_numbers = #tpu.dot_dimension_numbers<[1], [0], [0], [1], [0, 0, 1, 1], [], []>} : vector<40x80xbf16>, vector<80x240xbf16>, vector<40x240xf32> -> vector<40x240xf32>
    %29 = arith.truncf %28 : vector<40x240xf32> to vector<40x240xbf16>
    %c3_26 = arith.constant 3 : index
    %c0_27 = arith.constant 0 : index
    %c0_28 = arith.constant 0 : index
    %30 = vector.load %arg2[%c3_26, %c0_27, %c0_28] : memref<5x240x608xbf16, #tpu.memory_space<vmem>>, vector<1x240x608xbf16>
    %31 = vector.shape_cast %30 : vector<1x240x608xbf16> to vector<240x608xbf16>
    %cst_29 = arith.constant dense<0.000000e+00> : vector<40x608xf32>
    %32 = tpu.matmul %29, %31, %cst_29 {dimension_numbers = #tpu.dot_dimension_numbers<[1], [0], [0], [1], [0, 0, 1, 1], [], []>} : vector<40x240xbf16>, vector<240x608xbf16>, vector<40x608xf32> -> vector<40x608xf32>
    %33 = arith.addf %25, %32 : vector<40x608xf32>
    %c4 = arith.constant 4 : index
    %c0_30 = arith.constant 0 : index
    %c0_31 = arith.constant 0 : index
    %34 = vector.load %arg1[%c4, %c0_30, %c0_31] : memref<5x40x80xbf16, #tpu.memory_space<vmem>>, vector<1x40x80xbf16>
    %35 = vector.shape_cast %34 : vector<1x40x80xbf16> to vector<40x80xbf16>
    %cst_32 = arith.constant dense<0.000000e+00> : vector<40x240xf32>
    %36 = tpu.matmul %35, %0, %cst_32 {dimension_numbers = #tpu.dot_dimension_numbers<[1], [0], [0], [1], [0, 0, 1, 1], [], []>} : vector<40x80xbf16>, vector<80x240xbf16>, vector<40x240xf32> -> vector<40x240xf32>
    %37 = arith.truncf %36 : vector<40x240xf32> to vector<40x240xbf16>
    %c4_33 = arith.constant 4 : index
    %c0_34 = arith.constant 0 : index
    %c0_35 = arith.constant 0 : index
    %38 = vector.load %arg2[%c4_33, %c0_34, %c0_35] : memref<5x240x608xbf16, #tpu.memory_space<vmem>>, vector<1x240x608xbf16>
    %39 = vector.shape_cast %38 : vector<1x240x608xbf16> to vector<240x608xbf16>
    %cst_36 = arith.constant dense<0.000000e+00> : vector<40x608xf32>
    %40 = tpu.matmul %37, %39, %cst_36 {dimension_numbers = #tpu.dot_dimension_numbers<[1], [0], [0], [1], [0, 0, 1, 1], [], []>} : vector<40x240xbf16>, vector<240x608xbf16>, vector<40x608xf32> -> vector<40x608xf32>
    %41 = arith.addf %33, %40 : vector<40x608xf32>
    %c0_37 = arith.constant 0 : index
    %c0_38 = arith.constant 0 : index
    %42 = vector.load %arg3[%c0_37, %c0_38] : memref<1x608xf32, #tpu.memory_space<vmem>>, vector<1x608xf32>
    %43 = vector.broadcast %42 : vector<1x608xf32> to vector<40x608xf32>
    %44 = arith.addf %41, %43 : vector<40x608xf32>
    %cst_39 = arith.constant 0.000000e+00 : f32
    %45 = vector.broadcast %cst_39 : f32 to vector<40x608xf32>
    %46 = arith.maximumf %44, %45 : vector<40x608xf32>
    %c0_40 = arith.constant 0 : index
    %c0_41 = arith.constant 0 : index
    %47 = vector.load %arg14[%c0_40, %c0_41] : memref<40x608xf32, #tpu.memory_space<vmem>>, vector<40x608xf32>
    tpu.vector_store %arg14[%c0_40, %c0_41], %46 {strides = array<i32>} : memref<40x608xf32, #tpu.memory_space<vmem>>, vector<40x608xf32>,
    %c0_42 = arith.constant 0 : index
    %c0_43 = arith.constant 0 : index
    %48 = vector.load %arg14[%c0_42, %c0_43] : memref<40x608xf32, #tpu.memory_space<vmem>>, vector<40x608xf32>
    %49 = arith.truncf %48 : vector<40x608xf32> to vector<40x608xbf16>
    %cst_44 = arith.constant 0.000000e+00 : f32
    %50 = vector.broadcast %cst_44 : f32 to vector<16x544xf32>
    %c0_45 = arith.constant 0 : index
    %c0_46 = arith.constant 0 : index
    %c0_47 = arith.constant 0 : index
    %51 = vector.load %arg4[%c0_45, %c0_46, %c0_47] : memref<5x16x40xbf16, #tpu.memory_space<vmem>>, vector<1x16x40xbf16>
    %52 = vector.shape_cast %51 : vector<1x16x40xbf16> to vector<16x40xbf16>
    %cst_48 = arith.constant dense<0.000000e+00> : vector<16x608xf32>
    %53 = tpu.matmul %52, %49, %cst_48 {dimension_numbers = #tpu.dot_dimension_numbers<[1], [0], [0], [1], [0, 0, 1, 1], [], []>} : vector<16x40xbf16>, vector<40x608xbf16>, vector<16x608xf32> -> vector<16x608xf32>
    %54 = arith.truncf %53 : vector<16x608xf32> to vector<16x608xbf16>
    %c0_49 = arith.constant 0 : index
    %c0_50 = arith.constant 0 : index
    %c0_51 = arith.constant 0 : index
    %55 = vector.load %arg5[%c0_49, %c0_50, %c0_51] : memref<5x608x544xbf16, #tpu.memory_space<vmem>>, vector<1x608x544xbf16>
    %56 = vector.shape_cast %55 : vector<1x608x544xbf16> to vector<608x544xbf16>
    %cst_52 = arith.constant dense<0.000000e+00> : vector<16x544xf32>
    %57 = tpu.matmul %54, %56, %cst_52 {dimension_numbers = #tpu.dot_dimension_numbers<[1], [0], [0], [1], [0, 0, 1, 1], [], []>} : vector<16x608xbf16>, vector<608x544xbf16>, vector<16x544xf32> -> vector<16x544xf32>
    %58 = arith.addf %50, %57 : vector<16x544xf32>
    %c1_53 = arith.constant 1 : index
    %c0_54 = arith.constant 0 : index
    %c0_55 = arith.constant 0 : index
    %59 = vector.load %arg4[%c1_53, %c0_54, %c0_55] : memref<5x16x40xbf16, #tpu.memory_space<vmem>>, vector<1x16x40xbf16>
    %60 = vector.shape_cast %59 : vector<1x16x40xbf16> to vector<16x40xbf16>
    %cst_56 = arith.constant dense<0.000000e+00> : vector<16x608xf32>
    %61 = tpu.matmul %60, %49, %cst_56 {dimension_numbers = #tpu.dot_dimension_numbers<[1], [0], [0], [1], [0, 0, 1, 1], [], []>} : vector<16x40xbf16>, vector<40x608xbf16>, vector<16x608xf32> -> vector<16x608xf32>
    %62 = arith.truncf %61 : vector<16x608xf32> to vector<16x608xbf16>
    %c1_57 = arith.constant 1 : index
    %c0_58 = arith.constant 0 : index
    %c0_59 = arith.constant 0 : index
    %63 = vector.load %arg5[%c1_57, %c0_58, %c0_59] : memref<5x608x544xbf16, #tpu.memory_space<vmem>>, vector<1x608x544xbf16>
    %64 = vector.shape_cast %63 : vector<1x608x544xbf16> to vector<608x544xbf16>
    %cst_60 = arith.constant dense<0.000000e+00> : vector<16x544xf32>
    %65 = tpu.matmul %62, %64, %cst_60 {dimension_numbers = #tpu.dot_dimension_numbers<[1], [0], [0], [1], [0, 0, 1, 1], [], []>} : vector<16x608xbf16>, vector<608x544xbf16>, vector<16x544xf32> -> vector<16x544xf32>
    %66 = arith.addf %58, %65 : vector<16x544xf32>
    %c2_61 = arith.constant 2 : index
    %c0_62 = arith.constant 0 : index
    %c0_63 = arith.constant 0 : index
    %67 = vector.load %arg4[%c2_61, %c0_62, %c0_63] : memref<5x16x40xbf16, #tpu.memory_space<vmem>>, vector<1x16x40xbf16>
    %68 = vector.shape_cast %67 : vector<1x16x40xbf16> to vector<16x40xbf16>
    %cst_64 = arith.constant dense<0.000000e+00> : vector<16x608xf32>
    %69 = tpu.matmul %68, %49, %cst_64 {dimension_numbers = #tpu.dot_dimension_numbers<[1], [0], [0], [1], [0, 0, 1, 1], [], []>} : vector<16x40xbf16>, vector<40x608xbf16>, vector<16x608xf32> -> vector<16x608xf32>
    %70 = arith.truncf %69 : vector<16x608xf32> to vector<16x608xbf16>
    %c2_65 = arith.constant 2 : index
    %c0_66 = arith.constant 0 : index
    %c0_67 = arith.constant 0 : index
    %71 = vector.load %arg5[%c2_65, %c0_66, %c0_67] : memref<5x608x544xbf16, #tpu.memory_space<vmem>>, vector<1x608x544xbf16>
    %72 = vector.shape_cast %71 : vector<1x608x544xbf16> to vector<608x544xbf16>
    %cst_68 = arith.constant dense<0.000000e+00> : vector<16x544xf32>
    %73 = tpu.matmul %70, %72, %cst_68 {dimension_numbers = #tpu.dot_dimension_numbers<[1], [0], [0], [1], [0, 0, 1, 1], [], []>} : vector<16x608xbf16>, vector<608x544xbf16>, vector<16x544xf32> -> vector<16x544xf32>
    %74 = arith.addf %66, %73 : vector<16x544xf32>
    %c3_69 = arith.constant 3 : index
    %c0_70 = arith.constant 0 : index
    %c0_71 = arith.constant 0 : index
    %75 = vector.load %arg4[%c3_69, %c0_70, %c0_71] : memref<5x16x40xbf16, #tpu.memory_space<vmem>>, vector<1x16x40xbf16>
    %76 = vector.shape_cast %75 : vector<1x16x40xbf16> to vector<16x40xbf16>
    %cst_72 = arith.constant dense<0.000000e+00> : vector<16x608xf32>
    %77 = tpu.matmul %76, %49, %cst_72 {dimension_numbers = #tpu.dot_dimension_numbers<[1], [0], [0], [1], [0, 0, 1, 1], [], []>} : vector<16x40xbf16>, vector<40x608xbf16>, vector<16x608xf32> -> vector<16x608xf32>
    %78 = arith.truncf %77 : vector<16x608xf32> to vector<16x608xbf16>
    %c3_73 = arith.constant 3 : index
    %c0_74 = arith.constant 0 : index
    %c0_75 = arith.constant 0 : index
    %79 = vector.load %arg5[%c3_73, %c0_74, %c0_75] : memref<5x608x544xbf16, #tpu.memory_space<vmem>>, vector<1x608x544xbf16>
    %80 = vector.shape_cast %79 : vector<1x608x544xbf16> to vector<608x544xbf16>
    %cst_76 = arith.constant dense<0.000000e+00> : vector<16x544xf32>
    %81 = tpu.matmul %78, %80, %cst_76 {dimension_numbers = #tpu.dot_dimension_numbers<[1], [0], [0], [1], [0, 0, 1, 1], [], []>} : vector<16x608xbf16>, vector<608x544xbf16>, vector<16x544xf32> -> vector<16x544xf32>
    %82 = arith.addf %74, %81 : vector<16x544xf32>
    %c4_77 = arith.constant 4 : index
    %c0_78 = arith.constant 0 : index
    %c0_79 = arith.constant 0 : index
    %83 = vector.load %arg4[%c4_77, %c0_78, %c0_79] : memref<5x16x40xbf16, #tpu.memory_space<vmem>>, vector<1x16x40xbf16>
    %84 = vector.shape_cast %83 : vector<1x16x40xbf16> to vector<16x40xbf16>
    %cst_80 = arith.constant dense<0.000000e+00> : vector<16x608xf32>
    %85 = tpu.matmul %84, %49, %cst_80 {dimension_numbers = #tpu.dot_dimension_numbers<[1], [0], [0], [1], [0, 0, 1, 1], [], []>} : vector<16x40xbf16>, vector<40x608xbf16>, vector<16x608xf32> -> vector<16x608xf32>
    %86 = arith.truncf %85 : vector<16x608xf32> to vector<16x608xbf16>
    %c4_81 = arith.constant 4 : index
    %c0_82 = arith.constant 0 : index
    %c0_83 = arith.constant 0 : index
    %87 = vector.load %arg5[%c4_81, %c0_82, %c0_83] : memref<5x608x544xbf16, #tpu.memory_space<vmem>>, vector<1x608x544xbf16>
    %88 = vector.shape_cast %87 : vector<1x608x544xbf16> to vector<608x544xbf16>
    %cst_84 = arith.constant dense<0.000000e+00> : vector<16x544xf32>
    %89 = tpu.matmul %86, %88, %cst_84 {dimension_numbers = #tpu.dot_dimension_numbers<[1], [0], [0], [1], [0, 0, 1, 1], [], []>} : vector<16x608xbf16>, vector<608x544xbf16>, vector<16x544xf32> -> vector<16x544xf32>
    %90 = arith.addf %82, %89 : vector<16x544xf32>
    %c0_85 = arith.constant 0 : index
    %c0_86 = arith.constant 0 : index
    %91 = vector.load %arg6[%c0_85, %c0_86] : memref<1x544xf32, #tpu.memory_space<vmem>>, vector<1x544xf32>
    %92 = vector.broadcast %91 : vector<1x544xf32> to vector<16x544xf32>
    %93 = arith.addf %90, %92 : vector<16x544xf32>
    %cst_87 = arith.constant 0.000000e+00 : f32
    %94 = vector.broadcast %cst_87 : f32 to vector<16x544xf32>
    %95 = arith.maximumf %93, %94 : vector<16x544xf32>
    %c0_88 = arith.constant 0 : index
    %c0_89 = arith.constant 0 : index
    %96 = vector.load %arg15[%c0_88, %c0_89] : memref<16x544xf32, #tpu.memory_space<vmem>>, vector<16x544xf32>
    tpu.vector_store %arg15[%c0_88, %c0_89], %95 {strides = array<i32>} : memref<16x544xf32, #tpu.memory_space<vmem>>, vector<16x544xf32>,
    %c0_90 = arith.constant 0 : index
    %c0_91 = arith.constant 0 : index
    %97 = vector.load %arg15[%c0_90, %c0_91] : memref<16x544xf32, #tpu.memory_space<vmem>>, vector<16x544xf32>
    %98 = arith.truncf %97 : vector<16x544xf32> to vector<16x544xbf16>
    %cst_92 = arith.constant 0.000000e+00 : f32
    %99 = vector.broadcast %cst_92 : f32 to vector<8x224xf32>
    %c0_93 = arith.constant 0 : index
    %c0_94 = arith.constant 0 : index
    %c0_95 = arith.constant 0 : index
    %100 = vector.load %arg7[%c0_93, %c0_94, %c0_95] : memref<5x8x16xbf16, #tpu.memory_space<vmem>>, vector<1x8x16xbf16>
    %101 = vector.shape_cast %100 : vector<1x8x16xbf16> to vector<8x16xbf16>
    %cst_96 = arith.constant dense<0.000000e+00> : vector<8x544xf32>
    %102 = tpu.matmul %101, %98, %cst_96 {dimension_numbers = #tpu.dot_dimension_numbers<[1], [0], [0], [1], [0, 0, 1, 1], [], []>} : vector<8x16xbf16>, vector<16x544xbf16>, vector<8x544xf32> -> vector<8x544xf32>
    %103 = arith.truncf %102 : vector<8x544xf32> to vector<8x544xbf16>
    %c0_97 = arith.constant 0 : index
    %c0_98 = arith.constant 0 : index
    %c0_99 = arith.constant 0 : index
    %104 = vector.load %arg8[%c0_97, %c0_98, %c0_99] : memref<5x544x224xbf16, #tpu.memory_space<vmem>>, vector<1x544x224xbf16>
    %105 = vector.shape_cast %104 : vector<1x544x224xbf16> to vector<544x224xbf16>
    %cst_100 = arith.constant dense<0.000000e+00> : vector<8x224xf32>
    %106 = tpu.matmul %103, %105, %cst_100 {dimension_numbers = #tpu.dot_dimension_numbers<[1], [0], [0], [1], [0, 0, 1, 1], [], []>} : vector<8x544xbf16>, vector<544x224xbf16>, vector<8x224xf32> -> vector<8x224xf32>
    %107 = arith.addf %99, %106 : vector<8x224xf32>
    %c1_101 = arith.constant 1 : index
    %c0_102 = arith.constant 0 : index
    %c0_103 = arith.constant 0 : index
    %108 = vector.load %arg7[%c1_101, %c0_102, %c0_103] : memref<5x8x16xbf16, #tpu.memory_space<vmem>>, vector<1x8x16xbf16>
    %109 = vector.shape_cast %108 : vector<1x8x16xbf16> to vector<8x16xbf16>
    %cst_104 = arith.constant dense<0.000000e+00> : vector<8x544xf32>
    %110 = tpu.matmul %109, %98, %cst_104 {dimension_numbers = #tpu.dot_dimension_numbers<[1], [0], [0], [1], [0, 0, 1, 1], [], []>} : vector<8x16xbf16>, vector<16x544xbf16>, vector<8x544xf32> -> vector<8x544xf32>
    %111 = arith.truncf %110 : vector<8x544xf32> to vector<8x544xbf16>
    %c1_105 = arith.constant 1 : index
    %c0_106 = arith.constant 0 : index
    %c0_107 = arith.constant 0 : index
    %112 = vector.load %arg8[%c1_105, %c0_106, %c0_107] : memref<5x544x224xbf16, #tpu.memory_space<vmem>>, vector<1x544x224xbf16>
    %113 = vector.shape_cast %112 : vector<1x544x224xbf16> to vector<544x224xbf16>
    %cst_108 = arith.constant dense<0.000000e+00> : vector<8x224xf32>
    %114 = tpu.matmul %111, %113, %cst_108 {dimension_numbers = #tpu.dot_dimension_numbers<[1], [0], [0], [1], [0, 0, 1, 1], [], []>} : vector<8x544xbf16>, vector<544x224xbf16>, vector<8x224xf32> -> vector<8x224xf32>
    %115 = arith.addf %107, %114 : vector<8x224xf32>
    %c2_109 = arith.constant 2 : index
    %c0_110 = arith.constant 0 : index
    %c0_111 = arith.constant 0 : index
    %116 = vector.load %arg7[%c2_109, %c0_110, %c0_111] : memref<5x8x16xbf16, #tpu.memory_space<vmem>>, vector<1x8x16xbf16>
    %117 = vector.shape_cast %116 : vector<1x8x16xbf16> to vector<8x16xbf16>
    %cst_112 = arith.constant dense<0.000000e+00> : vector<8x544xf32>
    %118 = tpu.matmul %117, %98, %cst_112 {dimension_numbers = #tpu.dot_dimension_numbers<[1], [0], [0], [1], [0, 0, 1, 1], [], []>} : vector<8x16xbf16>, vector<16x544xbf16>, vector<8x544xf32> -> vector<8x544xf32>
    %119 = arith.truncf %118 : vector<8x544xf32> to vector<8x544xbf16>
    %c2_113 = arith.constant 2 : index
    %c0_114 = arith.constant 0 : index
    %c0_115 = arith.constant 0 : index
    %120 = vector.load %arg8[%c2_113, %c0_114, %c0_115] : memref<5x544x224xbf16, #tpu.memory_space<vmem>>, vector<1x544x224xbf16>
    %121 = vector.shape_cast %120 : vector<1x544x224xbf16> to vector<544x224xbf16>
    %cst_116 = arith.constant dense<0.000000e+00> : vector<8x224xf32>
    %122 = tpu.matmul %119, %121, %cst_116 {dimension_numbers = #tpu.dot_dimension_numbers<[1], [0], [0], [1], [0, 0, 1, 1], [], []>} : vector<8x544xbf16>, vector<544x224xbf16>, vector<8x224xf32> -> vector<8x224xf32>
    %123 = arith.addf %115, %122 : vector<8x224xf32>
    %c3_117 = arith.constant 3 : index
    %c0_118 = arith.constant 0 : index
    %c0_119 = arith.constant 0 : index
    %124 = vector.load %arg7[%c3_117, %c0_118, %c0_119] : memref<5x8x16xbf16, #tpu.memory_space<vmem>>, vector<1x8x16xbf16>
    %125 = vector.shape_cast %124 : vector<1x8x16xbf16> to vector<8x16xbf16>
    %cst_120 = arith.constant dense<0.000000e+00> : vector<8x544xf32>
    %126 = tpu.matmul %125, %98, %cst_120 {dimension_numbers = #tpu.dot_dimension_numbers<[1], [0], [0], [1], [0, 0, 1, 1], [], []>} : vector<8x16xbf16>, vector<16x544xbf16>, vector<8x544xf32> -> vector<8x544xf32>
    %127 = arith.truncf %126 : vector<8x544xf32> to vector<8x544xbf16>
    %c3_121 = arith.constant 3 : index
    %c0_122 = arith.constant 0 : index
    %c0_123 = arith.constant 0 : index
    %128 = vector.load %arg8[%c3_121, %c0_122, %c0_123] : memref<5x544x224xbf16, #tpu.memory_space<vmem>>, vector<1x544x224xbf16>
    %129 = vector.shape_cast %128 : vector<1x544x224xbf16> to vector<544x224xbf16>
    %cst_124 = arith.constant dense<0.000000e+00> : vector<8x224xf32>
    %130 = tpu.matmul %127, %129, %cst_124 {dimension_numbers = #tpu.dot_dimension_numbers<[1], [0], [0], [1], [0, 0, 1, 1], [], []>} : vector<8x544xbf16>, vector<544x224xbf16>, vector<8x224xf32> -> vector<8x224xf32>
    %131 = arith.addf %123, %130 : vector<8x224xf32>
    %c4_125 = arith.constant 4 : index
    %c0_126 = arith.constant 0 : index
    %c0_127 = arith.constant 0 : index
    %132 = vector.load %arg7[%c4_125, %c0_126, %c0_127] : memref<5x8x16xbf16, #tpu.memory_space<vmem>>, vector<1x8x16xbf16>
    %133 = vector.shape_cast %132 : vector<1x8x16xbf16> to vector<8x16xbf16>
    %cst_128 = arith.constant dense<0.000000e+00> : vector<8x544xf32>
    %134 = tpu.matmul %133, %98, %cst_128 {dimension_numbers = #tpu.dot_dimension_numbers<[1], [0], [0], [1], [0, 0, 1, 1], [], []>} : vector<8x16xbf16>, vector<16x544xbf16>, vector<8x544xf32> -> vector<8x544xf32>
    %135 = arith.truncf %134 : vector<8x544xf32> to vector<8x544xbf16>
    %c4_129 = arith.constant 4 : index
    %c0_130 = arith.constant 0 : index
    %c0_131 = arith.constant 0 : index
    %136 = vector.load %arg8[%c4_129, %c0_130, %c0_131] : memref<5x544x224xbf16, #tpu.memory_space<vmem>>, vector<1x544x224xbf16>
    %137 = vector.shape_cast %136 : vector<1x544x224xbf16> to vector<544x224xbf16>
    %cst_132 = arith.constant dense<0.000000e+00> : vector<8x224xf32>
    %138 = tpu.matmul %135, %137, %cst_132 {dimension_numbers = #tpu.dot_dimension_numbers<[1], [0], [0], [1], [0, 0, 1, 1], [], []>} : vector<8x544xbf16>, vector<544x224xbf16>, vector<8x224xf32> -> vector<8x224xf32>
    %139 = arith.addf %131, %138 : vector<8x224xf32>
    %c0_133 = arith.constant 0 : index
    %c0_134 = arith.constant 0 : index
    %140 = vector.load %arg9[%c0_133, %c0_134] : memref<1x224xf32, #tpu.memory_space<vmem>>, vector<1x224xf32>
    %141 = vector.broadcast %140 : vector<1x224xf32> to vector<8x224xf32>
    %142 = arith.addf %139, %141 : vector<8x224xf32>
    %cst_135 = arith.constant 0.000000e+00 : f32
    %143 = vector.broadcast %cst_135 : f32 to vector<8x224xf32>
    %144 = arith.maximumf %142, %143 : vector<8x224xf32>
    %c0_136 = arith.constant 0 : index
    %c0_137 = arith.constant 0 : index
    %145 = vector.load %arg16[%c0_136, %c0_137] : memref<8x224xf32, #tpu.memory_space<vmem>>, vector<8x224xf32>
    tpu.vector_store %arg16[%c0_136, %c0_137], %144 {strides = array<i32>} : memref<8x224xf32, #tpu.memory_space<vmem>>, vector<8x224xf32>,
    %c0_138 = arith.constant 0 : index
    %c0_139 = arith.constant 0 : index
    %146 = vector.load %arg16[%c0_138, %c0_139] : memref<8x224xf32, #tpu.memory_space<vmem>>, vector<8x224xf32>
    %147 = arith.truncf %146 : vector<8x224xf32> to vector<8x224xbf16>
    %cst_140 = arith.constant 0.000000e+00 : f32
    %148 = vector.broadcast %cst_140 : f32 to vector<2x2xf32>
    %c0_141 = arith.constant 0 : index
    %c0_142 = arith.constant 0 : index
    %c0_143 = arith.constant 0 : index
    %149 = vector.load %arg10[%c0_141, %c0_142, %c0_143] : memref<2x2x8xbf16, #tpu.memory_space<vmem>>, vector<1x2x8xbf16>
    %150 = vector.shape_cast %149 : vector<1x2x8xbf16> to vector<2x8xbf16>
    %cst_144 = arith.constant dense<0.000000e+00> : vector<2x224xf32>
    %151 = tpu.matmul %150, %147, %cst_144 {dimension_numbers = #tpu.dot_dimension_numbers<[1], [0], [0], [1], [0, 0, 1, 1], [], []>} : vector<2x8xbf16>, vector<8x224xbf16>, vector<2x224xf32> -> vector<2x224xf32>
    %152 = arith.truncf %151 : vector<2x224xf32> to vector<2x224xbf16>
    %c0_145 = arith.constant 0 : index
    %c0_146 = arith.constant 0 : index
    %c0_147 = arith.constant 0 : index
    %153 = vector.load %arg11[%c0_145, %c0_146, %c0_147] : memref<2x224x2xbf16, #tpu.memory_space<vmem>>, vector<1x224x2xbf16>
    %154 = vector.shape_cast %153 : vector<1x224x2xbf16> to vector<224x2xbf16>
    %cst_148 = arith.constant dense<0.000000e+00> : vector<2x2xf32>
    %155 = tpu.matmul %152, %154, %cst_148 {dimension_numbers = #tpu.dot_dimension_numbers<[1], [0], [0], [1], [0, 0, 1, 1], [], []>} : vector<2x224xbf16>, vector<224x2xbf16>, vector<2x2xf32> -> vector<2x2xf32>
    %156 = arith.addf %148, %155 : vector<2x2xf32>
    %c1_149 = arith.constant 1 : index
    %c0_150 = arith.constant 0 : index
    %c0_151 = arith.constant 0 : index
    %157 = vector.load %arg10[%c1_149, %c0_150, %c0_151] : memref<2x2x8xbf16, #tpu.memory_space<vmem>>, vector<1x2x8xbf16>
    %158 = vector.shape_cast %157 : vector<1x2x8xbf16> to vector<2x8xbf16>
    %cst_152 = arith.constant dense<0.000000e+00> : vector<2x224xf32>
    %159 = tpu.matmul %158, %147, %cst_152 {dimension_numbers = #tpu.dot_dimension_numbers<[1], [0], [0], [1], [0, 0, 1, 1], [], []>} : vector<2x8xbf16>, vector<8x224xbf16>, vector<2x224xf32> -> vector<2x224xf32>
    %160 = arith.truncf %159 : vector<2x224xf32> to vector<2x224xbf16>
    %c1_153 = arith.constant 1 : index
    %c0_154 = arith.constant 0 : index
    %c0_155 = arith.constant 0 : index
    %161 = vector.load %arg11[%c1_153, %c0_154, %c0_155] : memref<2x224x2xbf16, #tpu.memory_space<vmem>>, vector<1x224x2xbf16>
    %162 = vector.shape_cast %161 : vector<1x224x2xbf16> to vector<224x2xbf16>
    %cst_156 = arith.constant dense<0.000000e+00> : vector<2x2xf32>
    %163 = tpu.matmul %160, %162, %cst_156 {dimension_numbers = #tpu.dot_dimension_numbers<[1], [0], [0], [1], [0, 0, 1, 1], [], []>} : vector<2x224xbf16>, vector<224x2xbf16>, vector<2x2xf32> -> vector<2x2xf32>
    %164 = arith.addf %156, %163 : vector<2x2xf32>
    %c0_157 = arith.constant 0 : index
    %c0_158 = arith.constant 0 : index
    %165 = vector.load %arg12[%c0_157, %c0_158] : memref<1x2xf32, #tpu.memory_space<vmem>>, vector<1x2xf32>
    %166 = vector.broadcast %165 : vector<1x2xf32> to vector<2x2xf32>
    %167 = arith.addf %164, %166 : vector<2x2xf32>
    %c0_159 = arith.constant 0 : index
    %c0_160 = arith.constant 0 : index
    %168 = vector.load %arg13[%c0_159, %c0_160] : memref<2x2xf32, #tpu.memory_space<vmem>>, vector<2x2xf32>
    tpu.vector_store %arg13[%c0_159, %c0_160], %167 {strides = array<i32>} : memref<2x2xf32, #tpu.memory_space<vmem>>, vector<2x2xf32>,
    return
  }
}

</mosaic_0001>

<bundles_post_ra>
// kernel: tile.18
= control target key start
LH: loop header
LB: loop body
LE: loop exit
PB: predicated region body
PF: predicated region fallthrough
CT: control target
= control target key end

     0   :  { %s46_s0 = inlined_call_operand.vmem [shape: f32[16], index: 0, kind: input, shape index: {}]   ;;  %s47_s1 = inlined_call_operand.vmem [shape: f32[38,16], index: 1, kind: output, shape index: {}]  }
   0x1   :  { %v4_v0 = vld [vmem:[%s46_s0] ss:$0 sm:$0xff] }
   0x2   :  { %5 = vst [vmem:[%s47_s1] sm:$0xff] %v4_v0  ;;  %14 = vst [vmem:[%s47_s1 + $0x8] sm:$0xff] %v4_v0 }
   0x3   :  { %15 = vst [vmem:[%s47_s1 + $0x10] sm:$0xff] %v4_v0  ;;  %16 = vst [vmem:[%s47_s1 + $0x18] sm:$0xff] %v4_v0 }
   0x4   :  { %17 = vst [vmem:[%s47_s1 + $0x20] sm:$0xff] %v4_v0 }

// kernel: tile.19
= control target key start
LH: loop header
LB: loop body
LE: loop exit
PB: predicated region body
PF: predicated region fallthrough
CT: control target
= control target key end

     0   :  { %vm5_vm0 = vcmask 1044484   ;;  %s145_s8 = smov 112   ;;  %s146_s17 = smov 80   ;;  %vm7_vm1 = vcmask 130048   ;;  %vm15_vm2 = vcmask 1048448   ;;  %vm31_vm3 = vcmask 786048   ;;  %s225_s0 = inlined_call_operand.vmem [shape: f32[38,16], index: 0, kind: input, shape index: {}]   ;;  %s226_s1 = inlined_call_operand.vmem [shape: f32[1,608], index: 1, kind: output, shape index: {}]  }
   0x1   :  { %v122_v0 = vld [vmem:[%s225_s0 + $0x7] ss:$8 sm:$0xf]   ;;  %v124_v1 = vld [vmem:[%s225_s0 + $0x5] ss:$8 sm:$0xf]  }
   0x2   :  { %13 = vrot.lane.b32.xlu0 %v122_v0, %s145_s8  ;;  %v125_v2 = vld [vmem:[%s225_s0 + $0x21] sm:$0x10]   ;;  %v123_v4 = vld [vmem:[%s225_s0 + $0x6] ss:$8 sm:$0xf]   ;;  %s147_s24 = smov 96  }
   0x3   :  { %v28_v3 = vsel %vm5_vm0, %v125_v2, %v124_v1  ;;  %v126_v5 = vld [vmem:[%s225_s0 + $0x4] ss:$8 sm:$0xf]   ;;  %v128_v7 = vld [vmem:[%s225_s0 + $0x3] ss:$8 sm:$0xf]  }
   0x4   :  { %29 = vrot.lane.b32.xlu1 %v28_v3, %s146_s17  ;;  %v127_v6 = vld [vmem:[%s225_s0 + $0x20] sm:$0x10]   ;;  %v129_v9 = vld [vmem:[%s225_s0 + $0x1f] sm:$0x10]   ;;  %v131_v11 = vld [vmem:[%s225_s0 + $0x1e] sm:$0x10]  }
   0x5   :  { %v40_v8 = vsel %vm5_vm0, %v127_v6, %v126_v5  ;;  %v130_v10 = vld [vmem:[%s225_s0 + $0x2] ss:$8 sm:$0xf]   ;;  %v52_v12 = vsel %vm5_vm0, %v129_v9, %v128_v7  ;;  %v132_v13 = vld [vmem:[%s225_s0 + $0x1] ss:$8 sm:$0xf]  }
   0x6   :  { %19 = vrot.lane.b32.xlu0 %v123_v4, %s147_s24  ;;  %v121_v14 = vld [vmem:[%s225_s0 + $0x1c] sm:$0x10]   ;;  %s148_s4 = smov 64   ;;  %v133_v15 = vld [vmem:[%s225_s0 + $0x1d] sm:$0x10]   ;;  %v64_v17 = vsel %vm5_vm0, %v131_v11, %v130_v10  ;;  %s150_s9 = smov 32  }
   0x7   :  { %v2_v16 = vld [vmem:[%s225_s0] ss:$8 sm:$0xf]   ;;  %s149_s0 = smov 48   ;;  %v76_v19 = vsel %vm5_vm0, %v133_v15, %v132_v13  ;;  %s151_s10 = smov 16   ;;  %vm21_vm4 = vcmask 917248  }
   0x8   :  { %41 = vrot.lane.b32.xlu1 %v40_v8, %s148_s4  ;;  %v6_v18 = vsel %vm5_vm0, %v121_v14, %v2_v16  ;;  %vm43_vm5 = vcmask 654848   ;;  %vm55_vm6 = vcmask 523648   ;;  %vm67_vm7 = vcmask 392448  }
   0x9   :  { %8 = vst.msk [vmem:[#allocation0] ss:$8 sm:$0xf] %vm7_vm1, %v6_v18   ;;  %10 = vst.msk [vmem:[#allocation0 + $0x1c] sm:$0x10] %vm7_vm1, %v6_v18   ;;  %vm79_vm8 = vcmask 261248  }
   0xa   :  { %53 = vrot.lane.b32.xlu0 %v52_v12, %s149_s0 }
   0xc   :  { %65 = vrot.lane.b32.xlu1 %v64_v17, %s150_s9 }
   0xe   :  { %77 = vrot.lane.b32.xlu0 %v76_v19, %s151_s10 }
  0x74   :  { %v14_v20 = vpop.permute.xlu0 %13  }
  0x75   :  { %16 = vst.msk [vmem:[#allocation0] ss:$8 sm:$0xf] %vm15_vm2, %v14_v20  }
  0x76   :  { %v30_v21 = vpop.permute.xlu1 %29  }
  0x77   :  { %34 = vst.msk [vmem:[#allocation0 + $0x1c] sm:$0x10] %vm31_vm3, %v30_v21  }
  0x78   :  { %v20_v22 = vpop.permute.xlu0 %19  }
  0x79   :  { %22 = vst.msk [vmem:[#allocation0] ss:$8 sm:$0xf] %vm21_vm4, %v20_v22  }
  0x7a   :  { %32 = vst.msk [vmem:[#allocation0] ss:$8 sm:$0xf] %vm31_vm3, %v30_v21   ;;  %v42_v23 = vpop.permute.xlu1 %41  }
  0x7b   :  { %44 = vst.msk [vmem:[#allocation0] ss:$8 sm:$0xf] %vm43_vm5, %v42_v23   ;;  %46 = vst.msk [vmem:[#allocation0 + $0x1c] sm:$0x10] %vm43_vm5, %v42_v23  }
  0x7c   :  { %v54_v24 = vpop.permute.xlu0 %53  }
  0x7d   :  { %56 = vst.msk [vmem:[#allocation0] ss:$8 sm:$0xf] %vm55_vm6, %v54_v24   ;;  %58 = vst.msk [vmem:[#allocation0 + $0x1c] sm:$0x10] %vm55_vm6, %v54_v24  }
  0x7e   :  { %v66_v25 = vpop.permute.xlu1 %65  }
  0x7f   :  { %68 = vst.msk [vmem:[#allocation0] ss:$8 sm:$0xf] %vm67_vm7, %v66_v25   ;;  %70 = vst.msk [vmem:[#allocation0 + $0x1c] sm:$0x10] %vm67_vm7, %v66_v25  }
  0x80   :  { %v78_v26 = vpop.permute.xlu0 %77  }
  0x81   :  { %80 = vst.msk [vmem:[#allocation0] ss:$8 sm:$0xf] %vm79_vm8, %v78_v26   ;;  %82 = vst.msk [vmem:[#allocation0 + $0x1c] sm:$0x10] %vm79_vm8, %v78_v26  }
  0x88   :  { %v87_v27 = vld [vmem:[#allocation0] sm:$0x1]  ;;  %v92_v28 = vld [vmem:[#allocation0 + $0x8] sm:$0x1]  ;;  %v98_v29 = vld [vmem:[#allocation0 + $0x10] sm:$0x1] }
  0x89   :  { %90 = vst [vmem:[%s226_s1] sm:$0x1] %v87_v27  ;;  %134 = vst [vmem:[%s226_s1 + $0x1] sm:$0x1] %v92_v28  ;;  %v105_v30 = vld [vmem:[#allocation0 + $0x18] sm:$0x1] }
  0x8a   :  { %135 = vst [vmem:[%s226_s1 + $0x2] sm:$0x1] %v98_v29  ;;  %v112_v31 = vld [vmem:[#allocation0 + $0x20] sm:$0x1]  ;;  %136 = vst [vmem:[%s226_s1 + $0x3] sm:$0x1] %v105_v30 }
  0x8b   :  { %137 = vst [vmem:[%s226_s1 + $0x4] sm:$0x1] %v112_v31 }

// kernel: tile.23
= control target key start
LH: loop header
LB: loop body
LE: loop exit
PB: predicated region body
PF: predicated region fallthrough
CT: control target
= control target key end

     0   :  { %s34_s0 = inlined_call_operand.vmem [shape: f32[32], index: 0, kind: input, shape index: {}]   ;;  %s35_s1 = inlined_call_operand.vmem [shape: f32[17,32], index: 1, kind: output, shape index: {}]  }
   0x1   :  { %v4_v0 = vld [vmem:[%s34_s0] ss:$0 sm:$0xff] }
   0x2   :  { %5 = vst [vmem:[%s35_s1] sm:$0xff] %v4_v0  ;;  %10 = vst [vmem:[%s35_s1 + $0x8] sm:$0xff] %v4_v0 }
   0x3   :  { %11 = vst [vmem:[%s35_s1 + $0x10] sm:$0xff] %v4_v0 }

// kernel: tile.24
= control target key start
LH: loop header
LB: loop body
LE: loop exit
PB: predicated region body
PF: predicated region fallthrough
CT: control target
= control target key end

     0   :  { %s73_s8 = smov 96   ;;  %vm3_vm0 = vcmask 261120   ;;  %s75_s15 = smov 64   ;;  %vm11_vm1 = vcmask 1048320   ;;  %vm17_vm2 = vcmask 785920   ;;  %vm23_vm3 = vcmask 523520   ;;  %s113_s0 = inlined_call_operand.vmem [shape: f32[17,32], index: 0, kind: input, shape index: {}]   ;;  %s114_s1 = inlined_call_operand.vmem [shape: f32[1,544], index: 1, kind: output, shape index: {}]  }
   0x1   :  { %v63_v0 = vld [vmem:[%s113_s0 + $0x3] ss:$4 sm:$0xf]   ;;  %v64_v1 = vld [vmem:[%s113_s0 + $0x2] ss:$4 sm:$0xf]  }
   0x2   :  { %9 = vrot.lane.b32.xlu0 %v63_v0, %s73_s8  ;;  %v65_v2 = vld [vmem:[%s113_s0 + $0x1] ss:$4 sm:$0xf]   ;;  %v2_v3 = vld [vmem:[%s113_s0] ss:$4 sm:$0x1f]  }
   0x3   :  { %s74_s0 = smov 32   ;;  %4 = vst.msk [vmem:[#allocation0] ss:$8 sm:$0xf] %vm3_vm0, %v2_v3   ;;  %6 = vst.msk [vmem:[#allocation0 + $0x1c] sm:$0x10] %vm3_vm0, %v2_v3  }
   0x4   :  { %21 = vrot.lane.b32.xlu1 %v65_v2, %s74_s0 }
   0x6   :  { %15 = vrot.lane.b32.xlu0 %v64_v1, %s75_s15 }
   0xa   :  { %v54_v4 = vld [vmem:[#allocation0 + $0x20] sm:$0x1] }
   0xb   :  { %69 = vst [vmem:[%s114_s1 + $0x4] sm:$0x1] %v54_v4 }
  0x74   :  { %v10_v5 = vpop.permute.xlu0 %9  }
  0x75   :  { %12 = vst.msk [vmem:[#allocation0] ss:$8 sm:$0xf] %vm11_vm1, %v10_v5  }
  0x76   :  { %v22_v6 = vpop.permute.xlu1 %21  }
  0x78   :  { %v16_v7 = vpop.permute.xlu0 %15  }
  0x79   :  { %18 = vst.msk [vmem:[#allocation0] ss:$8 sm:$0xf] %vm17_vm2, %v16_v7  }
  0x7a   :  { %24 = vst.msk [vmem:[#allocation0] ss:$8 sm:$0xf] %vm23_vm3, %v22_v6  }
  0x81   :  { %v29_v8 = vld [vmem:[#allocation0] sm:$0x1]  ;;  %v34_v9 = vld [vmem:[#allocation0 + $0x8] sm:$0x1]  ;;  %v40_v10 = vld [vmem:[#allocation0 + $0x10] sm:$0x1] }
  0x82   :  { %32 = vst [vmem:[%s114_s1] sm:$0x1] %v29_v8  ;;  %66 = vst [vmem:[%s114_s1 + $0x1] sm:$0x1] %v34_v9  ;;  %v47_v11 = vld [vmem:[#allocation0 + $0x18] sm:$0x1] }
  0x83   :  { %67 = vst [vmem:[%s114_s1 + $0x2] sm:$0x1] %v40_v10  ;;  %68 = vst [vmem:[%s114_s1 + $0x3] sm:$0x1] %v47_v11 }

// kernel: tile.28
= control target key start
LH: loop header
LB: loop body
LE: loop exit
PB: predicated region body
PF: predicated region fallthrough
CT: control target
= control target key end

     0   :  { %s22_s0 = inlined_call_operand.vmem [shape: f32[32], index: 0, kind: input, shape index: {}]   ;;  %s23_s1 = inlined_call_operand.vmem [shape: f32[7,32], index: 1, kind: output, shape index: {}]  }
   0x1   :  { %v4_v0 = vld [vmem:[%s22_s0] ss:$0 sm:$0xff] }
   0x2   :  { %5 = vst [vmem:[%s23_s1] sm:$0xff] %v4_v0 }

// kernel: tile.29
= control target key start
LH: loop header
LB: loop body
LE: loop exit
PB: predicated region body
PF: predicated region fallthrough
CT: control target
= control target key end

     0   :  { %s13_s8 = smov 3  ;;  %s47_s9 = smov 96   ;;  %vm4_vm0 = vcmask 261120   ;;  %vm10_vm1 = vcmask 1048320   ;;  %vm17_vm2 = vcmask 785920   ;;  %vm24_vm3 = vcmask 523520   ;;  %s78_s0 = inlined_call_operand.vmem [shape: f32[7,32], index: 0, kind: input, shape index: {}]   ;;  %s79_s1 = inlined_call_operand.vmem [shape: f32[1,224], index: 1, kind: output, shape index: {}]  }
   0x1   :  { %v40_v0 = vld [vmem:[%s78_s0 + $0x3] sm:$0x1]   ;;  %s20_s10 = smov 3  ;;  %v41_v1 = vld [vmem:[%s78_s0 + $0x2] ss:$4 sm:%s13_s8]   ;;  %s2_s15 = smov 3 }
   0x2   :  { %8 = vrot.lane.b32.xlu0 %v40_v0, %s47_s9  ;;  %v42_v2 = vld [vmem:[%s78_s0 + $0x1] ss:$4 sm:%s20_s10]   ;;  %s48_s16 = smov 32  }
   0x3   :  { %22 = vrot.lane.b32.xlu1 %v42_v2, %s48_s16  ;;  %v3_v3 = vld [vmem:[%s78_s0] ss:$4 sm:%s2_s15]   ;;  %s49_s0 = smov 64  }
   0x4   :  { %5 = vst.msk [vmem:[#allocation0] ss:$8 sm:$0x3] %vm4_vm0, %v3_v3  }
   0x6   :  { %15 = vrot.lane.b32.xlu0 %v41_v1, %s49_s0 }
  0x74   :  { %v9_v4 = vpop.permute.xlu0 %8  }
  0x75   :  { %11 = vst.msk [vmem:[#allocation0] sm:$0x1] %vm10_vm1, %v9_v4   ;;  %v23_v5 = vpop.permute.xlu1 %22  }
  0x78   :  { %v16_v6 = vpop.permute.xlu0 %15  }
  0x79   :  { %18 = vst.msk [vmem:[#allocation0] ss:$8 sm:$0x3] %vm17_vm2, %v16_v6  }
  0x7a   :  { %25 = vst.msk [vmem:[#allocation0] ss:$8 sm:$0x3] %vm24_vm3, %v23_v5  }
  0x81   :  { %v30_v7 = vld [vmem:[#allocation0] sm:$0x1]  ;;  %v35_v8 = vld [vmem:[#allocation0 + $0x8] sm:$0x1] }
  0x82   :  { %33 = vst [vmem:[%s79_s1] sm:$0x1] %v30_v7  ;;  %43 = vst [vmem:[%s79_s1 + $0x1] sm:$0x1] %v35_v8 }

// kernel: dqn_forward.1
= control target key start
LH: loop header
LB: loop body
LE: loop exit
PB: predicated region body
PF: predicated region fallthrough
CT: control target
= control target key end

     0   :  { %v30013_v2 = vmov 0   ;;  %vm124_vm0 = vcmask 654336   ;;  %vm867_vm1 = vcmask 916480   ;;  %s29994_s0 = inlined_call_operand.vmem [shape: bf16[80,240], index: 0, kind: input, shape index: {}]   ;;  %s29995_s1 = inlined_call_operand.vmem [shape: bf16[5,40,80], index: 1, kind: input, shape index: {}]   ;;  %s29996_s2 = inlined_call_operand.vmem [shape: bf16[5,240,608], index: 2, kind: input, shape index: {}]   ;;  %s29997_s3 = inlined_call_operand.vmem [shape: f32[1,608], index: 3, kind: input, shape index: {}]   ;;  %s29998_s4 = inlined_call_operand.vmem [shape: bf16[5,16,40], index: 4, kind: input, shape index: {}]   ;;  %s29999_s5 = inlined_call_operand.vmem [shape: bf16[5,608,544], index: 5, kind: input, shape index: {}]   ;;  %s30000_s6 = inlined_call_operand.vmem [shape: f32[1,544], index: 6, kind: input, shape index: {}]   ;;  %s30001_s7 = inlined_call_operand.vmem [shape: bf16[5,8,16], index: 7, kind: input, shape index: {}]   ;;  %s30002_s8 = inlined_call_operand.vmem [shape: bf16[5,544,224], index: 8, kind: input, shape index: {}]   ;;  %s30003_s9 = inlined_call_operand.vmem [shape: f32[1,224], index: 9, kind: input, shape index: {}]   ;;  %s30004_s10 = inlined_call_operand.vmem [shape: bf16[2,2,8], index: 10, kind: input, shape index: {}]   ;;  %s30005_s11 = inlined_call_operand.vmem [shape: bf16[2,224,2], index: 11, kind: input, shape index: {}]   ;;  %s30006_s12 = inlined_call_operand.vmem [shape: f32[1,2], index: 12, kind: input, shape index: {}]   ;;  %s30007_s13 = inlined_call_operand.hbm [shape: f32[2,2], index: 13, kind: output, shape index: {}]  }
   0x1   :  { %v20680_v0 = vld [vmem:[%s29994_s0 + $0x44] ss:$8 sps:$4 sm:$0xff]   ;;  %v20682_v1 = vld [vmem:[%s29994_s0 + $0x40] ss:$8 sps:$4 sm:$0xff]   ;;  %351 = vmatprep.mubr.bf16.mxu1 %v30013_v2  ;;  %166 = vmatprep.mubr.bf16.mxu0 %v30013_v2  ;;  %v20683_v3 = vld [vmem:[%s29994_s0 + $0x34] ss:$8 sps:$4 sm:$0xff]  }
   0x2   :  { %325 = vmatprep.subr.bf16.mxu1 %v20680_v0  ;;  %140 = vmatprep.subr.bf16.mxu0 %v20680_v0  ;;  %v20685_v4 = vld [vmem:[%s29994_s0 + $0x30] ss:$8 sps:$4 sm:$0xff]   ;;  %v20686_v5 = vld [vmem:[%s29994_s0 + $0x24] ss:$8 sps:$4 sm:$0xff]   ;;  %v20688_v6 = vld [vmem:[%s29994_s0 + $0x20] ss:$8 sps:$4 sm:$0xff]  }
   0x3   :  { %326 = vmatpush1.bf16.msra.mxu1 %v20682_v1  ;;  %141 = vmatpush1.bf16.msra.mxu0 %v20682_v1  ;;  %v20689_v7 = vld [vmem:[%s29994_s0 + $0x14] ss:$8 sps:$4 sm:$0xff]   ;;  %v20691_v8 = vld [vmem:[%s29994_s0 + $0x10] ss:$8 sps:$4 sm:$0xff]   ;;  %v20692_v9 = vld [vmem:[%s29994_s0 + $0x4] ss:$8 sps:$4 sm:$0xff]  }
   0x4   :  { %327 = vmatprep.subr.bf16.mxu1 %v20683_v3  ;;  %142 = vmatprep.subr.bf16.mxu0 %v20683_v3  ;;  %v20694_v10 = vld [vmem:[%s29994_s0] ss:$8 sps:$4 sm:$0xff]   ;;  %v20706_v12 = vld [vmem:[%s29996_s2 + $0x37c] ss:$20 sps:$4 sm:$0xff]   ;;  %v20695_v13 = vld [vmem:[%s29995_s1 + $0x14] sm:$0xff]  }
   0x5   :  { %v20703_v11 = vld [vmem:[%s29996_s2 + $0x374] ss:$20 sps:$4 sm:$0xff]   ;;  %v20698_v14 = vld [vmem:[%s29995_s1] sm:$0xff]   ;;  %v20704_v16 = vld [vmem:[%s29996_s2 + $0x378] ss:$20 sps:$4 sm:$0xff]  }
   0x6   :  { %v20701_v15 = vld [vmem:[%s29996_s2 + $0x370] ss:$20 sps:$4 sm:$0xff]   ;;  %v20709_v17 = vld [vmem:[%s29996_s2 + $0x34c] ss:$20 sps:$4 sm:$0xff]   ;;  %v20712_v18 = vld [vmem:[%s29996_s2 + $0x354] ss:$20 sps:$4 sm:$0xff]  }
   0x7   :  { %328 = vmatpush1.bf16.msra.mxu1 %v20685_v4  ;;  %143 = vmatpush1.bf16.msra.mxu0 %v20685_v4  ;;  %v20707_v19 = vld [vmem:[%s29996_s2 + $0x348] ss:$20 sps:$4 sm:$0xff]   ;;  %v20710_v20 = vld [vmem:[%s29996_s2 + $0x350] ss:$20 sps:$4 sm:$0xff]   ;;  %v20718_v22 = vld [vmem:[%s29996_s2 + $0x32c] ss:$20 sps:$4 sm:$0xff]  }
   0x8   :  { %329 = vmatprep.subr.bf16.mxu1 %v20686_v5  ;;  %144 = vmatprep.subr.bf16.mxu0 %v20686_v5  ;;  %v20715_v21 = vld [vmem:[%s29996_s2 + $0x324] ss:$20 sps:$4 sm:$0xff]   ;;  %v20696_v23 = vld [vmem:[%s29995_s1 + $0x1c] sm:$0xff]   ;;  %v20699_v24 = vld [vmem:[%s29995_s1 + $0x8] sm:$0xff]  }
   0x9   :  { %v20713_v25 = vld [vmem:[%s29996_s2 + $0x320] ss:$20 sps:$4 sm:$0xff]   ;;  %v20716_v26 = vld [vmem:[%s29996_s2 + $0x328] ss:$20 sps:$4 sm:$0xff]   ;;  %v20724_v28 = vld [vmem:[%s29996_s2 + $0x304] ss:$20 sps:$4 sm:$0xff]  }
   0xa   :  { %v20721_v27 = vld [vmem:[%s29996_s2 + $0x2fc] ss:$20 sps:$4 sm:$0xff]   ;;  %v20719_v29 = vld [vmem:[%s29996_s2 + $0x2f8] ss:$20 sps:$4 sm:$0xff]   ;;  %v20722_v30 = vld [vmem:[%s29996_s2 + $0x300] ss:$20 sps:$4 sm:$0xff]  }
   0xb   :  { %330 = vmatpush1.bf16.msra.mxu1 %v20688_v6  ;;  %145 = vmatpush1.bf16.msra.mxu0 %v20688_v6  ;;  %v20727_v31 = vld [vmem:[%s29996_s2 + $0x2d4] ss:$20 sps:$4 sm:$0xff]   ;;  %v20730_v32 = vld [vmem:[%s29996_s2 + $0x2dc] ss:$20 sps:$4 sm:$0xff]   ;;  %v20697_v33 = vld [vmem:[%s29995_s1 + $0x24] ss:$0 sps:$4 sm:$0xff]  }
   0xc   :  { %331 = vmatprep.subr.bf16.mxu1 %v20689_v7  ;;  %146 = vmatprep.subr.bf16.mxu0 %v20689_v7  ;;  %v20700_v34 = vld [vmem:[%s29995_s1 + $0x10] ss:$0 sps:$4 sm:$0xff]   ;;  %v20728_v36 = vld [vmem:[%s29996_s2 + $0x2d8] ss:$20 sps:$4 sm:$0xff]   ;;  %v20736_v38 = vld [vmem:[%s29996_s2 + $0x2b4] ss:$20 sps:$4 sm:$0xff]  }
   0xd   :  { %v20725_v35 = vld [vmem:[%s29996_s2 + $0x2d0] ss:$20 sps:$4 sm:$0xff]   ;;  %v20733_v37 = vld [vmem:[%s29996_s2 + $0x2ac] ss:$20 sps:$4 sm:$0xff]   ;;  %v20731_v39 = vld [vmem:[%s29996_s2 + $0x2a8] ss:$20 sps:$4 sm:$0xff]  }
   0xe   :  { %v20734_v40 = vld [vmem:[%s29996_s2 + $0x2b0] ss:$20 sps:$4 sm:$0xff]   ;;  %v20742_v42 = vld [vmem:[%s29996_s2 + $0x28c] ss:$20 sps:$4 sm:$0xff]   ;;  %v20740_v44 = vld [vmem:[%s29996_s2 + $0x288] ss:$20 sps:$4 sm:$0xff]  }
   0xf   :  { %332 = vmatpush1.bf16.msra.mxu1 %v20691_v8  ;;  %147 = vmatpush1.bf16.msra.mxu0 %v20691_v8  ;;  %v20739_v41 = vld [vmem:[%s29996_s2 + $0x284] ss:$20 sps:$4 sm:$0xff]   ;;  %v20737_v43 = vld [vmem:[%s29996_s2 + $0x280] ss:$20 sps:$4 sm:$0xff]   ;;  %v20745_v45 = vld [vmem:[%s29996_s2 + $0x25c] ss:$20 sps:$4 sm:$0xff]  }
  0x10   :  { %333 = vmatprep.subr.bf16.mxu1 %v20692_v9  ;;  %148 = vmatprep.subr.bf16.mxu0 %v20692_v9  ;;  %v20748_v46 = vld [vmem:[%s29996_s2 + $0x264] ss:$20 sps:$4 sm:$0xff]   ;;  %v20746_v48 = vld [vmem:[%s29996_s2 + $0x260] ss:$20 sps:$4 sm:$0xff]   ;;  %v20749_v51 = vld [vmem:[%s29996_s2 + $0x488] ss:$20 sps:$4 sm:$0xff]  }
  0x11   :  { %v20743_v47 = vld [vmem:[%s29996_s2 + $0x258] ss:$20 sps:$4 sm:$0xff]   ;;  %v20754_v50 = vld [vmem:[%s29996_s2 + $0x494] ss:$20 sps:$4 sm:$0xff]   ;;  %v20752_v52 = vld [vmem:[%s29996_s2 + $0x490] ss:$20 sps:$4 sm:$0xff]  }
  0x12   :  { %v20751_v49 = vld [vmem:[%s29996_s2 + $0x48c] ss:$20 sps:$4 sm:$0xff]   ;;  %v20757_v53 = vld [vmem:[%s29996_s2 + $0x464] ss:$20 sps:$4 sm:$0xff]   ;;  %v20758_v56 = vld [vmem:[%s29996_s2 + $0x468] ss:$20 sps:$4 sm:$0xff]  }
  0x13   :  { %334 = vmatpush1.bf16.msra.mxu1 %v20694_v10  ;;  %149 = vmatpush1.bf16.msra.mxu0 %v20694_v10  ;;  %v20760_v54 = vld [vmem:[%s29996_s2 + $0x46c] ss:$20 sps:$4 sm:$0xff]   ;;  %v20763_v57 = vld [vmem:[%s29996_s2 + $0x43c] ss:$20 sps:$4 sm:$0xff]   ;;  %v20766_v58 = vld [vmem:[%s29996_s2 + $0x444] ss:$20 sps:$4 sm:$0xff]  }
  0x14   :  { %877 = vmatprep.subr.bf16.mxu0 %v20703_v11  ;;  %938 = vmatprep.subr.bf16.mxu1 %v20706_v12  ;;  %v20755_v55 = vld [vmem:[%s29996_s2 + $0x460] ss:$20 sps:$4 sm:$0xff]   ;;  %v20761_v59 = vld [vmem:[%s29996_s2 + $0x438] ss:$20 sps:$4 sm:$0xff]   ;;  %v20772_v62 = vld [vmem:[%s29996_s2 + $0x41c] ss:$20 sps:$4 sm:$0xff]  }
  0x15   :  { %v20764_v60 = vld [vmem:[%s29996_s2 + $0x440] ss:$20 sps:$4 sm:$0xff]   ;;  %v20767_v63 = vld [vmem:[%s29996_s2 + $0x410] ss:$20 sps:$4 sm:$0xff]   ;;  %v20770_v0 = vld [vmem:[%s29996_s2 + $0x418] ss:$20 sps:$4 sm:$0xff]  }
  0x16   :  { %16800 = vmatmul.mubr.msk.bf16.vlgmr.msra.gmra.mxu1 %vm124_vm0, %v20695_v13  ;;  %16789 = vmatmul.mubr.msk.bf16.vlgmr.msra.gmra.mxu0 %vm124_vm0, %v20698_v14  ;;  %v20769_v61 = vld [vmem:[%s29996_s2 + $0x414] ss:$20 sps:$4 sm:$0xff]   ;;  %v20775_v1 = vld [vmem:[%s29996_s2 + $0x3ec] ss:$20 sps:$4 sm:$0xff]   ;;  %v20776_v5 = vld [vmem:[%s29996_s2 + $0x3f0] ss:$20 sps:$4 sm:$0xff]  }
  0x17   :  { %361 = vmatprep.mubr.bf16.mxu1 %v30013_v2  ;;  %176 = vmatprep.mubr.bf16.mxu0 %v30013_v2  ;;  %v20778_v3 = vld [vmem:[%s29996_s2 + $0x3f4] ss:$20 sps:$4 sm:$0xff]   ;;  %v20781_v6 = vld [vmem:[%s29996_s2 + $0x3c4] ss:$20 sps:$4 sm:$0xff]   ;;  %v20784_v7 = vld [vmem:[%s29996_s2 + $0x3cc] ss:$20 sps:$4 sm:$0xff]  }
  0x18   :  { %878 = vmatpush1.bf16.msra.mxu0 %v20701_v15  ;;  %939 = vmatpush1.bf16.msra.mxu1 %v20704_v16  ;;  %v20773_v4 = vld [vmem:[%s29996_s2 + $0x3e8] ss:$20 sps:$4 sm:$0xff]   ;;  %v20779_v8 = vld [vmem:[%s29996_s2 + $0x3c0] ss:$20 sps:$4 sm:$0xff]   ;;  %v20790_v11 = vld [vmem:[%s29996_s2 + $0x3a4] ss:$20 sps:$4 sm:$0xff]  }
  0x19   :  { %879 = vmatprep.subr.bf16.mxu0 %v20709_v17  ;;  %940 = vmatprep.subr.bf16.mxu1 %v20712_v18  ;;  %v20782_v9 = vld [vmem:[%s29996_s2 + $0x3c8] ss:$20 sps:$4 sm:$0xff]   ;;  %v20785_v12 = vld [vmem:[%s29996_s2 + $0x398] ss:$20 sps:$4 sm:$0xff]   ;;  %v20788_v13 = vld [vmem:[%s29996_s2 + $0x3a0] ss:$20 sps:$4 sm:$0xff]  }
  0x1a   :  { %v20787_v10 = vld [vmem:[%s29996_s2 + $0x39c] ss:$20 sps:$4 sm:$0xff]  }
  0x1b   :  { %v20793_v14 = vld [vmem:[%s29996_s2 + $0x11c] ss:$20 sps:$4 sm:$0xff]  }
  0x1c   :  { %880 = vmatpush1.bf16.msra.mxu0 %v20707_v19  ;;  %941 = vmatpush1.bf16.msra.mxu1 %v20710_v20 }
  0x1d   :  { %881 = vmatprep.subr.bf16.mxu0 %v20715_v21  ;;  %942 = vmatprep.subr.bf16.mxu1 %v20718_v22  ;;  %v20791_v21 = vld [vmem:[%s29996_s2 + $0x118] ss:$20 sps:$4 sm:$0xff]   ;;  %v20794_v22 = vld [vmem:[%s29996_s2 + $0x380] ss:$20 sps:$4 sm:$0xff]  }
  0x1e   :  { %16801 = vmatmul.mubr.msk.bf16.gmra.mxu1 %vm124_vm0, %v20696_v23  ;;  %16790 = vmatmul.mubr.msk.bf16.gmra.mxu0 %vm124_vm0, %v20699_v24  ;;  %v20797_v24 = vld [vmem:[%s29996_s2 + $0xf4] ss:$20 sps:$4 sm:$0xff]  }
  0x1f   :  { %371 = vmatprep.mubr.bf16.mxu1 %v30013_v2  ;;  %186 = vmatprep.mubr.bf16.mxu0 %v30013_v2 }
  0x20   :  { %882 = vmatpush1.bf16.msra.mxu0 %v20713_v25  ;;  %943 = vmatpush1.bf16.msra.mxu1 %v20716_v26 }
  0x21   :  { %883 = vmatprep.subr.bf16.mxu0 %v20721_v27  ;;  %944 = vmatprep.subr.bf16.mxu1 %v20724_v28 }
  0x24   :  { %884 = vmatpush1.bf16.msra.mxu0 %v20719_v29  ;;  %945 = vmatpush1.bf16.msra.mxu1 %v20722_v30  ;;  %v20795_v30 = vld [vmem:[%s29996_s2 + $0xf0] ss:$20 sps:$4 sm:$0xff]  }
  0x25   :  { %885 = vmatprep.subr.bf16.mxu0 %v20727_v31  ;;  %946 = vmatprep.subr.bf16.mxu1 %v20730_v32  ;;  %v20798_v31 = vld [vmem:[%s29996_s2 + $0x358] ss:$20 sps:$4 sm:$0xff]  }
  0x26   :  { %16802 = vmatmul.mubr.msk.bf16.gmra.mxu1 %vm124_vm0, %v20697_v33  ;;  %16791 = vmatmul.mubr.msk.bf16.gmra.mxu0 %vm124_vm0, %v20700_v34  ;;  %v20801_v33 = vld [vmem:[%s29996_s2 + $0xcc] ss:$20 sps:$4 sm:$0xff]  }
  0x28   :  { %886 = vmatpush1.bf16.msra.mxu0 %v20725_v35  ;;  %947 = vmatpush1.bf16.msra.mxu1 %v20728_v36 }
  0x29   :  { %887 = vmatprep.subr.bf16.mxu0 %v20733_v37  ;;  %948 = vmatprep.subr.bf16.mxu1 %v20736_v38  ;;  %v20799_v37 = vld [vmem:[%s29996_s2 + $0xc8] ss:$20 sps:$4 sm:$0xff]   ;;  %v20802_v38 = vld [vmem:[%s29996_s2 + $0x330] ss:$20 sps:$4 sm:$0xff]  }
  0x2c   :  { %888 = vmatpush1.bf16.msra.mxu0 %v20731_v39  ;;  %949 = vmatpush1.bf16.msra.mxu1 %v20734_v40 }
  0x2d   :  { %889 = vmatprep.subr.bf16.mxu0 %v20739_v41  ;;  %950 = vmatprep.subr.bf16.mxu1 %v20742_v42  ;;  %v20805_v41 = vld [vmem:[%s29996_s2 + $0xa4] ss:$20 sps:$4 sm:$0xff]  }
  0x30   :  { %890 = vmatpush1.bf16.msra.mxu0 %v20737_v43  ;;  %951 = vmatpush1.bf16.msra.mxu1 %v20740_v44 }
  0x31   :  { %891 = vmatprep.subr.bf16.mxu0 %v20745_v45  ;;  %952 = vmatprep.subr.bf16.mxu1 %v20748_v46  ;;  %v20803_v46 = vld [vmem:[%s29996_s2 + $0xa0] ss:$20 sps:$4 sm:$0xff]  }
  0x34   :  { %892 = vmatpush1.bf16.msra.mxu0 %v20743_v47  ;;  %953 = vmatpush1.bf16.msra.mxu1 %v20746_v48  ;;  %v20806_v47 = vld [vmem:[%s29996_s2 + $0x308] ss:$20 sps:$4 sm:$0xff]  }
  0x35   :  { %895 = vmatprep.subr.bf16.mxu0 %v20751_v49  ;;  %956 = vmatprep.subr.bf16.mxu1 %v20754_v50 }
  0x38   :  { %896 = vmatpush2.bf16.msra.mxu0 %v20749_v51  ;;  %957 = vmatpush2.bf16.msra.mxu1 %v20752_v52  ;;  %v20809_v51 = vld [vmem:[%s29996_s2 + $0x7c] ss:$20 sps:$4 sm:$0xff]  }
  0x39   :  { %897 = vmatprep.subr.bf16.mxu0 %v20757_v53  ;;  %958 = vmatprep.subr.bf16.mxu1 %v20760_v54  ;;  %v20807_v54 = vld [vmem:[%s29996_s2 + $0x78] ss:$20 sps:$4 sm:$0xff]  }
  0x3c   :  { %898 = vmatpush2.bf16.msra.mxu0 %v20755_v55  ;;  %959 = vmatpush2.bf16.msra.mxu1 %v20758_v56  ;;  %v20810_v55 = vld [vmem:[%s29996_s2 + $0x2e0] ss:$20 sps:$4 sm:$0xff]  }
  0x3d   :  { %899 = vmatprep.subr.bf16.mxu0 %v20763_v57  ;;  %960 = vmatprep.subr.bf16.mxu1 %v20766_v58 }
  0x40   :  { %900 = vmatpush2.bf16.msra.mxu0 %v20761_v59  ;;  %961 = vmatpush2.bf16.msra.mxu1 %v20764_v60  ;;  %v20813_v59 = vld [vmem:[%s29996_s2 + $0x54] ss:$20 sps:$4 sm:$0xff]   ;;  %v20811_v60 = vld [vmem:[%s29996_s2 + $0x50] ss:$20 sps:$4 sm:$0xff]  }
  0x41   :  { %901 = vmatprep.subr.bf16.mxu0 %v20769_v61  ;;  %962 = vmatprep.subr.bf16.mxu1 %v20772_v62  ;;  %v20814_v61 = vld [vmem:[%s29996_s2 + $0x2b8] ss:$20 sps:$4 sm:$0xff]  }
  0x44   :  { %902 = vmatpush2.bf16.msra.mxu0 %v20767_v63  ;;  %963 = vmatpush2.bf16.msra.mxu1 %v20770_v0  ;;  %v20817_v63 = vld [vmem:[%s29996_s2 + $0x2c] ss:$20 sps:$4 sm:$0xff]   ;;  %v20815_v0 = vld [vmem:[%s29996_s2 + $0x28] ss:$20 sps:$4 sm:$0xff]  }
  0x45   :  { %903 = vmatprep.subr.bf16.mxu0 %v20775_v1  ;;  %964 = vmatprep.subr.bf16.mxu1 %v20778_v3  ;;  %v20818_v1 = vld [vmem:[%s29996_s2 + $0x290] ss:$20 sps:$4 sm:$0xff]  }
  0x46   :  { %v20821_v3 = vld [vmem:[%s29996_s2 + $0x4] ss:$20 sps:$4 sm:$0xff]  }
  0x48   :  { %904 = vmatpush2.bf16.msra.mxu0 %v20773_v4  ;;  %965 = vmatpush2.bf16.msra.mxu1 %v20776_v5  ;;  %v20819_v4 = vld [vmem:[%s29996_s2] ss:$20 sps:$4 sm:$0xff]   ;;  %v20822_v5 = vld [vmem:[%s29996_s2 + $0x268] ss:$20 sps:$4 sm:$0xff]  }
  0x49   :  { %905 = vmatprep.subr.bf16.mxu0 %v20781_v6  ;;  %966 = vmatprep.subr.bf16.mxu1 %v20784_v7  ;;  %v20825_v6 = vld [vmem:[%s29996_s2 + $0x234] ss:$20 sps:$4 sm:$0xff]   ;;  %v20823_v7 = vld [vmem:[%s29996_s2 + $0x230] ss:$20 sps:$4 sm:$0xff]  }
  0x4c   :  { %906 = vmatpush2.bf16.msra.mxu0 %v20779_v8  ;;  %967 = vmatpush2.bf16.msra.mxu1 %v20782_v9  ;;  %v20826_v8 = vld [vmem:[%s29996_s2 + $0x498] ss:$20 sps:$4 sm:$0xff]  }
  0x4d   :  { %907 = vmatprep.subr.bf16.mxu0 %v20787_v10  ;;  %968 = vmatprep.subr.bf16.mxu1 %v20790_v11  ;;  %v20829_v9 = vld [vmem:[%s29996_s2 + $0x20c] ss:$20 sps:$4 sm:$0xff]   ;;  %v20827_v10 = vld [vmem:[%s29996_s2 + $0x208] ss:$20 sps:$4 sm:$0xff]   ;;  %v20830_v11 = vld [vmem:[%s29996_s2 + $0x470] ss:$20 sps:$4 sm:$0xff]  }
  0x50   :  { %908 = vmatpush2.bf16.msra.mxu0 %v20785_v12  ;;  %969 = vmatpush2.bf16.msra.mxu1 %v20788_v13  ;;  %v20833_v12 = vld [vmem:[%s29996_s2 + $0x1e4] ss:$20 sps:$4 sm:$0xff]   ;;  %v20831_v13 = vld [vmem:[%s29996_s2 + $0x1e0] ss:$20 sps:$4 sm:$0xff]  }
  0x51   :  { %999 = vmatprep.subr.bf16.mxu0 %v30013_v2  ;;  %1454 = vmatprep.subr.bf16.mxu1 %v20793_v14  ;;  %v20834_v14 = vld [vmem:[%s29996_s2 + $0x448] ss:$20 sps:$4 sm:$0xff]  }
  0xd6   :  { %v353_v15 = vpop.f32.mrf.mxu1  ;;  %v23477_v16 = vpop.f32.mrf.mxu0 }
  0xd8   :  { %v355_v17 = vpop.f32.mrf.mxu1  ;;  %v23479_v18 = vpop.f32.mrf.mxu0 }
  0xda   :  { %v357_v19 = vpop.f32.mrf.mxu1  ;;  %v23481_v20 = vpop.f32.mrf.mxu0 }
  0xdb   :  { %v23496_v27 = vpack.c.bf16 %v357_v19, %v353_v15  ;;  %v20837_v15 = vld [vmem:[%s29996_s2 + $0x1bc] ss:$20 sps:$4 sm:$0xff]   ;;  %v20841_v19 = vld [vmem:[%s29996_s2 + $0x194] ss:$20 sps:$4 sm:$0xff]  }
  0xdc   :  { %v359_v23 = vpop.f32.mrf.mxu1  ;;  %v23492_v25 = vpop.f32.mrf.mxu0 }
  0xdd   :  { %v23494_v26 = vpack.c.bf16 %v359_v23, %v355_v17  ;;  %v23582_v62 = vpack.c.bf16 %v23492_v25, %v23479_v18  ;;  %v20835_v17 = vld [vmem:[%s29996_s2 + $0x1b8] ss:$20 sps:$4 sm:$0xff]   ;;  %v20838_v18 = vld [vmem:[%s29996_s2 + $0x420] ss:$20 sps:$4 sm:$0xff]   ;;  %v20846_v25 = vld [vmem:[%s29996_s2 + $0x3d0] ss:$20 sps:$4 sm:$0xff]  }
  0xde   :  { %v363_v28 = vpop.f32.mrf.mxu1  ;;  %v23498_v29 = vpop.f32.mrf.mxu0  ;;  %v20845_v23 = vld [vmem:[%s29996_s2 + $0x16c] ss:$20 sps:$4 sm:$0xff]  }
  0xdf   :  { %16968 = vmatprep.mubr.msk.bf16.mxu0 %vm867_vm1, %v23494_v26  ;;  %16971 = vmatprep.mubr.msk.bf16.mxu1 %vm867_vm1, %v23494_v26 }
  0xe0   :  { %v365_v32 = vpop.f32.mrf.mxu1  ;;  %910 = vmatmul.mubr.bf16.vlgmr.msra.gmra.mxu0 %v23496_v27  ;;  %971 = vmatmul.mubr.bf16.vlgmr.msra.gmra.mxu1 %v23496_v27  ;;  %v23515_v34 = vpop.f32.mrf.mxu0 }
  0xe1   :  { %1000 = vmatpush1.bf16.msra.mxu0 %v20794_v22  ;;  %1455 = vmatpush1.bf16.msra.mxu1 %v20791_v21  ;;  %v20839_v21 = vld [vmem:[%s29996_s2 + $0x190] ss:$20 sps:$4 sm:$0xff]   ;;  %v20842_v22 = vld [vmem:[%s29996_s2 + $0x3f8] ss:$20 sps:$4 sm:$0xff]  }
  0xe2   :  { %v367_v35 = vpop.f32.mrf.mxu1  ;;  %1001 = vmatprep.subr.bf16.mxu0 %v30013_v2  ;;  %1456 = vmatprep.subr.bf16.mxu1 %v20797_v24  ;;  %v23518_v36 = vpop.f32.mrf.mxu0  ;;  %v20843_v24 = vld [vmem:[%s29996_s2 + $0x168] ss:$20 sps:$4 sm:$0xff]  }
  0xe3   :  { %v23526_v39 = vpack.c.bf16 %v367_v35, %v363_v28  ;;  %v20847_v28 = vld [vmem:[%s29996_s2 + $0x140] ss:$20 sps:$4 sm:$0xff]   ;;  %v20854_v35 = vld [vmem:[%s29996_s2 + $0x128] ss:$20 sps:$4 sm:$0xff]  }
  0xe4   :  { %v369_v40 = vpop.f32.mrf.mxu1  ;;  %v23531_v42 = vpop.f32.mrf.mxu0 }
  0xe5   :  { %v23533_v43 = vpack.c.bf16 %v369_v40, %v365_v32  ;;  %1002 = vmatpush1.bf16.msra.mxu0 %v20798_v31  ;;  %1457 = vmatpush1.bf16.msra.mxu1 %v20795_v30  ;;  %v20850_v30 = vld [vmem:[%s29996_s2 + $0x3a8] ss:$20 sps:$4 sm:$0xff]   ;;  %v20853_v31 = vld [vmem:[%s29996_s2 + $0x124] ss:$20 sps:$4 sm:$0xff]   ;;  %v20851_v32 = vld [vmem:[%s29996_s2 + $0x120] ss:$20 sps:$4 sm:$0xff]  }
  0xe6   :  { %1003 = vmatprep.subr.bf16.mxu0 %v30013_v2  ;;  %1458 = vmatprep.subr.bf16.mxu1 %v20801_v33  ;;  %v373_v44 = vpop.f32.mrf.mxu1  ;;  %v23536_v45 = vpop.f32.mrf.mxu0  ;;  %v23689_v33 = vpack.c.bf16 %v23481_v20, %v23477_v16  ;;  %v20855_v16 = vld [vmem:[%s29996_s2 + $0xf8] ss:$20 sps:$4 sm:$0xff]   ;;  %v20858_v20 = vld [vmem:[%s29996_s2 + $0x100] ss:$20 sps:$4 sm:$0xff]  }
  0xe7   :  { %16969 = vmatprep.mubr.msk.bf16.mxu0 %vm867_vm1, %v23533_v43  ;;  %16972 = vmatprep.mubr.msk.bf16.mxu1 %vm867_vm1, %v23533_v43  ;;  %v23568_v56 = vpack.c.bf16 %v373_v44, %v373_v44  ;;  %v20861_v40 = vld [vmem:[%s29996_s2 + $0xd4] ss:$20 sps:$4 sm:$0xff]   ;;  %v20869_v44 = vld [vmem:[%s29996_s2 + $0x84] ss:$20 sps:$4 sm:$0xff]  }
  0xe8   :  { %920 = vmatmul.mubr.bf16.gmra.mxu0 %v23526_v39  ;;  %v375_v48 = vpop.f32.mrf.mxu1  ;;  %981 = vmatmul.mubr.bf16.gmra.mxu1 %v23526_v39  ;;  %v23550_v49 = vpop.f32.mrf.mxu0 }
  0xe9   :  { %1004 = vmatpush1.bf16.msra.mxu0 %v20802_v38  ;;  %1459 = vmatpush1.bf16.msra.mxu1 %v20799_v37  ;;  %v23552_v50 = vpack.c.bf16 %v375_v48, %v375_v48  ;;  %v20857_v37 = vld [vmem:[%s29996_s2 + $0xfc] ss:$20 sps:$4 sm:$0xff]   ;;  %v23700_v38 = vpack.c.bf16 %v23531_v42, %v23515_v34  ;;  %v23723_v34 = vpack.c.bf16 %v23518_v36, %v23498_v29  ;;  %v20865_v42 = vld [vmem:[%s29996_s2 + $0xac] ss:$20 sps:$4 sm:$0xff]  }
  0xea   :  { %1005 = vmatprep.subr.bf16.mxu0 %v30013_v2  ;;  %1460 = vmatprep.subr.bf16.mxu1 %v20805_v41  ;;  %v377_v52 = vpop.f32.mrf.mxu1  ;;  %v192_v53 = vpop.f32.mrf.mxu0  ;;  %v20862_v41 = vld [vmem:[%s29996_s2 + $0xd8] ss:$20 sps:$4 sm:$0xff]   ;;  %v20863_v29 = vld [vmem:[%s29996_s2 + $0xa8] ss:$20 sps:$4 sm:$0xff]   ;;  %v20866_v36 = vld [vmem:[%s29996_s2 + $0xb0] ss:$20 sps:$4 sm:$0xff]  }
  0xeb   :  { %16970 = vmatprep.mubr.msk.bf16.mxu0 %vm867_vm1, %v23552_v50  ;;  %16973 = vmatprep.mubr.msk.bf16.mxu1 %vm867_vm1, %v23552_v50  ;;  %v20873_v48 = vld [vmem:[%s29996_s2 + $0x5c] ss:$20 sps:$4 sm:$0xff]   ;;  %v20878_v52 = vld [vmem:[%s29996_s2 + $0x38] ss:$20 sps:$4 sm:$0xff]  }
  0xec   :  { %v378_v57 = vpop.f32.mrf.mxu1  ;;  %v193_v58 = vpop.f32.mrf.mxu0  ;;  %v20881_v53 = vld [vmem:[%s29996_s2 + $0xc] ss:$20 sps:$4 sm:$0xff]  }
  0xed   :  { %1006 = vmatpush1.bf16.msra.mxu0 %v20806_v47  ;;  %1461 = vmatpush1.bf16.msra.mxu1 %v20803_v46  ;;  %v23757_v46 = vpack.c.bf16 %v23536_v45, %v23536_v45  ;;  %v20870_v47 = vld [vmem:[%s29996_s2 + $0x88] ss:$20 sps:$4 sm:$0xff]   ;;  %v20874_v45 = vld [vmem:[%s29996_s2 + $0x60] ss:$20 sps:$4 sm:$0xff]   ;;  %v20883_v57 = vld [vmem:[%s29996_s2 + $0x238] ss:$20 sps:$4 sm:$0xff]  }
  0xee   :  { %1007 = vmatprep.subr.bf16.mxu0 %v30013_v2  ;;  %1462 = vmatprep.subr.bf16.mxu1 %v20809_v51  ;;  %v20875_v51 = vld [vmem:[%s29996_s2 + $0x30] ss:$20 sps:$4 sm:$0xff]   ;;  %v20886_v58 = vld [vmem:[%s29996_s2 + $0x240] ss:$20 sps:$4 sm:$0xff]  }
  0xf0   :  { %930 = vmatmul.mubr.bf16.gmra.mxu0 %v23568_v56  ;;  %991 = vmatmul.mubr.bf16.gmra.mxu1 %v23568_v56 }
  0xf1   :  { %1008 = vmatpush1.bf16.msra.mxu0 %v20810_v55  ;;  %1463 = vmatpush1.bf16.msra.mxu1 %v20807_v54  ;;  %v20879_v54 = vld [vmem:[%s29996_s2 + $0x8] ss:$20 sps:$4 sm:$0xff]   ;;  %v20882_v55 = vld [vmem:[%s29996_s2 + $0x10] ss:$20 sps:$4 sm:$0xff]  }
  0xf2   :  { %16974 = vmatprep.mubr.msk.bf16.mxu0 %vm867_vm1, %v23494_v26  ;;  %1009 = vmatprep.subr.bf16.mxu0 %v30013_v2  ;;  %v20849_v26 = vld [vmem:[%s29996_s2 + $0x144] ss:$20 sps:$4 sm:$0xff]  }
  0xf3   :  { %1464 = vmatprep.subr.bf16.mxu1 %v20813_v59  ;;  %17052 = vmatprep.mubr.msk.bf16.mxu1 %vm867_vm1, %v23582_v62  ;;  %v20889_v59 = vld [vmem:[%s29996_s2 + $0x214] ss:$20 sps:$4 sm:$0xff]  }
  0xf5   :  { %1010 = vmatpush1.bf16.msra.mxu0 %v20814_v61  ;;  %1465 = vmatpush1.bf16.msra.mxu1 %v20811_v60  ;;  %v20887_v60 = vld [vmem:[%s29996_s2 + $0x210] ss:$20 sps:$4 sm:$0xff]   ;;  %v20890_v61 = vld [vmem:[%s29996_s2 + $0x218] ss:$20 sps:$4 sm:$0xff]  }
  0xf6   :  { %1011 = vmatprep.subr.bf16.mxu0 %v30013_v2  ;;  %1466 = vmatprep.subr.bf16.mxu1 %v20817_v63  ;;  %v20891_v63 = vld [vmem:[%s29996_s2 + $0x1e8] ss:$20 sps:$4 sm:$0xff]  }
  0xf9   :  { %1012 = vmatpush1.bf16.msra.mxu0 %v20818_v1  ;;  %1467 = vmatpush1.bf16.msra.mxu1 %v20815_v0  ;;  %v20894_v0 = vld [vmem:[%s29996_s2 + $0x1f0] ss:$20 sps:$4 sm:$0xff]  }
  0xfa   :  { %1013 = vmatprep.subr.bf16.mxu0 %v30013_v2  ;;  %1468 = vmatprep.subr.bf16.mxu1 %v20821_v3  ;;  %v20897_v1 = vld [vmem:[%s29996_s2 + $0x1c4] ss:$20 sps:$4 sm:$0xff]   ;;  %v20895_v3 = vld [vmem:[%s29996_s2 + $0x1c0] ss:$20 sps:$4 sm:$0xff]  }
  0xfd   :  { %1014 = vmatpush1.bf16.msra.mxu0 %v20822_v5  ;;  %1469 = vmatpush1.bf16.msra.mxu1 %v20819_v4  ;;  %v20898_v4 = vld [vmem:[%s29996_s2 + $0x1c8] ss:$20 sps:$4 sm:$0xff]  }
  0xfe   :  { %1017 = vmatprep.subr.bf16.mxu0 %v30013_v2  ;;  %1472 = vmatprep.subr.bf16.mxu1 %v20825_v6  ;;  %v20901_v5 = vld [vmem:[%s29996_s2 + $0x19c] ss:$20 sps:$4 sm:$0xff]   ;;  %v20899_v6 = vld [vmem:[%s29996_s2 + $0x198] ss:$20 sps:$4 sm:$0xff]  }
 0x101   :  { %1018 = vmatpush2.bf16.msra.mxu0 %v20826_v8  ;;  %1473 = vmatpush2.bf16.msra.mxu1 %v20823_v7  ;;  %v20902_v7 = vld [vmem:[%s29996_s2 + $0x1a0] ss:$20 sps:$4 sm:$0xff]  }
 0x102   :  { %1019 = vmatprep.subr.bf16.mxu0 %v30013_v2  ;;  %1474 = vmatprep.subr.bf16.mxu1 %v20829_v9  ;;  %v20905_v8 = vld [vmem:[%s29996_s2 + $0x174] ss:$20 sps:$4 sm:$0xff]   ;;  %v20903_v9 = vld [vmem:[%s29996_s2 + $0x170] ss:$20 sps:$4 sm:$0xff]  }
 0x105   :  { %1020 = vmatpush2.bf16.msra.mxu0 %v20830_v11  ;;  %1475 = vmatpush2.bf16.msra.mxu1 %v20827_v10  ;;  %v20906_v10 = vld [vmem:[%s29996_s2 + $0x178] ss:$20 sps:$4 sm:$0xff]  }
 0x106   :  { %1021 = vmatprep.subr.bf16.mxu0 %v30013_v2  ;;  %1476 = vmatprep.subr.bf16.mxu1 %v20833_v12  ;;  %v20909_v11 = vld [vmem:[%s29996_s2 + $0x14c] ss:$20 sps:$4 sm:$0xff]   ;;  %v20907_v12 = vld [vmem:[%s29996_s2 + $0x148] ss:$20 sps:$4 sm:$0xff]  }
 0x109   :  { %1022 = vmatpush2.bf16.msra.mxu0 %v20834_v14  ;;  %1477 = vmatpush2.bf16.msra.mxu1 %v20831_v13  ;;  %v20910_v13 = vld [vmem:[%s29996_s2 + $0x150] ss:$20 sps:$4 sm:$0xff]  }
 0x10a   :  { %1023 = vmatprep.subr.bf16.mxu0 %v30013_v2  ;;  %1478 = vmatprep.subr.bf16.mxu1 %v20837_v15  ;;  %v23872_v14 = vld [vmem:[%s29994_s0 + $0x44] ss:$8 sps:$4 sm:$0xff]   ;;  %v23109_v15 = vld [vmem:[%s29994_s0 + $0x40] ss:$8 sps:$4 sm:$0xff]  }
 0x10d   :  { %1024 = vmatpush2.bf16.msra.mxu0 %v20838_v18  ;;  %1479 = vmatpush2.bf16.msra.mxu1 %v20835_v17  ;;  %v23110_v17 = vld [vmem:[%s29994_s0 + $0x34] ss:$8 sps:$4 sm:$0xff]   ;;  %v23111_v18 = vld [vmem:[%s29994_s0 + $0x30] ss:$8 sps:$4 sm:$0xff]  }
 0x10e   :  { %1025 = vmatprep.subr.bf16.mxu0 %v30013_v2  ;;  %1480 = vmatprep.subr.bf16.mxu1 %v20841_v19  ;;  %v23112_v19 = vld [vmem:[%s29994_s0 + $0x24] ss:$8 sps:$4 sm:$0xff]  }
 0x111   :  { %1026 = vmatpush2.bf16.msra.mxu0 %v20842_v22  ;;  %1481 = vmatpush2.bf16.msra.mxu1 %v20839_v21  ;;  %v23113_v21 = vld [vmem:[%s29994_s0 + $0x20] ss:$8 sps:$4 sm:$0xff]   ;;  %v23114_v22 = vld [vmem:[%s29994_s0 + $0x14] ss:$8 sps:$4 sm:$0xff]  }
 0x112   :  { %1027 = vmatprep.subr.bf16.mxu0 %v30013_v2  ;;  %1482 = vmatprep.subr.bf16.mxu1 %v20845_v23  ;;  %v23115_v23 = vld [vmem:[%s29994_s0 + $0x10] ss:$8 sps:$4 sm:$0xff]  }
 0x115   :  { %1028 = vmatpush2.bf16.msra.mxu0 %v20846_v25  ;;  %1483 = vmatpush2.bf16.msra.mxu1 %v20843_v24  ;;  %v23116_v24 = vld [vmem:[%s29994_s0 + $0x4] ss:$8 sps:$4 sm:$0xff]   ;;  %v23117_v25 = vld [vmem:[%s29994_s0] ss:$8 sps:$4 sm:$0xff]  }
 0x116   :  { %1029 = vmatprep.subr.bf16.mxu0 %v30013_v2  ;;  %1484 = vmatprep.subr.bf16.mxu1 %v20849_v26  ;;  %v20911_v26 = vld [vmem:[%s29995_s1 + $0x28] sm:$0xff]  }
 0x119   :  { %1030 = vmatpush2.bf16.msra.mxu0 %v20850_v30  ;;  %1485 = vmatpush2.bf16.msra.mxu1 %v20847_v28  ;;  %v20914_v28 = vld [vmem:[%s29996_s2 + $0x5c8] ss:$20 sps:$4 sm:$0xff]   ;;  %v20916_v30 = vld [vmem:[%s29996_s2 + $0x5cc] ss:$20 sps:$4 sm:$0xff]  }
 0x11a   :  { %1515 = vmatprep.subr.bf16.mxu0 %v20853_v31  ;;  %1576 = vmatprep.subr.bf16.mxu1 %v30013_v2  ;;  %v20917_v31 = vld [vmem:[%s29996_s2 + $0x5d0] ss:$20 sps:$4 sm:$0xff]  }
 0x11c   :  { %1032 = vmatmul.mubr.bf16.vlgmr.msra.gmra.mxu0 %v23496_v27  ;;  %1487 = vmatmul.mubr.bf16.vlgmr.msra.gmra.mxu1 %v23689_v33  ;;  %v20859_v27 = vld [vmem:[%s29996_s2 + $0xd0] ss:$20 sps:$4 sm:$0xff]  }
 0x11d   :  { %16975 = vmatprep.mubr.msk.bf16.mxu0 %vm867_vm1, %v23533_v43  ;;  %1516 = vmatpush1.bf16.msra.mxu0 %v20851_v32  ;;  %v23734_v43 = vpack.c.bf16 %v23550_v49, %v23550_v49  ;;  %v20871_v49 = vld [vmem:[%s29996_s2 + $0x58] ss:$20 sps:$4 sm:$0xff]   ;;  %v20919_v32 = vld [vmem:[%s29996_s2 + $0x5d4] ss:$20 sps:$4 sm:$0xff]  }
 0x11e   :  { %1577 = vmatpush1.bf16.msra.mxu1 %v20854_v35  ;;  %1517 = vmatprep.subr.bf16.mxu0 %v20857_v37  ;;  %v20912_v35 = vld [vmem:[%s29995_s1 + $0x30] sm:$0xff]   ;;  %v20925_v37 = vld [vmem:[%s29996_s2 + $0x5ac] ss:$20 sps:$4 sm:$0xff]  }
 0x11f   :  { %1578 = vmatprep.subr.bf16.mxu1 %v30013_v2  ;;  %17053 = vmatprep.mubr.msk.bf16.mxu1 %vm867_vm1, %v23700_v38 }
 0x121   :  { %1518 = vmatpush1.bf16.msra.mxu0 %v20855_v16  ;;  %v20923_v16 = vld [vmem:[%s29996_s2 + $0x5a8] ss:$20 sps:$4 sm:$0xff]  }
 0x122   :  { %1579 = vmatpush1.bf16.msra.mxu1 %v20858_v20  ;;  %1519 = vmatprep.subr.bf16.mxu0 %v20861_v40  ;;  %v20928_v20 = vld [vmem:[%s29996_s2 + $0x57c] ss:$20 sps:$4 sm:$0xff]   ;;  %v20931_v40 = vld [vmem:[%s29996_s2 + $0x584] ss:$20 sps:$4 sm:$0xff]  }
 0x123   :  { %1580 = vmatprep.subr.bf16.mxu1 %v30013_v2 }
 0x124   :  { %1040 = vmatmul.mubr.bf16.gmra.mxu0 %v23526_v39  ;;  %1497 = vmatmul.mubr.bf16.gmra.mxu1 %v23723_v34  ;;  %v20867_v39 = vld [vmem:[%s29996_s2 + $0x80] ss:$20 sps:$4 sm:$0xff]  }
 0x125   :  { %16976 = vmatprep.mubr.msk.bf16.mxu0 %vm867_vm1, %v23552_v50  ;;  %1520 = vmatpush1.bf16.msra.mxu0 %v20859_v27  ;;  %v20877_v50 = vld [vmem:[%s29996_s2 + $0x34] ss:$20 sps:$4 sm:$0xff]   ;;  %v20926_v27 = vld [vmem:[%s29996_s2 + $0x578] ss:$20 sps:$4 sm:$0xff]  }
 0x126   :  { %1581 = vmatpush1.bf16.msra.mxu1 %v20862_v41  ;;  %1521 = vmatprep.subr.bf16.mxu0 %v20865_v42  ;;  %v20929_v41 = vld [vmem:[%s29996_s2 + $0x580] ss:$20 sps:$4 sm:$0xff]  }
 0x127   :  { %1582 = vmatprep.subr.bf16.mxu1 %v30013_v2  ;;  %17054 = vmatprep.mubr.msk.bf16.mxu1 %vm867_vm1, %v23734_v43  ;;  %v20934_v42 = vld [vmem:[%s29996_s2 + $0x554] ss:$20 sps:$4 sm:$0xff]  }
 0x129   :  { %1522 = vmatpush1.bf16.msra.mxu0 %v20863_v29  ;;  %v20937_v29 = vld [vmem:[%s29996_s2 + $0x55c] ss:$20 sps:$4 sm:$0xff]  }
 0x12a   :  { %1583 = vmatpush1.bf16.msra.mxu1 %v20866_v36  ;;  %1523 = vmatprep.subr.bf16.mxu0 %v20869_v44  ;;  %v20935_v36 = vld [vmem:[%s29996_s2 + $0x558] ss:$20 sps:$4 sm:$0xff]  }
 0x12b   :  { %1584 = vmatprep.subr.bf16.mxu1 %v30013_v2  ;;  %v20940_v44 = vld [vmem:[%s29996_s2 + $0x52c] ss:$20 sps:$4 sm:$0xff]  }
 0x12c   :  { %1048 = vmatmul.mubr.bf16.gmra.mxu0 %v23568_v56  ;;  %1507 = vmatmul.mubr.bf16.gmra.mxu1 %v23757_v46  ;;  %v20885_v56 = vld [vmem:[%s29996_s2 + $0x23c] ss:$20 sps:$4 sm:$0xff]  }
 0x12d   :  { %1524 = vmatpush1.bf16.msra.mxu0 %v20867_v39  ;;  %17055 = vmatprep.mubr.msk.bf16.mxu0 %vm867_vm1, %v23582_v62  ;;  %v20943_v39 = vld [vmem:[%s29996_s2 + $0x534] ss:$20 sps:$4 sm:$0xff]  }
 0x12e   :  { %1585 = vmatpush1.bf16.msra.mxu1 %v20870_v47  ;;  %1525 = vmatprep.subr.bf16.mxu0 %v20873_v48  ;;  %v20941_v47 = vld [vmem:[%s29996_s2 + $0x530] ss:$20 sps:$4 sm:$0xff]  }
 0x12f   :  { %1586 = vmatprep.subr.bf16.mxu1 %v30013_v2  ;;  %17058 = vmatprep.mubr.msk.bf16.mxu1 %vm867_vm1, %v23582_v62  ;;  %v20893_v62 = vld [vmem:[%s29996_s2 + $0x1ec] ss:$20 sps:$4 sm:$0xff]   ;;  %v20946_v48 = vld [vmem:[%s29996_s2 + $0x504] ss:$20 sps:$4 sm:$0xff]  }
 0x131   :  { %1526 = vmatpush1.bf16.msra.mxu0 %v20871_v49  ;;  %v20949_v49 = vld [vmem:[%s29996_s2 + $0x50c] ss:$20 sps:$4 sm:$0xff]  }
 0x132   :  { %1587 = vmatpush1.bf16.msra.mxu1 %v20874_v45  ;;  %1527 = vmatprep.subr.bf16.mxu0 %v20877_v50  ;;  %v20944_v45 = vld [vmem:[%s29996_s2 + $0x500] ss:$20 sps:$4 sm:$0xff]   ;;  %v20947_v50 = vld [vmem:[%s29996_s2 + $0x508] ss:$20 sps:$4 sm:$0xff]  }
 0x133   :  { %1588 = vmatprep.subr.bf16.mxu1 %v30013_v2 }
 0x135   :  { %1528 = vmatpush1.bf16.msra.mxu0 %v20875_v51  ;;  %v20952_v51 = vld [vmem:[%s29996_s2 + $0x4dc] ss:$20 sps:$4 sm:$0xff]  }
 0x136   :  { %1589 = vmatpush1.bf16.msra.mxu1 %v20878_v52  ;;  %1529 = vmatprep.subr.bf16.mxu0 %v20881_v53  ;;  %v20955_v52 = vld [vmem:[%s29996_s2 + $0x4e4] ss:$20 sps:$4 sm:$0xff]  }
 0x137   :  { %1590 = vmatprep.subr.bf16.mxu1 %v30013_v2  ;;  %v20950_v53 = vld [vmem:[%s29996_s2 + $0x4d8] ss:$20 sps:$4 sm:$0xff]  }
 0x139   :  { %1530 = vmatpush1.bf16.msra.mxu0 %v20879_v54  ;;  %v20953_v54 = vld [vmem:[%s29996_s2 + $0x4e0] ss:$20 sps:$4 sm:$0xff]  }
 0x13a   :  { %1591 = vmatpush1.bf16.msra.mxu1 %v20882_v55  ;;  %1533 = vmatprep.subr.bf16.mxu0 %v20885_v56  ;;  %v20958_v55 = vld [vmem:[%s29996_s2 + $0x4b4] ss:$20 sps:$4 sm:$0xff]   ;;  %v20956_v56 = vld [vmem:[%s29996_s2 + $0x4b0] ss:$20 sps:$4 sm:$0xff]  }
 0x13b   :  { %1594 = vmatprep.subr.bf16.mxu1 %v30013_v2 }
 0x13d   :  { %1534 = vmatpush2.bf16.msra.mxu0 %v20883_v57  ;;  %v20961_v57 = vld [vmem:[%s29996_s2 + $0x4bc] ss:$20 sps:$4 sm:$0xff]  }
 0x13e   :  { %1595 = vmatpush2.bf16.msra.mxu1 %v20886_v58  ;;  %1535 = vmatprep.subr.bf16.mxu0 %v20889_v59  ;;  %v20959_v58 = vld [vmem:[%s29996_s2 + $0x4b8] ss:$20 sps:$4 sm:$0xff]  }
 0x13f   :  { %1596 = vmatprep.subr.bf16.mxu1 %v30013_v2  ;;  %v20964_v59 = vld [vmem:[%s29996_s2 + $0x6e4] ss:$20 sps:$4 sm:$0xff]  }
 0x141   :  { %1536 = vmatpush2.bf16.msra.mxu0 %v20887_v60  ;;  %v20962_v60 = vld [vmem:[%s29996_s2 + $0x6e0] ss:$20 sps:$4 sm:$0xff]  }
 0x142   :  { %1597 = vmatpush2.bf16.msra.mxu1 %v20890_v61  ;;  %1537 = vmatprep.subr.bf16.mxu0 %v20893_v62  ;;  %v20967_v61 = vld [vmem:[%s29996_s2 + $0x6ec] ss:$20 sps:$4 sm:$0xff]   ;;  %v20965_v62 = vld [vmem:[%s29996_s2 + $0x6e8] ss:$20 sps:$4 sm:$0xff]  }
 0x143   :  { %1598 = vmatprep.subr.bf16.mxu1 %v30013_v2 }
 0x145   :  { %1538 = vmatpush2.bf16.msra.mxu0 %v20891_v63 }
 0x146   :  { %1599 = vmatpush2.bf16.msra.mxu1 %v20894_v0  ;;  %1539 = vmatprep.subr.bf16.mxu0 %v20897_v1  ;;  %v20970_v1 = vld [vmem:[%s29996_s2 + $0x6bc] ss:$20 sps:$4 sm:$0xff]  }
 0x147   :  { %1600 = vmatprep.subr.bf16.mxu1 %v30013_v2 }
 0x149   :  { %1540 = vmatpush2.bf16.msra.mxu0 %v20895_v3  ;;  %v20968_v3 = vld [vmem:[%s29996_s2 + $0x6b8] ss:$20 sps:$4 sm:$0xff]  }
 0x14a   :  { %1601 = vmatpush2.bf16.msra.mxu1 %v20898_v4  ;;  %1541 = vmatprep.subr.bf16.mxu0 %v20901_v5  ;;  %v20973_v4 = vld [vmem:[%s29996_s2 + $0x6c4] ss:$20 sps:$4 sm:$0xff]  }
 0x14b   :  { %1602 = vmatprep.subr.bf16.mxu1 %v30013_v2 }
 0x14d   :  { %1542 = vmatpush2.bf16.msra.mxu0 %v20899_v6 }
 0x14e   :  { %1603 = vmatpush2.bf16.msra.mxu1 %v20902_v7  ;;  %1543 = vmatprep.subr.bf16.mxu0 %v20905_v8  ;;  %v20971_v7 = vld [vmem:[%s29996_s2 + $0x6c0] ss:$20 sps:$4 sm:$0xff]  }
 0x14f   :  { %1604 = vmatprep.subr.bf16.mxu1 %v30013_v2 }
 0x151   :  { %1544 = vmatpush2.bf16.msra.mxu0 %v20903_v9 }
 0x152   :  { %1605 = vmatpush2.bf16.msra.mxu1 %v20906_v10  ;;  %1545 = vmatprep.subr.bf16.mxu0 %v20909_v11  ;;  %v20976_v10 = vld [vmem:[%s29996_s2 + $0x694] ss:$20 sps:$4 sm:$0xff]   ;;  %v20974_v11 = vld [vmem:[%s29996_s2 + $0x690] ss:$20 sps:$4 sm:$0xff]  }
 0x153   :  { %1606 = vmatprep.subr.bf16.mxu1 %v30013_v2 }
 0x155   :  { %1546 = vmatpush2.bf16.msra.mxu0 %v20907_v12  ;;  %v20979_v12 = vld [vmem:[%s29996_s2 + $0x69c] ss:$20 sps:$4 sm:$0xff]  }
 0x156   :  { %1607 = vmatpush2.bf16.msra.mxu1 %v20910_v13  ;;  %1666 = vmatprep.subr.bf16.mxu0 %v23872_v14 }
 0x157   :  { %2217 = vmatprep.subr.bf16.mxu1 %v20916_v30 }
 0x158   :  { %1548 = vmatmul.mubr.bf16.vlgmr.msra.gmra.mxu0 %v23689_v33 }
 0x159   :  { %1609 = vmatmul.mubr.bf16.vlgmr.msra.gmra.mxu1 %v23689_v33  ;;  %17056 = vmatprep.mubr.msk.bf16.mxu0 %vm867_vm1, %v23700_v38  ;;  %v20922_v33 = vld [vmem:[%s29996_s2 + $0x5a4] ss:$20 sps:$4 sm:$0xff]  }
 0x15a   :  { %17059 = vmatprep.mubr.msk.bf16.mxu1 %vm867_vm1, %v23700_v38  ;;  %1667 = vmatpush1.bf16.msra.mxu0 %v23109_v15  ;;  %v20920_v38 = vld [vmem:[%s29996_s2 + $0x5a0] ss:$20 sps:$4 sm:$0xff]  }
 0x15b   :  { %1668 = vmatprep.subr.bf16.mxu0 %v23110_v17  ;;  %2218 = vmatpush1.bf16.msra.mxu1 %v20914_v28  ;;  %v20977_v17 = vld [vmem:[%s29996_s2 + $0x698] ss:$20 sps:$4 sm:$0xff]  }
 0x15c   :  { %2219 = vmatprep.subr.bf16.mxu1 %v20922_v33  ;;  %v20991_v33 = vld [vmem:[%s29996_s2 + $0x64c] ss:$20 sps:$4 sm:$0xff]  }
 0x15e   :  { %1669 = vmatpush1.bf16.msra.mxu0 %v23111_v18 }
 0x15f   :  { %1670 = vmatprep.subr.bf16.mxu0 %v23112_v19  ;;  %2220 = vmatpush1.bf16.msra.mxu1 %v20920_v38  ;;  %v20989_v38 = vld [vmem:[%s29996_s2 + $0x648] ss:$20 sps:$4 sm:$0xff]  }
 0x160   :  { %1558 = vmatmul.mubr.bf16.gmra.mxu0 %v23723_v34  ;;  %2221 = vmatprep.subr.bf16.mxu1 %v20928_v20 }
 0x161   :  { %1617 = vmatmul.mubr.bf16.gmra.mxu1 %v23723_v34  ;;  %17057 = vmatprep.mubr.msk.bf16.mxu0 %vm867_vm1, %v23734_v43  ;;  %v20913_v34 = vld [vmem:[%s29995_s1 + $0x38] ss:$0 sps:$4 sm:$0xff]  }
 0x162   :  { %17060 = vmatprep.mubr.msk.bf16.mxu1 %vm867_vm1, %v23734_v43  ;;  %1671 = vmatpush1.bf16.msra.mxu0 %v23113_v21  ;;  %v20932_v43 = vld [vmem:[%s29996_s2 + $0x550] ss:$20 sps:$4 sm:$0xff]   ;;  %v20982_v21 = vld [vmem:[%s29996_s2 + $0x66c] ss:$20 sps:$4 sm:$0xff]  }
 0x163   :  { %1672 = vmatprep.subr.bf16.mxu0 %v23114_v22  ;;  %2222 = vmatpush1.bf16.msra.mxu1 %v20926_v27  ;;  %v20980_v22 = vld [vmem:[%s29996_s2 + $0x668] ss:$20 sps:$4 sm:$0xff]  }
 0x164   :  { %2223 = vmatprep.subr.bf16.mxu1 %v20934_v42  ;;  %v20994_v27 = vld [vmem:[%s29996_s2 + $0x61c] ss:$20 sps:$4 sm:$0xff]  }
 0x166   :  { %1673 = vmatpush1.bf16.msra.mxu0 %v23115_v23  ;;  %v20985_v23 = vld [vmem:[%s29996_s2 + $0x674] ss:$20 sps:$4 sm:$0xff]  }
 0x167   :  { %1674 = vmatprep.subr.bf16.mxu0 %v23116_v24  ;;  %2224 = vmatpush1.bf16.msra.mxu1 %v20932_v43  ;;  %v20995_v43 = vld [vmem:[%s29996_s2 + $0x620] ss:$20 sps:$4 sm:$0xff]  }
 0x168   :  { %1568 = vmatmul.mubr.bf16.gmra.mxu0 %v23757_v46  ;;  %2225 = vmatprep.subr.bf16.mxu1 %v20940_v44  ;;  %v21000_v44 = vld [vmem:[%s29996_s2 + $0x5f4] ss:$20 sps:$4 sm:$0xff]  }
 0x169   :  { %1625 = vmatmul.mubr.bf16.gmra.mxu1 %v23757_v46  ;;  %1692 = vmatprep.mubr.bf16.mxu0 %v30013_v2  ;;  %v20938_v46 = vld [vmem:[%s29996_s2 + $0x528] ss:$20 sps:$4 sm:$0xff]  }
 0x16a   :  { %1675 = vmatpush1.bf16.msra.mxu0 %v23117_v25 }
 0x16b   :  { %2278 = vmatprep.subr.bf16.mxu0 %v20919_v32  ;;  %2226 = vmatpush1.bf16.msra.mxu1 %v20938_v46  ;;  %v20986_v32 = vld [vmem:[%s29996_s2 + $0x640] ss:$20 sps:$4 sm:$0xff]   ;;  %v21003_v46 = vld [vmem:[%s29996_s2 + $0x5fc] ss:$20 sps:$4 sm:$0xff]  }
 0x16c   :  { %2227 = vmatprep.subr.bf16.mxu1 %v20946_v48 }
 0x16f   :  { %2228 = vmatpush1.bf16.msra.mxu1 %v20944_v45 }
 0x170   :  { %17069 = vmatmul.mubr.msk.bf16.vlgmr.msra.gmra.mxu0 %vm124_vm0, %v20911_v26  ;;  %2229 = vmatprep.subr.bf16.mxu1 %v20952_v51  ;;  %v20983_v26 = vld [vmem:[%s29996_s2 + $0x670] ss:$20 sps:$4 sm:$0xff]  }
 0x171   :  { %1702 = vmatprep.mubr.bf16.mxu0 %v30013_v2  ;;  %2279 = vmatpush1.bf16.msra.mxu0 %v20917_v31  ;;  %v20988_v31 = vld [vmem:[%s29996_s2 + $0x644] ss:$20 sps:$4 sm:$0xff]  }
 0x172   :  { %2280 = vmatprep.subr.bf16.mxu0 %v20925_v37 }
 0x173   :  { %2230 = vmatpush1.bf16.msra.mxu1 %v20950_v53 }
 0x174   :  { %2231 = vmatprep.subr.bf16.mxu1 %v20958_v55 }
 0x175   :  { %2281 = vmatpush1.bf16.msra.mxu0 %v20923_v16 }
 0x176   :  { %2282 = vmatprep.subr.bf16.mxu0 %v20931_v40  ;;  %v20992_v40 = vld [vmem:[%s29996_s2 + $0x618] ss:$20 sps:$4 sm:$0xff]  }
 0x177   :  { %2232 = vmatpush1.bf16.msra.mxu1 %v20956_v56 }
 0x178   :  { %17070 = vmatmul.mubr.msk.bf16.gmra.mxu0 %vm124_vm0, %v20912_v35  ;;  %2235 = vmatprep.subr.bf16.mxu1 %v20964_v59 }
 0x179   :  { %1712 = vmatprep.mubr.bf16.mxu0 %v30013_v2  ;;  %2283 = vmatpush1.bf16.msra.mxu0 %v20929_v41 }
 0x17a   :  { %2284 = vmatprep.subr.bf16.mxu0 %v20937_v29 }
 0x17b   :  { %2236 = vmatpush2.bf16.msra.mxu1 %v20962_v60 }
 0x17c   :  { %2237 = vmatprep.subr.bf16.mxu1 %v20970_v1 }
 0x17d   :  { %2285 = vmatpush1.bf16.msra.mxu0 %v20935_v36 }
 0x17e   :  { %2286 = vmatprep.subr.bf16.mxu0 %v20943_v39  ;;  %v20998_v39 = vld [vmem:[%s29996_s2 + $0x5f0] ss:$20 sps:$4 sm:$0xff]  }
 0x17f   :  { %2238 = vmatpush2.bf16.msra.mxu1 %v20968_v3 }
 0x180   :  { %17071 = vmatmul.mubr.msk.bf16.gmra.mxu0 %vm124_vm0, %v20913_v34  ;;  %2239 = vmatprep.subr.bf16.mxu1 %v20976_v10  ;;  %v20997_v34 = vld [vmem:[%s29996_s2 + $0x624] ss:$20 sps:$4 sm:$0xff]  }
 0x181   :  { %2287 = vmatpush1.bf16.msra.mxu0 %v20941_v47 }
 0x182   :  { %2288 = vmatprep.subr.bf16.mxu0 %v20949_v49  ;;  %v21001_v49 = vld [vmem:[%s29996_s2 + $0x5f8] ss:$20 sps:$4 sm:$0xff]  }
 0x183   :  { %2240 = vmatpush2.bf16.msra.mxu1 %v20974_v11 }
 0x184   :  { %2241 = vmatprep.subr.bf16.mxu1 %v20982_v21 }
 0x185   :  { %2289 = vmatpush1.bf16.msra.mxu0 %v20947_v50 }
 0x186   :  { %2290 = vmatprep.subr.bf16.mxu0 %v20955_v52 }
 0x187   :  { %2242 = vmatpush2.bf16.msra.mxu1 %v20980_v22 }
 0x188   :  { %2243 = vmatprep.subr.bf16.mxu1 %v20988_v31 }
 0x189   :  { %2291 = vmatpush1.bf16.msra.mxu0 %v20953_v54 }
 0x18a   :  { %2292 = vmatprep.subr.bf16.mxu0 %v20961_v57 }
 0x18b   :  { %2244 = vmatpush2.bf16.msra.mxu1 %v20986_v32 }
 0x18c   :  { %2245 = vmatprep.subr.bf16.mxu1 %v20994_v27 }
 0x18d   :  { %2293 = vmatpush1.bf16.msra.mxu0 %v20959_v58 }
 0x18e   :  { %2296 = vmatprep.subr.bf16.mxu0 %v20967_v61 }
 0x18f   :  { %2246 = vmatpush2.bf16.msra.mxu1 %v20992_v40 }
 0x190   :  { %2247 = vmatprep.subr.bf16.mxu1 %v21000_v44 }
 0x191   :  { %2297 = vmatpush2.bf16.msra.mxu0 %v20965_v62 }
 0x192   :  { %2298 = vmatprep.subr.bf16.mxu0 %v20973_v4 }
 0x193   :  { %2248 = vmatpush2.bf16.msra.mxu1 %v20998_v39 }
 0x194   :  { %2339 = vmatprep.subr.bf16.mxu1 %v30013_v2 }
 0x195   :  { %2299 = vmatpush2.bf16.msra.mxu0 %v20971_v7 }
 0x196   :  { %2300 = vmatprep.subr.bf16.mxu0 %v20979_v12 }
 0x199   :  { %2301 = vmatpush2.bf16.msra.mxu0 %v20977_v17 }
 0x19a   :  { %2302 = vmatprep.subr.bf16.mxu0 %v20985_v23 }
 0x19d   :  { %2303 = vmatpush2.bf16.msra.mxu0 %v20983_v26 }
 0x19e   :  { %2304 = vmatprep.subr.bf16.mxu0 %v20991_v33 }
 0x1a0   :  { %v24039_v63 = vpop.f32.mrf.mxu0  ;;  %v24041_v0 = vpop.f32.mrf.mxu1 }
 0x1a1   :  { %2305 = vmatpush2.bf16.msra.mxu0 %v20989_v38 }
 0x1a2   :  { %v24052_v5 = vpop.f32.mrf.mxu0  ;;  %v24054_v6 = vpop.f32.mrf.mxu1  ;;  %2306 = vmatprep.subr.bf16.mxu0 %v20997_v34 }
 0x1a4   :  { %v24059_v8 = vpop.f32.mrf.mxu0  ;;  %v24061_v9 = vpop.f32.mrf.mxu1 }
 0x1a5   :  { %2307 = vmatpush2.bf16.msra.mxu0 %v20995_v43 }
 0x1a6   :  { %v24072_v13 = vpop.f32.mrf.mxu0  ;;  %v24074_v15 = vpop.f32.mrf.mxu1  ;;  %2308 = vmatprep.subr.bf16.mxu0 %v21003_v46 }
 0x1a8   :  { %v24079_v18 = vpop.f32.mrf.mxu0  ;;  %v24081_v19 = vpop.f32.mrf.mxu1 }
 0x1a9   :  { %2309 = vmatpush2.bf16.msra.mxu0 %v21001_v49 }
 0x1aa   :  { %v923_v24 = vpop.f32.mrf.mxu0  ;;  %v24092_v25 = vpop.f32.mrf.mxu1  ;;  %2454 = vmatprep.subr.bf16.mxu0 %v23872_v14 }
 0x1ac   :  { %v925_v28 = vpop.f32.mrf.mxu0  ;;  %v24097_v30 = vpop.f32.mrf.mxu1 }
 0x1ae   :  { %v24108_v35 = vpop.f32.mrf.mxu0  ;;  %v24110_v37 = vpop.f32.mrf.mxu1 }
 0x1b0   :  { %v931_v16 = vpop.f32.mrf.mxu0  ;;  %v24115_v20 = vpop.f32.mrf.mxu1 }
 0x1b2   :  { %v933_v41 = vpop.f32.mrf.mxu0  ;;  %v24126_v42 = vpop.f32.mrf.mxu1 }
 0x1b4   :  { %v935_v29 = vpop.f32.mrf.mxu0  ;;  %v996_v36 = vpop.f32.mrf.mxu1 }
 0x1b6   :  { %v936_v47 = vpop.f32.mrf.mxu0  ;;  %v997_v48 = vpop.f32.mrf.mxu1 }
 0x1dc   :  { %v1033_v45 = vpop.f32.mrf.mxu0  ;;  %v1488_v50 = vpop.f32.mrf.mxu1 }
 0x1dd   :  { %v24146_v51 = vadd.f32 %v1488_v50, %v24039_v63 }
 0x1de   :  { %v1035_v52 = vpop.f32.mrf.mxu0  ;;  %v1490_v53 = vpop.f32.mrf.mxu1 }
 0x1df   :  { %v24149_v54 = vadd.f32 %v1490_v53, %v24052_v5 }
 0x1e0   :  { %v1036_v55 = vpop.f32.mrf.mxu0  ;;  %v1492_v56 = vpop.f32.mrf.mxu1 }
 0x1e1   :  { %v24152_v57 = vadd.f32 %v1492_v56, %v24059_v8 }
 0x1e2   :  { %v1038_v58 = vpop.f32.mrf.mxu0  ;;  %v24154_v59 = vpop.f32.mrf.mxu1 }
 0x1e4   :  { %v1041_v60 = vpop.f32.mrf.mxu0  ;;  %v1498_v14 = vpop.f32.mrf.mxu1 }
 0x1e5   :  { %v24157_v61 = vadd.f32 %v1498_v14, %v24079_v18 }
 0x1e6   :  { %v1043_v62 = vpop.f32.mrf.mxu0  ;;  %v1500_v63 = vpop.f32.mrf.mxu1 }
 0x1e7   :  { %v24159_v1 = vadd.f32 %v1500_v63, %v923_v24 }
 0x1e8   :  { %v1044_v3 = vpop.f32.mrf.mxu0  ;;  %v1502_v4 = vpop.f32.mrf.mxu1 }
 0x1e9   :  { %v24161_v5 = vadd.f32 %v1502_v4, %v925_v28 }
 0x1ea   :  { %v1046_v7 = vpop.f32.mrf.mxu0  ;;  %v24163_v10 = vpop.f32.mrf.mxu1 }
 0x1ec   :  { %v1049_v8 = vpop.f32.mrf.mxu0  ;;  %v1508_v11 = vpop.f32.mrf.mxu1 }
 0x1ed   :  { %v24165_v12 = vadd.f32 %v1508_v11, %v931_v16 }
 0x1ee   :  { %v1051_v17 = vpop.f32.mrf.mxu0  ;;  %v1510_v21 = vpop.f32.mrf.mxu1 }
 0x1ef   :  { %v24167_v22 = vadd.f32 %v1510_v21, %v933_v41 }
 0x1f0   :  { %v1052_v18 = vpop.f32.mrf.mxu0  ;;  %v1512_v23 = vpop.f32.mrf.mxu1 }
 0x1f1   :  { %v21005_v18 = vld [vmem:[%s29996_s2 + $0x5b0] ss:$20 sps:$4 sm:$0xff]  }
 0x1f2   :  { %v1053_v26 = vpop.f32.mrf.mxu0  ;;  %v1513_v24 = vpop.f32.mrf.mxu1 }
 0x1f3   :  { %v23118_v26 = vld [vmem:[%s29994_s0 + $0x40] ss:$8 sps:$4 sm:$0xff]  }
 0x218   :  { %v24169_v31 = vpop.f32.mrf.mxu0 }
 0x219   :  { %v1610_v32 = vpop.f32.mrf.mxu1 }
 0x21a   :  { %v24171_v28 = vadd.f32 %v1610_v32, %v1033_v45  ;;  %v24173_v33 = vpop.f32.mrf.mxu0  ;;  %v23119_v32 = vld [vmem:[%s29994_s0 + $0x34] ss:$8 sps:$4 sm:$0xff]  }
 0x21b   :  { %v1612_v38 = vpop.f32.mrf.mxu1 }
 0x21c   :  { %v24175_v40 = vpop.f32.mrf.mxu0  ;;  %v21006_v38 = vld [vmem:[%s29996_s2 + $0x588] ss:$20 sps:$4 sm:$0xff]  }
 0x21d   :  { %v1613_v16 = vpop.f32.mrf.mxu1 }
 0x21e   :  { %v24177_v27 = vadd.f32 %v1613_v16, %v1036_v55  ;;  %v24179_v34 = vpop.f32.mrf.mxu0 }
 0x21f   :  { %v1615_v41 = vpop.f32.mrf.mxu1 }
 0x220   :  { %v24181_v43 = vpop.f32.mrf.mxu0 }
 0x221   :  { %v1618_v29 = vpop.f32.mrf.mxu1 }
 0x222   :  { %v24183_v36 = vadd.f32 %v1618_v29, %v1041_v60  ;;  %v24185_v44 = vpop.f32.mrf.mxu0  ;;  %v23120_v29 = vld [vmem:[%s29994_s0 + $0x30] ss:$8 sps:$4 sm:$0xff]  }
 0x223   :  { %v1620_v39 = vpop.f32.mrf.mxu1 }
 0x224   :  { %v24187_v46 = vpop.f32.mrf.mxu0 }
 0x225   :  { %v1621_v47 = vpop.f32.mrf.mxu1 }
 0x226   :  { %v24189_v48 = vadd.f32 %v1621_v47, %v1044_v3  ;;  %v24191_v49 = vpop.f32.mrf.mxu0  ;;  %v21004_v3 = vld [vmem:[%s29996_s2 + $0x5d8] ss:$20 sps:$4 sm:$0xff]  }
 0x227   :  { %v1623_v45 = vpop.f32.mrf.mxu1 }
 0x228   :  { %v24193_v50 = vpop.f32.mrf.mxu0  ;;  %v23121_v45 = vld [vmem:[%s29994_s0 + $0x24] ss:$8 sps:$4 sm:$0xff]  }
 0x229   :  { %v1626_v52 = vpop.f32.mrf.mxu1 }
 0x22a   :  { %v24195_v53 = vadd.f32 %v1626_v52, %v1049_v8  ;;  %v24197_v55 = vpop.f32.mrf.mxu0  ;;  %v21007_v52 = vld [vmem:[%s29996_s2 + $0x560] ss:$20 sps:$4 sm:$0xff]  }
 0x22b   :  { %v1628_v56 = vpop.f32.mrf.mxu1 }
 0x22c   :  { %v1573_v58 = vpop.f32.mrf.mxu0 }
 0x22d   :  { %v1629_v60 = vpop.f32.mrf.mxu1 }
 0x22e   :  { %v1574_v14 = vpop.f32.mrf.mxu0  ;;  %v23122_v60 = vld [vmem:[%s29994_s0 + $0x20] ss:$8 sps:$4 sm:$0xff]  }
 0x22f   :  { %v1630_v62 = vpop.f32.mrf.mxu1 }
 0x230   :  { %v1694_v63 = vpop.f32.mrf.mxu0  ;;  %v23123_v62 = vld [vmem:[%s29994_s0 + $0x14] ss:$8 sps:$4 sm:$0xff]  }
 0x232   :  { %v1696_v4 = vpop.f32.mrf.mxu0 }
 0x234   :  { %v1698_v7 = vpop.f32.mrf.mxu0 }
 0x235   :  { %v24202_v21 = vpack.c.bf16 %v1698_v7, %v1694_v63  ;;  %v21008_v63 = vld [vmem:[%s29996_s2 + $0x538] ss:$20 sps:$4 sm:$0xff]  }
 0x236   :  { %v1700_v11 = vpop.f32.mrf.mxu0  ;;  %v23124_v7 = vld [vmem:[%s29994_s0 + $0x10] ss:$8 sps:$4 sm:$0xff]  }
 0x237   :  { %v1722_v17 = vpack.c.bf16 %v1700_v11, %v1696_v4 }
 0x238   :  { %v1704_v8 = vpop.f32.mrf.mxu0 }
 0x239   :  { %17237 = vmatprep.mubr.msk.bf16.mxu1 %vm867_vm1, %v1722_v17  ;;  %17240 = vmatprep.mubr.msk.bf16.mxu0 %vm867_vm1, %v1722_v17 }
 0x23a   :  { %v1706_v23 = vpop.f32.mrf.mxu0  ;;  %2250 = vmatmul.mubr.bf16.vlgmr.msra.gmra.mxu1 %v24202_v21  ;;  %2311 = vmatmul.mubr.bf16.vlgmr.msra.gmra.mxu0 %v24202_v21 }
 0x23b   :  { %2340 = vmatpush1.bf16.msra.mxu1 %v21004_v3  ;;  %2455 = vmatpush1.bf16.msra.mxu0 %v23118_v26  ;;  %v21024_v3 = vld [vmem:[%s29996_s2 + $0x824] ss:$20 sps:$4 sm:$0xff]   ;;  %v21011_v26 = vld [vmem:[%s29995_s1 + $0x3c] sm:$0xff]  }
 0x23c   :  { %v1708_v24 = vpop.f32.mrf.mxu0  ;;  %2341 = vmatprep.subr.bf16.mxu1 %v30013_v2  ;;  %2456 = vmatprep.subr.bf16.mxu0 %v23119_v32  ;;  %v21030_v32 = vld [vmem:[%s29996_s2 + $0x7fc] ss:$20 sps:$4 sm:$0xff]  }
 0x23d   :  { %v24226_v39 = vpack.c.bf16 %v1708_v24, %v1704_v8  ;;  %v23125_v8 = vld [vmem:[%s29994_s0 + $0x4] ss:$8 sps:$4 sm:$0xff]   ;;  %v21010_v24 = vld [vmem:[%s29996_s2 + $0x4e8] ss:$20 sps:$4 sm:$0xff]  }
 0x23e   :  { %v1710_v16 = vpop.f32.mrf.mxu0 }
 0x23f   :  { %v24221_v41 = vpack.c.bf16 %v1710_v16, %v1706_v23  ;;  %2342 = vmatpush1.bf16.msra.mxu1 %v21005_v18  ;;  %2457 = vmatpush1.bf16.msra.mxu0 %v23120_v29  ;;  %v21009_v18 = vld [vmem:[%s29996_s2 + $0x510] ss:$20 sps:$4 sm:$0xff]   ;;  %v23126_v23 = vld [vmem:[%s29994_s0] ss:$8 sps:$4 sm:$0xff]   ;;  %v21028_v16 = vld [vmem:[%s29996_s2 + $0x7f8] ss:$20 sps:$4 sm:$0xff]  }
 0x240   :  { %v1714_v47 = vpop.f32.mrf.mxu0  ;;  %2343 = vmatprep.subr.bf16.mxu1 %v30013_v2  ;;  %2458 = vmatprep.subr.bf16.mxu0 %v23121_v45  ;;  %v21036_v29 = vld [vmem:[%s29996_s2 + $0x7d4] ss:$20 sps:$4 sm:$0xff]   ;;  %v21013_v45 = vld [vmem:[%s29996_s2 + $0x6f0] ss:$20 sps:$4 sm:$0xff]  }
 0x241   :  { %17238 = vmatprep.mubr.msk.bf16.mxu1 %vm867_vm1, %v24221_v41  ;;  %17241 = vmatprep.mubr.msk.bf16.mxu0 %vm867_vm1, %v24221_v41  ;;  %v24263_v11 = vpack.c.bf16 %v1714_v47, %v1714_v47  ;;  %v21014_v47 = vld [vmem:[%s29995_s1 + $0x44] sm:$0xff]  }
 0x242   :  { %v1716_v56 = vpop.f32.mrf.mxu0  ;;  %2260 = vmatmul.mubr.bf16.gmra.mxu1 %v24226_v39  ;;  %2321 = vmatmul.mubr.bf16.gmra.mxu0 %v24226_v39 }
 0x243   :  { %v24241_v58 = vpack.c.bf16 %v1716_v56, %v1716_v56  ;;  %2344 = vmatpush1.bf16.msra.mxu1 %v21006_v38  ;;  %2459 = vmatpush1.bf16.msra.mxu0 %v23122_v60  ;;  %v21012_v38 = vld [vmem:[%s29996_s2 + $0x4c0] ss:$20 sps:$4 sm:$0xff]   ;;  %v21015_v60 = vld [vmem:[%s29996_s2 + $0x6c8] ss:$20 sps:$4 sm:$0xff]  }
 0x244   :  { %v1718_v14 = vpop.f32.mrf.mxu0  ;;  %2345 = vmatprep.subr.bf16.mxu1 %v30013_v2  ;;  %2460 = vmatprep.subr.bf16.mxu0 %v23123_v62  ;;  %v21042_v56 = vld [vmem:[%s29996_s2 + $0x7ac] ss:$20 sps:$4 sm:$0xff]   ;;  %v21048_v62 = vld [vmem:[%s29996_s2 + $0x784] ss:$20 sps:$4 sm:$0xff]  }
 0x245   :  { %17239 = vmatprep.mubr.msk.bf16.mxu1 %vm867_vm1, %v24241_v58  ;;  %17242 = vmatprep.mubr.msk.bf16.mxu0 %vm867_vm1, %v24241_v58  ;;  %v21040_v14 = vld [vmem:[%s29996_s2 + $0x7a8] ss:$20 sps:$4 sm:$0xff]  }
 0x246   :  { %v1719_v4 = vpop.f32.mrf.mxu0 }
 0x247   :  { %2346 = vmatpush1.bf16.msra.mxu1 %v21007_v52  ;;  %2461 = vmatpush1.bf16.msra.mxu0 %v23124_v7  ;;  %v21034_v52 = vld [vmem:[%s29996_s2 + $0x7d0] ss:$20 sps:$4 sm:$0xff]   ;;  %v21016_v4 = vld [vmem:[%s29996_s2 + $0x6a0] ss:$20 sps:$4 sm:$0xff]  }
 0x248   :  { %2347 = vmatprep.subr.bf16.mxu1 %v30013_v2  ;;  %2462 = vmatprep.subr.bf16.mxu0 %v23125_v8  ;;  %v21046_v7 = vld [vmem:[%s29996_s2 + $0x780] ss:$20 sps:$4 sm:$0xff]   ;;  %v21018_v8 = vld [vmem:[%s29996_s2 + $0x678] ss:$20 sps:$4 sm:$0xff]  }
 0x24a   :  { %2270 = vmatmul.mubr.bf16.gmra.mxu1 %v24263_v11  ;;  %2331 = vmatmul.mubr.bf16.gmra.mxu0 %v24263_v11 }
 0x24b   :  { %2348 = vmatpush1.bf16.msra.mxu1 %v21008_v63  ;;  %17243 = vmatprep.mubr.msk.bf16.mxu1 %vm867_vm1, %v1722_v17  ;;  %v21022_v17 = vld [vmem:[%s29996_s2 + $0x820] ss:$20 sps:$4 sm:$0xff]   ;;  %v21017_v63 = vld [vmem:[%s29995_s1 + $0x4c] ss:$0 sps:$4 sm:$0xff]  }
 0x24c   :  { %2349 = vmatprep.subr.bf16.mxu1 %v30013_v2  ;;  %2463 = vmatpush1.bf16.msra.mxu0 %v23126_v23  ;;  %v21060_v23 = vld [vmem:[%s29996_s2 + $0x734] ss:$20 sps:$4 sm:$0xff]  }
 0x24d   :  { %2480 = vmatprep.mubr.bf16.mxu0 %v30013_v2  ;;  %3005 = vmatprep.subr.bf16.mxu0 %v21024_v3  ;;  %v21054_v3 = vld [vmem:[%s29996_s2 + $0x75c] ss:$20 sps:$4 sm:$0xff]  }
 0x24f   :  { %2350 = vmatpush1.bf16.msra.mxu1 %v21009_v18  ;;  %v21052_v18 = vld [vmem:[%s29996_s2 + $0x758] ss:$20 sps:$4 sm:$0xff]  }
 0x250   :  { %2351 = vmatprep.subr.bf16.mxu1 %v30013_v2 }
 0x252   :  { %17254 = vmatmul.mubr.msk.bf16.vlgmr.msra.gmra.mxu0 %vm124_vm0, %v21011_v26  ;;  %v21019_v26 = vld [vmem:[%s29996_s2 + $0x650] ss:$20 sps:$4 sm:$0xff]  }
 0x253   :  { %2352 = vmatpush1.bf16.msra.mxu1 %v21010_v24  ;;  %2490 = vmatprep.mubr.bf16.mxu0 %v30013_v2  ;;  %v21058_v24 = vld [vmem:[%s29996_s2 + $0x730] ss:$20 sps:$4 sm:$0xff]  }
 0x254   :  { %2353 = vmatprep.subr.bf16.mxu1 %v30013_v2  ;;  %3006 = vmatpush1.bf16.msra.mxu0 %v21022_v17  ;;  %v21020_v17 = vld [vmem:[%s29996_s2 + $0x628] ss:$20 sps:$4 sm:$0xff]  }
 0x255   :  { %3007 = vmatprep.subr.bf16.mxu0 %v21030_v32  ;;  %v21021_v32 = vld [vmem:[%s29996_s2 + $0x600] ss:$20 sps:$4 sm:$0xff]  }
 0x257   :  { %2354 = vmatpush1.bf16.msra.mxu1 %v21012_v38  ;;  %v21027_v38 = vld [vmem:[%s29996_s2 + $0x82c] ss:$20 sps:$4 sm:$0xff]  }
 0x258   :  { %2357 = vmatprep.subr.bf16.mxu1 %v30013_v2  ;;  %3008 = vmatpush1.bf16.msra.mxu0 %v21028_v16  ;;  %v21025_v16 = vld [vmem:[%s29996_s2 + $0x828] ss:$20 sps:$4 sm:$0xff]  }
 0x259   :  { %3009 = vmatprep.subr.bf16.mxu0 %v21036_v29  ;;  %v21033_v29 = vld [vmem:[%s29996_s2 + $0x804] ss:$20 sps:$4 sm:$0xff]  }
 0x25a   :  { %17255 = vmatmul.mubr.msk.bf16.gmra.mxu0 %vm124_vm0, %v21014_v47  ;;  %v21031_v47 = vld [vmem:[%s29996_s2 + $0x800] ss:$20 sps:$4 sm:$0xff]  }
 0x25b   :  { %2358 = vmatpush2.bf16.msra.mxu1 %v21013_v45  ;;  %2500 = vmatprep.mubr.bf16.mxu0 %v30013_v2  ;;  %v21039_v45 = vld [vmem:[%s29996_s2 + $0x7dc] ss:$20 sps:$4 sm:$0xff]  }
 0x25c   :  { %2359 = vmatprep.subr.bf16.mxu1 %v30013_v2  ;;  %3010 = vmatpush1.bf16.msra.mxu0 %v21034_v52  ;;  %v21066_v52 = vld [vmem:[%s29996_s2 + $0x70c] ss:$20 sps:$4 sm:$0xff]  }
 0x25d   :  { %3011 = vmatprep.subr.bf16.mxu0 %v21042_v56  ;;  %v21037_v56 = vld [vmem:[%s29996_s2 + $0x7d8] ss:$20 sps:$4 sm:$0xff]  }
 0x25f   :  { %2360 = vmatpush2.bf16.msra.mxu1 %v21015_v60  ;;  %v21072_v60 = vld [vmem:[%s29996_s2 + $0x93c] ss:$20 sps:$4 sm:$0xff]  }
 0x260   :  { %2361 = vmatprep.subr.bf16.mxu1 %v30013_v2  ;;  %3012 = vmatpush1.bf16.msra.mxu0 %v21040_v14  ;;  %v21043_v14 = vld [vmem:[%s29996_s2 + $0x7b0] ss:$20 sps:$4 sm:$0xff]  }
 0x261   :  { %3013 = vmatprep.subr.bf16.mxu0 %v21048_v62  ;;  %v21070_v62 = vld [vmem:[%s29996_s2 + $0x938] ss:$20 sps:$4 sm:$0xff]  }
 0x262   :  { %17256 = vmatmul.mubr.msk.bf16.gmra.mxu0 %vm124_vm0, %v21017_v63  ;;  %v21049_v63 = vld [vmem:[%s29996_s2 + $0x788] ss:$20 sps:$4 sm:$0xff]  }
 0x263   :  { %2362 = vmatpush2.bf16.msra.mxu1 %v21016_v4  ;;  %v21076_v4 = vld [vmem:[%s29996_s2 + $0x910] ss:$20 sps:$4 sm:$0xff]  }
 0x264   :  { %2363 = vmatprep.subr.bf16.mxu1 %v30013_v2  ;;  %3014 = vmatpush1.bf16.msra.mxu0 %v21046_v7  ;;  %v21057_v7 = vld [vmem:[%s29996_s2 + $0x764] ss:$20 sps:$4 sm:$0xff]  }
 0x265   :  { %3015 = vmatprep.subr.bf16.mxu0 %v21054_v3  ;;  %v21084_v3 = vld [vmem:[%s29996_s2 + $0x8ec] ss:$20 sps:$4 sm:$0xff]  }
 0x267   :  { %2364 = vmatpush2.bf16.msra.mxu1 %v21018_v8  ;;  %v21055_v8 = vld [vmem:[%s29996_s2 + $0x760] ss:$20 sps:$4 sm:$0xff]  }
 0x268   :  { %2365 = vmatprep.subr.bf16.mxu1 %v30013_v2  ;;  %3016 = vmatpush1.bf16.msra.mxu0 %v21052_v18  ;;  %v21082_v18 = vld [vmem:[%s29996_s2 + $0x8e8] ss:$20 sps:$4 sm:$0xff]  }
 0x269   :  { %3017 = vmatprep.subr.bf16.mxu0 %v21060_v23  ;;  %v21063_v23 = vld [vmem:[%s29996_s2 + $0x73c] ss:$20 sps:$4 sm:$0xff]  }
 0x26b   :  { %2366 = vmatpush2.bf16.msra.mxu1 %v21019_v26  ;;  %v21061_v26 = vld [vmem:[%s29996_s2 + $0x738] ss:$20 sps:$4 sm:$0xff]  }
 0x26c   :  { %2367 = vmatprep.subr.bf16.mxu1 %v30013_v2  ;;  %3018 = vmatpush1.bf16.msra.mxu0 %v21058_v24  ;;  %v21088_v24 = vld [vmem:[%s29996_s2 + $0x8c0] ss:$20 sps:$4 sm:$0xff]  }
 0x26d   :  { %3019 = vmatprep.subr.bf16.mxu0 %v21066_v52  ;;  %v21073_v52 = vld [vmem:[%s29996_s2 + $0x940] ss:$20 sps:$4 sm:$0xff]  }
 0x26f   :  { %2368 = vmatpush2.bf16.msra.mxu1 %v21020_v17  ;;  %v21069_v17 = vld [vmem:[%s29996_s2 + $0x714] ss:$20 sps:$4 sm:$0xff]  }
 0x270   :  { %2369 = vmatprep.subr.bf16.mxu1 %v30013_v2 }
 0x273   :  { %2370 = vmatpush2.bf16.msra.mxu1 %v21021_v32  ;;  %v21094_v32 = vld [vmem:[%s29996_s2 + $0x898] ss:$20 sps:$4 sm:$0xff]  }
 0x274   :  { %3066 = vmatprep.subr.bf16.mxu1 %v21027_v38  ;;  %v21096_v38 = vld [vmem:[%s29996_s2 + $0x89c] ss:$20 sps:$4 sm:$0xff]  }
 0x276   :  { %2372 = vmatmul.mubr.bf16.vlgmr.msra.gmra.mxu1 %v24202_v21  ;;  %v21064_v21 = vld [vmem:[%s29996_s2 + $0x708] ss:$20 sps:$4 sm:$0xff]  }
 0x277   :  { %17244 = vmatprep.mubr.msk.bf16.mxu1 %vm867_vm1, %v24221_v41  ;;  %3067 = vmatpush1.bf16.msra.mxu1 %v21025_v16  ;;  %v21045_v41 = vld [vmem:[%s29996_s2 + $0x7b4] ss:$20 sps:$4 sm:$0xff]   ;;  %v21067_v16 = vld [vmem:[%s29996_s2 + $0x710] ss:$20 sps:$4 sm:$0xff]  }
 0x278   :  { %3068 = vmatprep.subr.bf16.mxu1 %v21033_v29  ;;  %3020 = vmatpush1.bf16.msra.mxu0 %v21064_v21  ;;  %v21075_v29 = vld [vmem:[%s29996_s2 + $0x944] ss:$20 sps:$4 sm:$0xff]   ;;  %v21108_v21 = vld [vmem:[%s29996_s2 + $0x84c] ss:$20 sps:$4 sm:$0xff]  }
 0x279   :  { %3023 = vmatprep.subr.bf16.mxu0 %v21072_v60  ;;  %v21106_v60 = vld [vmem:[%s29996_s2 + $0x848] ss:$20 sps:$4 sm:$0xff]  }
 0x27b   :  { %3069 = vmatpush1.bf16.msra.mxu1 %v21031_v47  ;;  %v21100_v47 = vld [vmem:[%s29996_s2 + $0x870] ss:$20 sps:$4 sm:$0xff]  }
 0x27c   :  { %3070 = vmatprep.subr.bf16.mxu1 %v21039_v45  ;;  %3024 = vmatpush2.bf16.msra.mxu0 %v21070_v62  ;;  %v21102_v45 = vld [vmem:[%s29996_s2 + $0x874] ss:$20 sps:$4 sm:$0xff]   ;;  %v21085_v62 = vld [vmem:[%s29996_s2 + $0x8f0] ss:$20 sps:$4 sm:$0xff]  }
 0x27e   :  { %2380 = vmatmul.mubr.bf16.gmra.mxu1 %v24226_v39  ;;  %v21051_v39 = vld [vmem:[%s29996_s2 + $0x78c] ss:$20 sps:$4 sm:$0xff]  }
 0x27f   :  { %17245 = vmatprep.mubr.msk.bf16.mxu1 %vm867_vm1, %v24241_v58  ;;  %3071 = vmatpush1.bf16.msra.mxu1 %v21037_v56  ;;  %v21078_v58 = vld [vmem:[%s29996_s2 + $0x914] ss:$20 sps:$4 sm:$0xff]   ;;  %v21081_v56 = vld [vmem:[%s29996_s2 + $0x91c] ss:$20 sps:$4 sm:$0xff]  }
 0x280   :  { %3072 = vmatprep.subr.bf16.mxu1 %v21045_v41  ;;  %3025 = vmatprep.subr.bf16.mxu0 %v21078_v58  ;;  %v21079_v41 = vld [vmem:[%s29996_s2 + $0x918] ss:$20 sps:$4 sm:$0xff]   ;;  %v21091_v58 = vld [vmem:[%s29996_s2 + $0x8c8] ss:$20 sps:$4 sm:$0xff]  }
 0x281   :  { %3026 = vmatpush2.bf16.msra.mxu0 %v21076_v4  ;;  %v21097_v4 = vld [vmem:[%s29996_s2 + $0x8a0] ss:$20 sps:$4 sm:$0xff]  }
 0x282   :  { %3027 = vmatprep.subr.bf16.mxu0 %v21084_v3  ;;  %v21103_v3 = vld [vmem:[%s29996_s2 + $0x878] ss:$20 sps:$4 sm:$0xff]  }
 0x283   :  { %3073 = vmatpush1.bf16.msra.mxu1 %v21043_v14  ;;  %v21087_v14 = vld [vmem:[%s29996_s2 + $0x8f4] ss:$20 sps:$4 sm:$0xff]  }
 0x284   :  { %3074 = vmatprep.subr.bf16.mxu1 %v21051_v39  ;;  %v21093_v39 = vld [vmem:[%s29996_s2 + $0x8cc] ss:$20 sps:$4 sm:$0xff]  }
 0x285   :  { %3028 = vmatpush2.bf16.msra.mxu0 %v21082_v18  ;;  %v21109_v18 = vld [vmem:[%s29996_s2 + $0x850] ss:$20 sps:$4 sm:$0xff]  }
 0x286   :  { %2388 = vmatmul.mubr.bf16.gmra.mxu1 %v24263_v11  ;;  %v21090_v11 = vld [vmem:[%s29996_s2 + $0x8c4] ss:$20 sps:$4 sm:$0xff]  }
 0x287   :  { %3075 = vmatpush1.bf16.msra.mxu1 %v21049_v63  ;;  %3029 = vmatprep.subr.bf16.mxu0 %v21090_v11  ;;  %v21099_v63 = vld [vmem:[%s29996_s2 + $0x8a4] ss:$20 sps:$4 sm:$0xff]   ;;  %v1550_v11 = vadd.f32 %v24169_v31, %v24041_v0 }
 0x288   :  { %3076 = vmatprep.subr.bf16.mxu1 %v21057_v7  ;;  %v21105_v7 = vld [vmem:[%s29996_s2 + $0x87c] ss:$20 sps:$4 sm:$0xff]  }
 0x289   :  { %3030 = vmatpush2.bf16.msra.mxu0 %v21088_v24 }
 0x28a   :  { %3031 = vmatprep.subr.bf16.mxu0 %v21096_v38 }
 0x28b   :  { %3077 = vmatpush1.bf16.msra.mxu1 %v21055_v8  ;;  %v21111_v8 = vld [vmem:[%s29996_s2 + $0x854] ss:$20 sps:$4 sm:$0xff]  }
 0x28c   :  { %3078 = vmatprep.subr.bf16.mxu1 %v21063_v23  ;;  %v23127_v23 = vld [vmem:[%s29994_s0 + $0x44] ss:$8 sps:$4 sm:$0xff]  }
 0x28d   :  { %3032 = vmatpush2.bf16.msra.mxu0 %v21094_v32 }
 0x28e   :  { %3033 = vmatprep.subr.bf16.mxu0 %v21102_v45 }
 0x28f   :  { %3079 = vmatpush1.bf16.msra.mxu1 %v21061_v26 }
 0x290   :  { %3080 = vmatprep.subr.bf16.mxu1 %v21069_v17  ;;  %v1552_v17 = vadd.f32 %v24173_v33, %v24054_v6 }
 0x291   :  { %3034 = vmatpush2.bf16.msra.mxu0 %v21100_v47  ;;  %v1554_v47 = vadd.f32 %v24175_v40, %v24061_v9 }
 0x292   :  { %3035 = vmatprep.subr.bf16.mxu0 %v21108_v21  ;;  %v1560_v21 = vadd.f32 %v24181_v43, %v24081_v19 }
 0x293   :  { %3081 = vmatpush1.bf16.msra.mxu1 %v21067_v16 }
 0x294   :  { %3084 = vmatprep.subr.bf16.mxu1 %v21075_v29 }
 0x295   :  { %3036 = vmatpush2.bf16.msra.mxu0 %v21106_v60 }
 0x296   :  { %3127 = vmatprep.subr.bf16.mxu0 %v30013_v2 }
 0x297   :  { %3085 = vmatpush2.bf16.msra.mxu1 %v21073_v52 }
 0x298   :  { %3086 = vmatprep.subr.bf16.mxu1 %v21081_v56 }
 0x29b   :  { %3087 = vmatpush2.bf16.msra.mxu1 %v21079_v41 }
 0x29c   :  { %3088 = vmatprep.subr.bf16.mxu1 %v21087_v14 }
 0x29f   :  { %3089 = vmatpush2.bf16.msra.mxu1 %v21085_v62  ;;  %v1564_v62 = vadd.f32 %v24187_v46, %v24097_v30 }
 0x2a0   :  { %3090 = vmatprep.subr.bf16.mxu1 %v21093_v39 }
 0x2a3   :  { %3091 = vmatpush2.bf16.msra.mxu1 %v21091_v58 }
 0x2a4   :  { %3092 = vmatprep.subr.bf16.mxu1 %v21099_v63 }
 0x2a7   :  { %3093 = vmatpush2.bf16.msra.mxu1 %v21097_v4  ;;  %v1570_v4 = vadd.f32 %v24193_v50, %v24115_v20 }
 0x2a8   :  { %3094 = vmatprep.subr.bf16.mxu1 %v21105_v7 }
 0x2ab   :  { %3095 = vmatpush2.bf16.msra.mxu1 %v21103_v3 }
 0x2ac   :  { %3096 = vmatprep.subr.bf16.mxu1 %v21111_v8 }
 0x2af   :  { %3097 = vmatpush2.bf16.msra.mxu1 %v21109_v18 }
 0x2b0   :  { %3242 = vmatprep.subr.bf16.mxu1 %v23127_v23 }
 0x2fa   :  { %v2251_v26 = vpop.f32.mrf.mxu1  ;;  %v2312_v24 = vpop.f32.mrf.mxu0 }
 0x2fb   :  { %v24523_v32 = vadd.f32 %v2251_v26, %v24146_v51  ;;  %v24525_v38 = vadd.f32 %v2312_v24, %v1550_v11 }
 0x2fc   :  { %v2253_v16 = vpop.f32.mrf.mxu1  ;;  %v2314_v29 = vpop.f32.mrf.mxu0 }
 0x2fd   :  { %v24530_v45 = vadd.f32 %v2253_v16, %v24149_v54  ;;  %v24532_v52 = vadd.f32 %v2314_v29, %v1552_v17  ;;  %v1562_v54 = vadd.f32 %v24185_v44, %v24092_v25 }
 0x2fe   :  { %v2255_v0 = vpop.f32.mrf.mxu1  ;;  %v2316_v31 = vpop.f32.mrf.mxu0 }
 0x2ff   :  { %v24535_v56 = vadd.f32 %v2255_v0, %v24152_v57  ;;  %v24537_v6 = vadd.f32 %v2316_v31, %v1554_v47 }
 0x300   :  { %v24539_v51 = vpop.f32.mrf.mxu1  ;;  %v24541_v33 = vpop.f32.mrf.mxu0 }
 0x302   :  { %v2261_v9 = vpop.f32.mrf.mxu1  ;;  %v2322_v40 = vpop.f32.mrf.mxu0 }
 0x303   :  { %v24548_v41 = vadd.f32 %v2261_v9, %v24157_v61  ;;  %v24550_v60 = vadd.f32 %v2322_v40, %v1560_v21 }
 0x304   :  { %v2263_v57 = vpop.f32.mrf.mxu1  ;;  %v2324_v14 = vpop.f32.mrf.mxu0 }
 0x305   :  { %v24555_v39 = vadd.f32 %v2263_v57, %v24159_v1  ;;  %v24557_v58 = vadd.f32 %v2324_v14, %v1562_v54  ;;  %v1572_v1 = vadd.f32 %v24197_v55, %v24126_v42  ;;  %v21112_v42 = vld [vmem:[%s29996_s2 + $0x830] ss:$20 sps:$4 sm:$0xff]  }
 0x306   :  { %v2265_v19 = vpop.f32.mrf.mxu1  ;;  %v2326_v43 = vpop.f32.mrf.mxu0 }
 0x307   :  { %v24560_v63 = vadd.f32 %v2265_v19, %v24161_v5  ;;  %v24562_v25 = vadd.f32 %v2326_v43, %v1564_v62 }
 0x308   :  { %v24564_v61 = vpop.f32.mrf.mxu1  ;;  %v24566_v44 = vpop.f32.mrf.mxu0 }
 0x30a   :  { %v2271_v30 = vpop.f32.mrf.mxu1  ;;  %v2332_v46 = vpop.f32.mrf.mxu0 }
 0x30b   :  { %v24573_v7 = vadd.f32 %v2271_v30, %v24165_v12  ;;  %v24575_v3 = vadd.f32 %v2332_v46, %v1570_v4 }
 0x30c   :  { %v2273_v5 = vpop.f32.mrf.mxu1  ;;  %v2334_v8 = vpop.f32.mrf.mxu0 }
 0x30d   :  { %v24578_v18 = vadd.f32 %v2273_v5, %v24167_v22  ;;  %v24580_v23 = vadd.f32 %v2334_v8, %v1572_v1 }
 0x30e   :  { %v2275_v11 = vpop.f32.mrf.mxu1  ;;  %v2336_v26 = vpop.f32.mrf.mxu0 }
 0x310   :  { %v2276_v20 = vpop.f32.mrf.mxu1  ;;  %v2337_v50 = vpop.f32.mrf.mxu0 }
 0x312   :  { %v2482_v24 = vpop.f32.mrf.mxu0 }
 0x314   :  { %v2484_v17 = vpop.f32.mrf.mxu0 }
 0x316   :  { %v2486_v16 = vpop.f32.mrf.mxu0 }
 0x317   :  { %v24585_v29 = vpack.c.bf16 %v2486_v16, %v2482_v24 }
 0x318   :  { %v2488_v12 = vpop.f32.mrf.mxu0 }
 0x319   :  { %v2510_v55 = vpack.c.bf16 %v2488_v12, %v2484_v17 }
 0x31a   :  { %v2492_v47 = vpop.f32.mrf.mxu0 }
 0x31b   :  { %18 = vsyncpa [#allocation6], 0  ;;  %17422 = vmatprep.mubr.msk.bf16.mxu0 %vm867_vm1, %v2510_v55  ;;  %17425 = vmatprep.mubr.msk.bf16.mxu1 %vm867_vm1, %v2510_v55  ;;  %v21113_v0 = vld [vmem:[%s29996_s2 + $0x808] ss:$20 sps:$4 sm:$0xff]   ;;  %v21114_v57 = vld [vmem:[%s29996_s2 + $0x7e0] ss:$20 sps:$4 sm:$0xff]  }
 0x31c   :  { %v2494_v22 = vpop.f32.mrf.mxu0  ;;  %3038 = vmatmul.mubr.bf16.vlgmr.msra.gmra.mxu0 %v24585_v29  ;;  %3099 = vmatmul.mubr.bf16.vlgmr.msra.gmra.mxu1 %v24585_v29  ;;  %v23128_v31 = vld [vmem:[%s29994_s0 + $0x40] ss:$8 sps:$4 sm:$0xff]   ;;  %v23129_v9 = vld [vmem:[%s29994_s0 + $0x34] ss:$8 sps:$4 sm:$0xff]   ;;  %v23130_v14 = vld [vmem:[%s29994_s0 + $0x30] ss:$8 sps:$4 sm:$0xff]  }
 0x31d   :  { %3128 = vmatpush1.bf16.msra.mxu0 %v21112_v42  ;;  %3243 = vmatpush1.bf16.msra.mxu1 %v23128_v31  ;;  %v23131_v43 = vld [vmem:[%s29994_s0 + $0x24] ss:$8 sps:$4 sm:$0xff]   ;;  %v23132_v1 = vld [vmem:[%s29994_s0 + $0x20] ss:$8 sps:$4 sm:$0xff]   ;;  %v23133_v8 = vld [vmem:[%s29994_s0 + $0x14] ss:$8 sps:$4 sm:$0xff]  }
 0x31e   :  { %v2496_v21 = vpop.f32.mrf.mxu0  ;;  %3129 = vmatprep.subr.bf16.mxu0 %v30013_v2  ;;  %3244 = vmatprep.subr.bf16.mxu1 %v23129_v9  ;;  %v21115_v46 = vld [vmem:[%s29996_s2 + $0x7b8] ss:$20 sps:$4 sm:$0xff]   ;;  %v21116_v26 = vld [vmem:[%s29996_s2 + $0x790] ss:$20 sps:$4 sm:$0xff]   ;;  %v21117_v16 = vld [vmem:[%s29996_s2 + $0x768] ss:$20 sps:$4 sm:$0xff]  }
 0x31f   :  { %v24609_v62 = vpack.c.bf16 %v2496_v21, %v2492_v47  ;;  %v23134_v20 = vld [vmem:[%s29994_s0 + $0x10] ss:$8 sps:$4 sm:$0xff]   ;;  %v23135_v24 = vld [vmem:[%s29994_s0 + $0x4] ss:$8 sps:$4 sm:$0xff]   ;;  %v23136_v42 = vld [vmem:[%s29994_s0] ss:$8 sps:$4 sm:$0xff]  }
 0x320   :  { %v2498_v40 = vpop.f32.mrf.mxu0  ;;  %v21132_v17 = vld [vmem:[%s29996_s2 + $0xa7c] ss:$20 sps:$4 sm:$0xff]   ;;  %v21130_v47 = vld [vmem:[%s29996_s2 + $0xa78] ss:$20 sps:$4 sm:$0xff]   ;;  %vm4150_vm2 = vcmask 1043456   ;;  %vm4146_vm3 = vcmask 326656  }
 0x321   :  { %v24601_v54 = vpack.c.bf16 %v2498_v40, %v2494_v22  ;;  %3130 = vmatpush1.bf16.msra.mxu0 %v21113_v0  ;;  %3245 = vmatpush1.bf16.msra.mxu1 %v23130_v14  ;;  %v21119_v12 = vld [vmem:[%s29995_s1 + $0x50] sm:$0xff]   ;;  %v21120_v0 = vld [vmem:[%s29996_s2 + $0x718] ss:$20 sps:$4 sm:$0xff]   ;;  %vm23161_vm4 = vmmov 0   ;;  %vm4077_vm5 = vcmask 785408   ;;  %vm12978_vm6 = vcmask 130048  }
 0x322   :  { %v2502_v19 = vpop.f32.mrf.mxu0  ;;  %3131 = vmatprep.subr.bf16.mxu0 %v30013_v2  ;;  %3246 = vmatprep.subr.bf16.mxu1 %v23131_v43  ;;  %v21138_v22 = vld [vmem:[%s29996_s2 + $0xa54] ss:$20 sps:$4 sm:$0xff]   ;;  %v21136_v21 = vld [vmem:[%s29996_s2 + $0xa50] ss:$20 sps:$4 sm:$0xff]   ;;  %v21144_v40 = vld [vmem:[%s29996_s2 + $0xa2c] ss:$20 sps:$4 sm:$0xff]  }
 0x323   :  { %17423 = vmatprep.mubr.msk.bf16.mxu0 %vm867_vm1, %v24601_v54  ;;  %17426 = vmatprep.mubr.msk.bf16.mxu1 %vm867_vm1, %v24601_v54  ;;  %v24643_v50 = vpack.c.bf16 %v2502_v19, %v2502_v19  ;;  %v21122_v14 = vld [vmem:[%s29995_s1 + $0x58] sm:$0xff]   ;;  %vm12955_vm7 = vcmask 261120   ;;  %vm16340_vm8 = vcmask 64512   ;;  %s23162_s14 = smov [#allocation5]   ;;  %vm16760_vm9 = vcmask 9216  }
 0x324   :  { %v2504_v4 = vpop.f32.mrf.mxu0  ;;  %3048 = vmatmul.mubr.bf16.gmra.mxu0 %v24609_v62  ;;  %3109 = vmatmul.mubr.bf16.gmra.mxu1 %v24609_v62  ;;  %v21121_v19 = vld [vmem:[%s29996_s2 + $0x948] ss:$20 sps:$4 sm:$0xff]  }
 0x325   :  { %v24621_v30 = vpack.c.bf16 %v2504_v4, %v2504_v4  ;;  %3132 = vmatpush1.bf16.msra.mxu0 %v21114_v57  ;;  %3247 = vmatpush1.bf16.msra.mxu1 %v23132_v1 }
 0x326   :  { %v2506_v5 = vpop.f32.mrf.mxu0  ;;  %3133 = vmatprep.subr.bf16.mxu0 %v30013_v2  ;;  %3248 = vmatprep.subr.bf16.mxu1 %v23133_v8 }
 0x327   :  { %17424 = vmatprep.mubr.msk.bf16.mxu0 %vm867_vm1, %v24621_v30  ;;  %17427 = vmatprep.mubr.msk.bf16.mxu1 %vm867_vm1, %v24621_v30  ;;  %v21123_v5 = vld [vmem:[%s29996_s2 + $0x920] ss:$20 sps:$4 sm:$0xff]  }
 0x328   :  { %v2507_v11 = vpop.f32.mrf.mxu0 }
 0x329   :  { %3134 = vmatpush1.bf16.msra.mxu0 %v21115_v46  ;;  %3249 = vmatpush1.bf16.msra.mxu1 %v23134_v20  ;;  %v21150_v46 = vld [vmem:[%s29996_s2 + $0xa04] ss:$20 sps:$4 sm:$0xff]  }
 0x32a   :  { %3135 = vmatprep.subr.bf16.mxu0 %v30013_v2  ;;  %3250 = vmatprep.subr.bf16.mxu1 %v23135_v24  ;;  %v21126_v24 = vld [vmem:[%s29995_s1 + $0x60] ss:$0 sps:$4 sm:$0xff]  }
 0x32c   :  { %3058 = vmatmul.mubr.bf16.gmra.mxu0 %v24643_v50  ;;  %3119 = vmatmul.mubr.bf16.gmra.mxu1 %v24643_v50 }
 0x32d   :  { %3136 = vmatpush1.bf16.msra.mxu0 %v21116_v26  ;;  %17428 = vmatprep.mubr.msk.bf16.mxu0 %vm867_vm1, %v2510_v55  ;;  %v21118_v55 = vld [vmem:[%s29996_s2 + $0x740] ss:$20 sps:$4 sm:$0xff]   ;;  %v21156_v26 = vld [vmem:[%s29996_s2 + $0x9dc] ss:$20 sps:$4 sm:$0xff]  }
 0x32e   :  { %3137 = vmatprep.subr.bf16.mxu0 %v30013_v2  ;;  %3251 = vmatpush1.bf16.msra.mxu1 %v23136_v42 }
 0x32f   :  { %3268 = vmatprep.mubr.bf16.mxu1 %v30013_v2  ;;  %3793 = vmatprep.subr.bf16.mxu1 %v21132_v17  ;;  %v21124_v17 = vld [vmem:[%s29996_s2 + $0x8f8] ss:$20 sps:$4 sm:$0xff]  }
 0x331   :  { %3138 = vmatpush1.bf16.msra.mxu0 %v21117_v16 }
 0x332   :  { %3139 = vmatprep.subr.bf16.mxu0 %v30013_v2 }
 0x334   :  { %17439 = vmatmul.mubr.msk.bf16.vlgmr.msra.gmra.mxu1 %vm124_vm0, %v21119_v12  ;;  %v21162_v12 = vld [vmem:[%s29996_s2 + $0x9b4] ss:$20 sps:$4 sm:$0xff]  }
 0x335   :  { %3140 = vmatpush1.bf16.msra.mxu0 %v21118_v55  ;;  %3278 = vmatprep.mubr.bf16.mxu1 %v30013_v2 }
 0x336   :  { %v2373_v31 = vpop.f32.mrf.mxu1  ;;  %3141 = vmatprep.subr.bf16.mxu0 %v30013_v2  ;;  %3794 = vmatpush1.bf16.msra.mxu1 %v21130_v47  ;;  %v21125_v47 = vld [vmem:[%s29996_s2 + $0x8d0] ss:$20 sps:$4 sm:$0xff]  }
 0x337   :  { %v24686_v9 = vadd.f32 %v2373_v31, %v24171_v28  ;;  %3795 = vmatprep.subr.bf16.mxu1 %v21138_v22  ;;  %v21142_v28 = vld [vmem:[%s29996_s2 + $0xa28] ss:$20 sps:$4 sm:$0xff]   ;;  %v21168_v31 = vld [vmem:[%s29996_s2 + $0x98c] ss:$20 sps:$4 sm:$0xff]  }
 0x338   :  { %v2375_v57 = vpop.f32.mrf.mxu1 }
 0x339   :  { %3142 = vmatpush1.bf16.msra.mxu0 %v21120_v0 }
 0x33a   :  { %v2376_v43 = vpop.f32.mrf.mxu1  ;;  %3145 = vmatprep.subr.bf16.mxu0 %v30013_v2  ;;  %3796 = vmatpush1.bf16.msra.mxu1 %v21136_v21 }
 0x33b   :  { %v24702_v4 = vadd.f32 %v2376_v43, %v24177_v27  ;;  %3797 = vmatprep.subr.bf16.mxu1 %v21144_v40  ;;  %v21148_v27 = vld [vmem:[%s29996_s2 + $0xa00] ss:$20 sps:$4 sm:$0xff]   ;;  %v21127_v40 = vld [vmem:[%s29996_s2 + $0x8a8] ss:$20 sps:$4 sm:$0xff]   ;;  %v21129_v43 = vld [vmem:[%s29996_s2 + $0x858] ss:$20 sps:$4 sm:$0xff]  }
 0x33c   :  { %v2378_v1 = vpop.f32.mrf.mxu1  ;;  %17440 = vmatmul.mubr.msk.bf16.gmra.mxu1 %vm124_vm0, %v21122_v14 }
 0x33d   :  { %3146 = vmatpush2.bf16.msra.mxu0 %v21121_v19  ;;  %3288 = vmatprep.mubr.bf16.mxu1 %v30013_v2  ;;  %v21128_v19 = vld [vmem:[%s29996_s2 + $0x880] ss:$20 sps:$4 sm:$0xff]   ;;  %v21141_v1 = vld [vmem:[%s29996_s2 + $0xa5c] ss:$20 sps:$4 sm:$0xff]  }
 0x33e   :  { %v2381_v8 = vpop.f32.mrf.mxu1  ;;  %3147 = vmatprep.subr.bf16.mxu0 %v30013_v2  ;;  %3798 = vmatpush1.bf16.msra.mxu1 %v21142_v28  ;;  %v21135_v28 = vld [vmem:[%s29996_s2 + $0xa84] ss:$20 sps:$4 sm:$0xff]  }
 0x33f   :  { %v24717_v11 = vadd.f32 %v2381_v8, %v24183_v36  ;;  %3799 = vmatprep.subr.bf16.mxu1 %v21150_v46  ;;  %v21154_v36 = vld [vmem:[%s29996_s2 + $0x9d8] ss:$20 sps:$4 sm:$0xff]   ;;  %v21133_v46 = vld [vmem:[%s29996_s2 + $0xa80] ss:$20 sps:$4 sm:$0xff]  }
 0x340   :  { %v2383_v20 = vpop.f32.mrf.mxu1  ;;  %v21147_v8 = vld [vmem:[%s29996_s2 + $0xa34] ss:$20 sps:$4 sm:$0xff]  }
 0x341   :  { %3148 = vmatpush2.bf16.msra.mxu0 %v21123_v5  ;;  %v21139_v5 = vld [vmem:[%s29996_s2 + $0xa58] ss:$20 sps:$4 sm:$0xff]   ;;  %v21180_v20 = vld [vmem:[%s29996_s2 + $0xb94] ss:$20 sps:$4 sm:$0xff]  }
 0x342   :  { %v2384_v16 = vpop.f32.mrf.mxu1  ;;  %3149 = vmatprep.subr.bf16.mxu0 %v30013_v2  ;;  %3800 = vmatpush1.bf16.msra.mxu1 %v21148_v27  ;;  %v21174_v27 = vld [vmem:[%s29996_s2 + $0x964] ss:$20 sps:$4 sm:$0xff]  }
 0x343   :  { %v24733_v42 = vadd.f32 %v2384_v16, %v24189_v48  ;;  %3801 = vmatprep.subr.bf16.mxu1 %v21156_v26  ;;  %v21160_v48 = vld [vmem:[%s29996_s2 + $0x9b0] ss:$20 sps:$4 sm:$0xff]   ;;  %v21153_v26 = vld [vmem:[%s29996_s2 + $0xa0c] ss:$20 sps:$4 sm:$0xff]  }
 0x344   :  { %v2386_v55 = vpop.f32.mrf.mxu1  ;;  %17441 = vmatmul.mubr.msk.bf16.gmra.mxu1 %vm124_vm0, %v21126_v24  ;;  %v21151_v24 = vld [vmem:[%s29996_s2 + $0xa08] ss:$20 sps:$4 sm:$0xff]   ;;  %v21157_v16 = vld [vmem:[%s29996_s2 + $0x9e0] ss:$20 sps:$4 sm:$0xff]  }
 0x345   :  { %3150 = vmatpush2.bf16.msra.mxu0 %v21124_v17  ;;  %v21178_v17 = vld [vmem:[%s29996_s2 + $0xb90] ss:$20 sps:$4 sm:$0xff]  }
 0x346   :  { %v2389_v22 = vpop.f32.mrf.mxu1  ;;  %3151 = vmatprep.subr.bf16.mxu0 %v30013_v2  ;;  %3802 = vmatpush1.bf16.msra.mxu1 %v21154_v36  ;;  %v21184_v36 = vld [vmem:[%s29996_s2 + $0xb68] ss:$20 sps:$4 sm:$0xff]   ;;  %v21192_v55 = vld [vmem:[%s29996_s2 + $0xb44] ss:$20 sps:$4 sm:$0xff]  }
 0x347   :  { %v24747_v0 = vadd.f32 %v2389_v22, %v24195_v53  ;;  %3803 = vmatprep.subr.bf16.mxu1 %v21162_v12  ;;  %v21166_v53 = vld [vmem:[%s29996_s2 + $0x988] ss:$20 sps:$4 sm:$0xff]   ;;  %v21190_v22 = vld [vmem:[%s29996_s2 + $0xb40] ss:$20 sps:$4 sm:$0xff]  }
 0x348   :  { %v2391_v21 = vpop.f32.mrf.mxu1  ;;  %v21165_v12 = vld [vmem:[%s29996_s2 + $0x9bc] ss:$20 sps:$4 sm:$0xff]  }
 0x349   :  { %3152 = vmatpush2.bf16.msra.mxu0 %v21125_v47  ;;  %v21163_v47 = vld [vmem:[%s29996_s2 + $0x9b8] ss:$20 sps:$4 sm:$0xff]  }
 0x34a   :  { %v2392_v57 = vpop.f32.mrf.mxu1  ;;  %3153 = vmatprep.subr.bf16.mxu0 %v30013_v2  ;;  %3804 = vmatpush1.bf16.msra.mxu1 %v21160_v48  ;;  %v21171_v48 = vld [vmem:[%s29996_s2 + $0x994] ss:$20 sps:$4 sm:$0xff]   ;;  %v21196_v21 = vld [vmem:[%s29996_s2 + $0xb18] ss:$20 sps:$4 sm:$0xff]  }
 0x34b   :  { %3805 = vmatprep.subr.bf16.mxu1 %v21168_v31  ;;  %v21169_v31 = vld [vmem:[%s29996_s2 + $0x990] ss:$20 sps:$4 sm:$0xff]  }
 0x34c   :  { %v2393_v14 = vpop.f32.mrf.mxu1  ;;  %v21202_v57 = vld [vmem:[%s29996_s2 + $0xaf0] ss:$20 sps:$4 sm:$0xff]  }
 0x34d   :  { %3154 = vmatpush2.bf16.msra.mxu0 %v21127_v40  ;;  %v21177_v40 = vld [vmem:[%s29996_s2 + $0x96c] ss:$20 sps:$4 sm:$0xff]   ;;  %v21175_v14 = vld [vmem:[%s29996_s2 + $0x968] ss:$20 sps:$4 sm:$0xff]  }
 0x34e   :  { %3155 = vmatprep.subr.bf16.mxu0 %v30013_v2  ;;  %3806 = vmatpush1.bf16.msra.mxu1 %v21166_v53  ;;  %v21204_v53 = vld [vmem:[%s29996_s2 + $0xaf4] ss:$20 sps:$4 sm:$0xff]  }
 0x34f   :  { %3807 = vmatprep.subr.bf16.mxu1 %v21174_v27  ;;  %v21214_v27 = vld [vmem:[%s29996_s2 + $0xaa0] ss:$20 sps:$4 sm:$0xff]  }
 0x351   :  { %3156 = vmatpush2.bf16.msra.mxu0 %v21128_v19  ;;  %v21183_v19 = vld [vmem:[%s29996_s2 + $0xb9c] ss:$20 sps:$4 sm:$0xff]  }
 0x352   :  { %3157 = vmatprep.subr.bf16.mxu0 %v30013_v2 }
 0x355   :  { %3158 = vmatpush2.bf16.msra.mxu0 %v21129_v43  ;;  %v21208_v43 = vld [vmem:[%s29996_s2 + $0xac8] ss:$20 sps:$4 sm:$0xff]  }
 0x356   :  { %3854 = vmatprep.subr.bf16.mxu0 %v21135_v28  ;;  %v21210_v28 = vld [vmem:[%s29996_s2 + $0xacc] ss:$20 sps:$4 sm:$0xff]  }
 0x358   :  { %3160 = vmatmul.mubr.bf16.vlgmr.msra.gmra.mxu0 %v24585_v29  ;;  %v21145_v29 = vld [vmem:[%s29996_s2 + $0xa30] ss:$20 sps:$4 sm:$0xff]  }
 0x359   :  { %17429 = vmatprep.mubr.msk.bf16.mxu0 %vm867_vm1, %v24601_v54  ;;  %3855 = vmatpush1.bf16.msra.mxu0 %v21133_v46  ;;  %v21172_v54 = vld [vmem:[%s29996_s2 + $0x960] ss:$20 sps:$4 sm:$0xff]   ;;  %v21181_v46 = vld [vmem:[%s29996_s2 + $0xb98] ss:$20 sps:$4 sm:$0xff]  }
 0x35a   :  { %3856 = vmatprep.subr.bf16.mxu0 %v21141_v1  ;;  %3808 = vmatpush1.bf16.msra.mxu1 %v21172_v54  ;;  %v21189_v1 = vld [vmem:[%s29996_s2 + $0xb74] ss:$20 sps:$4 sm:$0xff]  }
 0x35b   :  { %3811 = vmatprep.subr.bf16.mxu1 %v21180_v20  ;;  %v21193_v54 = vld [vmem:[%s29996_s2 + $0xb48] ss:$20 sps:$4 sm:$0xff]   ;;  %v21199_v20 = vld [vmem:[%s29996_s2 + $0xb20] ss:$20 sps:$4 sm:$0xff]  }
 0x35d   :  { %3857 = vmatpush1.bf16.msra.mxu0 %v21139_v5  ;;  %v21216_v5 = vld [vmem:[%s29996_s2 + $0xaa4] ss:$20 sps:$4 sm:$0xff]  }
 0x35e   :  { %3858 = vmatprep.subr.bf16.mxu0 %v21147_v8  ;;  %3812 = vmatpush2.bf16.msra.mxu1 %v21178_v17  ;;  %v21187_v8 = vld [vmem:[%s29996_s2 + $0xb70] ss:$20 sps:$4 sm:$0xff]   ;;  %v21205_v17 = vld [vmem:[%s29996_s2 + $0xaf8] ss:$20 sps:$4 sm:$0xff]  }
 0x360   :  { %3168 = vmatmul.mubr.bf16.gmra.mxu0 %v24609_v62  ;;  %v21159_v62 = vld [vmem:[%s29996_s2 + $0x9e4] ss:$20 sps:$4 sm:$0xff]  }
 0x361   :  { %17430 = vmatprep.mubr.msk.bf16.mxu0 %vm867_vm1, %v24621_v30  ;;  %3859 = vmatpush1.bf16.msra.mxu0 %v21145_v29  ;;  %v21186_v30 = vld [vmem:[%s29996_s2 + $0xb6c] ss:$20 sps:$4 sm:$0xff]  }
 0x362   :  { %3860 = vmatprep.subr.bf16.mxu0 %v21153_v26  ;;  %3813 = vmatprep.subr.bf16.mxu1 %v21186_v30  ;;  %v21195_v29 = vld [vmem:[%s29996_s2 + $0xb4c] ss:$20 sps:$4 sm:$0xff]   ;;  %v21201_v26 = vld [vmem:[%s29996_s2 + $0xb24] ss:$20 sps:$4 sm:$0xff]  }
 0x363   :  { %3814 = vmatpush2.bf16.msra.mxu1 %v21184_v36  ;;  %v21211_v30 = vld [vmem:[%s29996_s2 + $0xad0] ss:$20 sps:$4 sm:$0xff]   ;;  %v21217_v36 = vld [vmem:[%s29996_s2 + $0xaa8] ss:$20 sps:$4 sm:$0xff]  }
 0x364   :  { %3815 = vmatprep.subr.bf16.mxu1 %v21192_v55 }
 0x365   :  { %3861 = vmatpush1.bf16.msra.mxu0 %v21151_v24  ;;  %v21207_v24 = vld [vmem:[%s29996_s2 + $0xafc] ss:$20 sps:$4 sm:$0xff]  }
 0x366   :  { %3862 = vmatprep.subr.bf16.mxu0 %v21159_v62  ;;  %v21213_v62 = vld [vmem:[%s29996_s2 + $0xad4] ss:$20 sps:$4 sm:$0xff]  }
 0x367   :  { %3816 = vmatpush2.bf16.msra.mxu1 %v21190_v22 }
 0x368   :  { %3176 = vmatmul.mubr.bf16.gmra.mxu0 %v24643_v50  ;;  %v21198_v50 = vld [vmem:[%s29996_s2 + $0xb1c] ss:$20 sps:$4 sm:$0xff]  }
 0x369   :  { %3863 = vmatpush1.bf16.msra.mxu0 %v21157_v16  ;;  %3817 = vmatprep.subr.bf16.mxu1 %v21198_v50  ;;  %v21219_v16 = vld [vmem:[%s29996_s2 + $0xaac] ss:$20 sps:$4 sm:$0xff]  }
 0x36a   :  { %3864 = vmatprep.subr.bf16.mxu0 %v21165_v12 }
 0x36b   :  { %3818 = vmatpush2.bf16.msra.mxu1 %v21196_v21 }
 0x36c   :  { %3819 = vmatprep.subr.bf16.mxu1 %v21204_v53 }
 0x36d   :  { %3865 = vmatpush1.bf16.msra.mxu0 %v21163_v47 }
 0x36e   :  { %3866 = vmatprep.subr.bf16.mxu0 %v21171_v48 }
 0x36f   :  { %3820 = vmatpush2.bf16.msra.mxu1 %v21202_v57 }
 0x370   :  { %3821 = vmatprep.subr.bf16.mxu1 %v21210_v28 }
 0x371   :  { %3867 = vmatpush1.bf16.msra.mxu0 %v21169_v31 }
 0x372   :  { %3868 = vmatprep.subr.bf16.mxu0 %v21177_v40 }
 0x373   :  { %3822 = vmatpush2.bf16.msra.mxu1 %v21208_v43 }
 0x374   :  { %3823 = vmatprep.subr.bf16.mxu1 %v21216_v5 }
 0x375   :  { %3869 = vmatpush1.bf16.msra.mxu0 %v21175_v14 }
 0x376   :  { %3872 = vmatprep.subr.bf16.mxu0 %v21183_v19 }
 0x377   :  { %3824 = vmatpush2.bf16.msra.mxu1 %v21214_v27 }
 0x378   :  { %3915 = vmatprep.subr.bf16.mxu1 %v30013_v2 }
 0x379   :  { %3873 = vmatpush2.bf16.msra.mxu0 %v21181_v46 }
 0x37a   :  { %3874 = vmatprep.subr.bf16.mxu0 %v21189_v1 }
 0x37d   :  { %3875 = vmatpush2.bf16.msra.mxu0 %v21187_v8 }
 0x37e   :  { %3876 = vmatprep.subr.bf16.mxu0 %v21195_v29 }
 0x381   :  { %3877 = vmatpush2.bf16.msra.mxu0 %v21193_v54 }
 0x382   :  { %3878 = vmatprep.subr.bf16.mxu0 %v21201_v26 }
 0x385   :  { %3879 = vmatpush2.bf16.msra.mxu0 %v21199_v20 }
 0x386   :  { %3880 = vmatprep.subr.bf16.mxu0 %v21207_v24 }
 0x389   :  { %3881 = vmatpush2.bf16.msra.mxu0 %v21205_v17 }
 0x38a   :  { %3882 = vmatprep.subr.bf16.mxu0 %v21213_v62 }
 0x38d   :  { %3883 = vmatpush2.bf16.msra.mxu0 %v21211_v30 }
 0x38e   :  { %3884 = vmatprep.subr.bf16.mxu0 %v21219_v16 }
 0x391   :  { %3885 = vmatpush2.bf16.msra.mxu0 %v21217_v36 }
 0x3dc   :  { %v3039_v12 = vpop.f32.mrf.mxu0  ;;  %v3100_v55 = vpop.f32.mrf.mxu1 }
 0x3dd   :  { %v24914_v47 = vadd.f32 %v3039_v12, %v24523_v32  ;;  %v24917_v22 = vadd.f32 %v3100_v55, %v24525_v38 }
 0x3de   :  { %v3041_v48 = vpop.f32.mrf.mxu0  ;;  %v3102_v50 = vpop.f32.mrf.mxu1 }
 0x3df   :  { %v24920_v31 = vadd.f32 %v3041_v48, %v24530_v45  ;;  %v24923_v21 = vadd.f32 %v3102_v50, %v24532_v52  ;;  %v21221_v50 = vld [vmem:[%s29996_s2 + $0xa60] ss:$20 sps:$4 sm:$0xff]  }
 0x3e0   :  { %v3043_v40 = vpop.f32.mrf.mxu0  ;;  %v3104_v57 = vpop.f32.mrf.mxu1 }
 0x3e1   :  { %v24926_v53 = vadd.f32 %v3043_v40, %v24535_v56  ;;  %v24929_v14 = vadd.f32 %v3104_v57, %v24537_v6 }
 0x3e2   :  { %v24931_v32 = vpop.f32.mrf.mxu0  ;;  %v24933_v38 = vpop.f32.mrf.mxu1 }
 0x3e4   :  { %v3049_v19 = vpop.f32.mrf.mxu0  ;;  %v3110_v43 = vpop.f32.mrf.mxu1 }
 0x3e5   :  { %v24936_v45 = vadd.f32 %v3049_v19, %v24548_v41  ;;  %v24939_v52 = vadd.f32 %v3110_v43, %v24550_v60 }
 0x3e6   :  { %v3051_v28 = vpop.f32.mrf.mxu0  ;;  %v3112_v46 = vpop.f32.mrf.mxu1 }
 0x3e7   :  { %v24942_v56 = vadd.f32 %v3051_v28, %v24555_v39  ;;  %v24945_v6 = vadd.f32 %v3112_v46, %v24557_v58  ;;  %v21222_v28 = vld [vmem:[%s29996_s2 + $0xa38] ss:$20 sps:$4 sm:$0xff]  }
 0x3e8   :  { %v3053_v1 = vpop.f32.mrf.mxu0  ;;  %v3114_v5 = vpop.f32.mrf.mxu1 }
 0x3e9   :  { %v24948_v8 = vadd.f32 %v3053_v1, %v24560_v63  ;;  %v24951_v27 = vadd.f32 %v3114_v5, %v24562_v25 }
 0x3ea   :  { %v24953_v41 = vpop.f32.mrf.mxu0  ;;  %v24955_v60 = vpop.f32.mrf.mxu1 }
 0x3ec   :  { %v3059_v29 = vpop.f32.mrf.mxu0  ;;  %v3120_v54 = vpop.f32.mrf.mxu1 }
 0x3ed   :  { %v24958_v39 = vadd.f32 %v3059_v29, %v24573_v7  ;;  %v24961_v58 = vadd.f32 %v3120_v54, %v24575_v3  ;;  %v21220_v3 = vld [vmem:[%s29996_s2 + $0xa88] ss:$20 sps:$4 sm:$0xff]   ;;  %v21223_v29 = vld [vmem:[%s29996_s2 + $0xa10] ss:$20 sps:$4 sm:$0xff]  }
 0x3ee   :  { %v3061_v26 = vpop.f32.mrf.mxu0  ;;  %v3122_v20 = vpop.f32.mrf.mxu1 }
 0x3ef   :  { %v24964_v63 = vadd.f32 %v3061_v26, %v24578_v18  ;;  %v24967_v25 = vadd.f32 %v3122_v20, %v24580_v23 }
 0x3f0   :  { %v3063_v24 = vpop.f32.mrf.mxu0  ;;  %v3124_v17 = vpop.f32.mrf.mxu1 }
 0x3f1   :  { %v21224_v24 = vld [vmem:[%s29996_s2 + $0x9e8] ss:$20 sps:$4 sm:$0xff]   ;;  %v21225_v17 = vld [vmem:[%s29996_s2 + $0x9c0] ss:$20 sps:$4 sm:$0xff]  }
 0x3f2   :  { %v3064_v62 = vpop.f32.mrf.mxu0  ;;  %v3125_v30 = vpop.f32.mrf.mxu1 }
 0x3f3   :  { %v21226_v62 = vld [vmem:[%s29996_s2 + $0x998] ss:$20 sps:$4 sm:$0xff]   ;;  %v21227_v30 = vld [vmem:[%s29996_s2 + $0x970] ss:$20 sps:$4 sm:$0xff]  }
 0x3f4   :  { %v3270_v16 = vpop.f32.mrf.mxu1 }
 0x3f6   :  { %v3272_v36 = vpop.f32.mrf.mxu1 }
 0x3f8   :  { %v3274_v12 = vpop.f32.mrf.mxu1 }
 0x3f9   :  { %v24972_v48 = vpack.c.bf16 %v3274_v12, %v3270_v16 }
 0x3fa   :  { %v3276_v7 = vpop.f32.mrf.mxu1 }
 0x3fb   :  { %v3298_v55 = vpack.c.bf16 %v3276_v7, %v3272_v36  ;;  %v21228_v7 = vld [vmem:[%s29996_s2 + $0xba0] ss:$20 sps:$4 sm:$0xff]  }
 0x3fc   :  { %v3280_v18 = vpop.f32.mrf.mxu1 }
 0x3fd   :  { %17607 = vmatprep.mubr.msk.bf16.mxu1 %vm867_vm1, %v3298_v55  ;;  %17610 = vmatprep.mubr.msk.bf16.mxu0 %vm867_vm1, %v3298_v55 }
 0x3fe   :  { %v3282_v23 = vpop.f32.mrf.mxu1  ;;  %3826 = vmatmul.mubr.bf16.vlgmr.msra.gmra.mxu1 %v24972_v48  ;;  %3887 = vmatmul.mubr.bf16.vlgmr.msra.gmra.mxu0 %v24972_v48 }
 0x3ff   :  { %3916 = vmatpush1.bf16.msra.mxu1 %v21220_v3 }
 0x400   :  { %v3284_v40 = vpop.f32.mrf.mxu1  ;;  %3917 = vmatprep.subr.bf16.mxu1 %v30013_v2 }
 0x401   :  { %v24982_v57 = vpack.c.bf16 %v3284_v40, %v3280_v18 }
 0x402   :  { %v3286_v19 = vpop.f32.mrf.mxu1 }
 0x403   :  { %v24984_v43 = vpack.c.bf16 %v3286_v19, %v3282_v23  ;;  %3918 = vmatpush1.bf16.msra.mxu1 %v21221_v50  ;;  %v21229_v23 = vld [vmem:[%s29996_s2 + $0xb78] ss:$20 sps:$4 sm:$0xff]   ;;  %v21230_v19 = vld [vmem:[%s29996_s2 + $0xb50] ss:$20 sps:$4 sm:$0xff]  }
 0x404   :  { %3919 = vmatprep.subr.bf16.mxu1 %v30013_v2  ;;  %v3290_v46 = vpop.f32.mrf.mxu1 }
 0x405   :  { %17608 = vmatprep.mubr.msk.bf16.mxu1 %vm867_vm1, %v24984_v43  ;;  %17611 = vmatprep.mubr.msk.bf16.mxu0 %vm867_vm1, %v24984_v43  ;;  %v3301_v26 = vpack.c.bf16 %v3290_v46, %v3290_v46 }
 0x406   :  { %3836 = vmatmul.mubr.bf16.gmra.mxu1 %v24982_v57  ;;  %3897 = vmatmul.mubr.bf16.gmra.mxu0 %v24982_v57  ;;  %v3292_v1 = vpop.f32.mrf.mxu1 }
 0x407   :  { %3920 = vmatpush1.bf16.msra.mxu1 %v21222_v28  ;;  %v24996_v5 = vpack.c.bf16 %v3292_v1, %v3292_v1  ;;  %v21231_v1 = vld [vmem:[%s29996_s2 + $0xb28] ss:$20 sps:$4 sm:$0xff]  }
 0x408   :  { %3921 = vmatprep.subr.bf16.mxu1 %v30013_v2  ;;  %v3294_v54 = vpop.f32.mrf.mxu1 }
 0x409   :  { %17609 = vmatprep.mubr.msk.bf16.mxu1 %vm867_vm1, %v24996_v5  ;;  %17612 = vmatprep.mubr.msk.bf16.mxu0 %vm867_vm1, %v24996_v5 }
 0x40a   :  { %v3295_v20 = vpop.f32.mrf.mxu1 }
 0x40b   :  { %3922 = vmatpush1.bf16.msra.mxu1 %v21223_v29  ;;  %v21232_v20 = vld [vmem:[%s29996_s2 + $0xb00] ss:$20 sps:$4 sm:$0xff]  }
 0x40c   :  { %3923 = vmatprep.subr.bf16.mxu1 %v30013_v2 }
 0x40e   :  { %3846 = vmatmul.mubr.bf16.gmra.mxu1 %v3301_v26  ;;  %3907 = vmatmul.mubr.bf16.gmra.mxu0 %v3301_v26 }
 0x40f   :  { %3924 = vmatpush1.bf16.msra.mxu1 %v21224_v24  ;;  %17613 = vmatprep.mubr.msk.bf16.mxu1 %vm867_vm1, %v3298_v55 }
 0x410   :  { %3925 = vmatprep.subr.bf16.mxu1 %v30013_v2  ;;  %4198 = vmatprep.mubr.bf16.mxu0 %v30013_v2 }
 0x413   :  { %3926 = vmatpush1.bf16.msra.mxu1 %v21225_v17  ;;  %v21233_v17 = vld [vmem:[%s29996_s2 + $0xad8] ss:$20 sps:$4 sm:$0xff]  }
 0x414   :  { %3927 = vmatprep.subr.bf16.mxu1 %v30013_v2 }
 0x417   :  { %3928 = vmatpush1.bf16.msra.mxu1 %v21226_v62  ;;  %v3998_v62 = vlaneseq }
 0x418   :  { %v3161_v16 = vpop.f32.mrf.mxu0  ;;  %3929 = vmatprep.subr.bf16.mxu1 %v30013_v2 }
 0x419   :  { %v25025_v36 = vadd.f32 %v3161_v16, %v24686_v9 }
 0x41a   :  { %v3163_v12 = vpop.f32.mrf.mxu0 }
 0x41b   :  { %3930 = vmatpush1.bf16.msra.mxu1 %v21227_v30  ;;  %v25074_v30 = vshrl.u32 %v3998_v62, 7 }
 0x41c   :  { %v3164_v55 = vpop.f32.mrf.mxu0  ;;  %3933 = vmatprep.subr.bf16.mxu1 %v30013_v2 }
 0x41d   :  { %v25032_v3 = vadd.f32 %v3164_v55, %v24702_v4  ;;  %30017 = vst [vmem:[#allocation8_spill] sm:$0xff] %v25074_v30  ;;  %v25077_v16 = vsub.s32 0, %v25074_v30  ;;  %v30010_v12 = vsub.s32 2, %v25074_v30  ;;  %v1556_v55 = vadd.f32 %v24179_v34, %v24074_v15 }
 0x41e   :  { %v3166_v18 = vpop.f32.mrf.mxu0 }
 0x41f   :  { %3934 = vmatpush2.bf16.msra.mxu1 %v21228_v7  ;;  %v1495_v7 = vadd.f32 %v24154_v59, %v24072_v13  ;;  %v2403_v59 = vadd.f32 %v24541_v33, %v1556_v55 }
 0x420   :  { %v3169_v9 = vpop.f32.mrf.mxu0  ;;  %3935 = vmatprep.subr.bf16.mxu1 %v30013_v2 }
 0x421   :  { %v25039_v50 = vadd.f32 %v3169_v9, %v24717_v11  ;;  %v2401_v13 = vadd.f32 %v24539_v51, %v1495_v7 }
 0x422   :  { %v3171_v40 = vpop.f32.mrf.mxu0 }
 0x423   :  { %3936 = vmatpush2.bf16.msra.mxu1 %v21229_v23 }
 0x424   :  { %v3172_v4 = vpop.f32.mrf.mxu0  ;;  %3937 = vmatprep.subr.bf16.mxu1 %v30013_v2 }
 0x425   :  { %v25046_v28 = vadd.f32 %v3172_v4, %v24733_v42 }
 0x426   :  { %v3174_v46 = vpop.f32.mrf.mxu0 }
 0x427   :  { %3938 = vmatpush2.bf16.msra.mxu1 %v21230_v19 }
 0x428   :  { %v3177_v11 = vpop.f32.mrf.mxu0  ;;  %3939 = vmatprep.subr.bf16.mxu1 %v30013_v2 }
 0x429   :  { %v25053_v29 = vadd.f32 %v3177_v11, %v24747_v0  ;;  %v21234_v0 = vld [vmem:[%s29996_s2 + $0xab0] ss:$20 sps:$4 sm:$0xff]   ;;  %v3189_v11 = vadd.f32 %v24931_v32, %v2401_v13 }
 0x42a   :  { %v3179_v54 = vpop.f32.mrf.mxu0 }
 0x42b   :  { %3940 = vmatpush2.bf16.msra.mxu1 %v21231_v1  ;;  %v3191_v54 = vadd.f32 %v24933_v38, %v2403_v59 }
 0x42c   :  { %v3180_v42 = vpop.f32.mrf.mxu0  ;;  %3941 = vmatprep.subr.bf16.mxu1 %v30013_v2 }
 0x42e   :  { %v3181_v24 = vpop.f32.mrf.mxu0 }
 0x42f   :  { %3942 = vmatpush2.bf16.msra.mxu1 %v21232_v20 }
 0x430   :  { %3943 = vmatprep.subr.bf16.mxu1 %v30013_v2 }
 0x433   :  { %3944 = vmatpush2.bf16.msra.mxu1 %v21233_v17 }
 0x434   :  { %3945 = vmatprep.subr.bf16.mxu1 %v30013_v2 }
 0x437   :  { %3946 = vmatpush2.bf16.msra.mxu1 %v21234_v0  ;;  %v1505_v0 = vadd.f32 %v24163_v10, %v24108_v35 }
 0x43a   :  { %3948 = vmatmul.mubr.bf16.vlgmr.msra.gmra.mxu1 %v24972_v48  ;;  %v25083_v48 = vld [vmem:[%s29997_s3] sm:$0x1f] }
 0x43b   :  { %17614 = vmatprep.mubr.msk.bf16.mxu1 %vm867_vm1, %v24984_v43  ;;  %v30009_v43 = vsub.s32 3, %v25074_v30 }
 0x43d   :  { %v25111_v4 = vrot.slane %v25083_v48, %v30009_v43 }
 0x442   :  { %3956 = vmatmul.mubr.bf16.gmra.mxu1 %v24982_v57  ;;  %v25086_v57 = vsub.s32 1, %v25074_v30 }
 0x443   :  { %17615 = vmatprep.mubr.msk.bf16.mxu1 %vm867_vm1, %v24996_v5  ;;  %v25091_v5 = vrot.slane %v25083_v48, %v25077_v16 }
 0x444   :  { %v25106_v19 = vrot.slane %v25083_v48, %v25086_v57 }
 0x44a   :  { %3964 = vmatmul.mubr.bf16.gmra.mxu1 %v3301_v26  ;;  %v25096_v26 = vrot.slane %v25083_v48, %v30010_v12 }
 0x44b   :  { %4612 = vmatprep.mubr.bf16.mxu1 %v30013_v2 }
 0x4be   :  { %v3827_v18 = vpop.f32.mrf.mxu1  ;;  %v3888_v23 = vpop.f32.mrf.mxu0 }
 0x4bf   :  { %v3971_v9 = vadd.f32 %v3827_v18, %v24914_v47  ;;  %v3973_v40 = vadd.f32 %v3888_v23, %v24917_v22 }
 0x4c0   :  { %v3829_v15 = vpop.f32.mrf.mxu1  ;;  %v3890_v34 = vpop.f32.mrf.mxu0 }
 0x4c1   :  { %v4023_v46 = vadd.f32 %v25091_v5, %v3971_v9  ;;  %v4025_v47 = vadd.f32 %v25096_v26, %v3973_v40  ;;  %v3972_v22 = vadd.f32 %v3829_v15, %v24920_v31  ;;  %v3974_v1 = vadd.f32 %v3890_v34, %v24923_v21 }
 0x4c2   :  { %v3831_v20 = vpop.f32.mrf.mxu1  ;;  %v3892_v42 = vpop.f32.mrf.mxu0  ;;  %v1566_v31 = vadd.f32 %v24191_v49, %v24110_v37  ;;  %v2411_v9 = vadd.f32 %v24564_v61, %v1505_v0 }
 0x4c3   :  { %v4048_v24 = vmax.f32 %v4023_v46, 0.0  ;;  %v4050_v51 = vmax.f32 %v4025_v47, 0.0  ;;  %v25122_v33 = vadd.f32 %v25106_v19, %v3972_v22  ;;  %v25125_v17 = vadd.f32 %v25111_v4, %v3974_v1 }
 0x4c4   :  { %v3976_v21 = vadd.f32 %v3831_v20, %v24926_v53  ;;  %v3978_v32 = vadd.f32 %v3892_v42, %v24929_v14  ;;  %v3833_v38 = vpop.f32.mrf.mxu1  ;;  %v3894_v62 = vpop.f32.mrf.mxu0  ;;  %v2413_v40 = vadd.f32 %v24566_v44, %v1566_v31  ;;  %v3199_v61 = vadd.f32 %v24953_v41, %v2411_v9 }
 0x4c5   :  { %v4049_v7 = vmax.f32 %v25122_v33, 0.0  ;;  %v4051_v55 = vmax.f32 %v25125_v17, 0.0  ;;  %v3977_v18 = vadd.f32 %v3833_v38, %v3189_v11  ;;  %v3979_v23 = vadd.f32 %v3894_v62, %v3191_v54  ;;  %v25220_v33 = vld [vmem:[%s29998_s4] sm:$0xff]   ;;  %v25225_v17 = vld [vmem:[%s29998_s4 + $0x8] sm:$0xff]  }
 0x4c6   :  { %v4028_v35 = vadd.f32 %v25091_v5, %v3976_v21  ;;  %v4030_v37 = vadd.f32 %v25096_v26, %v3978_v32  ;;  %v3837_v10 = vpop.f32.mrf.mxu1  ;;  %v3898_v49 = vpop.f32.mrf.mxu0  ;;  %v3201_v44 = vadd.f32 %v24955_v60, %v2413_v40 }
 0x4c7   :  { %v25140_v53 = vadd.f32 %v25106_v19, %v3977_v18  ;;  %v25143_v14 = vadd.f32 %v25111_v4, %v3979_v23  ;;  %v3981_v13 = vadd.f32 %v3837_v10, %v24936_v45  ;;  %v3983_v59 = vadd.f32 %v3898_v49, %v24939_v52 }
 0x4c8   :  { %v4053_v15 = vmax.f32 %v4028_v35, 0.0  ;;  %v4055_v34 = vmax.f32 %v4030_v37, 0.0  ;;  %v3839_v46 = vpop.f32.mrf.mxu1  ;;  %v3900_v47 = vpop.f32.mrf.mxu0 }
 0x4c9   :  { %v4054_v22 = vmax.f32 %v25140_v53, 0.0  ;;  %v4056_v1 = vmax.f32 %v25143_v14, 0.0  ;;  %v4033_v11 = vadd.f32 %v25091_v5, %v3981_v13  ;;  %v4035_v54 = vadd.f32 %v25096_v26, %v3983_v59 }
 0x4ca   :  { %v3982_v45 = vadd.f32 %v3839_v46, %v24942_v56  ;;  %v3984_v52 = vadd.f32 %v3900_v47, %v24945_v6  ;;  %v3841_v20 = vpop.f32.mrf.mxu1  ;;  %v3902_v41 = vpop.f32.mrf.mxu0  ;;  %v25155_v42 = vpack.c.bf16 %v4053_v15, %v4048_v24  ;;  %v25157_v60 = vpack.c.bf16 %v4055_v34, %v4050_v51 }
 0x4cb   :  { %v4058_v0 = vmax.f32 %v4033_v11, 0.0  ;;  %v4060_v31 = vmax.f32 %v4035_v54, 0.0  ;;  %v3986_v21 = vadd.f32 %v3841_v20, %v24948_v8  ;;  %v3988_v32 = vadd.f32 %v3902_v41, %v24951_v27 }
 0x4cc   :  { %v4034_v38 = vadd.f32 %v25106_v19, %v3982_v45  ;;  %v4036_v62 = vadd.f32 %v25111_v4, %v3984_v52  ;;  %v3843_v18 = vpop.f32.mrf.mxu1  ;;  %v3904_v56 = vpop.f32.mrf.mxu0 }
 0x4cd   :  { %v4038_v6 = vadd.f32 %v25091_v5, %v3986_v21  ;;  %v4040_v23 = vadd.f32 %v25096_v26, %v3988_v32  ;;  %v3987_v24 = vadd.f32 %v3843_v18, %v3199_v61  ;;  %v3989_v9 = vadd.f32 %v3904_v56, %v3201_v44 }
 0x4ce   :  { %v4059_v51 = vmax.f32 %v4034_v38, 0.0  ;;  %v4061_v40 = vmax.f32 %v4036_v62, 0.0  ;;  %v3847_v35 = vpop.f32.mrf.mxu1  ;;  %v3908_v37 = vpop.f32.mrf.mxu0 }
 0x4cf   :  { %v4063_v10 = vmax.f32 %v4038_v6, 0.0  ;;  %v4065_v8 = vmax.f32 %v4040_v23, 0.0  ;;  %v4039_v27 = vadd.f32 %v25106_v19, %v3987_v24  ;;  %v4041_v49 = vadd.f32 %v25111_v4, %v3989_v9 }
 0x4d0   :  { %v3991_v13 = vadd.f32 %v3847_v35, %v24958_v39  ;;  %v3993_v59 = vadd.f32 %v3908_v37, %v24961_v58  ;;  %v3849_v15 = vpop.f32.mrf.mxu1  ;;  %v3910_v34 = vpop.f32.mrf.mxu0  ;;  %v25205_v6 = vpack.c.bf16 %v4054_v22, %v4049_v7  ;;  %v25211_v23 = vpack.c.bf16 %v4056_v1, %v4051_v55 }
 0x4d1   :  { %v4064_v46 = vmax.f32 %v4039_v27, 0.0  ;;  %v4066_v47 = vmax.f32 %v4041_v49, 0.0  ;;  %v3992_v61 = vadd.f32 %v3849_v15, %v24964_v63  ;;  %v3994_v44 = vadd.f32 %v3910_v34, %v24967_v25 }
 0x4d2   :  { %v4043_v11 = vadd.f32 %v25091_v5, %v3991_v13  ;;  %v4045_v54 = vadd.f32 %v25096_v26, %v3993_v59  ;;  %v3851_v45 = vpop.f32.mrf.mxu1  ;;  %v3912_v52 = vpop.f32.mrf.mxu0  ;;  %v25173_v20 = vpack.c.bf16 %v4063_v10, %v4058_v0  ;;  %v25175_v41 = vpack.c.bf16 %v4065_v8, %v4060_v31 }
 0x4d3   :  { %v4044_v39 = vadd.f32 %v25106_v19, %v3992_v61  ;;  %v4046_v58 = vadd.f32 %v25111_v4, %v3994_v44  ;;  %v25193_v0 = vpack.c.bf16 %v4064_v46, %v4059_v51  ;;  %v25195_v31 = vpack.c.bf16 %v4066_v47, %v4061_v40 }
 0x4d4   :  { %v4068_v21 = vmax.f32 %v4043_v11, 0.0  ;;  %v4070_v32 = vmax.f32 %v4045_v54, 0.0  ;;  %v3852_v38 = vpop.f32.mrf.mxu1  ;;  %v3913_v63 = vpop.f32.mrf.mxu0  ;;  %v30011_v7 = vmov 0.0   ;;  %v30008_v55 = vsub.s32 4, %v25074_v30 }
 0x4d5   :  { %v4069_v62 = vmax.f32 %v4044_v39, 0.0  ;;  %v4071_v25 = vmax.f32 %v4046_v58, 0.0  ;;  %v21285_v63 = vld [vmem:[%s29999_s5 + $0x708] ss:$20 sps:$4 sm:$0xff]  }
 0x4d6   :  { %v4134_v5 = vpack.c.bf16 %v4068_v21, %v4068_v21  ;;  %v4136_v18 = vpack.c.bf16 %v4070_v32, %v4070_v32  ;;  %v4017_v53 = vrot.slane %v25083_v48, %v30008_v55 }
 0x4d7   :  { %v25179_v26 = vpack.c.bf16 %v4069_v62, %v4069_v62  ;;  %v25181_v56 = vpack.c.bf16 %v4071_v25, %v4071_v25  ;;  %v21287_v62 = vld [vmem:[%s29999_s5 + $0x70c] ss:$20 sps:$4 sm:$0xff]  }
 0x4d8   :  { %v25188_v19 = vsel %vm4150_vm2, %v4134_v5, 0  ;;  %v25191_v4 = vsel %vm4150_vm2, %v4136_v18, 0  ;;  %v21291_v25 = vld [vmem:[%s29999_s5 + $0x6e0] ss:$20 sps:$4 sm:$0xff]   ;;  %v21293_v5 = vld [vmem:[%s29999_s5 + $0x6e4] ss:$20 sps:$4 sm:$0xff]  }
 0x4d9   :  { %17617 = vmatprep.subr.msk.bf16.mxu0 %vm4150_vm2, %v25179_v26  ;;  %17627 = vmatprep.subr.msk.bf16.mxu1 %vm4150_vm2, %v25181_v56  ;;  %v21297_v18 = vld [vmem:[%s29999_s5 + $0x6b8] ss:$20 sps:$4 sm:$0xff]  }
 0x4da   :  { %4177 = vmatpush1.bf16.msra.mxu0 %v25188_v19  ;;  %4591 = vmatpush1.bf16.msra.mxu1 %v25191_v4 }
 0x4db   :  { %4178 = vmatprep.subr.bf16.mxu0 %v25193_v0  ;;  %4592 = vmatprep.subr.bf16.mxu1 %v25195_v31 }
 0x4de   :  { %4179 = vmatpush1.bf16.msra.mxu0 %v25173_v20  ;;  %4593 = vmatpush1.bf16.msra.mxu1 %v25175_v41 }
 0x4df   :  { %4180 = vmatprep.subr.bf16.mxu0 %v25205_v6  ;;  %4594 = vmatprep.subr.bf16.mxu1 %v25211_v23 }
 0x4e2   :  { %4181 = vmatpush1.bf16.msra.mxu0 %v25155_v42  ;;  %4595 = vmatpush1.bf16.msra.mxu1 %v25157_v60 }
 0x4e3   :  { %17619 = vmatprep.subr.msk.bf16.mxu0 %vm4150_vm2, %v25181_v56  ;;  %5889 = vmatprep.subr.bf16.mxu1 %v21287_v62  ;;  %v21269_v62 = vld [vmem:[%s29999_s5 + $0xa7c] ss:$20 sps:$4 sm:$0xff]  }
 0x4e5   :  { %17618 = vmatmul.mubr.msk.bf16.vlgmr.msra.gmra.mxu0 %vm4146_vm3, %v25220_v33  ;;  %17628 = vmatmul.mubr.msk.bf16.vlgmr.msra.gmra.mxu1 %vm4146_vm3, %v25225_v17 }
 0x4e6   :  { %4220 = vmatpush1.bf16.msra.mxu0 %v25191_v4  ;;  %4241 = vmatprep.mubr.bf16.mxu0 %v30013_v2 }
 0x4e7   :  { %4221 = vmatprep.subr.bf16.mxu0 %v25195_v31  ;;  %5890 = vmatpush1.bf16.msra.mxu1 %v21285_v63  ;;  %v21264_v63 = vld [vmem:[%s29999_s5 + $0xaa0] ss:$20 sps:$4 sm:$0xff]  }
 0x4e8   :  { %5891 = vmatprep.subr.bf16.mxu1 %v21293_v5  ;;  %v21272_v5 = vld [vmem:[%s29999_s5 + $0xa54] ss:$20 sps:$4 sm:$0xff]  }
 0x4ea   :  { %4222 = vmatpush1.bf16.msra.mxu0 %v25175_v41 }
 0x4eb   :  { %4223 = vmatprep.subr.bf16.mxu0 %v25211_v23  ;;  %5892 = vmatpush1.bf16.msra.mxu1 %v21291_v25  ;;  %v21267_v25 = vld [vmem:[%s29999_s5 + $0xa78] ss:$20 sps:$4 sm:$0xff]  }
 0x4ee   :  { %4224 = vmatpush1.bf16.msra.mxu0 %v25157_v60 }
 0x4ef   :  { %20516 = vmatprep.subr.bf16.mxu0 %v30011_v7 }
 0x4f1   :  { %17620 = vmatmul.mubr.msk.bf16.vlgmr.msra.gmra.mxu0 %vm4146_vm3, %v25220_v33 }
 0x4f2   :  { %20522 = vmatprep.mubr.msk.bf16.mxu0 %vm23161_vm4, %v30011_v7 }
 0x4fa   :  { %v3949_v14 = vpop.f32.mrf.mxu1 }
 0x4fb   :  { %v3975_v22 = vadd.f32 %v3949_v14, %v25025_v36  ;;  %v21305_v14 = vld [vmem:[%s29999_s5 + $0x694] ss:$20 sps:$4 sm:$0xff]  }
 0x4fc   :  { %v3951_v1 = vpop.f32.mrf.mxu1 }
 0x4fd   :  { %v4027_v24 = vadd.f32 %v4017_v53, %v3975_v22  ;;  %v21239_v22 = vld [vmem:[%s29999_s5 + $0x98c] ss:$20 sps:$4 sm:$0xff]   ;;  %v21237_v1 = vld [vmem:[%s29999_s5 + $0x988] ss:$20 sps:$4 sm:$0xff]  }
 0x4fe   :  { %v3952_v9 = vpop.f32.mrf.mxu1 }
 0x4ff   :  { %v4052_v51 = vmax.f32 %v4027_v24, 0.0  ;;  %v3980_v40 = vadd.f32 %v3952_v9, %v25032_v3  ;;  %v21309_v24 = vld [vmem:[%s29999_s5 + $0x668] ss:$20 sps:$4 sm:$0xff]   ;;  %v21311_v9 = vld [vmem:[%s29999_s5 + $0x66c] ss:$20 sps:$4 sm:$0xff]  }
 0x500   :  { %v3954_v35 = vpop.f32.mrf.mxu1 }
 0x501   :  { %4078 = vst.msk [vmem:[#allocation2 + $0x20] sm:$0xff] %vm4077_vm5, %v4052_v51  ;;  %v4032_v37 = vadd.f32 %v4017_v53, %v3980_v40  ;;  %v21242_v51 = vld [vmem:[%s29999_s5 + $0x964] ss:$20 sps:$4 sm:$0xff]   ;;  %v21240_v40 = vld [vmem:[%s29999_s5 + $0x960] ss:$20 sps:$4 sm:$0xff]  }
 0x502   :  { %v3957_v10 = vpop.f32.mrf.mxu1  ;;  %v21315_v35 = vld [vmem:[%s29999_s5 + $0x640] ss:$20 sps:$4 sm:$0xff]  }
 0x503   :  { %v4057_v8 = vmax.f32 %v4032_v37, 0.0  ;;  %v3985_v27 = vadd.f32 %v3957_v10, %v25039_v50  ;;  %v21317_v37 = vld [vmem:[%s29999_s5 + $0x644] ss:$20 sps:$4 sm:$0xff]   ;;  %v21245_v10 = vld [vmem:[%s29999_s5 + $0x93c] ss:$20 sps:$4 sm:$0xff]  }
 0x504   :  { %v3959_v49 = vpop.f32.mrf.mxu1 }
 0x505   :  { %4083 = vst.msk [vmem:[#allocation2 + $0x48] sm:$0xff] %vm4077_vm5, %v4057_v8  ;;  %v4037_v48 = vadd.f32 %v4017_v53, %v3985_v27  ;;  %v21321_v8 = vld [vmem:[%s29999_s5 + $0x618] ss:$20 sps:$4 sm:$0xff]   ;;  %v21323_v27 = vld [vmem:[%s29999_s5 + $0x61c] ss:$20 sps:$4 sm:$0xff]  }
 0x506   :  { %v3960_v36 = vpop.f32.mrf.mxu1  ;;  %v21248_v49 = vld [vmem:[%s29999_s5 + $0x914] ss:$20 sps:$4 sm:$0xff]  }
 0x507   :  { %v4062_v13 = vmax.f32 %v4037_v48, 0.0  ;;  %v3990_v59 = vadd.f32 %v3960_v36, %v25046_v28  ;;  %v21246_v48 = vld [vmem:[%s29999_s5 + $0x910] ss:$20 sps:$4 sm:$0xff]  }
 0x508   :  { %v3962_v15 = vpop.f32.mrf.mxu1  ;;  %v4103_v32 = vld [vmem:[#allocation2 + $0x20] sm:$0xff] }
 0x509   :  { %4088 = vst.msk [vmem:[#allocation2 + $0x70] sm:$0xff] %vm4077_vm5, %v4062_v13  ;;  %v4042_v3 = vadd.f32 %v4017_v53, %v3990_v59  ;;  %v21327_v36 = vld [vmem:[%s29999_s5 + $0x5f0] ss:$20 sps:$4 sm:$0xff]   ;;  %v21329_v13 = vld [vmem:[%s29999_s5 + $0x5f4] ss:$20 sps:$4 sm:$0xff]  }
 0x50a   :  { %v3965_v34 = vpop.f32.mrf.mxu1  ;;  %v21251_v59 = vld [vmem:[%s29999_s5 + $0x8ec] ss:$20 sps:$4 sm:$0xff]   ;;  %v21249_v15 = vld [vmem:[%s29999_s5 + $0x8e8] ss:$20 sps:$4 sm:$0xff]  }
 0x50b   :  { %v4067_v46 = vmax.f32 %v4042_v3, 0.0  ;;  %v3995_v47 = vadd.f32 %v3965_v34, %v25053_v29  ;;  %v21333_v3 = vld [vmem:[%s29999_s5 + $0x848] ss:$20 sps:$4 sm:$0xff]   ;;  %v21335_v34 = vld [vmem:[%s29999_s5 + $0x84c] ss:$20 sps:$4 sm:$0xff]  }
 0x50c   :  { %v3967_v61 = vpop.f32.mrf.mxu1  ;;  %v4108_v21 = vld [vmem:[#allocation2 + $0x48] sm:$0xff] }
 0x50d   :  { %4093 = vst.msk [vmem:[#allocation2 + $0x98] sm:$0xff] %vm4077_vm5, %v4067_v46  ;;  %v4047_v50 = vadd.f32 %v4017_v53, %v3995_v47  ;;  %v25269_v38 = vpack.c.bf16 %v4108_v21, %v4103_v32  ;;  %v21303_v53 = vld [vmem:[%s29999_s5 + $0x690] ss:$20 sps:$4 sm:$0xff]   ;;  %v21252_v47 = vld [vmem:[%s29999_s5 + $0x8c0] ss:$20 sps:$4 sm:$0xff]  }
 0x50e   :  { %v3968_v44 = vpop.f32.mrf.mxu1  ;;  %v21254_v46 = vld [vmem:[%s29999_s5 + $0x8c4] ss:$20 sps:$4 sm:$0xff]   ;;  %v21339_v61 = vld [vmem:[%s29999_s5 + $0x820] ss:$20 sps:$4 sm:$0xff]   ;;  %v21261_v21 = vld [vmem:[%s29999_s5 + $0xac8] ss:$20 sps:$4 sm:$0xff]  }
 0x50f   :  { %v4072_v11 = vmax.f32 %v4047_v50, 0.0  ;;  %v21341_v50 = vld [vmem:[%s29999_s5 + $0x824] ss:$20 sps:$4 sm:$0xff]   ;;  %v21257_v44 = vld [vmem:[%s29999_s5 + $0x89c] ss:$20 sps:$4 sm:$0xff]  }
 0x510   :  { %v3969_v54 = vpop.f32.mrf.mxu1  ;;  %v4113_v29 = vld [vmem:[#allocation2 + $0x70] sm:$0xff]  ;;  %v21266_v32 = vld [vmem:[%s29999_s5 + $0xaa4] ss:$20 sps:$4 sm:$0xff]  }
 0x511   :  { %4098 = vst.msk [vmem:[#allocation2 + $0xc0] sm:$0xff] %vm4077_vm5, %v4072_v11  ;;  %v21255_v11 = vld [vmem:[%s29999_s5 + $0x898] ss:$20 sps:$4 sm:$0xff]  }
 0x512   :  { %v21345_v54 = vld [vmem:[%s29999_s5 + $0x7f8] ss:$20 sps:$4 sm:$0xff]  }
 0x514   :  { %v4118_v39 = vld [vmem:[#allocation2 + $0x98] sm:$0xff] }
 0x515   :  { %v25265_v58 = vpack.c.bf16 %v4118_v39, %v4113_v29  ;;  %v21258_v39 = vld [vmem:[%s29999_s5 + $0x870] ss:$20 sps:$4 sm:$0xff]   ;;  %v21263_v29 = vld [vmem:[%s29999_s5 + $0xacc] ss:$20 sps:$4 sm:$0xff]  }
 0x518   :  { %v4123_v45 = vld [vmem:[#allocation2 + $0xc0] sm:$0xff] }
 0x519   :  { %v4138_v52 = vpack.c.bf16 %v4123_v45, %v4123_v45  ;;  %v21347_v45 = vld [vmem:[%s29999_s5 + $0x7fc] ss:$20 sps:$4 sm:$0xff]  }
 0x51b   :  { %v25261_v28 = vsel %vm4150_vm2, %v4138_v52, 0  ;;  %v21260_v52 = vld [vmem:[%s29999_s5 + $0x874] ss:$20 sps:$4 sm:$0xff]  }
 0x51c   :  { %20517 = vmatpush3.bf16.msra.mxu0 %v25261_v28 }
 0x51d   :  { %20518 = vmatprep.subr.bf16.mxu0 %v30011_v7 }
 0x520   :  { %20519 = vmatpush3.bf16.msra.mxu0 %v25265_v58 }
 0x521   :  { %20520 = vmatprep.subr.bf16.mxu0 %v30011_v7 }
 0x524   :  { %20521 = vmatpush3.bf16.msra.mxu0 %v25269_v38 }
 0x525   :  { %17625 = vmatprep.subr.msk.bf16.mxu0 %vm4150_vm2, %v25179_v26 }
 0x527   :  { %20523 = vmatmul.mubr.msk.bf16.vlgmr.msra.gmra.mxu0 %vm4146_vm3, %v25220_v33  ;;  %v21299_v33 = vld [vmem:[%s29999_s5 + $0x6bc] ss:$20 sps:$4 sm:$0xff]  }
 0x528   :  { %4548 = vmatpush1.bf16.msra.mxu0 %v25188_v19  ;;  %4569 = vmatprep.mubr.bf16.mxu0 %v30013_v2 }
 0x529   :  { %4549 = vmatprep.subr.bf16.mxu0 %v25193_v0  ;;  %5893 = vmatprep.subr.bf16.mxu1 %v21299_v33  ;;  %v21351_v33 = vld [vmem:[%s29999_s5 + $0x7d0] ss:$20 sps:$4 sm:$0xff]  }
 0x52a   :  { %5894 = vmatpush1.bf16.msra.mxu1 %v21297_v18  ;;  %v21353_v18 = vld [vmem:[%s29999_s5 + $0x7d4] ss:$20 sps:$4 sm:$0xff]  }
 0x52b   :  { %5895 = vmatprep.subr.bf16.mxu1 %v21305_v14  ;;  %v21275_v14 = vld [vmem:[%s29999_s5 + $0xa2c] ss:$20 sps:$4 sm:$0xff]  }
 0x52c   :  { %4550 = vmatpush1.bf16.msra.mxu0 %v25173_v20 }
 0x52d   :  { %4551 = vmatprep.subr.bf16.mxu0 %v25205_v6 }
 0x52e   :  { %5896 = vmatpush1.bf16.msra.mxu1 %v21303_v53  ;;  %v21270_v53 = vld [vmem:[%s29999_s5 + $0xa50] ss:$20 sps:$4 sm:$0xff]  }
 0x52f   :  { %5897 = vmatprep.subr.bf16.mxu1 %v21311_v9  ;;  %v21278_v9 = vld [vmem:[%s29999_s5 + $0xa04] ss:$20 sps:$4 sm:$0xff]  }
 0x530   :  { %4552 = vmatpush1.bf16.msra.mxu0 %v25155_v42 }
 0x531   :  { %20526 = vmatprep.subr.bf16.mxu0 %v30011_v7 }
 0x532   :  { %5898 = vmatpush1.bf16.msra.mxu1 %v21309_v24  ;;  %v21273_v24 = vld [vmem:[%s29999_s5 + $0xa28] ss:$20 sps:$4 sm:$0xff]  }
 0x533   :  { %17626 = vmatmul.mubr.msk.bf16.vlgmr.msra.gmra.mxu0 %vm4146_vm3, %v25225_v17  ;;  %5899 = vmatprep.subr.bf16.mxu1 %v21317_v37  ;;  %v21281_v37 = vld [vmem:[%s29999_s5 + $0x9dc] ss:$20 sps:$4 sm:$0xff]  }
 0x534   :  { %20527 = vmatpush3.bf16.msra.mxu0 %v25261_v28  ;;  %20532 = vmatprep.mubr.msk.bf16.mxu0 %vm23161_vm4, %v30011_v7 }
 0x535   :  { %20528 = vmatprep.subr.bf16.mxu0 %v30011_v7 }
 0x536   :  { %5900 = vmatpush1.bf16.msra.mxu1 %v21315_v35  ;;  %v21276_v35 = vld [vmem:[%s29999_s5 + $0xa00] ss:$20 sps:$4 sm:$0xff]  }
 0x537   :  { %5901 = vmatprep.subr.bf16.mxu1 %v21323_v27  ;;  %v21284_v27 = vld [vmem:[%s29999_s5 + $0x9b4] ss:$20 sps:$4 sm:$0xff]  }
 0x538   :  { %20529 = vmatpush3.bf16.msra.mxu0 %v25265_v58 }
 0x539   :  { %20530 = vmatprep.subr.bf16.mxu0 %v30011_v7 }
 0x53a   :  { %5902 = vmatpush1.bf16.msra.mxu1 %v21321_v8  ;;  %v21279_v8 = vld [vmem:[%s29999_s5 + $0x9d8] ss:$20 sps:$4 sm:$0xff]  }
 0x53b   :  { %5903 = vmatprep.subr.bf16.mxu1 %v21329_v13  ;;  %v21290_v13 = vld [vmem:[%s29999_s5 + $0x714] ss:$20 sps:$4 sm:$0xff]  }
 0x53c   :  { %20531 = vmatpush3.bf16.msra.mxu0 %v25269_v38 }
 0x53d   :  { %5932 = vmatprep.subr.bf16.mxu0 %v21239_v22  ;;  %v21359_v22 = vld [vmem:[%s29999_s5 + $0x7ac] ss:$20 sps:$4 sm:$0xff]  }
 0x53e   :  { %5904 = vmatpush1.bf16.msra.mxu1 %v21327_v36  ;;  %v21282_v36 = vld [vmem:[%s29999_s5 + $0x9b0] ss:$20 sps:$4 sm:$0xff]  }
 0x53f   :  { %20533 = vmatmul.mubr.msk.bf16.vlgmr.msra.gmra.mxu0 %vm4146_vm3, %v25225_v17  ;;  %v21243_v17 = vld [vmem:[%s29999_s5 + $0x938] ss:$20 sps:$4 sm:$0xff]   ;;  %5905 = vmatprep.subr.bf16.mxu1 %v21335_v34 }
 0x540   :  { %5933 = vmatpush1.bf16.msra.mxu0 %v21237_v1  ;;  %v21357_v1 = vld [vmem:[%s29999_s5 + $0x7a8] ss:$20 sps:$4 sm:$0xff]  }
 0x541   :  { %5934 = vmatprep.subr.bf16.mxu0 %v21242_v51  ;;  %v21363_v51 = vld [vmem:[%s29999_s5 + $0x780] ss:$20 sps:$4 sm:$0xff]  }
 0x542   :  { %5906 = vmatpush2.bf16.msra.mxu1 %v21333_v3 }
 0x543   :  { %5907 = vmatprep.subr.bf16.mxu1 %v21341_v50 }
 0x544   :  { %5935 = vmatpush1.bf16.msra.mxu0 %v21240_v40  ;;  %v21365_v40 = vld [vmem:[%s29999_s5 + $0x784] ss:$20 sps:$4 sm:$0xff]  }
 0x545   :  { %5936 = vmatprep.subr.bf16.mxu0 %v21245_v10  ;;  %v21371_v10 = vld [vmem:[%s29999_s5 + $0x75c] ss:$20 sps:$4 sm:$0xff]  }
 0x546   :  { %5908 = vmatpush2.bf16.msra.mxu1 %v21339_v61 }
 0x547   :  { %5909 = vmatprep.subr.bf16.mxu1 %v21347_v45  ;;  %v21288_v45 = vld [vmem:[%s29999_s5 + $0x710] ss:$20 sps:$4 sm:$0xff]  }
 0x548   :  { %5937 = vmatpush1.bf16.msra.mxu0 %v21243_v17  ;;  %v21369_v17 = vld [vmem:[%s29999_s5 + $0x758] ss:$20 sps:$4 sm:$0xff]  }
 0x549   :  { %5938 = vmatprep.subr.bf16.mxu0 %v21248_v49  ;;  %v21377_v49 = vld [vmem:[%s29999_s5 + $0x734] ss:$20 sps:$4 sm:$0xff]  }
 0x54a   :  { %5910 = vmatpush2.bf16.msra.mxu1 %v21345_v54 }
 0x54b   :  { %5911 = vmatprep.subr.bf16.mxu1 %v21353_v18 }
 0x54c   :  { %5939 = vmatpush1.bf16.msra.mxu0 %v21246_v48  ;;  %v21375_v48 = vld [vmem:[%s29999_s5 + $0x730] ss:$20 sps:$4 sm:$0xff]  }
 0x54d   :  { %5940 = vmatprep.subr.bf16.mxu0 %v21251_v59  ;;  %v21383_v59 = vld [vmem:[%s29999_s5 + $0xbbc] ss:$20 sps:$4 sm:$0xff]  }
 0x54e   :  { %5912 = vmatpush2.bf16.msra.mxu1 %v21351_v33  ;;  %v21306_v33 = vld [vmem:[%s29999_s5 + $0x698] ss:$20 sps:$4 sm:$0xff]  }
 0x54f   :  { %5913 = vmatprep.subr.bf16.mxu1 %v21359_v22  ;;  %v21320_v22 = vld [vmem:[%s29999_s5 + $0x64c] ss:$20 sps:$4 sm:$0xff]  }
 0x550   :  { %5941 = vmatpush1.bf16.msra.mxu0 %v21249_v15 }
 0x551   :  { %5942 = vmatprep.subr.bf16.mxu0 %v21254_v46 }
 0x552   :  { %5914 = vmatpush2.bf16.msra.mxu1 %v21357_v1  ;;  %v21318_v1 = vld [vmem:[%s29999_s5 + $0x648] ss:$20 sps:$4 sm:$0xff]  }
 0x553   :  { %5915 = vmatprep.subr.bf16.mxu1 %v21365_v40  ;;  %v21330_v40 = vld [vmem:[%s29999_s5 + $0x5f8] ss:$20 sps:$4 sm:$0xff]  }
 0x554   :  { %5943 = vmatpush1.bf16.msra.mxu0 %v21252_v47 }
 0x555   :  { %5944 = vmatprep.subr.bf16.mxu0 %v21257_v44 }
 0x556   :  { %5916 = vmatpush2.bf16.msra.mxu1 %v21363_v51  ;;  %v21332_v51 = vld [vmem:[%s29999_s5 + $0x5fc] ss:$20 sps:$4 sm:$0xff]  }
 0x557   :  { %5917 = vmatprep.subr.bf16.mxu1 %v21371_v10  ;;  %v21344_v10 = vld [vmem:[%s29999_s5 + $0x82c] ss:$20 sps:$4 sm:$0xff]  }
 0x558   :  { %5945 = vmatpush1.bf16.msra.mxu0 %v21255_v11 }
 0x559   :  { %5946 = vmatprep.subr.bf16.mxu0 %v21260_v52  ;;  %v21296_v52 = vld [vmem:[%s29999_s5 + $0x6ec] ss:$20 sps:$4 sm:$0xff]  }
 0x55a   :  { %5918 = vmatpush2.bf16.msra.mxu1 %v21369_v17  ;;  %v21342_v17 = vld [vmem:[%s29999_s5 + $0x828] ss:$20 sps:$4 sm:$0xff]  }
 0x55b   :  { %5919 = vmatprep.subr.bf16.mxu1 %v21377_v49  ;;  %v21356_v49 = vld [vmem:[%s29999_s5 + $0x7dc] ss:$20 sps:$4 sm:$0xff]  }
 0x55c   :  { %5947 = vmatpush1.bf16.msra.mxu0 %v21258_v39 }
 0x55d   :  { %5948 = vmatprep.subr.bf16.mxu0 %v21263_v29  ;;  %v21294_v29 = vld [vmem:[%s29999_s5 + $0x6e8] ss:$20 sps:$4 sm:$0xff]  }
 0x55e   :  { %5920 = vmatpush2.bf16.msra.mxu1 %v21375_v48  ;;  %v21354_v48 = vld [vmem:[%s29999_s5 + $0x7d8] ss:$20 sps:$4 sm:$0xff]  }
 0x55f   :  { %5979 = vmatprep.subr.bf16.mxu1 %v21383_v59  ;;  %v21368_v59 = vld [vmem:[%s29999_s5 + $0x78c] ss:$20 sps:$4 sm:$0xff]  }
 0x560   :  { %5949 = vmatpush2.bf16.msra.mxu0 %v21261_v21  ;;  %v21302_v21 = vld [vmem:[%s29999_s5 + $0x6c4] ss:$20 sps:$4 sm:$0xff]  }
 0x561   :  { %5950 = vmatprep.subr.bf16.mxu0 %v21266_v32 }
 0x564   :  { %5951 = vmatpush2.bf16.msra.mxu0 %v21264_v63 }
 0x565   :  { %5952 = vmatprep.subr.bf16.mxu0 %v21269_v62  ;;  %v21300_v62 = vld [vmem:[%s29999_s5 + $0x6c0] ss:$20 sps:$4 sm:$0xff]  }
 0x568   :  { %5953 = vmatpush2.bf16.msra.mxu0 %v21267_v25  ;;  %v21308_v25 = vld [vmem:[%s29999_s5 + $0x69c] ss:$20 sps:$4 sm:$0xff]  }
 0x569   :  { %5954 = vmatprep.subr.bf16.mxu0 %v21272_v5 }
 0x56c   :  { %5955 = vmatpush2.bf16.msra.mxu0 %v21270_v53  ;;  %v21314_v53 = vld [vmem:[%s29999_s5 + $0x674] ss:$20 sps:$4 sm:$0xff]  }
 0x56d   :  { %5956 = vmatprep.subr.bf16.mxu0 %v21275_v14  ;;  %v21312_v14 = vld [vmem:[%s29999_s5 + $0x670] ss:$20 sps:$4 sm:$0xff]  }
 0x570   :  { %5957 = vmatpush2.bf16.msra.mxu0 %v21273_v24  ;;  %v21326_v24 = vld [vmem:[%s29999_s5 + $0x624] ss:$20 sps:$4 sm:$0xff]  }
 0x571   :  { %5958 = vmatprep.subr.bf16.mxu0 %v21278_v9  ;;  %v21324_v9 = vld [vmem:[%s29999_s5 + $0x620] ss:$20 sps:$4 sm:$0xff]  }
 0x574   :  { %5959 = vmatpush2.bf16.msra.mxu0 %v21276_v35  ;;  %v21338_v35 = vld [vmem:[%s29999_s5 + $0x854] ss:$20 sps:$4 sm:$0xff]  }
 0x575   :  { %5960 = vmatprep.subr.bf16.mxu0 %v21281_v37  ;;  %v21336_v37 = vld [vmem:[%s29999_s5 + $0x850] ss:$20 sps:$4 sm:$0xff]  }
 0x578   :  { %5961 = vmatpush2.bf16.msra.mxu0 %v21279_v8  ;;  %v21350_v8 = vld [vmem:[%s29999_s5 + $0x804] ss:$20 sps:$4 sm:$0xff]  }
 0x579   :  { %5962 = vmatprep.subr.bf16.mxu0 %v21284_v27  ;;  %v21348_v27 = vld [vmem:[%s29999_s5 + $0x800] ss:$20 sps:$4 sm:$0xff]  }
 0x57c   :  { %5963 = vmatpush2.bf16.msra.mxu0 %v21282_v36  ;;  %v21362_v36 = vld [vmem:[%s29999_s5 + $0x7b4] ss:$20 sps:$4 sm:$0xff]  }
 0x57d   :  { %6018 = vmatprep.subr.bf16.mxu0 %v21290_v13  ;;  %v21360_v13 = vld [vmem:[%s29999_s5 + $0x7b0] ss:$20 sps:$4 sm:$0xff]  }
 0x5a5   :  { %v4614_v15 = vpop.f32.mrf.mxu1  ;;  %v4200_v3 = vpop.f32.mrf.mxu0 }
 0x5a7   :  { %v4616_v34 = vpop.f32.mrf.mxu1  ;;  %v25492_v46 = vpop.f32.mrf.mxu0 }
 0x5a9   :  { %v4618_v47 = vpop.f32.mrf.mxu1  ;;  %v4204_v61 = vpop.f32.mrf.mxu0 }
 0x5aa   :  { %v25494_v50 = vpack.c.bf16 %v4204_v61, %v4200_v3  ;;  %v25496_v44 = vpack.c.bf16 %v4618_v47, %v4614_v15  ;;  %v21366_v15 = vld [vmem:[%s29999_s5 + $0x788] ss:$20 sps:$4 sm:$0xff]   ;;  %v21374_v3 = vld [vmem:[%s29999_s5 + $0x764] ss:$20 sps:$4 sm:$0xff]  }
 0x5ab   :  { %v4620_v11 = vpop.f32.mrf.mxu1  ;;  %v25508_v39 = vpop.f32.mrf.mxu0  ;;  %v21380_v61 = vld [vmem:[%s29999_s5 + $0x73c] ss:$20 sps:$4 sm:$0xff]  }
 0x5ac   :  { %v25498_v54 = vpack.c.bf16 %v4620_v11, %v4616_v34  ;;  %v21372_v34 = vld [vmem:[%s29999_s5 + $0x760] ss:$20 sps:$4 sm:$0xff]  }
 0x5ae   :  { %5964 = vmatprep.mubr.bf16.mxu0 %v25498_v54 }
 0x5af   :  { %5965 = vmatmul.mubr.bf16.vlgmr.msra.gmra.mxu0 %v25496_v44 }
 0x5b0   :  { %6019 = vmatpush1.bf16.msra.mxu0 %v21288_v45  ;;  %v21378_v45 = vld [vmem:[%s29999_s5 + $0x738] ss:$20 sps:$4 sm:$0xff]  }
 0x5b1   :  { %6020 = vmatprep.subr.bf16.mxu0 %v21296_v52  ;;  %v4243_v32 = vpop.f32.mrf.mxu0 }
 0x5b3   :  { %v25516_v63 = vpop.f32.mrf.mxu0 }
 0x5b4   :  { %6021 = vmatpush1.bf16.msra.mxu0 %v21294_v29  ;;  %v21386_v29 = vld [vmem:[%s29999_s5 + $0xbc4] ss:$20 sps:$4 sm:$0xff]  }
 0x5b5   :  { %6022 = vmatprep.subr.bf16.mxu0 %v21302_v21  ;;  %v4247_v5 = vpop.f32.mrf.mxu0 }
 0x5b6   :  { %v25524_v18 = vpack.c.bf16 %v4247_v5, %v4243_v32 }
 0x5b7   :  { %v25595_v47 = vpop.f32.mrf.mxu0 }
 0x5b8   :  { %6023 = vmatpush1.bf16.msra.mxu0 %v21300_v62 }
 0x5b9   :  { %6024 = vmatprep.subr.bf16.mxu0 %v21308_v25 }
 0x5bc   :  { %6025 = vmatpush1.bf16.msra.mxu0 %v21306_v33 }
 0x5bd   :  { %6026 = vmatprep.subr.bf16.mxu0 %v21314_v53 }
 0x5c0   :  { %6027 = vmatpush1.bf16.msra.mxu0 %v21312_v14 }
 0x5c1   :  { %6028 = vmatprep.subr.bf16.mxu0 %v21320_v22  ;;  %v21381_v22 = vld [vmem:[%s29999_s5 + $0xbb8] ss:$20 sps:$4 sm:$0xff]  }
 0x5c4   :  { %6029 = vmatpush1.bf16.msra.mxu0 %v21318_v1  ;;  %v21384_v1 = vld [vmem:[%s29999_s5 + $0xbc0] ss:$20 sps:$4 sm:$0xff]  }
 0x5c5   :  { %6030 = vmatprep.subr.bf16.mxu0 %v21326_v24 }
 0x5c8   :  { %6031 = vmatpush1.bf16.msra.mxu0 %v21324_v9  ;;  %v21389_v9 = vld [vmem:[%s29999_s5 + $0xb94] ss:$20 sps:$4 sm:$0xff]  }
 0x5c9   :  { %6032 = vmatprep.subr.bf16.mxu0 %v21332_v51  ;;  %v21392_v51 = vld [vmem:[%s29999_s5 + $0xb9c] ss:$20 sps:$4 sm:$0xff]  }
 0x5cc   :  { %6033 = vmatpush1.bf16.msra.mxu0 %v21330_v40  ;;  %v21387_v40 = vld [vmem:[%s29999_s5 + $0xb90] ss:$20 sps:$4 sm:$0xff]  }
 0x5cd   :  { %6034 = vmatprep.subr.bf16.mxu0 %v21338_v35  ;;  %v21390_v35 = vld [vmem:[%s29999_s5 + $0xb98] ss:$20 sps:$4 sm:$0xff]  }
 0x5d0   :  { %6035 = vmatpush2.bf16.msra.mxu0 %v21336_v37  ;;  %v21395_v37 = vld [vmem:[%s29999_s5 + $0xb6c] ss:$20 sps:$4 sm:$0xff]  }
 0x5d1   :  { %6036 = vmatprep.subr.bf16.mxu0 %v21344_v10  ;;  %v21398_v10 = vld [vmem:[%s29999_s5 + $0xb74] ss:$20 sps:$4 sm:$0xff]  }
 0x5d4   :  { %6037 = vmatpush2.bf16.msra.mxu0 %v21342_v17 }
 0x5d5   :  { %6038 = vmatprep.subr.bf16.mxu0 %v21350_v8 }
 0x5d8   :  { %6039 = vmatpush2.bf16.msra.mxu0 %v21348_v27  ;;  %v21393_v27 = vld [vmem:[%s29999_s5 + $0xb68] ss:$20 sps:$4 sm:$0xff]  }
 0x5d9   :  { %6040 = vmatprep.subr.bf16.mxu0 %v21356_v49  ;;  %v21396_v49 = vld [vmem:[%s29999_s5 + $0xb70] ss:$20 sps:$4 sm:$0xff]  }
 0x5dc   :  { %6041 = vmatpush2.bf16.msra.mxu0 %v21354_v48  ;;  %v21401_v48 = vld [vmem:[%s29999_s5 + $0xb44] ss:$20 sps:$4 sm:$0xff]  }
 0x5dd   :  { %6042 = vmatprep.subr.bf16.mxu0 %v21362_v36  ;;  %v21404_v36 = vld [vmem:[%s29999_s5 + $0xb4c] ss:$20 sps:$4 sm:$0xff]  }
 0x5e0   :  { %6043 = vmatpush2.bf16.msra.mxu0 %v21360_v13 }
 0x5e1   :  { %6044 = vmatprep.subr.bf16.mxu0 %v21368_v59 }
 0x5e4   :  { %6045 = vmatpush2.bf16.msra.mxu0 %v21366_v15  ;;  %v21399_v15 = vld [vmem:[%s29999_s5 + $0xb40] ss:$20 sps:$4 sm:$0xff]  }
 0x5e5   :  { %6046 = vmatprep.subr.bf16.mxu0 %v21374_v3  ;;  %v21402_v3 = vld [vmem:[%s29999_s5 + $0xb48] ss:$20 sps:$4 sm:$0xff]  }
 0x5e7   :  { %v4286_v11 = vpop.f32.mrf.mxu0 }
 0x5e8   :  { %6047 = vmatpush2.bf16.msra.mxu0 %v21372_v34  ;;  %v21407_v34 = vld [vmem:[%s29999_s5 + $0xb1c] ss:$20 sps:$4 sm:$0xff]  }
 0x5e9   :  { %v20524_v52 = vpop.f32.mrf.mxu0  ;;  %6048 = vmatprep.subr.bf16.mxu0 %v21380_v61  ;;  %v21410_v61 = vld [vmem:[%s29999_s5 + $0xb24] ss:$20 sps:$4 sm:$0xff]  }
 0x5ea   :  { %v21413_v52 = vld [vmem:[%s29999_s5 + $0xaf4] ss:$20 sps:$4 sm:$0xff]  }
 0x5eb   :  { %v4289_v21 = vpop.f32.mrf.mxu0 }
 0x5ec   :  { %v25606_v32 = vpack.c.bf16 %v4289_v21, %v4286_v11  ;;  %6049 = vmatpush2.bf16.msra.mxu0 %v21378_v45  ;;  %v21405_v11 = vld [vmem:[%s29999_s5 + $0xb18] ss:$20 sps:$4 sm:$0xff]   ;;  %v21408_v45 = vld [vmem:[%s29999_s5 + $0xb20] ss:$20 sps:$4 sm:$0xff]   ;;  %v21411_v21 = vld [vmem:[%s29999_s5 + $0xaf0] ss:$20 sps:$4 sm:$0xff]  }
 0x5ed   :  { %v20525_v62 = vpop.f32.mrf.mxu0  ;;  %6108 = vmatprep.subr.bf16.mxu0 %v21386_v29  ;;  %v21416_v29 = vld [vmem:[%s29999_s5 + $0xafc] ss:$20 sps:$4 sm:$0xff]  }
 0x5ee   :  { %v21414_v62 = vld [vmem:[%s29999_s5 + $0xaf8] ss:$20 sps:$4 sm:$0xff]  }
 0x5f3   :  { %v4571_v25 = vpop.f32.mrf.mxu0 }
 0x5f5   :  { %v4573_v5 = vpop.f32.mrf.mxu0 }
 0x5f7   :  { %v4575_v33 = vpop.f32.mrf.mxu0 }
 0x5f8   :  { %v25616_v24 = vpack.c.bf16 %v4575_v33, %v4571_v25  ;;  %v21419_v25 = vld [vmem:[%s29999_s5 + $0x994] ss:$20 sps:$4 sm:$0xff]   ;;  %v21417_v33 = vld [vmem:[%s29999_s5 + $0x990] ss:$20 sps:$4 sm:$0xff]  }
 0x5f9   :  { %v4577_v53 = vpop.f32.mrf.mxu0 }
 0x5fa   :  { %v25608_v14 = vpack.c.bf16 %v4577_v53, %v4573_v5  ;;  %v21420_v5 = vld [vmem:[%s29999_s5 + $0xad8] ss:$20 sps:$4 sm:$0xff]  }
 0x5fc   :  { %5921 = vmatprep.mubr.bf16.mxu1 %v25608_v14  ;;  %6050 = vmatprep.mubr.bf16.mxu0 %v25608_v14 }
 0x5fd   :  { %5922 = vmatmul.mubr.bf16.vlgmr.msra.gmra.mxu1 %v25616_v24  ;;  %6051 = vmatmul.mubr.bf16.vlgmr.msra.gmra.mxu0 %v25616_v24 }
 0x5fe   :  { %5980 = vmatpush1.bf16.msra.mxu1 %v21381_v22  ;;  %6109 = vmatpush1.bf16.msra.mxu0 %v21384_v1  ;;  %v21421_v22 = vld [vmem:[%s29999_s5 + $0x998] ss:$20 sps:$4 sm:$0xff]  }
 0x5ff   :  { %5981 = vmatprep.subr.bf16.mxu1 %v21389_v9  ;;  %6110 = vmatprep.subr.bf16.mxu0 %v21392_v51  ;;  %v4657_v17 = vpop.f32.mrf.mxu0  ;;  %v21424_v1 = vld [vmem:[%s29999_s5 + $0x96c] ss:$20 sps:$4 sm:$0xff]   ;;  %v21425_v9 = vld [vmem:[%s29999_s5 + $0xab0] ss:$20 sps:$4 sm:$0xff]   ;;  %v21422_v51 = vld [vmem:[%s29999_s5 + $0x968] ss:$20 sps:$4 sm:$0xff]  }
 0x600   :  { %6007 = vmatprep.mubr.bf16.mxu1 %v30013_v2  ;;  %6136 = vmatprep.mubr.bf16.mxu0 %v30013_v2 }
 0x601   :  { %v20534_v8 = vpop.f32.mrf.mxu0 }
 0x602   :  { %5982 = vmatpush1.bf16.msra.mxu1 %v21387_v40  ;;  %6111 = vmatpush1.bf16.msra.mxu0 %v21390_v35  ;;  %v21426_v40 = vld [vmem:[%s29999_s5 + $0x970] ss:$20 sps:$4 sm:$0xff]   ;;  %v21435_v8 = vld [vmem:[%s29999_s5 + $0xa60] ss:$20 sps:$4 sm:$0xff]  }
 0x603   :  { %5983 = vmatprep.subr.bf16.mxu1 %v21395_v37  ;;  %6112 = vmatprep.subr.bf16.mxu0 %v21398_v10  ;;  %v4660_v13 = vpop.f32.mrf.mxu0  ;;  %v21429_v35 = vld [vmem:[%s29999_s5 + $0x944] ss:$20 sps:$4 sm:$0xff]   ;;  %v21430_v37 = vld [vmem:[%s29999_s5 + $0xa88] ss:$20 sps:$4 sm:$0xff]   ;;  %v21427_v10 = vld [vmem:[%s29999_s5 + $0x940] ss:$20 sps:$4 sm:$0xff]  }
 0x604   :  { %v25693_v53 = vpack.c.bf16 %v4660_v13, %v4657_v17  ;;  %v21434_v17 = vld [vmem:[%s29999_s5 + $0x91c] ss:$20 sps:$4 sm:$0xff]  }
 0x605   :  { %v20535_v59 = vpop.f32.mrf.mxu0  ;;  %v21437_v13 = vld [vmem:[%s29999_s5 + $0x8f0] ss:$20 sps:$4 sm:$0xff]  }
 0x606   :  { %5984 = vmatpush1.bf16.msra.mxu1 %v21393_v27  ;;  %6113 = vmatpush1.bf16.msra.mxu0 %v21396_v49  ;;  %v21432_v27 = vld [vmem:[%s29999_s5 + $0x918] ss:$20 sps:$4 sm:$0xff]   ;;  %v21436_v49 = vld [vmem:[%s29999_s5 + $0x920] ss:$20 sps:$4 sm:$0xff]  }
 0x607   :  { %5985 = vmatprep.subr.bf16.mxu1 %v21401_v48  ;;  %6114 = vmatprep.subr.bf16.mxu0 %v21404_v36  ;;  %v21439_v48 = vld [vmem:[%s29999_s5 + $0x8f4] ss:$20 sps:$4 sm:$0xff]   ;;  %v21440_v36 = vld [vmem:[%s29999_s5 + $0xa38] ss:$20 sps:$4 sm:$0xff]  }
 0x608   :  { %v21441_v59 = vld [vmem:[%s29999_s5 + $0x8f8] ss:$20 sps:$4 sm:$0xff]  }
 0x60a   :  { %5986 = vmatpush1.bf16.msra.mxu1 %v21399_v15  ;;  %6115 = vmatpush1.bf16.msra.mxu0 %v21402_v3  ;;  %v21444_v15 = vld [vmem:[%s29999_s5 + $0x8cc] ss:$20 sps:$4 sm:$0xff]   ;;  %v21445_v3 = vld [vmem:[%s29999_s5 + $0xa10] ss:$20 sps:$4 sm:$0xff]  }
 0x60b   :  { %5987 = vmatprep.subr.bf16.mxu1 %v21407_v34  ;;  %6116 = vmatprep.subr.bf16.mxu0 %v21410_v61  ;;  %v21442_v34 = vld [vmem:[%s29999_s5 + $0x8c8] ss:$20 sps:$4 sm:$0xff]   ;;  %v21446_v61 = vld [vmem:[%s29999_s5 + $0x8d0] ss:$20 sps:$4 sm:$0xff]  }
 0x60e   :  { %5988 = vmatpush1.bf16.msra.mxu1 %v21405_v11  ;;  %6117 = vmatpush1.bf16.msra.mxu0 %v21408_v45  ;;  %v21449_v11 = vld [vmem:[%s29999_s5 + $0x8a4] ss:$20 sps:$4 sm:$0xff]   ;;  %v21450_v45 = vld [vmem:[%s29999_s5 + $0x9e8] ss:$20 sps:$4 sm:$0xff]  }
 0x60f   :  { %5989 = vmatprep.subr.bf16.mxu1 %v21413_v52  ;;  %6118 = vmatprep.subr.bf16.mxu0 %v21416_v29  ;;  %v21447_v52 = vld [vmem:[%s29999_s5 + $0x8a0] ss:$20 sps:$4 sm:$0xff]   ;;  %v21451_v29 = vld [vmem:[%s29999_s5 + $0x8a8] ss:$20 sps:$4 sm:$0xff]  }
 0x612   :  { %5990 = vmatpush1.bf16.msra.mxu1 %v21411_v21  ;;  %6119 = vmatpush1.bf16.msra.mxu0 %v21414_v62  ;;  %v21454_v21 = vld [vmem:[%s29999_s5 + $0x87c] ss:$20 sps:$4 sm:$0xff]   ;;  %v21455_v62 = vld [vmem:[%s29999_s5 + $0x9c0] ss:$20 sps:$4 sm:$0xff]  }
 0x613   :  { %6061 = vmatprep.subr.bf16.mxu1 %v21419_v25  ;;  %20261 = vmatprep.subr.bf16.mxu0 %v21420_v5  ;;  %v21452_v25 = vld [vmem:[%s29999_s5 + $0x878] ss:$20 sps:$4 sm:$0xff]   ;;  %v21456_v5 = vld [vmem:[%s29999_s5 + $0x880] ss:$20 sps:$4 sm:$0xff]  }
 0x615   :  { %18048 = vmatmul.mubr.msk.bf16.vlgmr.msra.gmra.mxu1 %vm4077_vm5, %v25693_v53  ;;  %18049 = vmatmul.mubr.msk.bf16.vlgmr.msra.gmra.mxu0 %vm4077_vm5, %v25693_v53 }
 0x616   :  { %6062 = vmatpush1.bf16.msra.mxu1 %v21417_v33  ;;  %6093 = vmatprep.mubr.bf16.mxu1 %v25498_v54  ;;  %v21459_v33 = vld [vmem:[%s29999_s5 + $0xad4] ss:$20 sps:$4 sm:$0xff]  }
 0x617   :  { %20262 = vmatpush3.bf16.msra.mxu0 %v21421_v22  ;;  %6220 = vmatprep.mubr.bf16.mxu0 %v25498_v54  ;;  %v21431_v54 = vld [vmem:[%s29999_s5 + $0x948] ss:$20 sps:$4 sm:$0xff]  }
 0x618   :  { %6063 = vmatprep.subr.bf16.mxu1 %v21424_v1  ;;  %20263 = vmatprep.subr.bf16.mxu0 %v21425_v9  ;;  %v21462_v22 = vld [vmem:[%s29999_s5 + $0x11c] ss:$20 sps:$4 sm:$0xff]   ;;  %v21460_v9 = vld [vmem:[%s29999_s5 + $0x118] ss:$20 sps:$4 sm:$0xff]  }
 0x619   :  { %v21457_v1 = vld [vmem:[%s29999_s5 + $0xad0] ss:$20 sps:$4 sm:$0xff]  }
 0x61a   :  { %6064 = vmatpush1.bf16.msra.mxu1 %v21422_v51  ;;  %v21465_v51 = vld [vmem:[%s29999_s5 + $0xaac] ss:$20 sps:$4 sm:$0xff]  }
 0x61b   :  { %20264 = vmatpush3.bf16.msra.mxu0 %v21426_v40  ;;  %6065 = vmatprep.subr.bf16.mxu1 %v21429_v35  ;;  %v21468_v40 = vld [vmem:[%s29999_s5 + $0xf4] ss:$20 sps:$4 sm:$0xff]   ;;  %v25808_v35 = vpack.c.bf16 %v25508_v39, %v25492_v46  ;;  %v21474_v46 = vld [vmem:[%s29999_s5 + $0xcc] ss:$20 sps:$4 sm:$0xff]  }
 0x61c   :  { %20265 = vmatprep.subr.bf16.mxu0 %v21430_v37  ;;  %v21463_v37 = vld [vmem:[%s29999_s5 + $0xaa8] ss:$20 sps:$4 sm:$0xff]   ;;  %v21469_v39 = vld [vmem:[%s29999_s5 + $0xa80] ss:$20 sps:$4 sm:$0xff]  }
 0x61e   :  { %6066 = vmatpush1.bf16.msra.mxu1 %v21427_v10  ;;  %v21466_v10 = vld [vmem:[%s29999_s5 + $0xf0] ss:$20 sps:$4 sm:$0xff]  }
 0x61f   :  { %20266 = vmatpush3.bf16.msra.mxu0 %v21431_v54  ;;  %6067 = vmatprep.subr.bf16.mxu1 %v21434_v17  ;;  %v21471_v54 = vld [vmem:[%s29999_s5 + $0xa84] ss:$20 sps:$4 sm:$0xff]   ;;  %v21472_v17 = vld [vmem:[%s29999_s5 + $0xc8] ss:$20 sps:$4 sm:$0xff]  }
 0x620   :  { %20267 = vmatprep.subr.bf16.mxu0 %v21435_v8  ;;  %v21477_v8 = vld [vmem:[%s29999_s5 + $0xa5c] ss:$20 sps:$4 sm:$0xff]  }
 0x622   :  { %6068 = vmatpush1.bf16.msra.mxu1 %v21432_v27  ;;  %v21480_v27 = vld [vmem:[%s29999_s5 + $0xa4] ss:$20 sps:$4 sm:$0xff]  }
 0x623   :  { %20268 = vmatpush3.bf16.msra.mxu0 %v21436_v49  ;;  %6069 = vmatprep.subr.bf16.mxu1 %v21439_v48  ;;  %v21475_v49 = vld [vmem:[%s29999_s5 + $0xa58] ss:$20 sps:$4 sm:$0xff]   ;;  %v21478_v48 = vld [vmem:[%s29999_s5 + $0xa0] ss:$20 sps:$4 sm:$0xff]  }
 0x624   :  { %20269 = vmatprep.subr.bf16.mxu0 %v21440_v36  ;;  %v21483_v36 = vld [vmem:[%s29999_s5 + $0xa34] ss:$20 sps:$4 sm:$0xff]  }
 0x626   :  { %6070 = vmatpush1.bf16.msra.mxu1 %v21437_v13  ;;  %v21486_v13 = vld [vmem:[%s29999_s5 + $0x7c] ss:$20 sps:$4 sm:$0xff]  }
 0x627   :  { %20270 = vmatpush3.bf16.msra.mxu0 %v21441_v59  ;;  %6071 = vmatprep.subr.bf16.mxu1 %v21444_v15  ;;  %v21481_v59 = vld [vmem:[%s29999_s5 + $0xa30] ss:$20 sps:$4 sm:$0xff]   ;;  %v21484_v15 = vld [vmem:[%s29999_s5 + $0x78] ss:$20 sps:$4 sm:$0xff]  }
 0x628   :  { %20271 = vmatprep.subr.bf16.mxu0 %v21445_v3  ;;  %v21489_v3 = vld [vmem:[%s29999_s5 + $0xa0c] ss:$20 sps:$4 sm:$0xff]  }
 0x62a   :  { %6072 = vmatpush1.bf16.msra.mxu1 %v21442_v34  ;;  %v21492_v34 = vld [vmem:[%s29999_s5 + $0x54] ss:$20 sps:$4 sm:$0xff]  }
 0x62b   :  { %20272 = vmatpush3.bf16.msra.mxu0 %v21446_v61  ;;  %6073 = vmatprep.subr.bf16.mxu1 %v21449_v11  ;;  %v21487_v61 = vld [vmem:[%s29999_s5 + $0xa08] ss:$20 sps:$4 sm:$0xff]   ;;  %v21490_v11 = vld [vmem:[%s29999_s5 + $0x50] ss:$20 sps:$4 sm:$0xff]  }
 0x62c   :  { %20273 = vmatprep.subr.bf16.mxu0 %v21450_v45  ;;  %v21495_v45 = vld [vmem:[%s29999_s5 + $0x9e4] ss:$20 sps:$4 sm:$0xff]  }
 0x62e   :  { %6074 = vmatpush1.bf16.msra.mxu1 %v21447_v52  ;;  %v21498_v52 = vld [vmem:[%s29999_s5 + $0x2c] ss:$20 sps:$4 sm:$0xff]  }
 0x62f   :  { %20274 = vmatpush3.bf16.msra.mxu0 %v21451_v29  ;;  %6075 = vmatprep.subr.bf16.mxu1 %v21454_v21  ;;  %v21493_v29 = vld [vmem:[%s29999_s5 + $0x9e0] ss:$20 sps:$4 sm:$0xff]   ;;  %v21496_v21 = vld [vmem:[%s29999_s5 + $0x28] ss:$20 sps:$4 sm:$0xff]  }
 0x630   :  { %20275 = vmatprep.subr.bf16.mxu0 %v21455_v62  ;;  %v21501_v62 = vld [vmem:[%s29999_s5 + $0x9bc] ss:$20 sps:$4 sm:$0xff]  }
 0x632   :  { %6076 = vmatpush1.bf16.msra.mxu1 %v21452_v25  ;;  %v21504_v25 = vld [vmem:[%s29999_s5 + $0x4] ss:$20 sps:$4 sm:$0xff]  }
 0x633   :  { %20276 = vmatpush3.bf16.msra.mxu0 %v21456_v5  ;;  %6077 = vmatprep.subr.bf16.mxu1 %v21459_v33  ;;  %v21499_v5 = vld [vmem:[%s29999_s5 + $0x9b8] ss:$20 sps:$4 sm:$0xff]   ;;  %v21502_v33 = vld [vmem:[%s29999_s5] ss:$20 sps:$4 sm:$0xff]  }
 0x634   :  { %7261 = vmatprep.subr.bf16.mxu0 %v21462_v22  ;;  %v21505_v22 = vld [vmem:[%s29999_s5 + $0x858] ss:$20 sps:$4 sm:$0xff]  }
 0x636   :  { %6221 = vmatmul.mubr.bf16.vlgmr.msra.gmra.mxu0 %v25496_v44  ;;  %6078 = vmatpush2.bf16.msra.mxu1 %v21457_v1  ;;  %v21508_v1 = vld [vmem:[%s29999_s5 + $0x25c] ss:$20 sps:$4 sm:$0xff]  }
 0x637   :  { %7262 = vmatpush1.bf16.msra.mxu0 %v21460_v9  ;;  %7293 = vmatprep.mubr.bf16.mxu0 %v25808_v35  ;;  %v21509_v9 = vld [vmem:[%s29999_s5 + $0x718] ss:$20 sps:$4 sm:$0xff]  }
 0x638   :  { %6079 = vmatprep.subr.bf16.mxu1 %v21465_v51  ;;  %7263 = vmatprep.subr.bf16.mxu0 %v21468_v40  ;;  %v21506_v51 = vld [vmem:[%s29999_s5 + $0x258] ss:$20 sps:$4 sm:$0xff]   ;;  %v21510_v40 = vld [vmem:[%s29999_s5 + $0x830] ss:$20 sps:$4 sm:$0xff]  }
 0x63a   :  { %6080 = vmatpush2.bf16.msra.mxu1 %v21463_v37  ;;  %v21513_v37 = vld [vmem:[%s29999_s5 + $0x234] ss:$20 sps:$4 sm:$0xff]  }
 0x63b   :  { %7264 = vmatpush1.bf16.msra.mxu0 %v21466_v10  ;;  %6081 = vmatprep.subr.bf16.mxu1 %v21471_v54  ;;  %v21514_v10 = vld [vmem:[%s29999_s5 + $0x6f0] ss:$20 sps:$4 sm:$0xff]  }
 0x63c   :  { %7265 = vmatprep.subr.bf16.mxu0 %v21474_v46  ;;  %v21511_v54 = vld [vmem:[%s29999_s5 + $0x230] ss:$20 sps:$4 sm:$0xff]   ;;  %v21515_v46 = vld [vmem:[%s29999_s5 + $0x808] ss:$20 sps:$4 sm:$0xff]  }
 0x63e   :  { %6082 = vmatpush2.bf16.msra.mxu1 %v21469_v39  ;;  %v21516_v39 = vld [vmem:[%s29999_s5 + $0x208] ss:$20 sps:$4 sm:$0xff]  }
 0x63f   :  { %7266 = vmatpush1.bf16.msra.mxu0 %v21472_v17  ;;  %6083 = vmatprep.subr.bf16.mxu1 %v21477_v8  ;;  %v21520_v17 = vld [vmem:[%s29999_s5 + $0x7e0] ss:$20 sps:$4 sm:$0xff]   ;;  %v21523_v8 = vld [vmem:[%s29999_s5 + $0x1e4] ss:$20 sps:$4 sm:$0xff]  }
 0x640   :  { %7267 = vmatprep.subr.bf16.mxu0 %v21480_v27  ;;  %v21524_v27 = vld [vmem:[%s29999_s5 + $0x6a0] ss:$20 sps:$4 sm:$0xff]  }
 0x642   :  { %6084 = vmatpush2.bf16.msra.mxu1 %v21475_v49  ;;  %v21521_v49 = vld [vmem:[%s29999_s5 + $0x1e0] ss:$20 sps:$4 sm:$0xff]  }
 0x643   :  { %7268 = vmatpush1.bf16.msra.mxu0 %v21478_v48  ;;  %6085 = vmatprep.subr.bf16.mxu1 %v21483_v36  ;;  %v21525_v48 = vld [vmem:[%s29999_s5 + $0x7b8] ss:$20 sps:$4 sm:$0xff]   ;;  %v21528_v36 = vld [vmem:[%s29999_s5 + $0x1bc] ss:$20 sps:$4 sm:$0xff]  }
 0x644   :  { %7269 = vmatprep.subr.bf16.mxu0 %v21486_v13  ;;  %v21529_v13 = vld [vmem:[%s29999_s5 + $0x678] ss:$20 sps:$4 sm:$0xff]  }
 0x646   :  { %6086 = vmatpush2.bf16.msra.mxu1 %v21481_v59  ;;  %v21526_v59 = vld [vmem:[%s29999_s5 + $0x1b8] ss:$20 sps:$4 sm:$0xff]  }
 0x647   :  { %7270 = vmatpush1.bf16.msra.mxu0 %v21484_v15  ;;  %6087 = vmatprep.subr.bf16.mxu1 %v21489_v3  ;;  %v21530_v15 = vld [vmem:[%s29999_s5 + $0x790] ss:$20 sps:$4 sm:$0xff]   ;;  %v21533_v3 = vld [vmem:[%s29999_s5 + $0x194] ss:$20 sps:$4 sm:$0xff]  }
 0x648   :  { %7271 = vmatprep.subr.bf16.mxu0 %v21492_v34  ;;  %v21534_v34 = vld [vmem:[%s29999_s5 + $0x650] ss:$20 sps:$4 sm:$0xff]  }
 0x64a   :  { %6088 = vmatpush2.bf16.msra.mxu1 %v21487_v61  ;;  %v21531_v61 = vld [vmem:[%s29999_s5 + $0x190] ss:$20 sps:$4 sm:$0xff]  }
 0x64b   :  { %7272 = vmatpush1.bf16.msra.mxu0 %v21490_v11  ;;  %6089 = vmatprep.subr.bf16.mxu1 %v21495_v45  ;;  %v21535_v11 = vld [vmem:[%s29999_s5 + $0x768] ss:$20 sps:$4 sm:$0xff]   ;;  %v21538_v45 = vld [vmem:[%s29999_s5 + $0x16c] ss:$20 sps:$4 sm:$0xff]  }
 0x64c   :  { %7273 = vmatprep.subr.bf16.mxu0 %v21498_v52  ;;  %v21539_v52 = vld [vmem:[%s29999_s5 + $0x628] ss:$20 sps:$4 sm:$0xff]  }
 0x64e   :  { %6090 = vmatpush2.bf16.msra.mxu1 %v21493_v29  ;;  %v21536_v29 = vld [vmem:[%s29999_s5 + $0x168] ss:$20 sps:$4 sm:$0xff]  }
 0x64f   :  { %7274 = vmatpush1.bf16.msra.mxu0 %v21496_v21  ;;  %6091 = vmatprep.subr.bf16.mxu1 %v21501_v62  ;;  %v21540_v21 = vld [vmem:[%s29999_s5 + $0x740] ss:$20 sps:$4 sm:$0xff]   ;;  %v21543_v62 = vld [vmem:[%s29999_s5 + $0x144] ss:$20 sps:$4 sm:$0xff]  }
 0x650   :  { %7275 = vmatprep.subr.bf16.mxu0 %v21504_v25  ;;  %v21544_v25 = vld [vmem:[%s29999_s5 + $0x600] ss:$20 sps:$4 sm:$0xff]  }
 0x652   :  { %6092 = vmatpush2.bf16.msra.mxu1 %v21499_v5  ;;  %v21541_v5 = vld [vmem:[%s29999_s5 + $0x140] ss:$20 sps:$4 sm:$0xff]  }
 0x653   :  { %7276 = vmatpush1.bf16.msra.mxu0 %v21502_v33  ;;  %20239 = vmatprep.subr.bf16.mxu1 %v21505_v22  ;;  %v21547_v33 = vld [vmem:[%s29999_s5 + $0x5cc] ss:$20 sps:$4 sm:$0xff]   ;;  %v21548_v22 = vld [vmem:[%s29999_s5 + $0xbc8] ss:$20 sps:$4 sm:$0xff]  }
 0x654   :  { %7277 = vmatprep.subr.bf16.mxu0 %v21508_v1  ;;  %v21545_v1 = vld [vmem:[%s29999_s5 + $0x5c8] ss:$20 sps:$4 sm:$0xff]  }
 0x655   :  { %6094 = vmatmul.mubr.bf16.vlgmr.msra.gmra.mxu1 %v25496_v44  ;;  %v21518_v44 = vld [vmem:[%s29999_s5 + $0x20c] ss:$20 sps:$4 sm:$0xff]  }
 0x656   :  { %20240 = vmatpush3.bf16.msra.mxu1 %v21509_v9  ;;  %6179 = vmatprep.mubr.bf16.mxu1 %v25608_v14  ;;  %v21519_v14 = vld [vmem:[%s29999_s5 + $0x6c8] ss:$20 sps:$4 sm:$0xff]   ;;  %v21551_v9 = vld [vmem:[%s29999_s5 + $0x5a4] ss:$20 sps:$4 sm:$0xff]  }
 0x657   :  { %7278 = vmatpush2.bf16.msra.mxu0 %v21506_v51  ;;  %20241 = vmatprep.subr.bf16.mxu1 %v21510_v40  ;;  %v21552_v51 = vld [vmem:[%s29999_s5 + $0xba0] ss:$20 sps:$4 sm:$0xff]  }
 0x658   :  { %7279 = vmatprep.subr.bf16.mxu0 %v21513_v37  ;;  %v21549_v40 = vld [vmem:[%s29999_s5 + $0x5a0] ss:$20 sps:$4 sm:$0xff]   ;;  %v21555_v37 = vld [vmem:[%s29999_s5 + $0x57c] ss:$20 sps:$4 sm:$0xff]  }
 0x65a   :  { %20242 = vmatpush3.bf16.msra.mxu1 %v21514_v10  ;;  %v21553_v10 = vld [vmem:[%s29999_s5 + $0x578] ss:$20 sps:$4 sm:$0xff]  }
 0x65b   :  { %7280 = vmatpush2.bf16.msra.mxu0 %v21511_v54  ;;  %20243 = vmatprep.subr.bf16.mxu1 %v21515_v46  ;;  %v21559_v54 = vld [vmem:[%s29999_s5 + $0x554] ss:$20 sps:$4 sm:$0xff]   ;;  %v21560_v46 = vld [vmem:[%s29999_s5 + $0xb50] ss:$20 sps:$4 sm:$0xff]  }
 0x65c   :  { %7281 = vmatprep.subr.bf16.mxu0 %v21518_v44  ;;  %v21557_v44 = vld [vmem:[%s29999_s5 + $0x550] ss:$20 sps:$4 sm:$0xff]  }
 0x65e   :  { %20244 = vmatpush3.bf16.msra.mxu1 %v21519_v14  ;;  %v21563_v14 = vld [vmem:[%s29999_s5 + $0x52c] ss:$20 sps:$4 sm:$0xff]  }
 0x65f   :  { %7282 = vmatpush2.bf16.msra.mxu0 %v21516_v39  ;;  %20245 = vmatprep.subr.bf16.mxu1 %v21520_v17  ;;  %v21564_v39 = vld [vmem:[%s29999_s5 + $0xb28] ss:$20 sps:$4 sm:$0xff]  }
 0x660   :  { %7283 = vmatprep.subr.bf16.mxu0 %v21523_v8  ;;  %v21561_v17 = vld [vmem:[%s29999_s5 + $0x528] ss:$20 sps:$4 sm:$0xff]   ;;  %v21567_v8 = vld [vmem:[%s29999_s5 + $0x504] ss:$20 sps:$4 sm:$0xff]  }
 0x662   :  { %20246 = vmatpush3.bf16.msra.mxu1 %v21524_v27  ;;  %v21568_v27 = vld [vmem:[%s29999_s5 + $0xb00] ss:$20 sps:$4 sm:$0xff]  }
 0x663   :  { %7284 = vmatpush2.bf16.msra.mxu0 %v21521_v49  ;;  %20247 = vmatprep.subr.bf16.mxu1 %v21525_v48  ;;  %v21565_v49 = vld [vmem:[%s29999_s5 + $0x500] ss:$20 sps:$4 sm:$0xff]   ;;  %v21571_v48 = vld [vmem:[%s29999_s5 + $0x39c] ss:$20 sps:$4 sm:$0xff]  }
 0x664   :  { %7285 = vmatprep.subr.bf16.mxu0 %v21528_v36  ;;  %v21574_v36 = vld [vmem:[%s29999_s5 + $0x3a4] ss:$20 sps:$4 sm:$0xff]  }
 0x666   :  { %20248 = vmatpush3.bf16.msra.mxu1 %v21529_v13  ;;  %v21569_v13 = vld [vmem:[%s29999_s5 + $0x398] ss:$20 sps:$4 sm:$0xff]  }
 0x667   :  { %7286 = vmatpush2.bf16.msra.mxu0 %v21526_v59  ;;  %20249 = vmatprep.subr.bf16.mxu1 %v21530_v15  ;;  %v21572_v59 = vld [vmem:[%s29999_s5 + $0x3a0] ss:$20 sps:$4 sm:$0xff]  }
 0x668   :  { %7287 = vmatprep.subr.bf16.mxu0 %v21533_v3  ;;  %v21577_v15 = vld [vmem:[%s29999_s5 + $0x374] ss:$20 sps:$4 sm:$0xff]   ;;  %v26070_v3 = vpack.c.bf16 %v25595_v47, %v25516_v63  ;;  %v21578_v63 = vld [vmem:[%s29999_s5 + $0x378] ss:$20 sps:$4 sm:$0xff]  }
 0x669   :  { %v21583_v47 = vld [vmem:[%s29999_s5 + $0x34c] ss:$20 sps:$4 sm:$0xff]  }
 0x66a   :  { %20250 = vmatpush3.bf16.msra.mxu1 %v21534_v34  ;;  %v21580_v34 = vld [vmem:[%s29999_s5 + $0x37c] ss:$20 sps:$4 sm:$0xff]  }
 0x66b   :  { %7288 = vmatpush2.bf16.msra.mxu0 %v21531_v61  ;;  %20251 = vmatprep.subr.bf16.mxu1 %v21535_v11  ;;  %v21575_v61 = vld [vmem:[%s29999_s5 + $0x370] ss:$20 sps:$4 sm:$0xff]   ;;  %v21581_v11 = vld [vmem:[%s29999_s5 + $0x348] ss:$20 sps:$4 sm:$0xff]  }
 0x66c   :  { %7289 = vmatprep.subr.bf16.mxu0 %v21538_v45  ;;  %v21584_v45 = vld [vmem:[%s29999_s5 + $0x350] ss:$20 sps:$4 sm:$0xff]  }
 0x66e   :  { %20252 = vmatpush3.bf16.msra.mxu1 %v21539_v52  ;;  %v21589_v52 = vld [vmem:[%s29999_s5 + $0x324] ss:$20 sps:$4 sm:$0xff]  }
 0x66f   :  { %7290 = vmatpush2.bf16.msra.mxu0 %v21536_v29  ;;  %20253 = vmatprep.subr.bf16.mxu1 %v21540_v21  ;;  %v21592_v29 = vld [vmem:[%s29999_s5 + $0x32c] ss:$20 sps:$4 sm:$0xff]  }
 0x670   :  { %7291 = vmatprep.subr.bf16.mxu0 %v21543_v62  ;;  %v21587_v21 = vld [vmem:[%s29999_s5 + $0x320] ss:$20 sps:$4 sm:$0xff]   ;;  %v21590_v62 = vld [vmem:[%s29999_s5 + $0x328] ss:$20 sps:$4 sm:$0xff]  }
 0x672   :  { %20254 = vmatpush3.bf16.msra.mxu1 %v21544_v25  ;;  %v21595_v25 = vld [vmem:[%s29999_s5 + $0x2fc] ss:$20 sps:$4 sm:$0xff]  }
 0x673   :  { %7292 = vmatpush2.bf16.msra.mxu0 %v21541_v5  ;;  %20536 = vmatprep.subr.bf16.mxu1 %v30011_v7  ;;  %v21598_v5 = vld [vmem:[%s29999_s5 + $0x304] ss:$20 sps:$4 sm:$0xff]  }
 0x674   :  { %7351 = vmatprep.subr.bf16.mxu0 %v21547_v33  ;;  %v21593_v33 = vld [vmem:[%s29999_s5 + $0x2f8] ss:$20 sps:$4 sm:$0xff]  }
 0x675   :  { %6180 = vmatmul.mubr.bf16.vlgmr.msra.gmra.mxu1 %v25616_v24  ;;  %v21556_v24 = vld [vmem:[%s29999_s5 + $0xb78] ss:$20 sps:$4 sm:$0xff]  }
 0x676   :  { %7294 = vmatmul.mubr.bf16.vlgmr.msra.gmra.mxu0 %v25494_v50  ;;  %20537 = vmatpush3.bf16.msra.mxu1 %v21548_v22  ;;  %v21596_v22 = vld [vmem:[%s29999_s5 + $0x300] ss:$20 sps:$4 sm:$0xff]  }
 0x677   :  { %7352 = vmatpush1.bf16.msra.mxu0 %v21545_v1  ;;  %20538 = vmatprep.subr.bf16.mxu1 %v30011_v7  ;;  %v21601_v1 = vld [vmem:[%s29999_s5 + $0x2d4] ss:$20 sps:$4 sm:$0xff]  }
 0x678   :  { %7353 = vmatprep.subr.bf16.mxu0 %v21551_v9  ;;  %20548 = vmatprep.mubr.msk.bf16.mxu1 %vm23161_vm4, %v30011_v7  ;;  %v21604_v9 = vld [vmem:[%s29999_s5 + $0x2dc] ss:$20 sps:$4 sm:$0xff]  }
 0x679   :  { %7379 = vmatprep.mubr.bf16.mxu0 %v30013_v2 }
 0x67a   :  { %20539 = vmatpush3.bf16.msra.mxu1 %v21552_v51  ;;  %v21599_v51 = vld [vmem:[%s29999_s5 + $0x2d0] ss:$20 sps:$4 sm:$0xff]  }
 0x67b   :  { %7354 = vmatpush1.bf16.msra.mxu0 %v21549_v40  ;;  %20540 = vmatprep.subr.bf16.mxu1 %v30011_v7  ;;  %v21602_v40 = vld [vmem:[%s29999_s5 + $0x2d8] ss:$20 sps:$4 sm:$0xff]  }
 0x67c   :  { %7355 = vmatprep.subr.bf16.mxu0 %v21555_v37  ;;  %v21607_v37 = vld [vmem:[%s29999_s5 + $0x2ac] ss:$20 sps:$4 sm:$0xff]  }
 0x67e   :  { %20541 = vmatpush3.bf16.msra.mxu1 %v21556_v24  ;;  %v21610_v24 = vld [vmem:[%s29999_s5 + $0x2b4] ss:$20 sps:$4 sm:$0xff]  }
 0x67f   :  { %7356 = vmatpush1.bf16.msra.mxu0 %v21553_v10  ;;  %20542 = vmatprep.subr.bf16.mxu1 %v30011_v7  ;;  %v21605_v10 = vld [vmem:[%s29999_s5 + $0x2a8] ss:$20 sps:$4 sm:$0xff]  }
 0x680   :  { %7357 = vmatprep.subr.bf16.mxu0 %v21559_v54  ;;  %v21608_v54 = vld [vmem:[%s29999_s5 + $0x2b0] ss:$20 sps:$4 sm:$0xff]  }
 0x682   :  { %20543 = vmatpush3.bf16.msra.mxu1 %v21560_v46  ;;  %v21613_v46 = vld [vmem:[%s29999_s5 + $0x284] ss:$20 sps:$4 sm:$0xff]  }
 0x683   :  { %7358 = vmatpush1.bf16.msra.mxu0 %v21557_v44  ;;  %20544 = vmatprep.subr.bf16.mxu1 %v30011_v7  ;;  %v21616_v44 = vld [vmem:[%s29999_s5 + $0x28c] ss:$20 sps:$4 sm:$0xff]  }
 0x684   :  { %7359 = vmatprep.subr.bf16.mxu0 %v21563_v14  ;;  %v21611_v14 = vld [vmem:[%s29999_s5 + $0x280] ss:$20 sps:$4 sm:$0xff]  }
 0x686   :  { %20545 = vmatpush3.bf16.msra.mxu1 %v21564_v39  ;;  %v21614_v39 = vld [vmem:[%s29999_s5 + $0x288] ss:$20 sps:$4 sm:$0xff]  }
 0x687   :  { %7360 = vmatpush1.bf16.msra.mxu0 %v21561_v17  ;;  %20546 = vmatprep.subr.bf16.mxu1 %v30011_v7  ;;  %v21619_v17 = vld [vmem:[%s29999_s5 + $0x4dc] ss:$20 sps:$4 sm:$0xff]  }
 0x688   :  { %7361 = vmatprep.subr.bf16.mxu0 %v21567_v8  ;;  %v21622_v8 = vld [vmem:[%s29999_s5 + $0x4e4] ss:$20 sps:$4 sm:$0xff]  }
 0x68a   :  { %20547 = vmatpush3.bf16.msra.mxu1 %v21568_v27  ;;  %v21617_v27 = vld [vmem:[%s29999_s5 + $0x4d8] ss:$20 sps:$4 sm:$0xff]  }
 0x68b   :  { %7362 = vmatpush1.bf16.msra.mxu0 %v21565_v49  ;;  %7304 = vmatprep.subr.bf16.mxu1 %v21571_v48  ;;  %v21620_v49 = vld [vmem:[%s29999_s5 + $0x4e0] ss:$20 sps:$4 sm:$0xff]  }
 0x68c   :  { %7433 = vmatprep.subr.bf16.mxu0 %v21574_v36  ;;  %v21625_v48 = vld [vmem:[%s29999_s5 + $0x4b4] ss:$20 sps:$4 sm:$0xff]   ;;  %v21628_v36 = vld [vmem:[%s29999_s5 + $0x4bc] ss:$20 sps:$4 sm:$0xff]  }
 0x68d   :  { %20549 = vmatmul.mubr.msk.bf16.vlgmr.msra.gmra.mxu1 %vm4077_vm5, %v25693_v53  ;;  %v21586_v53 = vld [vmem:[%s29999_s5 + $0x354] ss:$20 sps:$4 sm:$0xff]  }
 0x68e   :  { %18241 = vmatmul.mubr.msk.bf16.vlgmr.msra.gmra.mxu0 %vm4077_vm5, %v25606_v32  ;;  %7305 = vmatpush1.bf16.msra.mxu1 %v21569_v13  ;;  %v21623_v13 = vld [vmem:[%s29999_s5 + $0x4b0] ss:$20 sps:$4 sm:$0xff]  }
 0x68f   :  { %7336 = vmatprep.mubr.bf16.mxu1 %v26070_v3  ;;  %7434 = vmatpush1.bf16.msra.mxu0 %v21572_v59  ;;  %v21626_v59 = vld [vmem:[%s29999_s5 + $0x4b8] ss:$20 sps:$4 sm:$0xff]  }
 0x690   :  { %7465 = vmatprep.mubr.bf16.mxu0 %v26070_v3  ;;  %7306 = vmatprep.subr.bf16.mxu1 %v21577_v15  ;;  %v21631_v15 = vld [vmem:[%s29999_s5 + $0x48c] ss:$20 sps:$4 sm:$0xff]  }
 0x691   :  { %7435 = vmatprep.subr.bf16.mxu0 %v21580_v34  ;;  %v21634_v34 = vld [vmem:[%s29999_s5 + $0x494] ss:$20 sps:$4 sm:$0xff]  }
 0x692   :  { %7307 = vmatpush1.bf16.msra.mxu1 %v21575_v61  ;;  %v21629_v61 = vld [vmem:[%s29999_s5 + $0x488] ss:$20 sps:$4 sm:$0xff]  }
 0x693   :  { %7436 = vmatpush1.bf16.msra.mxu0 %v21578_v63  ;;  %7308 = vmatprep.subr.bf16.mxu1 %v21583_v47  ;;  %v21632_v63 = vld [vmem:[%s29999_s5 + $0x490] ss:$20 sps:$4 sm:$0xff]  }
 0x694   :  { %7437 = vmatprep.subr.bf16.mxu0 %v21586_v53  ;;  %v21637_v47 = vld [vmem:[%s29999_s5 + $0x464] ss:$20 sps:$4 sm:$0xff]   ;;  %v21640_v53 = vld [vmem:[%s29999_s5 + $0x46c] ss:$20 sps:$4 sm:$0xff]  }
 0x696   :  { %7309 = vmatpush1.bf16.msra.mxu1 %v21581_v11  ;;  %v21635_v11 = vld [vmem:[%s29999_s5 + $0x460] ss:$20 sps:$4 sm:$0xff]  }
 0x697   :  { %7438 = vmatpush1.bf16.msra.mxu0 %v21584_v45  ;;  %7310 = vmatprep.subr.bf16.mxu1 %v21589_v52  ;;  %v21638_v45 = vld [vmem:[%s29999_s5 + $0x468] ss:$20 sps:$4 sm:$0xff]  }
 0x698   :  { %7439 = vmatprep.subr.bf16.mxu0 %v21592_v29  ;;  %v21643_v52 = vld [vmem:[%s29999_s5 + $0x43c] ss:$20 sps:$4 sm:$0xff]   ;;  %v21646_v29 = vld [vmem:[%s29999_s5 + $0x444] ss:$20 sps:$4 sm:$0xff]  }
 0x69a   :  { %7311 = vmatpush1.bf16.msra.mxu1 %v21587_v21  ;;  %v21641_v21 = vld [vmem:[%s29999_s5 + $0x438] ss:$20 sps:$4 sm:$0xff]  }
 0x69b   :  { %7440 = vmatpush1.bf16.msra.mxu0 %v21590_v62  ;;  %7312 = vmatprep.subr.bf16.mxu1 %v21595_v25  ;;  %v21644_v62 = vld [vmem:[%s29999_s5 + $0x440] ss:$20 sps:$4 sm:$0xff]  }
 0x69c   :  { %7441 = vmatprep.subr.bf16.mxu0 %v21598_v5  ;;  %v21649_v25 = vld [vmem:[%s29999_s5 + $0x414] ss:$20 sps:$4 sm:$0xff]   ;;  %v21652_v5 = vld [vmem:[%s29999_s5 + $0x41c] ss:$20 sps:$4 sm:$0xff]  }
 0x69e   :  { %7313 = vmatpush1.bf16.msra.mxu1 %v21593_v33  ;;  %v21647_v33 = vld [vmem:[%s29999_s5 + $0x410] ss:$20 sps:$4 sm:$0xff]  }
 0x69f   :  { %7442 = vmatpush1.bf16.msra.mxu0 %v21596_v22  ;;  %7314 = vmatprep.subr.bf16.mxu1 %v21601_v1  ;;  %v21650_v22 = vld [vmem:[%s29999_s5 + $0x418] ss:$20 sps:$4 sm:$0xff]  }
 0x6a0   :  { %7443 = vmatprep.subr.bf16.mxu0 %v21604_v9  ;;  %v21655_v1 = vld [vmem:[%s29999_s5 + $0x3ec] ss:$20 sps:$4 sm:$0xff]   ;;  %v21658_v9 = vld [vmem:[%s29999_s5 + $0x3f4] ss:$20 sps:$4 sm:$0xff]  }
 0x6a2   :  { %7315 = vmatpush1.bf16.msra.mxu1 %v21599_v51  ;;  %v21653_v51 = vld [vmem:[%s29999_s5 + $0x3e8] ss:$20 sps:$4 sm:$0xff]  }
 0x6a3   :  { %7444 = vmatpush1.bf16.msra.mxu0 %v21602_v40  ;;  %7316 = vmatprep.subr.bf16.mxu1 %v21607_v37  ;;  %v21656_v40 = vld [vmem:[%s29999_s5 + $0x3f0] ss:$20 sps:$4 sm:$0xff]  }
 0x6a4   :  { %7445 = vmatprep.subr.bf16.mxu0 %v21610_v24  ;;  %v21661_v37 = vld [vmem:[%s29999_s5 + $0x3c4] ss:$20 sps:$4 sm:$0xff]   ;;  %v21664_v24 = vld [vmem:[%s29999_s5 + $0x3cc] ss:$20 sps:$4 sm:$0xff]  }
 0x6a6   :  { %7317 = vmatpush1.bf16.msra.mxu1 %v21605_v10  ;;  %v21659_v10 = vld [vmem:[%s29999_s5 + $0x3c0] ss:$20 sps:$4 sm:$0xff]  }
 0x6a7   :  { %7446 = vmatpush1.bf16.msra.mxu0 %v21608_v54  ;;  %7318 = vmatprep.subr.bf16.mxu1 %v21613_v46  ;;  %v21662_v46 = vld [vmem:[%s29999_s5 + $0x3c8] ss:$20 sps:$4 sm:$0xff]  }
 0x6a8   :  { %7447 = vmatprep.subr.bf16.mxu0 %v21616_v44  ;;  %v21667_v44 = vld [vmem:[%s29999_s5 + $0x124] ss:$20 sps:$4 sm:$0xff]  }
 0x6aa   :  { %7319 = vmatpush1.bf16.msra.mxu1 %v21611_v14  ;;  %v21668_v14 = vld [vmem:[%s29999_s5 + $0x268] ss:$20 sps:$4 sm:$0xff]  }
 0x6ab   :  { %7448 = vmatpush1.bf16.msra.mxu0 %v21614_v39  ;;  %7320 = vmatprep.subr.bf16.mxu1 %v21619_v17  ;;  %v21665_v39 = vld [vmem:[%s29999_s5 + $0x120] ss:$20 sps:$4 sm:$0xff]  }
 0x6ac   :  { %7449 = vmatprep.subr.bf16.mxu0 %v21622_v8  ;;  %v21669_v8 = vld [vmem:[%s29999_s5 + $0x128] ss:$20 sps:$4 sm:$0xff]  }
 0x6ae   :  { %7321 = vmatpush2.bf16.msra.mxu1 %v21617_v27  ;;  %v5966_v27 = vpop.f32.mrf.mxu0 }
 0x6af   :  { %7450 = vmatpush2.bf16.msra.mxu0 %v21620_v49  ;;  %7322 = vmatprep.subr.bf16.mxu1 %v21625_v48  ;;  %v21672_v49 = vld [vmem:[%s29999_s5 + $0xfc] ss:$20 sps:$4 sm:$0xff]   ;;  %v21673_v48 = vld [vmem:[%s29999_s5 + $0x240] ss:$20 sps:$4 sm:$0xff]  }
 0x6b0   :  { %7451 = vmatprep.subr.bf16.mxu0 %v21628_v36  ;;  %v21670_v36 = vld [vmem:[%s29999_s5 + $0xf8] ss:$20 sps:$4 sm:$0xff]  }
 0x6b2   :  { %7323 = vmatpush2.bf16.msra.mxu1 %v21623_v13 }
 0x6b3   :  { %7452 = vmatpush2.bf16.msra.mxu0 %v21626_v59  ;;  %7324 = vmatprep.subr.bf16.mxu1 %v21631_v15  ;;  %v21674_v59 = vld [vmem:[%s29999_s5 + $0x100] ss:$20 sps:$4 sm:$0xff]  }
 0x6b4   :  { %7453 = vmatprep.subr.bf16.mxu0 %v21634_v34  ;;  %v21677_v15 = vld [vmem:[%s29999_s5 + $0xd4] ss:$20 sps:$4 sm:$0xff]   ;;  %v5968_v34 = vpop.f32.mrf.mxu0 }
 0x6b6   :  { %7325 = vmatpush2.bf16.msra.mxu1 %v21629_v61  ;;  %v21678_v61 = vld [vmem:[%s29999_s5 + $0x218] ss:$20 sps:$4 sm:$0xff]  }
 0x6b7   :  { %7454 = vmatpush2.bf16.msra.mxu0 %v21632_v63  ;;  %7326 = vmatprep.subr.bf16.mxu1 %v21637_v47  ;;  %v21675_v63 = vld [vmem:[%s29999_s5 + $0xd0] ss:$20 sps:$4 sm:$0xff]  }
 0x6b8   :  { %7455 = vmatprep.subr.bf16.mxu0 %v21640_v53  ;;  %v21679_v53 = vld [vmem:[%s29999_s5 + $0xd8] ss:$20 sps:$4 sm:$0xff]  }
 0x6ba   :  { %7327 = vmatpush2.bf16.msra.mxu1 %v21635_v11  ;;  %v5970_v11 = vpop.f32.mrf.mxu0 }
 0x6bb   :  { %7456 = vmatpush2.bf16.msra.mxu0 %v21638_v45  ;;  %7328 = vmatprep.subr.bf16.mxu1 %v21643_v52  ;;  %v21683_v52 = vld [vmem:[%s29999_s5 + $0x1f0] ss:$20 sps:$4 sm:$0xff]  }
 0x6bc   :  { %7457 = vmatprep.subr.bf16.mxu0 %v21646_v29 }
 0x6bd   :  { %v5923_v54 = vpop.f32.mrf.mxu1 }
 0x6be   :  { %7329 = vmatpush2.bf16.msra.mxu1 %v21641_v21  ;;  %v5967_v45 = vadd.f32 %v5966_v27, %v5923_v54  ;;  %v21685_v54 = vld [vmem:[%s29999_s5 + $0x80] ss:$20 sps:$4 sm:$0xff]  }
 0x6bf   :  { %7458 = vmatpush2.bf16.msra.mxu0 %v21644_v62  ;;  %7330 = vmatprep.subr.bf16.mxu1 %v21649_v25  ;;  %v5925_v17 = vpop.f32.mrf.mxu1  ;;  %v21680_v25 = vld [vmem:[%s29999_s5 + $0xa8] ss:$20 sps:$4 sm:$0xff]  }
 0x6c0   :  { %7459 = vmatprep.subr.bf16.mxu0 %v21652_v5  ;;  %v5969_v21 = vadd.f32 %v5968_v34, %v5925_v17  ;;  %v21690_v17 = vld [vmem:[%s29999_s5 + $0x58] ss:$20 sps:$4 sm:$0xff]   ;;  %v21697_v27 = vld [vmem:[%s29999_s5 + $0x34] ss:$20 sps:$4 sm:$0xff]  }
 0x6c1   :  { %v5927_v13 = vpop.f32.mrf.mxu1 }
 0x6c2   :  { %7331 = vmatpush2.bf16.msra.mxu1 %v21647_v33  ;;  %v21684_v33 = vld [vmem:[%s29999_s5 + $0xb0] ss:$20 sps:$4 sm:$0xff]  }
 0x6c3   :  { %7460 = vmatpush2.bf16.msra.mxu0 %v21650_v22  ;;  %7332 = vmatprep.subr.bf16.mxu1 %v21655_v1  ;;  %v26292_v47 = vpop.f32.mrf.mxu1  ;;  %v21687_v22 = vld [vmem:[%s29999_s5 + $0x84] ss:$20 sps:$4 sm:$0xff]   ;;  %v26314_v1 = vpop.f32.mrf.mxu0 }
 0x6c4   :  { %7461 = vmatprep.subr.bf16.mxu0 %v21658_v9  ;;  %v5971_v9 = vadd.f32 %v5970_v11, %v5927_v13  ;;  %v21699_v13 = vld [vmem:[%s29999_s5 + $0x38] ss:$20 sps:$4 sm:$0xff]   ;;  %v21705_v11 = vld [vmem:[%s29999_s5 + $0x260] ss:$20 sps:$4 sm:$0xff]  }
 0x6c6   :  { %7333 = vmatpush2.bf16.msra.mxu1 %v21653_v51 }
 0x6c7   :  { %7462 = vmatpush2.bf16.msra.mxu0 %v21656_v40  ;;  %7334 = vmatprep.subr.bf16.mxu1 %v21661_v37  ;;  %v21688_v40 = vld [vmem:[%s29999_s5 + $0x1c8] ss:$20 sps:$4 sm:$0xff]  }
 0x6c8   :  { %7463 = vmatprep.subr.bf16.mxu0 %v21664_v24  ;;  %v26321_v24 = vpop.f32.mrf.mxu0 }
 0x6ca   :  { %7335 = vmatpush2.bf16.msra.mxu1 %v21659_v10 }
 0x6cb   :  { %7464 = vmatpush2.bf16.msra.mxu0 %v21662_v46  ;;  %7390 = vmatprep.subr.bf16.mxu1 %v21667_v44  ;;  %v21689_v46 = vld [vmem:[%s29999_s5 + $0x88] ss:$20 sps:$4 sm:$0xff]  }
 0x6cc   :  { %20290 = vmatprep.subr.bf16.mxu0 %v21668_v14  ;;  %v21692_v44 = vld [vmem:[%s29999_s5 + $0x5c] ss:$20 sps:$4 sm:$0xff]   ;;  %v21693_v14 = vld [vmem:[%s29999_s5 + $0x1a0] ss:$20 sps:$4 sm:$0xff]  }
 0x6cd   :  { %7337 = vmatmul.mubr.bf16.vlgmr.msra.gmra.mxu1 %v25524_v18 }
 0x6ce   :  { %7466 = vmatmul.mubr.bf16.vlgmr.msra.gmra.mxu0 %v25524_v18  ;;  %7391 = vmatpush1.bf16.msra.mxu1 %v21665_v39  ;;  %v26337_v39 = vpop.f32.mrf.mxu0 }
 0x6cf   :  { %7422 = vmatprep.mubr.bf16.mxu1 %v25808_v35  ;;  %20291 = vmatpush3.bf16.msra.mxu0 %v21669_v8  ;;  %v21694_v8 = vld [vmem:[%s29999_s5 + $0x60] ss:$20 sps:$4 sm:$0xff]  }
 0x6d0   :  { %7551 = vmatprep.mubr.bf16.mxu0 %v25808_v35  ;;  %7392 = vmatprep.subr.bf16.mxu1 %v21672_v49  ;;  %v21682_v35 = vld [vmem:[%s29999_s5 + $0xac] ss:$20 sps:$4 sm:$0xff]  }
 0x6d1   :  { %20292 = vmatprep.subr.bf16.mxu0 %v21673_v48  ;;  %v21698_v49 = vld [vmem:[%s29999_s5 + $0x178] ss:$20 sps:$4 sm:$0xff]   ;;  %v26351_v48 = vpop.f32.mrf.mxu0 }
 0x6d2   :  { %7393 = vmatpush1.bf16.msra.mxu1 %v21670_v36  ;;  %v21695_v36 = vld [vmem:[%s29999_s5 + $0x30] ss:$20 sps:$4 sm:$0xff]  }
 0x6d3   :  { %20293 = vmatpush3.bf16.msra.mxu0 %v21674_v59  ;;  %7394 = vmatprep.subr.bf16.mxu1 %v21677_v15  ;;  %v21702_v59 = vld [vmem:[%s29999_s5 + $0xc] ss:$20 sps:$4 sm:$0xff]   ;;  %v21703_v15 = vld [vmem:[%s29999_s5 + $0x150] ss:$20 sps:$4 sm:$0xff]   ;;  %v26365_v34 = vpop.f32.mrf.mxu0 }
 0x6d4   :  { %20294 = vmatprep.subr.bf16.mxu0 %v21678_v61  ;;  %v21700_v61 = vld [vmem:[%s29999_s5 + $0x8] ss:$20 sps:$4 sm:$0xff]  }
 0x6d5   :  { %v6009_v29 = vpop.f32.mrf.mxu1 }
 0x6d6   :  { %v26303_v62 = vadd.f32 %v6009_v29, %v5967_v45  ;;  %7395 = vmatpush1.bf16.msra.mxu1 %v21675_v63  ;;  %v21704_v63 = vld [vmem:[%s29999_s5 + $0x10] ss:$20 sps:$4 sm:$0xff]   ;;  %v21708_v45 = vld [vmem:[%s29999_s5 + $0x5d8] ss:$20 sps:$4 sm:$0xff]  }
 0x6d7   :  { %20295 = vmatpush3.bf16.msra.mxu0 %v21679_v53  ;;  %v6011_v5 = vpop.f32.mrf.mxu1  ;;  %7396 = vmatprep.subr.bf16.mxu1 %v21682_v35  ;;  %v21707_v53 = vld [vmem:[%s29999_s5 + $0x264] ss:$20 sps:$4 sm:$0xff]   ;;  %v26376_v35 = vpop.f32.mrf.mxu0 }
 0x6d8   :  { %v26316_v51 = vadd.f32 %v6011_v5, %v5969_v21  ;;  %20296 = vmatprep.subr.bf16.mxu0 %v21683_v52  ;;  %v21711_v52 = vld [vmem:[%s29999_s5 + $0x23c] ss:$20 sps:$4 sm:$0xff]   ;;  %v21709_v21 = vld [vmem:[%s29999_s5 + $0x238] ss:$20 sps:$4 sm:$0xff]   ;;  %v21715_v5 = vld [vmem:[%s29999_s5 + $0x214] ss:$20 sps:$4 sm:$0xff]  }
 0x6d9   :  { %v6013_v37 = vpop.f32.mrf.mxu1  ;;  %v26387_v29 = vpop.f32.mrf.mxu0 }
 0x6da   :  { %v26323_v10 = vadd.f32 %v6013_v37, %v5971_v9  ;;  %7397 = vmatpush1.bf16.msra.mxu1 %v21680_v25  ;;  %v21712_v25 = vld [vmem:[%s29999_s5 + $0x5b0] ss:$20 sps:$4 sm:$0xff]   ;;  %v21716_v9 = vld [vmem:[%s29999_s5 + $0x588] ss:$20 sps:$4 sm:$0xff]  }
 0x6db   :  { %20297 = vmatpush3.bf16.msra.mxu0 %v21684_v33  ;;  %7398 = vmatprep.subr.bf16.mxu1 %v21687_v22  ;;  %v26400_v33 = vpop.f32.mrf.mxu0  ;;  %v21713_v22 = vld [vmem:[%s29999_s5 + $0x210] ss:$20 sps:$4 sm:$0xff]  }
 0x6dc   :  { %20298 = vmatprep.subr.bf16.mxu0 %v21688_v40  ;;  %v21719_v40 = vld [vmem:[%s29999_s5 + $0x1ec] ss:$20 sps:$4 sm:$0xff]  }
 0x6dd   :  { %v26414_v37 = vpop.f32.mrf.mxu0 }
 0x6de   :  { %7399 = vmatpush1.bf16.msra.mxu1 %v21685_v54 }
 0x6df   :  { %20299 = vmatpush3.bf16.msra.mxu0 %v21689_v46  ;;  %7400 = vmatprep.subr.bf16.mxu1 %v21692_v44  ;;  %v21717_v46 = vld [vmem:[%s29999_s5 + $0x1e8] ss:$20 sps:$4 sm:$0xff]   ;;  %v21720_v44 = vld [vmem:[%s29999_s5 + $0x560] ss:$20 sps:$4 sm:$0xff]  }
 0x6e0   :  { %20300 = vmatprep.subr.bf16.mxu0 %v21693_v14  ;;  %v21723_v14 = vld [vmem:[%s29999_s5 + $0x1c4] ss:$20 sps:$4 sm:$0xff]  }
 0x6e2   :  { %7401 = vmatpush1.bf16.msra.mxu1 %v21690_v17 }
 0x6e3   :  { %20301 = vmatpush3.bf16.msra.mxu0 %v21694_v8  ;;  %7402 = vmatprep.subr.bf16.mxu1 %v21697_v27  ;;  %v21721_v27 = vld [vmem:[%s29999_s5 + $0x1c0] ss:$20 sps:$4 sm:$0xff]  }
 0x6e4   :  { %20302 = vmatprep.subr.bf16.mxu0 %v21698_v49  ;;  %v21724_v49 = vld [vmem:[%s29999_s5 + $0x538] ss:$20 sps:$4 sm:$0xff]  }
 0x6e6   :  { %7403 = vmatpush1.bf16.msra.mxu1 %v21695_v36  ;;  %v21727_v36 = vld [vmem:[%s29999_s5 + $0x19c] ss:$20 sps:$4 sm:$0xff]  }
 0x6e7   :  { %20303 = vmatpush3.bf16.msra.mxu0 %v21699_v13  ;;  %7404 = vmatprep.subr.bf16.mxu1 %v21702_v59  ;;  %v21725_v13 = vld [vmem:[%s29999_s5 + $0x198] ss:$20 sps:$4 sm:$0xff]   ;;  %v21728_v59 = vld [vmem:[%s29999_s5 + $0x510] ss:$20 sps:$4 sm:$0xff]  }
 0x6e8   :  { %20304 = vmatprep.subr.bf16.mxu0 %v21703_v15  ;;  %v21731_v15 = vld [vmem:[%s29999_s5 + $0x174] ss:$20 sps:$4 sm:$0xff]  }
 0x6ea   :  { %7405 = vmatpush1.bf16.msra.mxu1 %v21700_v61  ;;  %v21729_v61 = vld [vmem:[%s29999_s5 + $0x170] ss:$20 sps:$4 sm:$0xff]  }
 0x6eb   :  { %20305 = vmatpush3.bf16.msra.mxu0 %v21704_v63  ;;  %7406 = vmatprep.subr.bf16.mxu1 %v21707_v53  ;;  %v21734_v63 = vld [vmem:[%s29999_s5 + $0x14c] ss:$20 sps:$4 sm:$0xff]   ;;  %v21732_v53 = vld [vmem:[%s29999_s5 + $0x148] ss:$20 sps:$4 sm:$0xff]  }
 0x6ec   :  { %20552 = vmatprep.subr.bf16.mxu0 %v30011_v7 }
 0x6ee   :  { %7552 = vmatmul.mubr.bf16.vlgmr.msra.gmra.mxu0 %v25494_v50  ;;  %7407 = vmatpush2.bf16.msra.mxu1 %v21705_v11  ;;  %v21737_v11 = vld [vmem:[%s29999_s5 + $0x5d4] ss:$20 sps:$4 sm:$0xff]  }
 0x6ef   :  { %20553 = vmatpush3.bf16.msra.mxu0 %v21708_v45  ;;  %7408 = vmatprep.subr.bf16.mxu1 %v21711_v52  ;;  %v21735_v45 = vld [vmem:[%s29999_s5 + $0x5d0] ss:$20 sps:$4 sm:$0xff]   ;;  %v21740_v52 = vld [vmem:[%s29999_s5 + $0x5ac] ss:$20 sps:$4 sm:$0xff]  }
 0x6f0   :  { %20554 = vmatprep.subr.bf16.mxu0 %v30011_v7  ;;  %20564 = vmatprep.mubr.msk.bf16.mxu0 %vm23161_vm4, %v30011_v7 }
 0x6f2   :  { %7409 = vmatpush2.bf16.msra.mxu1 %v21709_v21  ;;  %v21738_v21 = vld [vmem:[%s29999_s5 + $0x5a8] ss:$20 sps:$4 sm:$0xff]  }
 0x6f3   :  { %20555 = vmatpush3.bf16.msra.mxu0 %v21712_v25  ;;  %7410 = vmatprep.subr.bf16.mxu1 %v21715_v5  ;;  %v26483_v25 = vld [vmem:[%s29998_s4 + $0x10] sm:$0xff]   ;;  %v21744_v5 = vld [vmem:[%s29999_s5 + $0x584] ss:$20 sps:$4 sm:$0xff]  }
 0x6f4   :  { %20556 = vmatprep.subr.bf16.mxu0 %v30011_v7 }
 0x6f6   :  { %v20277_v54 = vpop.f32.mrf.mxu0  ;;  %7411 = vmatpush2.bf16.msra.mxu1 %v21713_v22  ;;  %v21747_v22 = vld [vmem:[%s29999_s5 + $0x55c] ss:$20 sps:$4 sm:$0xff]  }
 0x6f7   :  { %20557 = vmatpush3.bf16.msra.mxu0 %v21716_v9  ;;  %7412 = vmatprep.subr.bf16.mxu1 %v21719_v40  ;;  %v21745_v9 = vld [vmem:[%s29999_s5 + $0x558] ss:$20 sps:$4 sm:$0xff]   ;;  %v21750_v40 = vld [vmem:[%s29999_s5 + $0x534] ss:$20 sps:$4 sm:$0xff]  }
 0x6f8   :  { %v20278_v17 = vpop.f32.mrf.mxu0  ;;  %20558 = vmatprep.subr.bf16.mxu0 %v30011_v7 }
 0x6f9   :  { %v26427_v8 = vadd.f32 %v20278_v17, %v20277_v54  ;;  %v21748_v54 = vld [vmem:[%s29999_s5 + $0x530] ss:$20 sps:$4 sm:$0xff]   ;;  %v21755_v17 = vld [vmem:[%s29999_s5 + $0x3a8] ss:$20 sps:$4 sm:$0xff]  }
 0x6fa   :  { %7413 = vmatpush2.bf16.msra.mxu1 %v21717_v46  ;;  %v21753_v46 = vld [vmem:[%s29999_s5 + $0x50c] ss:$20 sps:$4 sm:$0xff]  }
 0x6fb   :  { %20559 = vmatpush3.bf16.msra.mxu0 %v21720_v44  ;;  %7414 = vmatprep.subr.bf16.mxu1 %v21723_v14  ;;  %v21751_v44 = vld [vmem:[%s29999_s5 + $0x508] ss:$20 sps:$4 sm:$0xff]  }
 0x6fc   :  { %20560 = vmatprep.subr.bf16.mxu0 %v30011_v7  ;;  %v21754_v14 = vld [vmem:[%s29999_s5 + $0x4e8] ss:$20 sps:$4 sm:$0xff]  }
 0x6fe   :  { %7415 = vmatpush2.bf16.msra.mxu1 %v21721_v27  ;;  %v21756_v27 = vld [vmem:[%s29999_s5 + $0x4c0] ss:$20 sps:$4 sm:$0xff]  }
 0x6ff   :  { %20561 = vmatpush3.bf16.msra.mxu0 %v21724_v49  ;;  %7416 = vmatprep.subr.bf16.mxu1 %v21727_v36  ;;  %v26522_v49 = vpop.f32.mrf.mxu1  ;;  %v21757_v36 = vld [vmem:[%s29999_s5 + $0x380] ss:$20 sps:$4 sm:$0xff]  }
 0x700   :  { %20562 = vmatprep.subr.bf16.mxu0 %v30011_v7 }
 0x702   :  { %7417 = vmatpush2.bf16.msra.mxu1 %v21725_v13 }
 0x703   :  { %20563 = vmatpush3.bf16.msra.mxu0 %v21728_v59  ;;  %7418 = vmatprep.subr.bf16.mxu1 %v21731_v15  ;;  %v21758_v59 = vld [vmem:[%s29999_s5 + $0x498] ss:$20 sps:$4 sm:$0xff]  }
 0x704   :  { %18249 = vmatprep.subr.msk.bf16.mxu0 %vm4150_vm2, %v25181_v56  ;;  %v21759_v15 = vld [vmem:[%s29999_s5 + $0x358] ss:$20 sps:$4 sm:$0xff]  }
 0x706   :  { %20565 = vmatmul.mubr.msk.bf16.vlgmr.msra.gmra.mxu0 %vm4077_vm5, %v25606_v32  ;;  %7419 = vmatpush2.bf16.msra.mxu1 %v21729_v61  ;;  %v21761_v61 = vld [vmem:[%s29999_s5 + $0x330] ss:$20 sps:$4 sm:$0xff]  }
 0x707   :  { %7707 = vmatpush1.bf16.msra.mxu0 %v25191_v4  ;;  %7420 = vmatprep.subr.bf16.mxu1 %v21734_v63 }
 0x708   :  { %7708 = vmatprep.subr.bf16.mxu0 %v25195_v31  ;;  %7728 = vmatprep.mubr.bf16.mxu0 %v30013_v2 }
 0x70a   :  { %7421 = vmatpush2.bf16.msra.mxu1 %v21732_v53  ;;  %v21762_v53 = vld [vmem:[%s29999_s5 + $0x448] ss:$20 sps:$4 sm:$0xff]  }
 0x70b   :  { %7709 = vmatpush1.bf16.msra.mxu0 %v25175_v41  ;;  %7480 = vmatprep.subr.bf16.mxu1 %v21737_v11  ;;  %v20280_v11 = vpop.f32.mrf.mxu0 }
 0x70c   :  { %7710 = vmatprep.subr.bf16.mxu0 %v25211_v23 }
 0x70d   :  { %7423 = vmatmul.mubr.bf16.vlgmr.msra.gmra.mxu1 %v25494_v50  ;;  %v21742_v50 = vld [vmem:[%s29999_s5 + $0x580] ss:$20 sps:$4 sm:$0xff]  }
 0x70e   :  { %7481 = vmatpush1.bf16.msra.mxu1 %v21735_v45  ;;  %7508 = vmatprep.mubr.bf16.mxu1 %v30013_v2  ;;  %v21763_v45 = vld [vmem:[%s29999_s5 + $0x308] ss:$20 sps:$4 sm:$0xff]  }
 0x70f   :  { %7711 = vmatpush1.bf16.msra.mxu0 %v25157_v60  ;;  %7482 = vmatprep.subr.bf16.mxu1 %v21740_v52 }
 0x712   :  { %18250 = vmatmul.mubr.msk.bf16.vlgmr.msra.gmra.mxu0 %vm4146_vm3, %v26483_v25  ;;  %7483 = vmatpush1.bf16.msra.mxu1 %v21738_v21  ;;  %v21764_v21 = vld [vmem:[%s29999_s5 + $0x420] ss:$20 sps:$4 sm:$0xff]  }
 0x713   :  { %7484 = vmatprep.subr.bf16.mxu1 %v21744_v5  ;;  %v20281_v5 = vpop.f32.mrf.mxu0 }
 0x715   :  { %v26530_v13 = vpop.f32.mrf.mxu1 }
 0x716   :  { %7485 = vmatpush1.bf16.msra.mxu1 %v21742_v50 }
 0x717   :  { %7486 = vmatprep.subr.bf16.mxu1 %v21747_v22 }
 0x71a   :  { %7487 = vmatpush1.bf16.msra.mxu1 %v21745_v9  ;;  %v21765_v9 = vld [vmem:[%s29999_s5 + $0x2e0] ss:$20 sps:$4 sm:$0xff]  }
 0x71b   :  { %7488 = vmatprep.subr.bf16.mxu1 %v21750_v40 }
 0x71e   :  { %7489 = vmatpush1.bf16.msra.mxu1 %v21748_v54 }
 0x71f   :  { %7490 = vmatprep.subr.bf16.mxu1 %v21753_v46  ;;  %v21766_v46 = vld [vmem:[%s29999_s5 + $0x3f8] ss:$20 sps:$4 sm:$0xff]  }
 0x722   :  { %7491 = vmatpush1.bf16.msra.mxu1 %v21751_v44 }
 0x723   :  { %20312 = vmatprep.subr.bf16.mxu1 %v21754_v14 }
 0x725   :  { %18242 = vmatmul.mubr.msk.bf16.vlgmr.msra.gmra.mxu1 %vm4077_vm5, %v25606_v32  ;;  %v26538_v32 = vpop.f32.mrf.mxu1 }
 0x726   :  { %20313 = vmatpush3.bf16.msra.mxu1 %v21755_v17  ;;  %7592 = vmatprep.mubr.bf16.mxu1 %v26070_v3  ;;  %v21760_v3 = vld [vmem:[%s29999_s5 + $0x470] ss:$20 sps:$4 sm:$0xff]  }
 0x727   :  { %20314 = vmatprep.subr.bf16.mxu1 %v21756_v27  ;;  %v26546_v63 = vpop.f32.mrf.mxu1 }
 0x729   :  { %v26554_v52 = vpop.f32.mrf.mxu1 }
 0x72a   :  { %20315 = vmatpush3.bf16.msra.mxu1 %v21757_v36 }
 0x72b   :  { %20316 = vmatprep.subr.bf16.mxu1 %v21758_v59  ;;  %v21767_v59 = vld [vmem:[%s29999_s5 + $0x2b8] ss:$20 sps:$4 sm:$0xff]  }
 0x72e   :  { %20317 = vmatpush3.bf16.msra.mxu1 %v21759_v15 }
 0x72f   :  { %20318 = vmatprep.subr.bf16.mxu1 %v21760_v3 }
 0x732   :  { %20319 = vmatpush3.bf16.msra.mxu1 %v21761_v61  ;;  %v21768_v61 = vld [vmem:[%s29999_s5 + $0x3d0] ss:$20 sps:$4 sm:$0xff]  }
 0x733   :  { %20320 = vmatprep.subr.bf16.mxu1 %v21762_v53 }
 0x735   :  { %v20255_v50 = vpop.f32.mrf.mxu1 }
 0x736   :  { %v7295_v22 = vpop.f32.mrf.mxu0  ;;  %20321 = vmatpush3.bf16.msra.mxu1 %v21763_v45  ;;  %v21769_v45 = vld [vmem:[%s29999_s5 + $0x290] ss:$20 sps:$4 sm:$0xff]  }
 0x737   :  { %v26563_v40 = vadd.f32 %v7295_v22, %v26303_v62  ;;  %v20256_v54 = vpop.f32.mrf.mxu1  ;;  %20322 = vmatprep.subr.bf16.mxu1 %v21764_v21  ;;  %v21772_v22 = vld [vmem:[%s29999_s5 + $0xf7c] ss:$20 sps:$4 sm:$0xff]  }
 0x738   :  { %v20257_v44 = vadd.f32 %v20256_v54, %v20255_v50  ;;  %v7297_v14 = vpop.f32.mrf.mxu0  ;;  %v21820_v54 = vld [vmem:[%s29999_s5 + $0xcfc] ss:$20 sps:$4 sm:$0xff]  }
 0x739   :  { %v26569_v17 = vadd.f32 %v7297_v14, %v26316_v51  ;;  %v20258_v27 = vpop.f32.mrf.mxu1  ;;  %v20282_v51 = vadd.f32 %v20281_v5, %v20280_v11  ;;  %9005 = vmatprep.subr.bf16.mxu0 %v21820_v54  ;;  %v21824_v14 = vld [vmem:[%s29999_s5 + $0xcd0] ss:$20 sps:$4 sm:$0xff]  }
 0x73a   :  { %v7299_v36 = vpop.f32.mrf.mxu0  ;;  %20323 = vmatpush3.bf16.msra.mxu1 %v21765_v9  ;;  %v6223_v62 = vadd.f32 %v26427_v8, %v20257_v44  ;;  %v21818_v9 = vld [vmem:[%s29999_s5 + $0xcf8] ss:$20 sps:$4 sm:$0xff]   ;;  %v21775_v44 = vld [vmem:[%s29999_s5 + $0xf54] ss:$20 sps:$4 sm:$0xff]   ;;  %v21785_v54 = vld [vmem:[%s29999_s5 + $0xeb0] ss:$20 sps:$4 sm:$0xff]  }
 0x73b   :  { %v26576_v15 = vadd.f32 %v7299_v36, %v26323_v10  ;;  %v20259_v3 = vpop.f32.mrf.mxu1  ;;  %20324 = vmatprep.subr.bf16.mxu1 %v21766_v46  ;;  %v21770_v46 = vld [vmem:[%s29999_s5 + $0xf78] ss:$20 sps:$4 sm:$0xff]   ;;  %9006 = vmatpush1.bf16.msra.mxu0 %v21818_v9  ;;  %v21773_v36 = vld [vmem:[%s29999_s5 + $0xf50] ss:$20 sps:$4 sm:$0xff]   ;;  %v21850_v9 = vld [vmem:[%s29999_s5 + $0xc34] ss:$20 sps:$4 sm:$0xff]  }
 0x73c   :  { %v20260_v53 = vadd.f32 %v20259_v3, %v20258_v27  ;;  %v21826_v27 = vld [vmem:[%s29999_s5 + $0xcd4] ss:$20 sps:$4 sm:$0xff]  }
 0x73d   :  { %9007 = vmatprep.subr.bf16.mxu0 %v21826_v27  ;;  %v21776_v3 = vld [vmem:[%s29999_s5 + $0xf28] ss:$20 sps:$4 sm:$0xff]  }
 0x73e   :  { %20325 = vmatpush3.bf16.msra.mxu1 %v21767_v59  ;;  %v6226_v21 = vadd.f32 %v20282_v51, %v20260_v53  ;;  %v21778_v59 = vld [vmem:[%s29999_s5 + $0xf2c] ss:$20 sps:$4 sm:$0xff]   ;;  %v21788_v27 = vld [vmem:[%s29999_s5 + $0xe88] ss:$20 sps:$4 sm:$0xff]  }
 0x73f   :  { %20326 = vmatprep.subr.bf16.mxu1 %v21768_v61  ;;  %9008 = vmatpush1.bf16.msra.mxu0 %v21824_v14  ;;  %v21781_v61 = vld [vmem:[%s29999_s5 + $0xf04] ss:$20 sps:$4 sm:$0xff]   ;;  %v21779_v51 = vld [vmem:[%s29999_s5 + $0xf00] ss:$20 sps:$4 sm:$0xff]  }
 0x740   :  { %v21836_v53 = vld [vmem:[%s29999_s5 + $0xc80] ss:$20 sps:$4 sm:$0xff]  }
 0x741   :  { %v21856_v14 = vld [vmem:[%s29999_s5 + $0xc0c] ss:$20 sps:$4 sm:$0xff]  }
 0x742   :  { %20327 = vmatpush3.bf16.msra.mxu1 %v21769_v45  ;;  %v21838_v45 = vld [vmem:[%s29999_s5 + $0xc84] ss:$20 sps:$4 sm:$0xff]  }
 0x743   :  { %18247 = vmatprep.subr.msk.bf16.mxu1 %vm4150_vm2, %v25179_v26 }
 0x745   :  { %7593 = vmatmul.mubr.bf16.vlgmr.msra.gmra.mxu1 %v25524_v18 }
 0x746   :  { %7664 = vmatpush1.bf16.msra.mxu1 %v25188_v19  ;;  %7685 = vmatprep.mubr.bf16.mxu1 %v30013_v2 }
 0x747   :  { %7665 = vmatprep.subr.bf16.mxu1 %v25193_v0 }
 0x74a   :  { %7666 = vmatpush1.bf16.msra.mxu1 %v25173_v20 }
 0x74b   :  { %7667 = vmatprep.subr.bf16.mxu1 %v25205_v6 }
 0x74d   :  { %v6263_v10 = vpop.f32.mrf.mxu1 }
 0x74e   :  { %v26592_v8 = vadd.f32 %v6263_v10, %v6223_v62  ;;  %7668 = vmatpush1.bf16.msra.mxu1 %v25155_v42  ;;  %v21832_v62 = vld [vmem:[%s29999_s5 + $0xcac] ss:$20 sps:$4 sm:$0xff]  }
 0x74f   :  { %v20550_v11 = vpop.f32.mrf.mxu1  ;;  %20568 = vmatprep.subr.bf16.mxu1 %v30011_v7  ;;  %9009 = vmatprep.subr.bf16.mxu0 %v21832_v62  ;;  %v21782_v10 = vld [vmem:[%s29999_s5 + $0xed8] ss:$20 sps:$4 sm:$0xff]   ;;  %v21791_v62 = vld [vmem:[%s29999_s5 + $0xe60] ss:$20 sps:$4 sm:$0xff]  }
 0x750   :  { %v21842_v11 = vld [vmem:[%s29999_s5 + $0xc58] ss:$20 sps:$4 sm:$0xff]  }
 0x751   :  { %v6266_v5 = vpop.f32.mrf.mxu1  ;;  %18248 = vmatmul.mubr.msk.bf16.vlgmr.msra.gmra.mxu1 %vm4146_vm3, %v26483_v25 }
 0x752   :  { %v26598_v18 = vadd.f32 %v6266_v5, %v6226_v21  ;;  %20569 = vmatpush3.bf16.msra.mxu1 %v25261_v28  ;;  %20574 = vmatprep.mubr.msk.bf16.mxu1 %vm23161_vm4, %v30011_v7  ;;  %v21784_v21 = vld [vmem:[%s29999_s5 + $0xedc] ss:$20 sps:$4 sm:$0xff]  }
 0x753   :  { %v20551_v50 = vpop.f32.mrf.mxu1  ;;  %20570 = vmatprep.subr.bf16.mxu1 %v30011_v7  ;;  %v21844_v5 = vld [vmem:[%s29999_s5 + $0xc5c] ss:$20 sps:$4 sm:$0xff]  }
 0x754   :  { %v21787_v50 = vld [vmem:[%s29999_s5 + $0xeb4] ss:$20 sps:$4 sm:$0xff]  }
 0x756   :  { %20571 = vmatpush3.bf16.msra.mxu1 %v25265_v58 }
 0x757   :  { %20572 = vmatprep.subr.bf16.mxu1 %v30011_v7 }
 0x75a   :  { %20573 = vmatpush3.bf16.msra.mxu1 %v25269_v38 }
 0x75b   :  { %9048 = vmatprep.subr.bf16.mxu1 %v21772_v22  ;;  %v21848_v22 = vld [vmem:[%s29999_s5 + $0xc30] ss:$20 sps:$4 sm:$0xff]  }
 0x75d   :  { %20575 = vmatmul.mubr.msk.bf16.vlgmr.msra.gmra.mxu1 %vm4146_vm3, %v26483_v25  ;;  %v21830_v25 = vld [vmem:[%s29999_s5 + $0xca8] ss:$20 sps:$4 sm:$0xff]  }
 0x75e   :  { %9049 = vmatpush1.bf16.msra.mxu1 %v21770_v46  ;;  %9010 = vmatpush1.bf16.msra.mxu0 %v21830_v25  ;;  %v21790_v46 = vld [vmem:[%s29999_s5 + $0xe8c] ss:$20 sps:$4 sm:$0xff]   ;;  %v21862_v25 = vld [vmem:[%s29999_s5 + $0xbe4] ss:$20 sps:$4 sm:$0xff]  }
 0x75f   :  { %9050 = vmatprep.subr.bf16.mxu1 %v21775_v44  ;;  %9011 = vmatprep.subr.bf16.mxu0 %v21838_v45  ;;  %v21854_v44 = vld [vmem:[%s29999_s5 + $0xc08] ss:$20 sps:$4 sm:$0xff]  }
 0x760   :  { %v21799_v45 = vld [vmem:[%s29999_s5 + $0x1094] ss:$20 sps:$4 sm:$0xff]  }
 0x762   :  { %9051 = vmatpush1.bf16.msra.mxu1 %v21773_v36  ;;  %9012 = vmatpush1.bf16.msra.mxu0 %v21836_v53  ;;  %v21793_v36 = vld [vmem:[%s29999_s5 + $0xe64] ss:$20 sps:$4 sm:$0xff]  }
 0x763   :  { %9052 = vmatprep.subr.bf16.mxu1 %v21778_v59  ;;  %9013 = vmatprep.subr.bf16.mxu0 %v21844_v5  ;;  %v21860_v59 = vld [vmem:[%s29999_s5 + $0xbe0] ss:$20 sps:$4 sm:$0xff]   ;;  %v21794_v53 = vld [vmem:[%s29999_s5 + $0x10b8] ss:$20 sps:$4 sm:$0xff]  }
 0x764   :  { %v21802_v5 = vld [vmem:[%s29999_s5 + $0x106c] ss:$20 sps:$4 sm:$0xff]  }
 0x766   :  { %9053 = vmatpush1.bf16.msra.mxu1 %v21776_v3  ;;  %9014 = vmatpush1.bf16.msra.mxu0 %v21842_v11  ;;  %v21796_v3 = vld [vmem:[%s29999_s5 + $0x10bc] ss:$20 sps:$4 sm:$0xff]  }
 0x767   :  { %9054 = vmatprep.subr.bf16.mxu1 %v21781_v61  ;;  %9015 = vmatprep.subr.bf16.mxu0 %v21850_v9  ;;  %v21866_v61 = vld [vmem:[%s29999_s5 + $0xe38] ss:$20 sps:$4 sm:$0xff]   ;;  %v21797_v11 = vld [vmem:[%s29999_s5 + $0x1090] ss:$20 sps:$4 sm:$0xff]   ;;  %v21800_v9 = vld [vmem:[%s29999_s5 + $0x1068] ss:$20 sps:$4 sm:$0xff]  }
 0x76a   :  { %9055 = vmatpush1.bf16.msra.mxu1 %v21779_v51  ;;  %9016 = vmatpush1.bf16.msra.mxu0 %v21848_v22  ;;  %v21868_v51 = vld [vmem:[%s29999_s5 + $0xe3c] ss:$20 sps:$4 sm:$0xff]   ;;  %v21880_v22 = vld [vmem:[%s29999_s5 + $0xdec] ss:$20 sps:$4 sm:$0xff]  }
 0x76b   :  { %9056 = vmatprep.subr.bf16.mxu1 %v21784_v21  ;;  %9017 = vmatprep.subr.bf16.mxu0 %v21856_v14  ;;  %v21872_v21 = vld [vmem:[%s29999_s5 + $0xe10] ss:$20 sps:$4 sm:$0xff]   ;;  %v21803_v14 = vld [vmem:[%s29999_s5 + $0x1040] ss:$20 sps:$4 sm:$0xff]  }
 0x76e   :  { %9057 = vmatpush1.bf16.msra.mxu1 %v21782_v10  ;;  %9018 = vmatpush1.bf16.msra.mxu0 %v21854_v44  ;;  %v21874_v10 = vld [vmem:[%s29999_s5 + $0xe14] ss:$20 sps:$4 sm:$0xff]   ;;  %v21886_v44 = vld [vmem:[%s29999_s5 + $0xdc4] ss:$20 sps:$4 sm:$0xff]  }
 0x76f   :  { %9058 = vmatprep.subr.bf16.mxu1 %v21787_v50  ;;  %9019 = vmatprep.subr.bf16.mxu0 %v21862_v25  ;;  %v21878_v50 = vld [vmem:[%s29999_s5 + $0xde8] ss:$20 sps:$4 sm:$0xff]   ;;  %v21890_v25 = vld [vmem:[%s29999_s5 + $0xd98] ss:$20 sps:$4 sm:$0xff]  }
 0x772   :  { %9059 = vmatpush1.bf16.msra.mxu1 %v21785_v54  ;;  %9020 = vmatpush1.bf16.msra.mxu0 %v21860_v59  ;;  %v21805_v54 = vld [vmem:[%s29999_s5 + $0x1044] ss:$20 sps:$4 sm:$0xff]  }
 0x773   :  { %9060 = vmatprep.subr.bf16.mxu1 %v21790_v46  ;;  %9021 = vmatprep.subr.bf16.mxu0 %v21868_v51  ;;  %v21884_v46 = vld [vmem:[%s29999_s5 + $0xdc0] ss:$20 sps:$4 sm:$0xff]   ;;  %v21806_v59 = vld [vmem:[%s29999_s5 + $0x1018] ss:$20 sps:$4 sm:$0xff]  }
 0x776   :  { %9061 = vmatpush1.bf16.msra.mxu1 %v21788_v27  ;;  %9022 = vmatpush2.bf16.msra.mxu0 %v21866_v61  ;;  %v21808_v27 = vld [vmem:[%s29999_s5 + $0x101c] ss:$20 sps:$4 sm:$0xff]   ;;  %v21811_v61 = vld [vmem:[%s29999_s5 + $0xff4] ss:$20 sps:$4 sm:$0xff]  }
 0x777   :  { %9062 = vmatprep.subr.bf16.mxu1 %v21793_v36  ;;  %9023 = vmatprep.subr.bf16.mxu0 %v21874_v10  ;;  %v26756_v36 = vpop.f32.mrf.mxu0  ;;  %v21898_v10 = vld [vmem:[%s29999_s5 + $0xd74] ss:$20 sps:$4 sm:$0xff]  }
 0x77a   :  { %9063 = vmatpush1.bf16.msra.mxu1 %v21791_v62  ;;  %9024 = vmatpush2.bf16.msra.mxu0 %v21872_v21  ;;  %v21892_v62 = vld [vmem:[%s29999_s5 + $0xd9c] ss:$20 sps:$4 sm:$0xff]  }
 0x77b   :  { %9064 = vmatprep.subr.bf16.mxu1 %v21796_v3  ;;  %9025 = vmatprep.subr.bf16.mxu0 %v21880_v22  ;;  %v7381_v3 = vpop.f32.mrf.mxu0  ;;  %v21896_v21 = vld [vmem:[%s29999_s5 + $0xd70] ss:$20 sps:$4 sm:$0xff]  }
 0x77e   :  { %9065 = vmatpush2.bf16.msra.mxu1 %v21794_v53  ;;  %9026 = vmatpush2.bf16.msra.mxu0 %v21878_v50 }
 0x77f   :  { %9066 = vmatprep.subr.bf16.mxu1 %v21799_v45  ;;  %9027 = vmatprep.subr.bf16.mxu0 %v21886_v44  ;;  %v21809_v45 = vld [vmem:[%s29999_s5 + $0xff0] ss:$20 sps:$4 sm:$0xff]  }
 0x782   :  { %9067 = vmatpush2.bf16.msra.mxu1 %v21797_v11  ;;  %9028 = vmatpush2.bf16.msra.mxu0 %v21884_v46  ;;  %v7383_v11 = vpop.f32.mrf.mxu0  ;;  %v21904_v46 = vld [vmem:[%s29999_s5 + $0xd4c] ss:$20 sps:$4 sm:$0xff]  }
 0x783   :  { %9068 = vmatprep.subr.bf16.mxu1 %v21802_v5  ;;  %9029 = vmatprep.subr.bf16.mxu0 %v21892_v62  ;;  %v21908_v62 = vld [vmem:[%s29999_s5 + $0xd20] ss:$20 sps:$4 sm:$0xff]  }
 0x786   :  { %9069 = vmatpush2.bf16.msra.mxu1 %v21800_v9  ;;  %9030 = vmatpush2.bf16.msra.mxu0 %v21890_v25 }
 0x787   :  { %9070 = vmatprep.subr.bf16.mxu1 %v21805_v54  ;;  %9031 = vmatprep.subr.bf16.mxu0 %v21898_v10  ;;  %v21902_v54 = vld [vmem:[%s29999_s5 + $0xd48] ss:$20 sps:$4 sm:$0xff]  }
 0x78a   :  { %9071 = vmatpush2.bf16.msra.mxu1 %v21803_v14  ;;  %9032 = vmatpush2.bf16.msra.mxu0 %v21896_v21 }
 0x78b   :  { %9072 = vmatprep.subr.bf16.mxu1 %v21808_v27  ;;  %v7385_v27 = vpop.f32.mrf.mxu0  ;;  %9033 = vmatprep.subr.bf16.mxu0 %v21904_v46 }
 0x78d   :  { %v7338_v51 = vpop.f32.mrf.mxu1 }
 0x78e   :  { %v7339_v53 = vadd.f32 %v7338_v51, %v26563_v40  ;;  %9073 = vmatpush2.bf16.msra.mxu1 %v21806_v59  ;;  %v21814_v40 = vld [vmem:[%s29999_s5 + $0xfcc] ss:$20 sps:$4 sm:$0xff]   ;;  %v21817_v59 = vld [vmem:[%s29999_s5 + $0xfa4] ss:$20 sps:$4 sm:$0xff]   ;;  %9034 = vmatpush2.bf16.msra.mxu0 %v21902_v54 }
 0x78f   :  { %v7340_v5 = vpop.f32.mrf.mxu1  ;;  %9074 = vmatprep.subr.bf16.mxu1 %v21811_v61  ;;  %v21823_v61 = vld [vmem:[%s29999_s5 + $0xd04] ss:$20 sps:$4 sm:$0xff]   ;;  %v21916_v51 = vld [vmem:[%s29999_s5 + $0x11ac] ss:$20 sps:$4 sm:$0xff]  }
 0x790   :  { %v26783_v50 = vadd.f32 %v7381_v3, %v7339_v53  ;;  %v7341_v22 = vadd.f32 %v7340_v5, %v26569_v17  ;;  %v21812_v17 = vld [vmem:[%s29999_s5 + $0xfc8] ss:$20 sps:$4 sm:$0xff]   ;;  %v21910_v3 = vld [vmem:[%s29999_s5 + $0xd24] ss:$20 sps:$4 sm:$0xff]   ;;  %v26818_v53 = vpop.f32.mrf.mxu0 }
 0x791   :  { %v7342_v9 = vpop.f32.mrf.mxu1  ;;  %9035 = vmatprep.subr.bf16.mxu0 %v21910_v3 }
 0x792   :  { %v26792_v44 = vadd.f32 %v7383_v11, %v7341_v22  ;;  %v7343_v14 = vadd.f32 %v7342_v9, %v26576_v15  ;;  %9075 = vmatpush2.bf16.msra.mxu1 %v21809_v45  ;;  %v21815_v15 = vld [vmem:[%s29999_s5 + $0xfa0] ss:$20 sps:$4 sm:$0xff]   ;;  %9036 = vmatpush2.bf16.msra.mxu0 %v21908_v62  ;;  %v7467_v45 = vpop.f32.mrf.mxu0  ;;  %v6098_v62 = vadd.f32 %v26538_v32, %v26337_v39 }
 0x793   :  { %9076 = vmatprep.subr.bf16.mxu1 %v21814_v40  ;;  %9095 = vmatprep.subr.bf16.mxu0 %v21916_v51 }
 0x794   :  { %v26801_v25 = vadd.f32 %v7385_v27, %v7343_v14  ;;  %v7469_v21 = vpop.f32.mrf.mxu0 }
 0x796   :  { %9077 = vmatpush2.bf16.msra.mxu1 %v21812_v17  ;;  %v7471_v10 = vpop.f32.mrf.mxu0 }
 0x797   :  { %9078 = vmatprep.subr.bf16.mxu1 %v21817_v59  ;;  %v6096_v59 = vadd.f32 %v26530_v13, %v26321_v24 }
 0x798   :  { %v26820_v11 = vpop.f32.mrf.mxu0 }
 0x799   :  { %30018 = vst [vmem:[#allocation9_spill] sm:$0xff] %v26820_v11 }
 0x79a   :  { %9079 = vmatpush2.bf16.msra.mxu1 %v21815_v15 }
 0x79b   :  { %9134 = vmatprep.subr.bf16.mxu1 %v21823_v61  ;;  %v26836_v61 = vpop.f32.mrf.mxu1 }
 0x7ae   :  { %v20306_v5 = vpop.f32.mrf.mxu0 }
 0x7b0   :  { %v20307_v40 = vpop.f32.mrf.mxu0 }
 0x7b1   :  { %v20308_v22 = vadd.f32 %v20307_v40, %v20306_v5 }
 0x7b2   :  { %v20309_v9 = vpop.f32.mrf.mxu0 }
 0x7b3   :  { %v26823_v54 = vadd.f32 %v20308_v22, %v26592_v8  ;;  %v6100_v8 = vadd.f32 %v26546_v63, %v26351_v48  ;;  %v6141_v22 = vadd.f32 %v26387_v29, %v6098_v62  ;;  %v21821_v29 = vld [vmem:[%s29999_s5 + $0xd00] ss:$20 sps:$4 sm:$0xff]   ;;  %v21839_v62 = vld [vmem:[%s29999_s5 + $0xc88] ss:$20 sps:$4 sm:$0xff]  }
 0x7b4   :  { %v20310_v46 = vpop.f32.mrf.mxu0 }
 0x7b5   :  { %v20311_v14 = vadd.f32 %v20310_v46, %v20309_v9  ;;  %v6143_v13 = vadd.f32 %v26400_v33, %v6100_v8  ;;  %v21829_v33 = vld [vmem:[%s29999_s5 + $0xcdc] ss:$20 sps:$4 sm:$0xff]  }
 0x7b7   :  { %v26826_v17 = vadd.f32 %v20311_v14, %v26598_v18  ;;  %v6139_v18 = vadd.f32 %v26376_v35, %v6096_v59 }
 0x7c6   :  { %v26828_v27 = vpop.f32.mrf.mxu0 }
 0x7c8   :  { %v20566_v15 = vpop.f32.mrf.mxu0 }
 0x7ca   :  { %v26834_v3 = vpop.f32.mrf.mxu0 }
 0x7cc   :  { %v20567_v51 = vpop.f32.mrf.mxu0 }
 0x7cd   :  { %v7424_v5 = vpop.f32.mrf.mxu1  ;;  %v21847_v51 = vld [vmem:[%s29999_s5 + $0xc64] ss:$20 sps:$4 sm:$0xff]  }
 0x7ce   :  { %v7425_v40 = vadd.f32 %v7424_v5, %v6139_v18 }
 0x7cf   :  { %v7426_v9 = vpop.f32.mrf.mxu1 }
 0x7d0   :  { %v7427_v24 = vadd.f32 %v7426_v9, %v6141_v22  ;;  %v7468_v46 = vadd.f32 %v7467_v45, %v7425_v40  ;;  %v21833_v45 = vld [vmem:[%s29999_s5 + $0xcb0] ss:$20 sps:$4 sm:$0xff]   ;;  %v21845_v22 = vld [vmem:[%s29999_s5 + $0xc60] ss:$20 sps:$4 sm:$0xff]  }
 0x7d1   :  { %v7428_v39 = vpop.f32.mrf.mxu1 }
 0x7d2   :  { %v7429_v32 = vadd.f32 %v7428_v39, %v6143_v13  ;;  %v7730_v14 = vpop.f32.mrf.mxu0  ;;  %v7470_v15 = vadd.f32 %v7469_v21, %v7427_v24  ;;  %v21841_v21 = vld [vmem:[%s29999_s5 + $0xc8c] ss:$20 sps:$4 sm:$0xff]   ;;  %v21853_v24 = vld [vmem:[%s29999_s5 + $0xc3c] ss:$20 sps:$4 sm:$0xff]  }
 0x7d3   :  { %v21851_v13 = vld [vmem:[%s29999_s5 + $0xc38] ss:$20 sps:$4 sm:$0xff]  }
 0x7d4   :  { %v7732_v55 = vpop.f32.mrf.mxu0  ;;  %v7472_v43 = vadd.f32 %v7471_v10, %v7429_v32  ;;  %v26867_v10 = vpop.f32.mrf.mxu1  ;;  %v21865_v39 = vld [vmem:[%s29999_s5 + $0xbec] ss:$20 sps:$4 sm:$0xff]   ;;  %v21863_v32 = vld [vmem:[%s29999_s5 + $0xbe8] ss:$20 sps:$4 sm:$0xff]  }
 0x7d5   :  { %30019 = vst [vmem:[#allocation10_spill] sm:$0xff] %v26867_v10 }
 0x7d6   :  { %v7734_v12 = vpop.f32.mrf.mxu0 }
 0x7d7   :  { %v26843_v48 = vpack.c.bf16 %v7734_v12, %v7730_v14  ;;  %v21827_v12 = vld [vmem:[%s29999_s5 + $0xcd8] ss:$20 sps:$4 sm:$0xff]  }
 0x7d8   :  { %v7736_v63 = vpop.f32.mrf.mxu0  ;;  %v21871_v14 = vld [vmem:[%s29999_s5 + $0xe44] ss:$20 sps:$4 sm:$0xff]  }
 0x7d9   :  { %v26845_v35 = vpack.c.bf16 %v7736_v63, %v7732_v55  ;;  %v21835_v55 = vld [vmem:[%s29999_s5 + $0xcb4] ss:$20 sps:$4 sm:$0xff]   ;;  %v21877_v63 = vld [vmem:[%s29999_s5 + $0xe1c] ss:$20 sps:$4 sm:$0xff]  }
 0x7db   :  { %9080 = vmatprep.mubr.bf16.mxu1 %v26845_v35 }
 0x7dc   :  { %9081 = vmatmul.mubr.bf16.vlgmr.msra.gmra.mxu1 %v26843_v48 }
 0x7dd   :  { %9135 = vmatpush1.bf16.msra.mxu1 %v21821_v29  ;;  %v21875_v29 = vld [vmem:[%s29999_s5 + $0xe18] ss:$20 sps:$4 sm:$0xff]  }
 0x7de   :  { %9136 = vmatprep.subr.bf16.mxu1 %v21829_v33  ;;  %v21883_v33 = vld [vmem:[%s29999_s5 + $0xdf4] ss:$20 sps:$4 sm:$0xff]  }
 0x7e1   :  { %9137 = vmatpush1.bf16.msra.mxu1 %v21827_v12  ;;  %v21881_v12 = vld [vmem:[%s29999_s5 + $0xdf0] ss:$20 sps:$4 sm:$0xff]  }
 0x7e2   :  { %9138 = vmatprep.subr.bf16.mxu1 %v21835_v55  ;;  %v21889_v55 = vld [vmem:[%s29999_s5 + $0xdcc] ss:$20 sps:$4 sm:$0xff]  }
 0x7e5   :  { %9139 = vmatpush1.bf16.msra.mxu1 %v21833_v45  ;;  %v7510_v59 = vpop.f32.mrf.mxu1 }
 0x7e6   :  { %v26872_v8 = vadd.f32 %v7510_v59, %v7468_v46  ;;  %9140 = vmatprep.subr.bf16.mxu1 %v21841_v21  ;;  %v21859_v46 = vld [vmem:[%s29999_s5 + $0xc14] ss:$20 sps:$4 sm:$0xff]  }
 0x7e7   :  { %v7512_v18 = vpop.f32.mrf.mxu1  ;;  %v21887_v59 = vld [vmem:[%s29999_s5 + $0xdc8] ss:$20 sps:$4 sm:$0xff]  }
 0x7e8   :  { %v26877_v5 = vadd.f32 %v7512_v18, %v7470_v15  ;;  %v21869_v15 = vld [vmem:[%s29999_s5 + $0xe40] ss:$20 sps:$4 sm:$0xff]  }
 0x7e9   :  { %9141 = vmatpush1.bf16.msra.mxu1 %v21839_v62  ;;  %v7514_v40 = vpop.f32.mrf.mxu1  ;;  %v21895_v62 = vld [vmem:[%s29999_s5 + $0xda4] ss:$20 sps:$4 sm:$0xff]  }
 0x7ea   :  { %v26882_v9 = vadd.f32 %v7514_v40, %v7472_v43  ;;  %9142 = vmatprep.subr.bf16.mxu1 %v21847_v51  ;;  %v21857_v43 = vld [vmem:[%s29999_s5 + $0xc10] ss:$20 sps:$4 sm:$0xff]  }
 0x7eb   :  { %v26923_v45 = vpop.f32.mrf.mxu1 }
 0x7ec   :  { %30020 = vst [vmem:[#allocation11_spill] sm:$0xff] %v26923_v45 }
 0x7ed   :  { %9143 = vmatpush1.bf16.msra.mxu1 %v21845_v22  ;;  %v21893_v22 = vld [vmem:[%s29999_s5 + $0xda0] ss:$20 sps:$4 sm:$0xff]  }
 0x7ee   :  { %9144 = vmatprep.subr.bf16.mxu1 %v21853_v24 }
 0x7f1   :  { %9145 = vmatpush1.bf16.msra.mxu1 %v21851_v13  ;;  %v21901_v13 = vld [vmem:[%s29999_s5 + $0xd7c] ss:$20 sps:$4 sm:$0xff]  }
 0x7f2   :  { %9146 = vmatprep.subr.bf16.mxu1 %v21859_v46 }
 0x7f5   :  { %9147 = vmatpush1.bf16.msra.mxu1 %v21857_v43 }
 0x7f6   :  { %9148 = vmatprep.subr.bf16.mxu1 %v21865_v39  ;;  %v21899_v39 = vld [vmem:[%s29999_s5 + $0xd78] ss:$20 sps:$4 sm:$0xff]  }
 0x7f9   :  { %9149 = vmatpush1.bf16.msra.mxu1 %v21863_v32 }
 0x7fa   :  { %9150 = vmatprep.subr.bf16.mxu1 %v21871_v14 }
 0x7fd   :  { %9151 = vmatpush2.bf16.msra.mxu1 %v21869_v15  ;;  %v21905_v15 = vld [vmem:[%s29999_s5 + $0xd50] ss:$20 sps:$4 sm:$0xff]  }
 0x7fe   :  { %9152 = vmatprep.subr.bf16.mxu1 %v21877_v63  ;;  %v21913_v63 = vld [vmem:[%s29999_s5 + $0xd2c] ss:$20 sps:$4 sm:$0xff]  }
 0x801   :  { %9153 = vmatpush2.bf16.msra.mxu1 %v21875_v29 }
 0x802   :  { %9154 = vmatprep.subr.bf16.mxu1 %v21883_v33  ;;  %v21911_v33 = vld [vmem:[%s29999_s5 + $0xd28] ss:$20 sps:$4 sm:$0xff]  }
 0x805   :  { %9155 = vmatpush2.bf16.msra.mxu1 %v21881_v12  ;;  %v20328_v21 = vpop.f32.mrf.mxu1 }
 0x806   :  { %9156 = vmatprep.subr.bf16.mxu1 %v21889_v55  ;;  %v21919_v55 = vld [vmem:[%s29999_s5 + $0x11b4] ss:$20 sps:$4 sm:$0xff]  }
 0x807   :  { %v20329_v51 = vpop.f32.mrf.mxu1 }
 0x808   :  { %v20330_v18 = vadd.f32 %v20329_v51, %v20328_v21  ;;  %v21917_v51 = vld [vmem:[%s29999_s5 + $0x11b0] ss:$20 sps:$4 sm:$0xff]  }
 0x809   :  { %9157 = vmatpush2.bf16.msra.mxu1 %v21887_v59  ;;  %v20331_v40 = vpop.f32.mrf.mxu1  ;;  %v21914_v59 = vld [vmem:[%s29999_s5 + $0x11a8] ss:$20 sps:$4 sm:$0xff]  }
 0x80a   :  { %v26935_v24 = vadd.f32 %v20330_v18, %v26823_v54  ;;  %9158 = vmatprep.subr.bf16.mxu1 %v21895_v62  ;;  %v21907_v54 = vld [vmem:[%s29999_s5 + $0xd54] ss:$20 sps:$4 sm:$0xff]   ;;  %v21922_v18 = vld [vmem:[%s29999_s5 + $0x1184] ss:$20 sps:$4 sm:$0xff]  }
 0x80b   :  { %v20332_v46 = vpop.f32.mrf.mxu1 }
 0x80c   :  { %v20333_v43 = vadd.f32 %v20332_v46, %v20331_v40  ;;  %v21925_v40 = vld [vmem:[%s29999_s5 + $0x118c] ss:$20 sps:$4 sm:$0xff]   ;;  %v21928_v46 = vld [vmem:[%s29999_s5 + $0x115c] ss:$20 sps:$4 sm:$0xff]  }
 0x80d   :  { %9159 = vmatpush2.bf16.msra.mxu1 %v21893_v22  ;;  %v21920_v22 = vld [vmem:[%s29999_s5 + $0x1180] ss:$20 sps:$4 sm:$0xff]  }
 0x80e   :  { %v26944_v32 = vadd.f32 %v20333_v43, %v26826_v17  ;;  %9160 = vmatprep.subr.bf16.mxu1 %v21901_v13  ;;  %v21923_v13 = vld [vmem:[%s29999_s5 + $0x1188] ss:$20 sps:$4 sm:$0xff]  }
 0x811   :  { %9161 = vmatpush2.bf16.msra.mxu1 %v21899_v39  ;;  %v7687_v14 = vpop.f32.mrf.mxu1  ;;  %v21931_v39 = vld [vmem:[%s29999_s5 + $0x1164] ss:$20 sps:$4 sm:$0xff]  }
 0x812   :  { %9162 = vmatprep.subr.bf16.mxu1 %v21907_v54 }
 0x813   :  { %v7689_v29 = vpop.f32.mrf.mxu1 }
 0x815   :  { %9163 = vmatpush2.bf16.msra.mxu1 %v21905_v15  ;;  %v7691_v17 = vpop.f32.mrf.mxu1  ;;  %v21929_v15 = vld [vmem:[%s29999_s5 + $0x1160] ss:$20 sps:$4 sm:$0xff]  }
 0x816   :  { %9164 = vmatprep.subr.bf16.mxu1 %v21913_v63  ;;  %v26966_v62 = vpack.c.bf16 %v7691_v17, %v7687_v14  ;;  %v21926_v14 = vld [vmem:[%s29999_s5 + $0x1158] ss:$20 sps:$4 sm:$0xff]   ;;  %v21934_v63 = vld [vmem:[%s29999_s5 + $0x1134] ss:$20 sps:$4 sm:$0xff]   ;;  %v21937_v17 = vld [vmem:[%s29999_s5 + $0x113c] ss:$20 sps:$4 sm:$0xff]  }
 0x817   :  { %v7693_v12 = vpop.f32.mrf.mxu1 }
 0x818   :  { %v26961_v21 = vpack.c.bf16 %v7693_v12, %v7689_v29  ;;  %v21932_v12 = vld [vmem:[%s29999_s5 + $0x1130] ss:$20 sps:$4 sm:$0xff]  }
 0x819   :  { %9165 = vmatpush2.bf16.msra.mxu1 %v21911_v33 }
 0x81a   :  { %9037 = vmatprep.mubr.bf16.mxu0 %v26961_v21  ;;  %9166 = vmatprep.mubr.bf16.mxu1 %v26961_v21 }
 0x81b   :  { %9224 = vmatprep.subr.bf16.mxu1 %v21919_v55  ;;  %9038 = vmatmul.mubr.bf16.vlgmr.msra.gmra.mxu0 %v26966_v62  ;;  %v21935_v55 = vld [vmem:[%s29999_s5 + $0x1138] ss:$20 sps:$4 sm:$0xff]  }
 0x81c   :  { %9096 = vmatpush1.bf16.msra.mxu0 %v21914_v59  ;;  %9167 = vmatmul.mubr.bf16.vlgmr.msra.gmra.mxu1 %v26966_v62  ;;  %v21940_v59 = vld [vmem:[%s29999_s5 + $0x110c] ss:$20 sps:$4 sm:$0xff]  }
 0x81d   :  { %9225 = vmatpush1.bf16.msra.mxu1 %v21917_v51  ;;  %9097 = vmatprep.subr.bf16.mxu0 %v21922_v18  ;;  %v7773_v43 = vpop.f32.mrf.mxu1  ;;  %v21943_v51 = vld [vmem:[%s29999_s5 + $0x1114] ss:$20 sps:$4 sm:$0xff]  }
 0x81e   :  { %9226 = vmatprep.subr.bf16.mxu1 %v21925_v40  ;;  %9123 = vmatprep.mubr.bf16.mxu0 %v30013_v2  ;;  %v21938_v18 = vld [vmem:[%s29999_s5 + $0x1108] ss:$20 sps:$4 sm:$0xff]   ;;  %v21941_v40 = vld [vmem:[%s29999_s5 + $0x1110] ss:$20 sps:$4 sm:$0xff]  }
 0x81f   :  { %v20576_v54 = vpop.f32.mrf.mxu1  ;;  %9252 = vmatprep.mubr.bf16.mxu1 %v30013_v2 }
 0x820   :  { %9098 = vmatpush1.bf16.msra.mxu0 %v21920_v22  ;;  %v21946_v22 = vld [vmem:[%s29999_s5 + $0x10e4] ss:$20 sps:$4 sm:$0xff]  }
 0x821   :  { %9227 = vmatpush1.bf16.msra.mxu1 %v21923_v13  ;;  %9099 = vmatprep.subr.bf16.mxu0 %v21928_v46  ;;  %v7776_v29 = vpop.f32.mrf.mxu1  ;;  %v21949_v13 = vld [vmem:[%s29999_s5 + $0x10ec] ss:$20 sps:$4 sm:$0xff]   ;;  %v21952_v54 = vld [vmem:[%s29999_s5 + $0xf84] ss:$20 sps:$4 sm:$0xff]  }
 0x822   :  { %9228 = vmatprep.subr.bf16.mxu1 %v21931_v39  ;;  %v21944_v46 = vld [vmem:[%s29999_s5 + $0x10e0] ss:$20 sps:$4 sm:$0xff]   ;;  %v21947_v39 = vld [vmem:[%s29999_s5 + $0x10e8] ss:$20 sps:$4 sm:$0xff]  }
 0x823   :  { %v20577_v33 = vpop.f32.mrf.mxu1 }
 0x824   :  { %9100 = vmatpush1.bf16.msra.mxu0 %v21926_v14  ;;  %v21953_v14 = vld [vmem:[%s29999_s5 + $0x10c8] ss:$20 sps:$4 sm:$0xff]  }
 0x825   :  { %9229 = vmatpush1.bf16.msra.mxu1 %v21929_v15  ;;  %9101 = vmatprep.subr.bf16.mxu0 %v21934_v63  ;;  %v21950_v15 = vld [vmem:[%s29999_s5 + $0xf80] ss:$20 sps:$4 sm:$0xff]   ;;  %v27046_v63 = vpack.c.bf16 %v7776_v29, %v7773_v43  ;;  %v21957_v33 = vld [vmem:[%s29999_s5 + $0xf5c] ss:$20 sps:$4 sm:$0xff]   ;;  %v21955_v43 = vld [vmem:[%s29999_s5 + $0xf58] ss:$20 sps:$4 sm:$0xff]  }
 0x826   :  { %9230 = vmatprep.subr.bf16.mxu1 %v21937_v17  ;;  %v21954_v17 = vld [vmem:[%s29999_s5 + $0xf88] ss:$20 sps:$4 sm:$0xff]   ;;  %v21959_v29 = vld [vmem:[%s29999_s5 + $0xf60] ss:$20 sps:$4 sm:$0xff]  }
 0x828   :  { %9102 = vmatpush1.bf16.msra.mxu0 %v21932_v12  ;;  %v21958_v12 = vld [vmem:[%s29999_s5 + $0x10a0] ss:$20 sps:$4 sm:$0xff]  }
 0x829   :  { %9231 = vmatpush1.bf16.msra.mxu1 %v21935_v55  ;;  %9103 = vmatprep.subr.bf16.mxu0 %v21940_v59  ;;  %v21962_v55 = vld [vmem:[%s29999_s5 + $0xf34] ss:$20 sps:$4 sm:$0xff]   ;;  %v21963_v59 = vld [vmem:[%s29999_s5 + $0x1078] ss:$20 sps:$4 sm:$0xff]  }
 0x82a   :  { %9232 = vmatprep.subr.bf16.mxu1 %v21943_v51  ;;  %v21960_v51 = vld [vmem:[%s29999_s5 + $0xf30] ss:$20 sps:$4 sm:$0xff]  }
 0x82c   :  { %9104 = vmatpush1.bf16.msra.mxu0 %v21938_v18  ;;  %v21964_v18 = vld [vmem:[%s29999_s5 + $0xf38] ss:$20 sps:$4 sm:$0xff]  }
 0x82d   :  { %9233 = vmatpush1.bf16.msra.mxu1 %v21941_v40  ;;  %9105 = vmatprep.subr.bf16.mxu0 %v21946_v22  ;;  %v21968_v40 = vld [vmem:[%s29999_s5 + $0x1050] ss:$20 sps:$4 sm:$0xff]   ;;  %v21965_v22 = vld [vmem:[%s29999_s5 + $0xf08] ss:$20 sps:$4 sm:$0xff]  }
 0x82e   :  { %9234 = vmatprep.subr.bf16.mxu1 %v21949_v13  ;;  %v21969_v13 = vld [vmem:[%s29999_s5 + $0xf10] ss:$20 sps:$4 sm:$0xff]  }
 0x830   :  { %9106 = vmatpush1.bf16.msra.mxu0 %v21944_v46  ;;  %v21972_v46 = vld [vmem:[%s29999_s5 + $0xee4] ss:$20 sps:$4 sm:$0xff]  }
 0x831   :  { %9235 = vmatpush1.bf16.msra.mxu1 %v21947_v39  ;;  %9177 = vmatprep.subr.bf16.mxu0 %v21952_v54  ;;  %v21973_v39 = vld [vmem:[%s29999_s5 + $0x1028] ss:$20 sps:$4 sm:$0xff]   ;;  %v21970_v54 = vld [vmem:[%s29999_s5 + $0xee0] ss:$20 sps:$4 sm:$0xff]  }
 0x832   :  { %20367 = vmatprep.subr.bf16.mxu1 %v21953_v14  ;;  %v21974_v14 = vld [vmem:[%s29999_s5 + $0xee8] ss:$20 sps:$4 sm:$0xff]  }
 0x833   :  { %18670 = vmatmul.mubr.msk.bf16.vlgmr.msra.gmra.mxu0 %vm4077_vm5, %v27046_v63 }
 0x834   :  { %18671 = vmatmul.mubr.msk.bf16.vlgmr.msra.gmra.mxu1 %vm4077_vm5, %v27046_v63  ;;  %9178 = vmatpush1.bf16.msra.mxu0 %v21950_v15  ;;  %v21977_v15 = vld [vmem:[%s29999_s5 + $0xebc] ss:$20 sps:$4 sm:$0xff]  }
 0x835   :  { %9209 = vmatprep.mubr.bf16.mxu0 %v26845_v35  ;;  %20368 = vmatpush3.bf16.msra.mxu1 %v21954_v17  ;;  %v21978_v17 = vld [vmem:[%s29999_s5 + $0x1000] ss:$20 sps:$4 sm:$0xff]  }
 0x836   :  { %9336 = vmatprep.mubr.bf16.mxu1 %v26845_v35  ;;  %9179 = vmatprep.subr.bf16.mxu0 %v21957_v33  ;;  %v21967_v35 = vld [vmem:[%s29999_s5 + $0xf0c] ss:$20 sps:$4 sm:$0xff]  }
 0x837   :  { %20369 = vmatprep.subr.bf16.mxu1 %v21958_v12  ;;  %v21975_v33 = vld [vmem:[%s29999_s5 + $0xeb8] ss:$20 sps:$4 sm:$0xff]   ;;  %v21979_v12 = vld [vmem:[%s29999_s5 + $0xec0] ss:$20 sps:$4 sm:$0xff]  }
 0x838   :  { %9180 = vmatpush1.bf16.msra.mxu0 %v21955_v43  ;;  %v21982_v43 = vld [vmem:[%s29999_s5 + $0xe94] ss:$20 sps:$4 sm:$0xff]  }
 0x839   :  { %20370 = vmatpush3.bf16.msra.mxu1 %v21959_v29  ;;  %9181 = vmatprep.subr.bf16.mxu0 %v21962_v55  ;;  %v21983_v29 = vld [vmem:[%s29999_s5 + $0xfd8] ss:$20 sps:$4 sm:$0xff]   ;;  %v21980_v55 = vld [vmem:[%s29999_s5 + $0xe90] ss:$20 sps:$4 sm:$0xff]  }
 0x83a   :  { %20371 = vmatprep.subr.bf16.mxu1 %v21963_v59  ;;  %v21984_v59 = vld [vmem:[%s29999_s5 + $0xe98] ss:$20 sps:$4 sm:$0xff]  }
 0x83c   :  { %9182 = vmatpush1.bf16.msra.mxu0 %v21960_v51  ;;  %v21987_v51 = vld [vmem:[%s29999_s5 + $0xe6c] ss:$20 sps:$4 sm:$0xff]  }
 0x83d   :  { %20372 = vmatpush3.bf16.msra.mxu1 %v21964_v18  ;;  %9183 = vmatprep.subr.bf16.mxu0 %v21967_v35  ;;  %v21988_v18 = vld [vmem:[%s29999_s5 + $0xfb0] ss:$20 sps:$4 sm:$0xff]   ;;  %v21985_v35 = vld [vmem:[%s29999_s5 + $0xe68] ss:$20 sps:$4 sm:$0xff]  }
 0x83e   :  { %20373 = vmatprep.subr.bf16.mxu1 %v21968_v40  ;;  %v21989_v40 = vld [vmem:[%s29999_s5 + $0xe70] ss:$20 sps:$4 sm:$0xff]  }
 0x840   :  { %9184 = vmatpush1.bf16.msra.mxu0 %v21965_v22  ;;  %v21992_v22 = vld [vmem:[%s29999_s5 + $0x10c4] ss:$20 sps:$4 sm:$0xff]  }
 0x841   :  { %20374 = vmatpush3.bf16.msra.mxu1 %v21969_v13  ;;  %9185 = vmatprep.subr.bf16.mxu0 %v21972_v46  ;;  %v21990_v13 = vld [vmem:[%s29999_s5 + $0x10c0] ss:$20 sps:$4 sm:$0xff]   ;;  %v21995_v46 = vld [vmem:[%s29999_s5 + $0x109c] ss:$20 sps:$4 sm:$0xff]  }
 0x842   :  { %20375 = vmatprep.subr.bf16.mxu1 %v21973_v39  ;;  %v21993_v39 = vld [vmem:[%s29999_s5 + $0x1098] ss:$20 sps:$4 sm:$0xff]  }
 0x844   :  { %9186 = vmatpush1.bf16.msra.mxu0 %v21970_v54  ;;  %v21998_v54 = vld [vmem:[%s29999_s5 + $0x1074] ss:$20 sps:$4 sm:$0xff]  }
 0x845   :  { %20376 = vmatpush3.bf16.msra.mxu1 %v21974_v14  ;;  %9187 = vmatprep.subr.bf16.mxu0 %v21977_v15  ;;  %v21996_v14 = vld [vmem:[%s29999_s5 + $0x1070] ss:$20 sps:$4 sm:$0xff]   ;;  %v22001_v15 = vld [vmem:[%s29999_s5 + $0x104c] ss:$20 sps:$4 sm:$0xff]  }
 0x846   :  { %20377 = vmatprep.subr.bf16.mxu1 %v21978_v17  ;;  %v21999_v17 = vld [vmem:[%s29999_s5 + $0x1048] ss:$20 sps:$4 sm:$0xff]  }
 0x848   :  { %9188 = vmatpush1.bf16.msra.mxu0 %v21975_v33  ;;  %v27176_v33 = vld [vmem:[%s29998_s4 + $0x18] sm:$0xff]  }
 0x849   :  { %20378 = vmatpush3.bf16.msra.mxu1 %v21979_v12  ;;  %9189 = vmatprep.subr.bf16.mxu0 %v21982_v43  ;;  %v22005_v12 = vld [vmem:[%s29999_s5 + $0x1024] ss:$20 sps:$4 sm:$0xff]   ;;  %v22003_v43 = vld [vmem:[%s29999_s5 + $0x1020] ss:$20 sps:$4 sm:$0xff]  }
 0x84a   :  { %20379 = vmatprep.subr.bf16.mxu1 %v21983_v29  ;;  %v22008_v29 = vld [vmem:[%s29999_s5 + $0xffc] ss:$20 sps:$4 sm:$0xff]  }
 0x84c   :  { %9190 = vmatpush1.bf16.msra.mxu0 %v21980_v55  ;;  %v22006_v55 = vld [vmem:[%s29999_s5 + $0xff8] ss:$20 sps:$4 sm:$0xff]  }
 0x84d   :  { %20380 = vmatpush3.bf16.msra.mxu1 %v21984_v59  ;;  %9191 = vmatprep.subr.bf16.mxu0 %v21987_v51  ;;  %v22011_v59 = vld [vmem:[%s29999_s5 + $0xfd4] ss:$20 sps:$4 sm:$0xff]   ;;  %v22009_v51 = vld [vmem:[%s29999_s5 + $0xfd0] ss:$20 sps:$4 sm:$0xff]  }
 0x84e   :  { %20381 = vmatprep.subr.bf16.mxu1 %v21988_v18  ;;  %v22014_v18 = vld [vmem:[%s29999_s5 + $0xfac] ss:$20 sps:$4 sm:$0xff]  }
 0x850   :  { %9192 = vmatpush1.bf16.msra.mxu0 %v21985_v35  ;;  %v22012_v35 = vld [vmem:[%s29999_s5 + $0xfa8] ss:$20 sps:$4 sm:$0xff]  }
 0x851   :  { %20382 = vmatpush3.bf16.msra.mxu1 %v21989_v40  ;;  %9193 = vmatprep.subr.bf16.mxu0 %v21992_v22  ;;  %v22015_v40 = vld [vmem:[%s29999_s5 + $0xe48] ss:$20 sps:$4 sm:$0xff]  }
 0x852   :  { %18676 = vmatprep.subr.msk.bf16.mxu1 %vm4150_vm2, %v25179_v26  ;;  %v22016_v22 = vld [vmem:[%s29999_s5 + $0xd08] ss:$20 sps:$4 sm:$0xff]  }
 0x854   :  { %9337 = vmatmul.mubr.bf16.vlgmr.msra.gmra.mxu1 %v26843_v48  ;;  %9194 = vmatpush2.bf16.msra.mxu0 %v21990_v13  ;;  %v22017_v13 = vld [vmem:[%s29999_s5 + $0xe20] ss:$20 sps:$4 sm:$0xff]  }
 0x855   :  { %9418 = vmatpush1.bf16.msra.mxu1 %v25188_v19  ;;  %9195 = vmatprep.subr.bf16.mxu0 %v21995_v46  ;;  %v22018_v46 = vld [vmem:[%s29999_s5 + $0xce0] ss:$20 sps:$4 sm:$0xff]  }
 0x856   :  { %9419 = vmatprep.subr.bf16.mxu1 %v25193_v0  ;;  %9439 = vmatprep.mubr.bf16.mxu1 %v30013_v2 }
 0x858   :  { %9196 = vmatpush2.bf16.msra.mxu0 %v21993_v39  ;;  %v22019_v39 = vld [vmem:[%s29999_s5 + $0xdf8] ss:$20 sps:$4 sm:$0xff]  }
 0x859   :  { %9420 = vmatpush1.bf16.msra.mxu1 %v25173_v20  ;;  %9197 = vmatprep.subr.bf16.mxu0 %v21998_v54  ;;  %v22020_v54 = vld [vmem:[%s29999_s5 + $0xcb8] ss:$20 sps:$4 sm:$0xff]  }
 0x85a   :  { %9421 = vmatprep.subr.bf16.mxu1 %v25205_v6 }
 0x85c   :  { %9198 = vmatpush2.bf16.msra.mxu0 %v21996_v14  ;;  %v22023_v14 = vld [vmem:[%s29999_s5 + $0xda8] ss:$20 sps:$4 sm:$0xff]  }
 0x85d   :  { %9422 = vmatpush1.bf16.msra.mxu1 %v25155_v42  ;;  %9199 = vmatprep.subr.bf16.mxu0 %v22001_v15  ;;  %v22055_v15 = vld [vmem:[%s29999_s5 + $0x12e8] ss:$20 sps:$4 sm:$0xff]  }
 0x85e   :  { %18678 = vmatprep.subr.msk.bf16.mxu1 %vm4150_vm2, %v25181_v56 }
 0x860   :  { %9200 = vmatpush2.bf16.msra.mxu0 %v21999_v17  ;;  %18677 = vmatmul.mubr.msk.bf16.vlgmr.msra.gmra.mxu1 %vm4146_vm3, %v27176_v33  ;;  %v22057_v17 = vld [vmem:[%s29999_s5 + $0x12ec] ss:$20 sps:$4 sm:$0xff]  }
 0x861   :  { %9461 = vmatpush1.bf16.msra.mxu1 %v25191_v4  ;;  %9201 = vmatprep.subr.bf16.mxu0 %v22005_v12  ;;  %v22024_v12 = vld [vmem:[%s29999_s5 + $0xc68] ss:$20 sps:$4 sm:$0xff]  }
 0x862   :  { %9462 = vmatprep.subr.bf16.mxu1 %v25195_v31  ;;  %9482 = vmatprep.mubr.bf16.mxu1 %v30013_v2 }
 0x864   :  { %9202 = vmatpush2.bf16.msra.mxu0 %v22003_v43  ;;  %v22063_v43 = vld [vmem:[%s29999_s5 + $0x12c4] ss:$20 sps:$4 sm:$0xff]  }
 0x865   :  { %9463 = vmatpush1.bf16.msra.mxu1 %v25175_v41  ;;  %9203 = vmatprep.subr.bf16.mxu0 %v22008_v29  ;;  %v22025_v29 = vld [vmem:[%s29999_s5 + $0xd80] ss:$20 sps:$4 sm:$0xff]  }
 0x866   :  { %9464 = vmatprep.subr.bf16.mxu1 %v25211_v23 }
 0x868   :  { %9204 = vmatpush2.bf16.msra.mxu0 %v22006_v55  ;;  %v22061_v55 = vld [vmem:[%s29999_s5 + $0x12c0] ss:$20 sps:$4 sm:$0xff]  }
 0x869   :  { %9465 = vmatpush1.bf16.msra.mxu1 %v25157_v60  ;;  %9205 = vmatprep.subr.bf16.mxu0 %v22011_v59  ;;  %v22026_v59 = vld [vmem:[%s29999_s5 + $0xc40] ss:$20 sps:$4 sm:$0xff]  }
 0x86a   :  { %10759 = vmatprep.subr.bf16.mxu1 %v22057_v17  ;;  %v22087_v17 = vld [vmem:[%s29999_s5 + $0x1224] ss:$20 sps:$4 sm:$0xff]  }
 0x86c   :  { %18679 = vmatmul.mubr.msk.bf16.vlgmr.msra.gmra.mxu1 %vm4146_vm3, %v27176_v33  ;;  %9206 = vmatpush2.bf16.msra.mxu0 %v22009_v51  ;;  %v22027_v51 = vld [vmem:[%s29999_s5 + $0xd58] ss:$20 sps:$4 sm:$0xff]  }
 0x86d   :  { %9207 = vmatprep.subr.bf16.mxu0 %v22014_v18  ;;  %10760 = vmatpush1.bf16.msra.mxu1 %v22055_v15  ;;  %v22028_v18 = vld [vmem:[%s29999_s5 + $0xc18] ss:$20 sps:$4 sm:$0xff]   ;;  %v22034_v15 = vld [vmem:[%s29999_s5 + $0x1140] ss:$20 sps:$4 sm:$0xff]  }
 0x86e   :  { %10761 = vmatprep.subr.bf16.mxu1 %v22063_v43  ;;  %v22035_v43 = vld [vmem:[%s29999_s5 + $0x1118] ss:$20 sps:$4 sm:$0xff]  }
 0x870   :  { %9208 = vmatpush2.bf16.msra.mxu0 %v22012_v35  ;;  %v22029_v35 = vld [vmem:[%s29999_s5 + $0xd30] ss:$20 sps:$4 sm:$0xff]  }
 0x871   :  { %20345 = vmatprep.subr.bf16.mxu0 %v22015_v40  ;;  %10762 = vmatpush1.bf16.msra.mxu1 %v22061_v55  ;;  %v22030_v40 = vld [vmem:[%s29999_s5 + $0xbf0] ss:$20 sps:$4 sm:$0xff]   ;;  %v22091_v55 = vld [vmem:[%s29999_s5 + $0x11f8] ss:$20 sps:$4 sm:$0xff]  }
 0x873   :  { %9210 = vmatmul.mubr.bf16.vlgmr.msra.gmra.mxu0 %v26843_v48  ;;  %v22021_v48 = vld [vmem:[%s29999_s5 + $0xdd0] ss:$20 sps:$4 sm:$0xff]  }
 0x874   :  { %20346 = vmatpush3.bf16.msra.mxu0 %v22016_v22  ;;  %9295 = vmatprep.mubr.bf16.mxu0 %v26961_v21  ;;  %v22022_v21 = vld [vmem:[%s29999_s5 + $0xc90] ss:$20 sps:$4 sm:$0xff]   ;;  %v22031_v22 = vld [vmem:[%s29999_s5 + $0x11b8] ss:$20 sps:$4 sm:$0xff]  }
 0x875   :  { %20347 = vmatprep.subr.bf16.mxu0 %v22017_v13  ;;  %v22069_v13 = vld [vmem:[%s29999_s5 + $0x129c] ss:$20 sps:$4 sm:$0xff]  }
 0x876   :  { %10763 = vmatprep.subr.bf16.mxu1 %v22069_v13  ;;  %v22039_v13 = vld [vmem:[%s29999_s5 + $0x156c] ss:$20 sps:$4 sm:$0xff]  }
 0x878   :  { %20348 = vmatpush3.bf16.msra.mxu0 %v22018_v46  ;;  %v22032_v46 = vld [vmem:[%s29999_s5 + $0x1190] ss:$20 sps:$4 sm:$0xff]  }
 0x879   :  { %20349 = vmatprep.subr.bf16.mxu0 %v22019_v39  ;;  %v22067_v39 = vld [vmem:[%s29999_s5 + $0x1298] ss:$20 sps:$4 sm:$0xff]  }
 0x87a   :  { %10764 = vmatpush1.bf16.msra.mxu1 %v22067_v39  ;;  %v22037_v39 = vld [vmem:[%s29999_s5 + $0x1568] ss:$20 sps:$4 sm:$0xff]  }
 0x87c   :  { %20350 = vmatpush3.bf16.msra.mxu0 %v22020_v54  ;;  %v22033_v54 = vld [vmem:[%s29999_s5 + $0x1168] ss:$20 sps:$4 sm:$0xff]  }
 0x87d   :  { %20351 = vmatprep.subr.bf16.mxu0 %v22021_v48  ;;  %v22073_v48 = vld [vmem:[%s29999_s5 + $0x1270] ss:$20 sps:$4 sm:$0xff]  }
 0x880   :  { %20352 = vmatpush3.bf16.msra.mxu0 %v22022_v21  ;;  %v22079_v21 = vld [vmem:[%s29999_s5 + $0x1248] ss:$20 sps:$4 sm:$0xff]  }
 0x881   :  { %20353 = vmatprep.subr.bf16.mxu0 %v22023_v14  ;;  %v22081_v14 = vld [vmem:[%s29999_s5 + $0x124c] ss:$20 sps:$4 sm:$0xff]  }
 0x884   :  { %20354 = vmatpush3.bf16.msra.mxu0 %v22024_v12  ;;  %v22085_v12 = vld [vmem:[%s29999_s5 + $0x1220] ss:$20 sps:$4 sm:$0xff]  }
 0x885   :  { %20355 = vmatprep.subr.bf16.mxu0 %v22025_v29  ;;  %v22093_v29 = vld [vmem:[%s29999_s5 + $0x11fc] ss:$20 sps:$4 sm:$0xff]  }
 0x888   :  { %20356 = vmatpush3.bf16.msra.mxu0 %v22026_v59  ;;  %v22036_v59 = vld [vmem:[%s29999_s5 + $0x10f0] ss:$20 sps:$4 sm:$0xff]  }
 0x889   :  { %20357 = vmatprep.subr.bf16.mxu0 %v22027_v51  ;;  %v22099_v51 = vld [vmem:[%s29999_s5 + $0x11d4] ss:$20 sps:$4 sm:$0xff]  }
 0x88c   :  { %20358 = vmatpush3.bf16.msra.mxu0 %v22028_v18  ;;  %v22097_v18 = vld [vmem:[%s29999_s5 + $0x11d0] ss:$20 sps:$4 sm:$0xff]  }
 0x88d   :  { %20359 = vmatprep.subr.bf16.mxu0 %v22029_v35  ;;  %v22105_v35 = vld [vmem:[%s29999_s5 + $0x142c] ss:$20 sps:$4 sm:$0xff]  }
 0x890   :  { %20360 = vmatpush3.bf16.msra.mxu0 %v22030_v40  ;;  %v22103_v40 = vld [vmem:[%s29999_s5 + $0x1428] ss:$20 sps:$4 sm:$0xff]  }
 0x891   :  { %20578 = vmatprep.subr.bf16.mxu0 %v30011_v7 }
 0x893   :  { %9296 = vmatmul.mubr.bf16.vlgmr.msra.gmra.mxu0 %v26966_v62  ;;  %v22075_v62 = vld [vmem:[%s29999_s5 + $0x1274] ss:$20 sps:$4 sm:$0xff]  }
 0x894   :  { %20579 = vmatpush3.bf16.msra.mxu0 %v22031_v22  ;;  %20590 = vmatprep.mubr.msk.bf16.mxu0 %vm23161_vm4, %v30011_v7  ;;  %v22109_v22 = vld [vmem:[%s29999_s5 + $0x1400] ss:$20 sps:$4 sm:$0xff]  }
 0x895   :  { %20580 = vmatprep.subr.bf16.mxu0 %v30011_v7  ;;  %10765 = vmatprep.subr.bf16.mxu1 %v22075_v62  ;;  %v22115_v62 = vld [vmem:[%s29999_s5 + $0x13d8] ss:$20 sps:$4 sm:$0xff]  }
 0x896   :  { %10766 = vmatpush1.bf16.msra.mxu1 %v22073_v48  ;;  %v22123_v48 = vld [vmem:[%s29999_s5 + $0x13b4] ss:$20 sps:$4 sm:$0xff]  }
 0x897   :  { %10767 = vmatprep.subr.bf16.mxu1 %v22081_v14  ;;  %v22121_v14 = vld [vmem:[%s29999_s5 + $0x13b0] ss:$20 sps:$4 sm:$0xff]  }
 0x898   :  { %20581 = vmatpush3.bf16.msra.mxu0 %v22032_v46  ;;  %v22117_v46 = vld [vmem:[%s29999_s5 + $0x13dc] ss:$20 sps:$4 sm:$0xff]  }
 0x899   :  { %20582 = vmatprep.subr.bf16.mxu0 %v30011_v7 }
 0x89a   :  { %10768 = vmatpush1.bf16.msra.mxu1 %v22079_v21  ;;  %v22040_v21 = vld [vmem:[%s29999_s5 + $0x1540] ss:$20 sps:$4 sm:$0xff]  }
 0x89b   :  { %10769 = vmatprep.subr.bf16.mxu1 %v22087_v17  ;;  %v22043_v17 = vld [vmem:[%s29999_s5 + $0x1518] ss:$20 sps:$4 sm:$0xff]  }
 0x89c   :  { %20583 = vmatpush3.bf16.msra.mxu0 %v22033_v54  ;;  %v22042_v54 = vld [vmem:[%s29999_s5 + $0x1544] ss:$20 sps:$4 sm:$0xff]  }
 0x89d   :  { %20584 = vmatprep.subr.bf16.mxu0 %v30011_v7 }
 0x89e   :  { %10770 = vmatpush1.bf16.msra.mxu1 %v22085_v12  ;;  %v22127_v12 = vld [vmem:[%s29999_s5 + $0x1388] ss:$20 sps:$4 sm:$0xff]  }
 0x89f   :  { %10771 = vmatprep.subr.bf16.mxu1 %v22093_v29  ;;  %v22133_v29 = vld [vmem:[%s29999_s5 + $0x1360] ss:$20 sps:$4 sm:$0xff]  }
 0x8a0   :  { %20585 = vmatpush3.bf16.msra.mxu0 %v22034_v15  ;;  %v22045_v15 = vld [vmem:[%s29999_s5 + $0x151c] ss:$20 sps:$4 sm:$0xff]  }
 0x8a1   :  { %20586 = vmatprep.subr.bf16.mxu0 %v30011_v7 }
 0x8a2   :  { %10772 = vmatpush1.bf16.msra.mxu1 %v22091_v55  ;;  %v22135_v55 = vld [vmem:[%s29999_s5 + $0x1364] ss:$20 sps:$4 sm:$0xff]  }
 0x8a3   :  { %10773 = vmatprep.subr.bf16.mxu1 %v22099_v51  ;;  %v22051_v51 = vld [vmem:[%s29999_s5 + $0x14cc] ss:$20 sps:$4 sm:$0xff]  }
 0x8a4   :  { %20587 = vmatpush3.bf16.msra.mxu0 %v22035_v43  ;;  %v22048_v43 = vld [vmem:[%s29999_s5 + $0x14f4] ss:$20 sps:$4 sm:$0xff]  }
 0x8a5   :  { %20588 = vmatprep.subr.bf16.mxu0 %v30011_v7 }
 0x8a6   :  { %10774 = vmatpush1.bf16.msra.mxu1 %v22097_v18  ;;  %v22139_v18 = vld [vmem:[%s29999_s5 + $0x1338] ss:$20 sps:$4 sm:$0xff]  }
 0x8a7   :  { %10775 = vmatprep.subr.bf16.mxu1 %v22105_v35  ;;  %v22141_v35 = vld [vmem:[%s29999_s5 + $0x133c] ss:$20 sps:$4 sm:$0xff]  }
 0x8a8   :  { %20589 = vmatpush3.bf16.msra.mxu0 %v22036_v59  ;;  %v22046_v59 = vld [vmem:[%s29999_s5 + $0x14f0] ss:$20 sps:$4 sm:$0xff]  }
 0x8a9   :  { %20594 = vmatprep.subr.bf16.mxu0 %v30011_v7 }
 0x8aa   :  { %10776 = vmatpush2.bf16.msra.mxu1 %v22103_v40  ;;  %v22049_v40 = vld [vmem:[%s29999_s5 + $0x14c8] ss:$20 sps:$4 sm:$0xff]  }
 0x8ab   :  { %20591 = vmatmul.mubr.msk.bf16.vlgmr.msra.gmra.mxu0 %vm4077_vm5, %v27046_v63  ;;  %v22111_v63 = vld [vmem:[%s29999_s5 + $0x1404] ss:$20 sps:$4 sm:$0xff]  }
 0x8ac   :  { %20595 = vmatpush3.bf16.msra.mxu0 %v25261_v28  ;;  %20600 = vmatprep.mubr.msk.bf16.mxu0 %vm23161_vm4, %v30011_v7 }
 0x8ad   :  { %20596 = vmatprep.subr.bf16.mxu0 %v30011_v7  ;;  %10777 = vmatprep.subr.bf16.mxu1 %v22111_v63  ;;  %v22054_v63 = vld [vmem:[%s29999_s5 + $0x14a4] ss:$20 sps:$4 sm:$0xff]  }
 0x8ae   :  { %10778 = vmatpush2.bf16.msra.mxu1 %v22109_v22  ;;  %v22145_v22 = vld [vmem:[%s29999_s5 + $0x1310] ss:$20 sps:$4 sm:$0xff]  }
 0x8af   :  { %10779 = vmatprep.subr.bf16.mxu1 %v22117_v46  ;;  %v22052_v46 = vld [vmem:[%s29999_s5 + $0x14a0] ss:$20 sps:$4 sm:$0xff]  }
 0x8b0   :  { %20597 = vmatpush3.bf16.msra.mxu0 %v25265_v58 }
 0x8b1   :  { %20598 = vmatprep.subr.bf16.mxu0 %v30011_v7 }
 0x8b2   :  { %10780 = vmatpush2.bf16.msra.mxu1 %v22115_v62  ;;  %v22058_v62 = vld [vmem:[%s29999_s5 + $0x1478] ss:$20 sps:$4 sm:$0xff]  }
 0x8b3   :  { %10781 = vmatprep.subr.bf16.mxu1 %v22123_v48  ;;  %v22064_v48 = vld [vmem:[%s29999_s5 + $0x1450] ss:$20 sps:$4 sm:$0xff]  }
 0x8b4   :  { %20599 = vmatpush3.bf16.msra.mxu0 %v25269_v38 }
 0x8b5   :  { %10802 = vmatprep.subr.bf16.mxu0 %v22039_v13  ;;  %v22147_v13 = vld [vmem:[%s29999_s5 + $0x1314] ss:$20 sps:$4 sm:$0xff]  }
 0x8b6   :  { %10782 = vmatpush2.bf16.msra.mxu1 %v22121_v14  ;;  %v22070_v14 = vld [vmem:[%s29999_s5 + $0x16a8] ss:$20 sps:$4 sm:$0xff]  }
 0x8b7   :  { %20601 = vmatmul.mubr.msk.bf16.vlgmr.msra.gmra.mxu0 %vm4146_vm3, %v27176_v33  ;;  %v22129_v33 = vld [vmem:[%s29999_s5 + $0x138c] ss:$20 sps:$4 sm:$0xff]  }
 0x8b8   :  { %10803 = vmatpush1.bf16.msra.mxu0 %v22037_v39  ;;  %10783 = vmatprep.subr.bf16.mxu1 %v22129_v33  ;;  %v22060_v39 = vld [vmem:[%s29999_s5 + $0x147c] ss:$20 sps:$4 sm:$0xff]   ;;  %v9082_v33 = vpop.f32.mrf.mxu1 }
 0x8b9   :  { %10804 = vmatprep.subr.bf16.mxu0 %v22042_v54  ;;  %v22066_v54 = vld [vmem:[%s29999_s5 + $0x1454] ss:$20 sps:$4 sm:$0xff]  }
 0x8ba   :  { %10784 = vmatpush2.bf16.msra.mxu1 %v22127_v12  ;;  %v22084_v12 = vld [vmem:[%s29999_s5 + $0x165c] ss:$20 sps:$4 sm:$0xff]  }
 0x8bb   :  { %10785 = vmatprep.subr.bf16.mxu1 %v22135_v55 }
 0x8bc   :  { %10805 = vmatpush1.bf16.msra.mxu0 %v22040_v21  ;;  %v22072_v21 = vld [vmem:[%s29999_s5 + $0x16ac] ss:$20 sps:$4 sm:$0xff]  }
 0x8bd   :  { %10806 = vmatprep.subr.bf16.mxu0 %v22045_v15  ;;  %v22078_v15 = vld [vmem:[%s29999_s5 + $0x1684] ss:$20 sps:$4 sm:$0xff]  }
 0x8be   :  { %10786 = vmatpush2.bf16.msra.mxu1 %v22133_v29 }
 0x8bf   :  { %10787 = vmatprep.subr.bf16.mxu1 %v22141_v35 }
 0x8c0   :  { %10807 = vmatpush1.bf16.msra.mxu0 %v22043_v17  ;;  %v22076_v17 = vld [vmem:[%s29999_s5 + $0x1680] ss:$20 sps:$4 sm:$0xff]  }
 0x8c1   :  { %10808 = vmatprep.subr.bf16.mxu0 %v22048_v43  ;;  %v9084_v43 = vpop.f32.mrf.mxu1 }
 0x8c2   :  { %10788 = vmatpush2.bf16.msra.mxu1 %v22139_v18  ;;  %v22090_v18 = vld [vmem:[%s29999_s5 + $0x1634] ss:$20 sps:$4 sm:$0xff]  }
 0x8c3   :  { %10789 = vmatprep.subr.bf16.mxu1 %v22147_v13  ;;  %v22088_v13 = vld [vmem:[%s29999_s5 + $0x1630] ss:$20 sps:$4 sm:$0xff]  }
 0x8c4   :  { %10809 = vmatpush1.bf16.msra.mxu0 %v22046_v59  ;;  %v22082_v59 = vld [vmem:[%s29999_s5 + $0x1658] ss:$20 sps:$4 sm:$0xff]  }
 0x8c5   :  { %10810 = vmatprep.subr.bf16.mxu0 %v22051_v51 }
 0x8c6   :  { %10790 = vmatpush2.bf16.msra.mxu1 %v22145_v22 }
 0x8c8   :  { %10811 = vmatpush1.bf16.msra.mxu0 %v22049_v40  ;;  %v9086_v40 = vpop.f32.mrf.mxu1 }
 0x8c9   :  { %10812 = vmatprep.subr.bf16.mxu0 %v22054_v63 }
 0x8cc   :  { %10813 = vmatpush1.bf16.msra.mxu0 %v22052_v46  ;;  %v22096_v46 = vld [vmem:[%s29999_s5 + $0x160c] ss:$20 sps:$4 sm:$0xff]  }
 0x8cd   :  { %10814 = vmatprep.subr.bf16.mxu0 %v22060_v39  ;;  %v22094_v39 = vld [vmem:[%s29999_s5 + $0x1608] ss:$20 sps:$4 sm:$0xff]  }
 0x8d0   :  { %10815 = vmatpush1.bf16.msra.mxu0 %v22058_v62  ;;  %v22174_v62 = vld [vmem:[%s29999_s5 + $0x179c] ss:$20 sps:$4 sm:$0xff]  }
 0x8d1   :  { %10816 = vmatprep.subr.bf16.mxu0 %v22066_v54  ;;  %v22102_v54 = vld [vmem:[%s29999_s5 + $0x15e4] ss:$20 sps:$4 sm:$0xff]   ;;  %10849 = vmatprep.subr.bf16.mxu1 %v22174_v62 }
 0x8d4   :  { %10817 = vmatpush1.bf16.msra.mxu0 %v22064_v48  ;;  %v22100_v48 = vld [vmem:[%s29999_s5 + $0x15e0] ss:$20 sps:$4 sm:$0xff]  }
 0x8d5   :  { %10818 = vmatprep.subr.bf16.mxu0 %v22072_v21  ;;  %v22108_v21 = vld [vmem:[%s29999_s5 + $0x15bc] ss:$20 sps:$4 sm:$0xff]  }
 0x8d8   :  { %10819 = vmatpush2.bf16.msra.mxu0 %v22070_v14  ;;  %v22106_v14 = vld [vmem:[%s29999_s5 + $0x15b8] ss:$20 sps:$4 sm:$0xff]  }
 0x8d9   :  { %10820 = vmatprep.subr.bf16.mxu0 %v22078_v15  ;;  %v22114_v15 = vld [vmem:[%s29999_s5 + $0x1594] ss:$20 sps:$4 sm:$0xff]  }
 0x8db   :  { %v9039_v29 = vpop.f32.mrf.mxu0 }
 0x8dc   :  { %v9083_v55 = vadd.f32 %v9082_v33, %v9039_v29  ;;  %10821 = vmatpush2.bf16.msra.mxu0 %v22076_v17  ;;  %v22112_v33 = vld [vmem:[%s29999_s5 + $0x1590] ss:$20 sps:$4 sm:$0xff]  }
 0x8dd   :  { %v9041_v51 = vpop.f32.mrf.mxu0  ;;  %10822 = vmatprep.subr.bf16.mxu0 %v22084_v12  ;;  %v22120_v12 = vld [vmem:[%s29999_s5 + $0x12f4] ss:$20 sps:$4 sm:$0xff]  }
 0x8de   :  { %v9085_v35 = vadd.f32 %v9084_v43, %v9041_v51  ;;  %v27504_v51 = vpop.f32.mrf.mxu1 }
 0x8df   :  { %v9043_v63 = vpop.f32.mrf.mxu0 }
 0x8e0   :  { %v9087_v22 = vadd.f32 %v9086_v40, %v9043_v63  ;;  %10823 = vmatpush2.bf16.msra.mxu0 %v22082_v59 }
 0x8e1   :  { %10824 = vmatprep.subr.bf16.mxu0 %v22090_v18  ;;  %v27499_v17 = vpop.f32.mrf.mxu0 }
 0x8e4   :  { %10825 = vmatpush2.bf16.msra.mxu0 %v22088_v13  ;;  %v9168_v13 = vpop.f32.mrf.mxu1 }
 0x8e5   :  { %10826 = vmatprep.subr.bf16.mxu0 %v22096_v46 }
 0x8e8   :  { %10827 = vmatpush2.bf16.msra.mxu0 %v22094_v39 }
 0x8e9   :  { %10828 = vmatprep.subr.bf16.mxu0 %v22102_v54  ;;  %v9170_v54 = vpop.f32.mrf.mxu1 }
 0x8ec   :  { %10829 = vmatpush2.bf16.msra.mxu0 %v22100_v48 }
 0x8ed   :  { %10830 = vmatprep.subr.bf16.mxu0 %v22108_v21 }
 0x8f0   :  { %10831 = vmatpush2.bf16.msra.mxu0 %v22106_v14 }
 0x8f1   :  { %10832 = vmatprep.subr.bf16.mxu0 %v22114_v15 }
 0x8f3   :  { %v9125_v43 = vpop.f32.mrf.mxu0 }
 0x8f4   :  { %v9126_v29 = vadd.f32 %v9125_v43, %v9083_v55  ;;  %10833 = vmatpush2.bf16.msra.mxu0 %v22112_v33  ;;  %v9172_v55 = vpop.f32.mrf.mxu1 }
 0x8f5   :  { %v9127_v59 = vpop.f32.mrf.mxu0  ;;  %10888 = vmatprep.subr.bf16.mxu0 %v22120_v12 }
 0x8f6   :  { %v27507_v18 = vadd.f32 %v9126_v29, %v26783_v50  ;;  %v9128_v40 = vadd.f32 %v9127_v59, %v9085_v35  ;;  %v27515_v48 = vpop.f32.mrf.mxu1 }
 0x8f7   :  { %v9129_v63 = vpop.f32.mrf.mxu0  ;;  %30021 = vst [vmem:[#allocation12_spill] sm:$0xff] %v27515_v48  ;;  %v22190_v48 = vld [vmem:[%s29999_s5 + $0x1720] ss:$20 sps:$4 sm:$0xff]  }
 0x8f8   :  { %v27510_v46 = vadd.f32 %v9128_v40, %v26792_v44  ;;  %v9130_v39 = vadd.f32 %v9129_v63, %v9087_v22  ;;  %v9254_v21 = vpop.f32.mrf.mxu1 }
 0x8f9   :  { %v27550_v45 = vpop.f32.mrf.mxu0 }
 0x8fa   :  { %v27513_v62 = vadd.f32 %v9130_v39, %v26801_v25  ;;  %v9256_v14 = vpop.f32.mrf.mxu1  ;;  %v22172_v39 = vld [vmem:[%s29999_s5 + $0x1798] ss:$20 sps:$4 sm:$0xff]  }
 0x8fc   :  { %v9258_v15 = vpop.f32.mrf.mxu1 }
 0x8fe   :  { %v27517_v33 = vpop.f32.mrf.mxu1 }
 0x8ff   :  { %30022 = vst [vmem:[#allocation13_spill] sm:$0xff] %v27517_v33 }
 0x914   :  { %v20383_v50 = vpop.f32.mrf.mxu1 }
 0x916   :  { %v20384_v35 = vpop.f32.mrf.mxu1 }
 0x917   :  { %v27519_v12 = vadd.f32 %v20384_v35, %v20383_v50  ;;  %v22180_v50 = vld [vmem:[%s29999_s5 + $0x1774] ss:$20 sps:$4 sm:$0xff]   ;;  %v22178_v35 = vld [vmem:[%s29999_s5 + $0x1770] ss:$20 sps:$4 sm:$0xff]  }
 0x918   :  { %v27521_v43 = vpop.f32.mrf.mxu1 }
 0x91a   :  { %v27523_v44 = vpop.f32.mrf.mxu1 }
 0x920   :  { %v9441_v22 = vpop.f32.mrf.mxu1 }
 0x922   :  { %v9443_v25 = vpop.f32.mrf.mxu1 }
 0x924   :  { %v9445_v29 = vpop.f32.mrf.mxu1 }
 0x925   :  { %v27525_v59 = vpack.c.bf16 %v9445_v29, %v9441_v22 }
 0x926   :  { %v9447_v40 = vpop.f32.mrf.mxu1 }
 0x927   :  { %v27527_v63 = vpack.c.bf16 %v9447_v40, %v9443_v25  ;;  %v22186_v25 = vld [vmem:[%s29999_s5 + $0x174c] ss:$20 sps:$4 sm:$0xff]   ;;  %v22184_v40 = vld [vmem:[%s29999_s5 + $0x1748] ss:$20 sps:$4 sm:$0xff]  }
 0x929   :  { %10791 = vmatprep.mubr.bf16.mxu1 %v27527_v63 }
 0x92a   :  { %10792 = vmatmul.mubr.bf16.vlgmr.msra.gmra.mxu1 %v27525_v59 }
 0x92b   :  { %10850 = vmatpush1.bf16.msra.mxu1 %v22172_v39  ;;  %10877 = vmatprep.mubr.bf16.mxu1 %v30013_v2  ;;  %v22192_v39 = vld [vmem:[%s29999_s5 + $0x1724] ss:$20 sps:$4 sm:$0xff]  }
 0x92c   :  { %v9484_v22 = vpop.f32.mrf.mxu1  ;;  %10851 = vmatprep.subr.bf16.mxu1 %v22180_v50 }
 0x92e   :  { %v9486_v29 = vpop.f32.mrf.mxu1 }
 0x92f   :  { %10852 = vmatpush1.bf16.msra.mxu1 %v22178_v35  ;;  %v22118_v35 = vld [vmem:[%s29999_s5 + $0x12f0] ss:$20 sps:$4 sm:$0xff]  }
 0x930   :  { %v9488_v7 = vpop.f32.mrf.mxu1  ;;  %10853 = vmatprep.subr.bf16.mxu1 %v22186_v25  ;;  %v22126_v25 = vld [vmem:[%s29999_s5 + $0x12cc] ss:$20 sps:$4 sm:$0xff]  }
 0x931   :  { %v27552_v2 = vpack.c.bf16 %v9488_v7, %v9484_v22  ;;  %v22198_v22 = vld [vmem:[%s29999_s5 + $0x16fc] ss:$20 sps:$4 sm:$0xff]  }
 0x932   :  { %v9490_v50 = vpop.f32.mrf.mxu1 }
 0x933   :  { %v27554_v30 = vpack.c.bf16 %v9490_v50, %v9486_v29  ;;  %v9211_v33 = vpop.f32.mrf.mxu0  ;;  %10854 = vmatpush1.bf16.msra.mxu1 %v22184_v40 }
 0x934   :  { %v9212_v11 = vadd.f32 %v9211_v33, %v9168_v13  ;;  %10855 = vmatprep.subr.bf16.mxu1 %v22192_v39  ;;  %v22124_v33 = vld [vmem:[%s29999_s5 + $0x12c8] ss:$20 sps:$4 sm:$0xff]  }
 0x935   :  { %10834 = vmatprep.mubr.bf16.mxu0 %v27554_v30  ;;  %v9213_v7 = vpop.f32.mrf.mxu0 }
 0x936   :  { %v9255_v29 = vadd.f32 %v9254_v21, %v9212_v11  ;;  %v9214_v50 = vadd.f32 %v9213_v7, %v9170_v54  ;;  %10835 = vmatmul.mubr.bf16.vlgmr.msra.gmra.mxu0 %v27552_v2  ;;  %v22132_v11 = vld [vmem:[%s29999_s5 + $0x12a4] ss:$20 sps:$4 sm:$0xff]   ;;  %v22204_v21 = vld [vmem:[%s29999_s5 + $0x16d4] ss:$20 sps:$4 sm:$0xff]   ;;  %v22150_v7 = vld [vmem:[%s29999_s5 + $0x122c] ss:$20 sps:$4 sm:$0xff]  }
 0x937   :  { %10889 = vmatpush1.bf16.msra.mxu0 %v22118_v35  ;;  %v9215_v13 = vpop.f32.mrf.mxu0  ;;  %10920 = vmatprep.mubr.bf16.mxu0 %v27527_v63  ;;  %v22196_v54 = vld [vmem:[%s29999_s5 + $0x16f8] ss:$20 sps:$4 sm:$0xff]   ;;  %v22138_v35 = vld [vmem:[%s29999_s5 + $0x127c] ss:$20 sps:$4 sm:$0xff]  }
 0x938   :  { %v27575_v40 = vadd.f32 %v9255_v29, %v26872_v8  ;;  %v9257_v39 = vadd.f32 %v9256_v14, %v9214_v50  ;;  %v9216_v10 = vadd.f32 %v9215_v13, %v9172_v55  ;;  %10890 = vmatprep.subr.bf16.mxu0 %v22126_v25  ;;  %10856 = vmatpush1.bf16.msra.mxu1 %v22190_v48  ;;  %v22130_v55 = vld [vmem:[%s29999_s5 + $0x12a0] ss:$20 sps:$4 sm:$0xff]   ;;  %v22142_v25 = vld [vmem:[%s29999_s5 + $0x1250] ss:$20 sps:$4 sm:$0xff]  }
 0x939   :  { %10857 = vmatprep.subr.bf16.mxu1 %v22198_v22  ;;  %v22148_v22 = vld [vmem:[%s29999_s5 + $0x1228] ss:$20 sps:$4 sm:$0xff]   ;;  %v22153_v29 = vld [vmem:[%s29999_s5 + $0x1204] ss:$20 sps:$4 sm:$0xff]   ;;  %v22151_v50 = vld [vmem:[%s29999_s5 + $0x1200] ss:$20 sps:$4 sm:$0xff]  }
 0x93a   :  { %v27587_v8 = vadd.f32 %v9257_v39, %v26877_v5  ;;  %v9259_v14 = vadd.f32 %v9258_v15, %v9216_v10  ;;  %v22202_v5 = vld [vmem:[%s29999_s5 + $0x16d0] ss:$20 sps:$4 sm:$0xff]   ;;  %v22210_v10 = vld [vmem:[%s29999_s5 + $0x1574] ss:$20 sps:$4 sm:$0xff]  }
 0x93b   :  { %10891 = vmatpush1.bf16.msra.mxu0 %v22124_v33  ;;  %v22144_v15 = vld [vmem:[%s29999_s5 + $0x1254] ss:$20 sps:$4 sm:$0xff]   ;;  %v22156_v13 = vld [vmem:[%s29999_s5 + $0x11dc] ss:$20 sps:$4 sm:$0xff]   ;;  %v22154_v33 = vld [vmem:[%s29999_s5 + $0x11d8] ss:$20 sps:$4 sm:$0xff]  }
 0x93c   :  { %v27593_v48 = vadd.f32 %v9259_v14, %v26882_v9  ;;  %10892 = vmatprep.subr.bf16.mxu0 %v22132_v11  ;;  %10858 = vmatpush1.bf16.msra.mxu1 %v22196_v54  ;;  %v22136_v9 = vld [vmem:[%s29999_s5 + $0x1278] ss:$20 sps:$4 sm:$0xff]   ;;  %v22159_v39 = vld [vmem:[%s29999_s5 + $0x1434] ss:$20 sps:$4 sm:$0xff]   ;;  %v27634_v11 = vpop.f32.mrf.mxu0 }
 0x93d   :  { %10859 = vmatprep.subr.bf16.mxu1 %v22204_v21  ;;  %v22157_v21 = vld [vmem:[%s29999_s5 + $0x1430] ss:$20 sps:$4 sm:$0xff]   ;;  %v22162_v14 = vld [vmem:[%s29999_s5 + $0x140c] ss:$20 sps:$4 sm:$0xff]  }
 0x93f   :  { %10893 = vmatpush1.bf16.msra.mxu0 %v22130_v55 }
 0x940   :  { %10894 = vmatprep.subr.bf16.mxu0 %v22138_v35  ;;  %10860 = vmatpush1.bf16.msra.mxu1 %v22202_v5 }
 0x941   :  { %10931 = vmatprep.subr.bf16.mxu1 %v22210_v10  ;;  %v22160_v10 = vld [vmem:[%s29999_s5 + $0x1408] ss:$20 sps:$4 sm:$0xff]  }
 0x943   :  { %10895 = vmatpush1.bf16.msra.mxu0 %v22136_v9  ;;  %v22165_v9 = vld [vmem:[%s29999_s5 + $0x13e4] ss:$20 sps:$4 sm:$0xff]  }
 0x944   :  { %10896 = vmatprep.subr.bf16.mxu0 %v22144_v15 }
 0x947   :  { %10897 = vmatpush1.bf16.msra.mxu0 %v22142_v25 }
 0x948   :  { %10898 = vmatprep.subr.bf16.mxu0 %v22150_v7  ;;  %v20388_v7 = vadd.f32 %v27523_v44, %v27521_v43  ;;  %v22171_v43 = vld [vmem:[%s29999_s5 + $0x1394] ss:$20 sps:$4 sm:$0xff]   ;;  %v22169_v44 = vld [vmem:[%s29999_s5 + $0x1390] ss:$20 sps:$4 sm:$0xff]  }
 0x94b   :  { %10899 = vmatpush1.bf16.msra.mxu0 %v22148_v22 }
 0x94c   :  { %10900 = vmatprep.subr.bf16.mxu0 %v22153_v29  ;;  %v22163_v29 = vld [vmem:[%s29999_s5 + $0x13e0] ss:$20 sps:$4 sm:$0xff]  }
 0x94f   :  { %10901 = vmatpush1.bf16.msra.mxu0 %v22151_v50  ;;  %v22168_v50 = vld [vmem:[%s29999_s5 + $0x13bc] ss:$20 sps:$4 sm:$0xff]  }
 0x950   :  { %10902 = vmatprep.subr.bf16.mxu0 %v22156_v13 }
 0x953   :  { %10903 = vmatpush1.bf16.msra.mxu0 %v22154_v33  ;;  %v20361_v54 = vpop.f32.mrf.mxu0  ;;  %v22177_v33 = vld [vmem:[%s29999_s5 + $0x136c] ss:$20 sps:$4 sm:$0xff]  }
 0x954   :  { %10904 = vmatprep.subr.bf16.mxu0 %v22159_v39  ;;  %v22175_v39 = vld [vmem:[%s29999_s5 + $0x1368] ss:$20 sps:$4 sm:$0xff]  }
 0x955   :  { %v20362_v55 = vpop.f32.mrf.mxu0 }
 0x956   :  { %v20363_v35 = vadd.f32 %v20362_v55, %v20361_v54  ;;  %v22183_v54 = vld [vmem:[%s29999_s5 + $0x1344] ss:$20 sps:$4 sm:$0xff]   ;;  %v7636_v55 = vadd.f32 %v26828_v27, %v26935_v24 }
 0x957   :  { %10905 = vmatpush2.bf16.msra.mxu0 %v22157_v21  ;;  %v20364_v5 = vpop.f32.mrf.mxu0  ;;  %v22195_v27 = vld [vmem:[%s29999_s5 + $0x17a4] ss:$20 sps:$4 sm:$0xff]  }
 0x958   :  { %10906 = vmatprep.subr.bf16.mxu0 %v22162_v14  ;;  %v9339_v15 = vadd.f32 %v27519_v12, %v20363_v35  ;;  %v22166_v12 = vld [vmem:[%s29999_s5 + $0x13b8] ss:$20 sps:$4 sm:$0xff]   ;;  %v22181_v14 = vld [vmem:[%s29999_s5 + $0x1340] ss:$20 sps:$4 sm:$0xff]  }
 0x959   :  { %v20365_v25 = vpop.f32.mrf.mxu0 }
 0x95a   :  { %v20366_v22 = vadd.f32 %v20365_v25, %v20364_v5  ;;  %v22189_v5 = vld [vmem:[%s29999_s5 + $0x131c] ss:$20 sps:$4 sm:$0xff]  }
 0x95b   :  { %10907 = vmatpush2.bf16.msra.mxu0 %v22160_v10 }
 0x95c   :  { %10908 = vmatprep.subr.bf16.mxu0 %v22165_v9  ;;  %v9342_v13 = vadd.f32 %v20388_v7, %v20366_v22  ;;  %v22187_v7 = vld [vmem:[%s29999_s5 + $0x1318] ss:$20 sps:$4 sm:$0xff]   ;;  %v7639_v22 = vadd.f32 %v26834_v3, %v26944_v32 }
 0x95d   :  { %v22199_v32 = vld [vmem:[%s29999_s5 + $0x1778] ss:$20 sps:$4 sm:$0xff]  }
 0x95f   :  { %10909 = vmatpush2.bf16.msra.mxu0 %v22163_v29 }
 0x960   :  { %10910 = vmatprep.subr.bf16.mxu0 %v22168_v50  ;;  %v22193_v50 = vld [vmem:[%s29999_s5 + $0x17a0] ss:$20 sps:$4 sm:$0xff]  }
 0x963   :  { %10911 = vmatpush2.bf16.msra.mxu0 %v22166_v12  ;;  %v22201_v12 = vld [vmem:[%s29999_s5 + $0x177c] ss:$20 sps:$4 sm:$0xff]  }
 0x964   :  { %10912 = vmatprep.subr.bf16.mxu0 %v22171_v43  ;;  %v22207_v43 = vld [vmem:[%s29999_s5 + $0x1754] ss:$20 sps:$4 sm:$0xff]  }
 0x967   :  { %10913 = vmatpush2.bf16.msra.mxu0 %v22169_v44 }
 0x968   :  { %10914 = vmatprep.subr.bf16.mxu0 %v22177_v33 }
 0x96b   :  { %10915 = vmatpush2.bf16.msra.mxu0 %v22175_v39  ;;  %v9379_v21 = vpop.f32.mrf.mxu0  ;;  %v22205_v39 = vld [vmem:[%s29999_s5 + $0x1750] ss:$20 sps:$4 sm:$0xff]  }
 0x96c   :  { %v9380_v35 = vadd.f32 %v9379_v21, %v9339_v15  ;;  %10916 = vmatprep.subr.bf16.mxu0 %v22183_v54  ;;  %v22208_v54 = vld [vmem:[%s29999_s5 + $0x1570] ss:$20 sps:$4 sm:$0xff]  }
 0x96d   :  { %v20592_v10 = vpop.f32.mrf.mxu0 }
 0x96e   :  { %v27683_v9 = vadd.f32 %v9380_v35, %v7636_v55  ;;  %v22216_v35 = vld [vmem:[%s29999_s5 + $0x154c] ss:$20 sps:$4 sm:$0xff]   ;;  %v22214_v10 = vld [vmem:[%s29999_s5 + $0x1548] ss:$20 sps:$4 sm:$0xff]  }
 0x96f   :  { %10917 = vmatpush2.bf16.msra.mxu0 %v22181_v14  ;;  %v9382_v25 = vpop.f32.mrf.mxu0  ;;  %v22213_v14 = vld [vmem:[%s29999_s5 + $0x172c] ss:$20 sps:$4 sm:$0xff]  }
 0x970   :  { %v9383_v29 = vadd.f32 %v9382_v25, %v9342_v13  ;;  %10918 = vmatprep.subr.bf16.mxu0 %v22189_v5  ;;  %v30023_v13 = vmov 0   ;;  %v22211_v5 = vld [vmem:[%s29999_s5 + $0x1728] ss:$20 sps:$4 sm:$0xff]   ;;  %v22219_v25 = vld [vmem:[%s29999_s5 + $0x1704] ss:$20 sps:$4 sm:$0xff]  }
 0x971   :  { %v20593_v24 = vpop.f32.mrf.mxu0 }
 0x972   :  { %v27693_v15 = vadd.f32 %v9383_v29, %v7639_v22  ;;  %v22217_v22 = vld [vmem:[%s29999_s5 + $0x1700] ss:$20 sps:$4 sm:$0xff]   ;;  %v22228_v24 = vld [vmem:[%s29999_s5 + $0x14fc] ss:$20 sps:$4 sm:$0xff]  }
 0x973   :  { %10919 = vmatpush2.bf16.msra.mxu0 %v22187_v7  ;;  %v22222_v7 = vld [vmem:[%s29999_s5 + $0x1524] ss:$20 sps:$4 sm:$0xff]   ;;  %v22220_v29 = vld [vmem:[%s29999_s5 + $0x1520] ss:$20 sps:$4 sm:$0xff]  }
 0x974   :  { %10978 = vmatprep.subr.bf16.mxu0 %v22195_v27  ;;  %v22225_v27 = vld [vmem:[%s29999_s5 + $0x16dc] ss:$20 sps:$4 sm:$0xff]  }
 0x976   :  { %10921 = vmatmul.mubr.bf16.vlgmr.msra.gmra.mxu0 %v27525_v59 }
 0x977   :  { %10979 = vmatpush1.bf16.msra.mxu0 %v22193_v50  ;;  %v9527_v3 = vpop.f32.mrf.mxu0  ;;  %11006 = vmatprep.mubr.bf16.mxu0 %v30023_v13  ;;  %v22223_v50 = vld [vmem:[%s29999_s5 + $0x16d8] ss:$20 sps:$4 sm:$0xff]  }
 0x978   :  { %10980 = vmatprep.subr.bf16.mxu0 %v22201_v12  ;;  %v22226_v12 = vld [vmem:[%s29999_s5 + $0x14f8] ss:$20 sps:$4 sm:$0xff]  }
 0x979   :  { %v20602_v44 = vpop.f32.mrf.mxu0 }
 0x97a   :  { %v22230_v44 = vld [vmem:[%s29999_s5 + $0x14d0] ss:$20 sps:$4 sm:$0xff]  }
 0x97b   :  { %10981 = vmatpush1.bf16.msra.mxu0 %v22199_v32  ;;  %v9530_v33 = vpop.f32.mrf.mxu0  ;;  %v22232_v32 = vld [vmem:[%s29999_s5 + $0x14d4] ss:$20 sps:$4 sm:$0xff]  }
 0x97c   :  { %v27715_v21 = vpack.c.bf16 %v9530_v33, %v9527_v3  ;;  %10982 = vmatprep.subr.bf16.mxu0 %v22207_v43  ;;  %v22229_v3 = vld [vmem:[%s29999_s5 + $0x16b8] ss:$20 sps:$4 sm:$0xff]   ;;  %v22234_v33 = vld [vmem:[%s29999_s5 + $0x1690] ss:$20 sps:$4 sm:$0xff]  }
 0x97d   :  { %v20603_v55 = vpop.f32.mrf.mxu0  ;;  %v22233_v43 = vld [vmem:[%s29999_s5 + $0x1578] ss:$20 sps:$4 sm:$0xff]  }
 0x97e   :  { %19099 = vmatmul.mubr.msk.bf16.vlgmr.msra.gmra.mxu1 %vm4077_vm5, %v27715_v21  ;;  %v22239_v55 = vld [vmem:[%s29999_s5 + $0x1668] ss:$20 sps:$4 sm:$0xff]  }
 0x97f   :  { %10983 = vmatpush1.bf16.msra.mxu0 %v22205_v39  ;;  %10932 = vmatpush1.bf16.msra.mxu1 %v22208_v54  ;;  %v22237_v39 = vld [vmem:[%s29999_s5 + $0x14ac] ss:$20 sps:$4 sm:$0xff]   ;;  %v22238_v54 = vld [vmem:[%s29999_s5 + $0x1550] ss:$20 sps:$4 sm:$0xff]  }
 0x980   :  { %10963 = vmatprep.mubr.bf16.mxu1 %v27554_v30  ;;  %10984 = vmatprep.subr.bf16.mxu0 %v22213_v14  ;;  %v22235_v14 = vld [vmem:[%s29999_s5 + $0x14a8] ss:$20 sps:$4 sm:$0xff]  }
 0x981   :  { %10933 = vmatprep.subr.bf16.mxu1 %v22216_v35  ;;  %v22242_v35 = vld [vmem:[%s29999_s5 + $0x1484] ss:$20 sps:$4 sm:$0xff]  }
 0x983   :  { %10985 = vmatpush1.bf16.msra.mxu0 %v22211_v5  ;;  %10934 = vmatpush1.bf16.msra.mxu1 %v22214_v10  ;;  %v22240_v5 = vld [vmem:[%s29999_s5 + $0x1480] ss:$20 sps:$4 sm:$0xff]  }
 0x984   :  { %10986 = vmatprep.subr.bf16.mxu0 %v22219_v25  ;;  %10935 = vmatprep.subr.bf16.mxu1 %v22222_v7  ;;  %v22244_v10 = vld [vmem:[%s29999_s5 + $0x1640] ss:$20 sps:$4 sm:$0xff]   ;;  %v22247_v25 = vld [vmem:[%s29999_s5 + $0x145c] ss:$20 sps:$4 sm:$0xff]  }
 0x985   :  { %v22248_v7 = vld [vmem:[%s29999_s5 + $0x1500] ss:$20 sps:$4 sm:$0xff]  }
 0x987   :  { %10987 = vmatpush1.bf16.msra.mxu0 %v22217_v22  ;;  %10936 = vmatpush1.bf16.msra.mxu1 %v22220_v29  ;;  %v22245_v22 = vld [vmem:[%s29999_s5 + $0x1458] ss:$20 sps:$4 sm:$0xff]  }
 0x988   :  { %10988 = vmatprep.subr.bf16.mxu0 %v22225_v27  ;;  %10937 = vmatprep.subr.bf16.mxu1 %v22228_v24  ;;  %v22249_v29 = vld [vmem:[%s29999_s5 + $0x1618] ss:$20 sps:$4 sm:$0xff]   ;;  %v22252_v27 = vld [vmem:[%s29999_s5 + $0x16b4] ss:$20 sps:$4 sm:$0xff]  }
 0x989   :  { %v22253_v24 = vld [vmem:[%s29999_s5 + $0x14d8] ss:$20 sps:$4 sm:$0xff]  }
 0x98b   :  { %10989 = vmatpush1.bf16.msra.mxu0 %v22223_v50  ;;  %10938 = vmatpush1.bf16.msra.mxu1 %v22226_v12  ;;  %v22250_v50 = vld [vmem:[%s29999_s5 + $0x16b0] ss:$20 sps:$4 sm:$0xff]  }
 0x98c   :  { %20422 = vmatprep.subr.bf16.mxu0 %v22229_v3  ;;  %10939 = vmatprep.subr.bf16.mxu1 %v22232_v32  ;;  %v22254_v12 = vld [vmem:[%s29999_s5 + $0x15f0] ss:$20 sps:$4 sm:$0xff]   ;;  %v22257_v3 = vld [vmem:[%s29999_s5 + $0x168c] ss:$20 sps:$4 sm:$0xff]  }
 0x98d   :  { %v22258_v32 = vld [vmem:[%s29999_s5 + $0x14b0] ss:$20 sps:$4 sm:$0xff]  }
 0x98e   :  { %19100 = vmatmul.mubr.msk.bf16.vlgmr.msra.gmra.mxu0 %vm4077_vm5, %v27715_v21 }
 0x98f   :  { %20423 = vmatpush3.bf16.msra.mxu0 %v22233_v43  ;;  %11090 = vmatprep.mubr.bf16.mxu0 %v27554_v30  ;;  %v22243_v30 = vld [vmem:[%s29999_s5 + $0x1528] ss:$20 sps:$4 sm:$0xff]  }
 0x990   :  { %10940 = vmatpush1.bf16.msra.mxu1 %v22230_v44  ;;  %20424 = vmatprep.subr.bf16.mxu0 %v22234_v33  ;;  %v22255_v43 = vld [vmem:[%s29999_s5 + $0x1688] ss:$20 sps:$4 sm:$0xff]   ;;  %v22262_v33 = vld [vmem:[%s29999_s5 + $0x1664] ss:$20 sps:$4 sm:$0xff]  }
 0x991   :  { %10941 = vmatprep.subr.bf16.mxu1 %v22237_v39  ;;  %v22259_v44 = vld [vmem:[%s29999_s5 + $0x15c8] ss:$20 sps:$4 sm:$0xff]  }
 0x992   :  { %v22263_v39 = vld [vmem:[%s29999_s5 + $0x1488] ss:$20 sps:$4 sm:$0xff]  }
 0x993   :  { %20425 = vmatpush3.bf16.msra.mxu0 %v22238_v54  ;;  %v22260_v54 = vld [vmem:[%s29999_s5 + $0x1660] ss:$20 sps:$4 sm:$0xff]  }
 0x994   :  { %10942 = vmatpush1.bf16.msra.mxu1 %v22235_v14  ;;  %20426 = vmatprep.subr.bf16.mxu0 %v22239_v55  ;;  %v22264_v14 = vld [vmem:[%s29999_s5 + $0x15a0] ss:$20 sps:$4 sm:$0xff]   ;;  %v22267_v55 = vld [vmem:[%s29999_s5 + $0x163c] ss:$20 sps:$4 sm:$0xff]  }
 0x995   :  { %10943 = vmatprep.subr.bf16.mxu1 %v22242_v35  ;;  %v22268_v35 = vld [vmem:[%s29999_s5 + $0x1460] ss:$20 sps:$4 sm:$0xff]  }
 0x997   :  { %20427 = vmatpush3.bf16.msra.mxu0 %v22243_v30  ;;  %v22265_v30 = vld [vmem:[%s29999_s5 + $0x1638] ss:$20 sps:$4 sm:$0xff]  }
 0x998   :  { %10944 = vmatpush1.bf16.msra.mxu1 %v22240_v5  ;;  %20428 = vmatprep.subr.bf16.mxu0 %v22244_v10  ;;  %v22271_v5 = vld [vmem:[%s29999_s5 + $0x1614] ss:$20 sps:$4 sm:$0xff]   ;;  %v22269_v10 = vld [vmem:[%s29999_s5 + $0x1610] ss:$20 sps:$4 sm:$0xff]  }
 0x999   :  { %10945 = vmatprep.subr.bf16.mxu1 %v22247_v25  ;;  %v22274_v25 = vld [vmem:[%s29999_s5 + $0x15ec] ss:$20 sps:$4 sm:$0xff]  }
 0x99b   :  { %20429 = vmatpush3.bf16.msra.mxu0 %v22248_v7  ;;  %v22277_v7 = vld [vmem:[%s29999_s5 + $0x15c4] ss:$20 sps:$4 sm:$0xff]  }
 0x99c   :  { %10946 = vmatpush1.bf16.msra.mxu1 %v22245_v22  ;;  %20430 = vmatprep.subr.bf16.mxu0 %v22249_v29  ;;  %v27887_v22 = vld [vmem:[%s29998_s4 + $0x20] sm:$0xff]   ;;  %s16768_s4 = sshll.u32 %s23162_s14, 4  ;;  %s16769_s4 = int_to_ptr.vmem [resolvable:$true] %s16768_s4 }
 0x99d   :  { %10947 = vmatprep.subr.bf16.mxu1 %v22252_v27  ;;  %v22292_v29 = vld [vmem:[%s29999_s5 + $0x1370] ss:$20 sps:$4 sm:$0xff]   ;;  %s23137_s15 = scalar_lea.vmem %s16769_s4, 32  ;;  %p23142_p1 = scmp.lt.s32.totalorder %s16769_s4, %s16769_s4 }
 0x99e   :  { %v22293_v27 = vld [vmem:[%s29999_s5 + $0x1230] ss:$20 sps:$4 sm:$0xff]   ;;  %p23138_p0 = scmp.ne.s32.totalorder %s16769_s4, %s23137_s15  ;;  %p23143_p2 = scmp.lt.s32.totalorder %s23137_s15, %s23137_s15 }
 0x99f   :  { %20431 = vmatpush3.bf16.msra.mxu0 %v22253_v24  ;;  %v22294_v24 = vld [vmem:[%s29999_s5 + $0x1348] ss:$20 sps:$4 sm:$0xff]  }
 0x9a0   :  { %10948 = vmatpush2.bf16.msra.mxu1 %v22250_v50  ;;  %20432 = vmatprep.subr.bf16.mxu0 %v22254_v12  ;;  %v22295_v50 = vld [vmem:[%s29999_s5 + $0x1208] ss:$20 sps:$4 sm:$0xff]   ;;  %v22296_v12 = vld [vmem:[%s29999_s5 + $0x1320] ss:$20 sps:$4 sm:$0xff]   ;;  %p23144_p3 = por %p23143_p2, %p23142_p1 }
 0x9a1   :  { %10949 = vmatprep.subr.bf16.mxu1 %v22257_v3  ;;  %v22322_v3 = vld [vmem:[%s29999_s5 + $0x18d8] ss:$20 sps:$4 sm:$0xff]  }
 0x9a2   :  { %p23145_p4 = pnand %p23144_p3, %p23138_p0 }
 0x9a3   :  { %20433 = vmatpush3.bf16.msra.mxu0 %v22258_v32  ;;  %v22324_v32 = vld [vmem:[%s29999_s5 + $0x18dc] ss:$20 sps:$4 sm:$0xff]  }
 0x9a4   :  { %10950 = vmatpush2.bf16.msra.mxu1 %v22255_v43  ;;  %20434 = vmatprep.subr.bf16.mxu0 %v22259_v44  ;;  %v22297_v43 = vld [vmem:[%s29999_s5 + $0x11e0] ss:$20 sps:$4 sm:$0xff]  }
 0x9a5   :  { %10951 = vmatprep.subr.bf16.mxu1 %v22262_v33  ;;  %v22330_v44 = vld [vmem:[%s29999_s5 + $0x18b4] ss:$20 sps:$4 sm:$0xff]   ;;  %v22328_v33 = vld [vmem:[%s29999_s5 + $0x18b0] ss:$20 sps:$4 sm:$0xff]  }
 0x9a7   :  { %20435 = vmatpush3.bf16.msra.mxu0 %v22263_v39  ;;  %v22336_v39 = vld [vmem:[%s29999_s5 + $0x188c] ss:$20 sps:$4 sm:$0xff]  }
 0x9a8   :  { %10952 = vmatpush2.bf16.msra.mxu1 %v22260_v54  ;;  %20436 = vmatprep.subr.bf16.mxu0 %v22264_v14  ;;  %v22298_v54 = vld [vmem:[%s29999_s5 + $0x17a8] ss:$20 sps:$4 sm:$0xff]   ;;  %v30024_v14 = vmov 0.0  }
 0x9a9   :  { %10953 = vmatprep.subr.bf16.mxu1 %v22267_v55  ;;  %v22334_v55 = vld [vmem:[%s29999_s5 + $0x1888] ss:$20 sps:$4 sm:$0xff]  }
 0x9ab   :  { %20437 = vmatpush3.bf16.msra.mxu0 %v22268_v35  ;;  %v22299_v35 = vld [vmem:[%s29999_s5 + $0x1780] ss:$20 sps:$4 sm:$0xff]  }
 0x9ac   :  { %10954 = vmatpush2.bf16.msra.mxu1 %v22265_v30  ;;  %19105 = vmatprep.subr.msk.bf16.mxu0 %vm4150_vm2, %v25179_v26  ;;  %v22272_v26 = vld [vmem:[%s29999_s5 + $0x15e8] ss:$20 sps:$4 sm:$0xff]   ;;  %v22300_v30 = vld [vmem:[%s29999_s5 + $0x1758] ss:$20 sps:$4 sm:$0xff]  }
 0x9ad   :  { %10955 = vmatprep.subr.bf16.mxu1 %v22271_v5  ;;  %v22302_v5 = vld [vmem:[%s29999_s5 + $0x1708] ss:$20 sps:$4 sm:$0xff]  }
 0x9ae   :  { %11091 = vmatmul.mubr.bf16.vlgmr.msra.gmra.mxu0 %v27552_v2 }
 0x9af   :  { %11172 = vmatpush1.bf16.msra.mxu0 %v25188_v19  ;;  %11193 = vmatprep.mubr.bf16.mxu0 %v30023_v13  ;;  %v22275_v19 = vld [vmem:[%s29999_s5 + $0x15c0] ss:$20 sps:$4 sm:$0xff]  }
 0x9b0   :  { %10956 = vmatpush2.bf16.msra.mxu1 %v22269_v10  ;;  %11173 = vmatprep.subr.bf16.mxu0 %v25193_v0  ;;  %v22280_v0 = vld [vmem:[%s29999_s5 + $0x159c] ss:$20 sps:$4 sm:$0xff]   ;;  %v22303_v10 = vld [vmem:[%s29999_s5 + $0x16e0] ss:$20 sps:$4 sm:$0xff]  }
 0x9b1   :  { %10957 = vmatprep.subr.bf16.mxu1 %v22274_v25  ;;  %v22342_v25 = vld [vmem:[%s29999_s5 + $0x1864] ss:$20 sps:$4 sm:$0xff]  }
 0x9b3   :  { %11174 = vmatpush1.bf16.msra.mxu0 %v25173_v20  ;;  %v22278_v20 = vld [vmem:[%s29999_s5 + $0x1598] ss:$20 sps:$4 sm:$0xff]  }
 0x9b4   :  { %10958 = vmatpush2.bf16.msra.mxu1 %v22272_v26  ;;  %11175 = vmatprep.subr.bf16.mxu0 %v25205_v6  ;;  %v22282_v6 = vld [vmem:[%s29999_s5 + $0x1438] ss:$20 sps:$4 sm:$0xff]   ;;  %v22340_v26 = vld [vmem:[%s29999_s5 + $0x1860] ss:$20 sps:$4 sm:$0xff]  }
 0x9b5   :  { %10959 = vmatprep.subr.bf16.mxu1 %v22277_v7 }
 0x9b7   :  { %11176 = vmatpush1.bf16.msra.mxu0 %v25155_v42  ;;  %v22283_v42 = vld [vmem:[%s29999_s5 + $0x12f8] ss:$20 sps:$4 sm:$0xff]  }
 0x9b8   :  { %10960 = vmatpush2.bf16.msra.mxu1 %v22275_v19  ;;  %19107 = vmatprep.subr.msk.bf16.mxu0 %vm4150_vm2, %v25181_v56  ;;  %v22284_v56 = vld [vmem:[%s29999_s5 + $0x1410] ss:$20 sps:$4 sm:$0xff]  }
 0x9b9   :  { %10961 = vmatprep.subr.bf16.mxu1 %v22280_v0  ;;  %v22348_v19 = vld [vmem:[%s29999_s5 + $0x183c] ss:$20 sps:$4 sm:$0xff]   ;;  %v22346_v0 = vld [vmem:[%s29999_s5 + $0x1838] ss:$20 sps:$4 sm:$0xff]  }
 0x9ba   :  { %19106 = vmatmul.mubr.msk.bf16.vlgmr.msra.gmra.mxu0 %vm4146_vm3, %v27887_v22 }
 0x9bb   :  { %11215 = vmatpush1.bf16.msra.mxu0 %v25191_v4  ;;  %11236 = vmatprep.mubr.bf16.mxu0 %v30023_v13  ;;  %v22285_v4 = vld [vmem:[%s29999_s5 + $0x12d0] ss:$20 sps:$4 sm:$0xff]  }
 0x9bc   :  { %10962 = vmatpush2.bf16.msra.mxu1 %v22278_v20  ;;  %11216 = vmatprep.subr.bf16.mxu0 %v25195_v31  ;;  %v22286_v31 = vld [vmem:[%s29999_s5 + $0x13e8] ss:$20 sps:$4 sm:$0xff]  }
 0x9bd   :  { %20400 = vmatprep.subr.bf16.mxu1 %v22282_v6 }
 0x9bf   :  { %10964 = vmatmul.mubr.bf16.vlgmr.msra.gmra.mxu1 %v27552_v2  ;;  %11217 = vmatpush1.bf16.msra.mxu0 %v25175_v41  ;;  %v22287_v2 = vld [vmem:[%s29999_s5 + $0x12a8] ss:$20 sps:$4 sm:$0xff]   ;;  %v22288_v41 = vld [vmem:[%s29999_s5 + $0x13c0] ss:$20 sps:$4 sm:$0xff]  }
 0x9c0   :  { %20401 = vmatpush3.bf16.msra.mxu1 %v22283_v42  ;;  %11049 = vmatprep.mubr.bf16.mxu1 %v27527_v63  ;;  %v22291_v63 = vld [vmem:[%s29999_s5 + $0x1258] ss:$20 sps:$4 sm:$0xff]   ;;  %v22354_v42 = vld [vmem:[%s29999_s5 + $0x1814] ss:$20 sps:$4 sm:$0xff]  }
 0x9c1   :  { %11218 = vmatprep.subr.bf16.mxu0 %v25211_v23  ;;  %20402 = vmatprep.subr.bf16.mxu1 %v22284_v56  ;;  %v22289_v23 = vld [vmem:[%s29999_s5 + $0x1280] ss:$20 sps:$4 sm:$0xff]  }
 0x9c3   :  { %11219 = vmatpush1.bf16.msra.mxu0 %v25157_v60  ;;  %v22290_v60 = vld [vmem:[%s29999_s5 + $0x1398] ss:$20 sps:$4 sm:$0xff]  }
 0x9c4   :  { %20403 = vmatpush3.bf16.msra.mxu1 %v22285_v4  ;;  %12513 = vmatprep.subr.bf16.mxu0 %v22324_v32  ;;  %v22352_v4 = vld [vmem:[%s29999_s5 + $0x1810] ss:$20 sps:$4 sm:$0xff]   ;;  %v22378_v32 = vld [vmem:[%s29999_s5 + $0x19f4] ss:$20 sps:$4 sm:$0xff]  }
 0x9c5   :  { %20404 = vmatprep.subr.bf16.mxu1 %v22286_v31 }
 0x9c6   :  { %19108 = vmatmul.mubr.msk.bf16.vlgmr.msra.gmra.mxu0 %vm4146_vm3, %v27887_v22 }
 0x9c7   :  { %12514 = vmatpush1.bf16.msra.mxu0 %v22322_v3  ;;  %v22370_v3 = vld [vmem:[%s29999_s5 + $0x1a18] ss:$20 sps:$4 sm:$0xff]  }
 0x9c8   :  { %20405 = vmatpush3.bf16.msra.mxu1 %v22287_v2  ;;  %12515 = vmatprep.subr.bf16.mxu0 %v22330_v44  ;;  %v22360_v2 = vld [vmem:[%s29999_s5 + $0x17ec] ss:$20 sps:$4 sm:$0xff]   ;;  %v22376_v44 = vld [vmem:[%s29999_s5 + $0x19f0] ss:$20 sps:$4 sm:$0xff]  }
 0x9c9   :  { %20406 = vmatprep.subr.bf16.mxu1 %v22288_v41 }
 0x9cb   :  { %12516 = vmatpush1.bf16.msra.mxu0 %v22328_v33  ;;  %v22313_v33 = vld [vmem:[%s29999_s5 + $0x1ae0] ss:$20 sps:$4 sm:$0xff]  }
 0x9cc   :  { %20407 = vmatpush3.bf16.msra.mxu1 %v22289_v23  ;;  %12517 = vmatprep.subr.bf16.mxu0 %v22336_v39  ;;  %v22384_v39 = vld [vmem:[%s29999_s5 + $0x19cc] ss:$20 sps:$4 sm:$0xff]  }
 0x9cd   :  { %20408 = vmatprep.subr.bf16.mxu1 %v22290_v60 }
 0x9cf   :  { %12518 = vmatpush1.bf16.msra.mxu0 %v22334_v55  ;;  %v22382_v55 = vld [vmem:[%s29999_s5 + $0x19c8] ss:$20 sps:$4 sm:$0xff]  }
 0x9d0   :  { %20409 = vmatpush3.bf16.msra.mxu1 %v22291_v63  ;;  %12519 = vmatprep.subr.bf16.mxu0 %v22342_v25  ;;  %v22306_v63 = vld [vmem:[%s29999_s5 + $0x1b5c] ss:$20 sps:$4 sm:$0xff]  }
 0x9d1   :  { %20410 = vmatprep.subr.bf16.mxu1 %v22292_v29  ;;  %v22304_v29 = vld [vmem:[%s29999_s5 + $0x1b58] ss:$20 sps:$4 sm:$0xff]   ;;  %v22396_v25 = vld [vmem:[%s29999_s5 + $0x197c] ss:$20 sps:$4 sm:$0xff]  }
 0x9d3   :  { %12520 = vmatpush1.bf16.msra.mxu0 %v22340_v26  ;;  %v22327_v26 = vld [vmem:[%s29999_s5 + $0x1a6c] ss:$20 sps:$4 sm:$0xff]  }
 0x9d4   :  { %20411 = vmatpush3.bf16.msra.mxu1 %v22293_v27  ;;  %12521 = vmatprep.subr.bf16.mxu0 %v22348_v19  ;;  %v22366_v27 = vld [vmem:[%s29999_s5 + $0x17c4] ss:$20 sps:$4 sm:$0xff]   ;;  %v22325_v19 = vld [vmem:[%s29999_s5 + $0x1a68] ss:$20 sps:$4 sm:$0xff]  }
 0x9d5   :  { %20412 = vmatprep.subr.bf16.mxu1 %v22294_v24  ;;  %v22364_v24 = vld [vmem:[%s29999_s5 + $0x17c0] ss:$20 sps:$4 sm:$0xff]  }
 0x9d7   :  { %12522 = vmatpush1.bf16.msra.mxu0 %v22346_v0  ;;  %v22402_v0 = vld [vmem:[%s29999_s5 + $0x1954] ss:$20 sps:$4 sm:$0xff]  }
 0x9d8   :  { %20413 = vmatpush3.bf16.msra.mxu1 %v22295_v50  ;;  %12523 = vmatprep.subr.bf16.mxu0 %v22354_v42  ;;  %v22372_v50 = vld [vmem:[%s29999_s5 + $0x1a1c] ss:$20 sps:$4 sm:$0xff]   ;;  %v22331_v42 = vld [vmem:[%s29999_s5 + $0x1a40] ss:$20 sps:$4 sm:$0xff]  }
 0x9d9   :  { %20414 = vmatprep.subr.bf16.mxu1 %v22296_v12  ;;  %v22312_v12 = vld [vmem:[%s29999_s5 + $0x1b0c] ss:$20 sps:$4 sm:$0xff]  }
 0x9db   :  { %12524 = vmatpush1.bf16.msra.mxu0 %v22352_v4  ;;  %v22408_v4 = vld [vmem:[%s29999_s5 + $0x192c] ss:$20 sps:$4 sm:$0xff]  }
 0x9dc   :  { %20415 = vmatpush3.bf16.msra.mxu1 %v22297_v43  ;;  %12525 = vmatprep.subr.bf16.mxu0 %v22360_v2  ;;  %v22315_v43 = vld [vmem:[%s29999_s5 + $0x1ae4] ss:$20 sps:$4 sm:$0xff]   ;;  %v22406_v2 = vld [vmem:[%s29999_s5 + $0x1928] ss:$20 sps:$4 sm:$0xff]  }
 0x9dd   :  { %20604 = vmatprep.subr.bf16.mxu1 %v30024_v14 }
 0x9df   :  { %11050 = vmatmul.mubr.bf16.vlgmr.msra.gmra.mxu1 %v27525_v59  ;;  %v22301_v59 = vld [vmem:[%s29999_s5 + $0x1730] ss:$20 sps:$4 sm:$0xff]  }
 0x9e0   :  { %20605 = vmatpush3.bf16.msra.mxu1 %v22298_v54  ;;  %20616 = vmatprep.mubr.msk.bf16.mxu1 %vm23161_vm4, %v30024_v14  ;;  %v22318_v54 = vld [vmem:[%s29999_s5 + $0x1abc] ss:$20 sps:$4 sm:$0xff]  }
 0x9e1   :  { %20606 = vmatprep.subr.bf16.mxu1 %v30024_v14 }
 0x9e4   :  { %20607 = vmatpush3.bf16.msra.mxu1 %v22299_v35  ;;  %v22316_v35 = vld [vmem:[%s29999_s5 + $0x1ab8] ss:$20 sps:$4 sm:$0xff]  }
 0x9e5   :  { %20608 = vmatprep.subr.bf16.mxu1 %v30024_v14 }
 0x9e8   :  { %20609 = vmatpush3.bf16.msra.mxu1 %v22300_v30  ;;  %v22390_v30 = vld [vmem:[%s29999_s5 + $0x19a4] ss:$20 sps:$4 sm:$0xff]  }
 0x9e9   :  { %20610 = vmatprep.subr.bf16.mxu1 %v30024_v14 }
 0x9ea   :  { %v10793_v7 = vpop.f32.mrf.mxu1 }
 0x9ec   :  { %20611 = vmatpush3.bf16.msra.mxu1 %v22301_v59  ;;  %v10795_v6 = vpop.f32.mrf.mxu1  ;;  %v22321_v59 = vld [vmem:[%s29999_s5 + $0x1a94] ss:$20 sps:$4 sm:$0xff]  }
 0x9ed   :  { %20612 = vmatprep.subr.bf16.mxu1 %v30024_v14 }
 0x9ee   :  { %v10797_v41 = vpop.f32.mrf.mxu1 }
 0x9f0   :  { %20613 = vmatpush3.bf16.msra.mxu1 %v22302_v5  ;;  %v22388_v5 = vld [vmem:[%s29999_s5 + $0x19a0] ss:$20 sps:$4 sm:$0xff]  }
 0x9f1   :  { %20614 = vmatprep.subr.bf16.mxu1 %v30024_v14 }
 0x9f4   :  { %20615 = vmatpush3.bf16.msra.mxu1 %v22303_v10  ;;  %v22319_v10 = vld [vmem:[%s29999_s5 + $0x1a90] ss:$20 sps:$4 sm:$0xff]  }
 0x9f5   :  { %20620 = vmatprep.subr.bf16.mxu1 %v30024_v14 }
 0x9f6   :  { %v10836_v20 = vpop.f32.mrf.mxu0 }
 0x9f7   :  { %20617 = vmatmul.mubr.msk.bf16.vlgmr.msra.gmra.mxu1 %vm4077_vm5, %v27715_v21  ;;  %v28018_v56 = vadd.f32 %v10836_v20, %v10793_v7  ;;  %v22394_v7 = vld [vmem:[%s29999_s5 + $0x1978] ss:$20 sps:$4 sm:$0xff]  }
 0x9f8   :  { %20621 = vmatpush3.bf16.msra.mxu1 %v25261_v28  ;;  %20626 = vmatprep.mubr.msk.bf16.mxu1 %vm23161_vm4, %v30024_v14  ;;  %v10838_v31 = vpop.f32.mrf.mxu0  ;;  %v22358_v28 = vld [vmem:[%s29999_s5 + $0x17e8] ss:$20 sps:$4 sm:$0xff]   ;;  %v22333_v20 = vld [vmem:[%s29999_s5 + $0x1a44] ss:$20 sps:$4 sm:$0xff]  }
 0x9f9   :  { %20622 = vmatprep.subr.bf16.mxu1 %v30024_v14  ;;  %v28030_v21 = vadd.f32 %v10838_v31, %v10795_v6  ;;  %12526 = vmatpush1.bf16.msra.mxu0 %v22358_v28  ;;  %v22400_v6 = vld [vmem:[%s29999_s5 + $0x1950] ss:$20 sps:$4 sm:$0xff]   ;;  %v22345_v28 = vld [vmem:[%s29999_s5 + $0x1c74] ss:$20 sps:$4 sm:$0xff]  }
 0x9fa   :  { %v10840_v23 = vpop.f32.mrf.mxu0  ;;  %12527 = vmatprep.subr.bf16.mxu0 %v22366_v27  ;;  %v22339_v31 = vld [vmem:[%s29999_s5 + $0x1c9c] ss:$20 sps:$4 sm:$0xff]   ;;  %v22351_v27 = vld [vmem:[%s29999_s5 + $0x1c4c] ss:$20 sps:$4 sm:$0xff]  }
 0x9fb   :  { %v28032_v60 = vadd.f32 %v10840_v23, %v10797_v41  ;;  %v22337_v41 = vld [vmem:[%s29999_s5 + $0x1c98] ss:$20 sps:$4 sm:$0xff]  }
 0x9fc   :  { %20623 = vmatpush3.bf16.msra.mxu1 %v25265_v58  ;;  %v22309_v58 = vld [vmem:[%s29999_s5 + $0x1b34] ss:$20 sps:$4 sm:$0xff]   ;;  %v22414_v23 = vld [vmem:[%s29999_s5 + $0x1904] ss:$20 sps:$4 sm:$0xff]  }
 0x9fd   :  { %20624 = vmatprep.subr.bf16.mxu1 %v30024_v14  ;;  %12528 = vmatpush1.bf16.msra.mxu0 %v22364_v24  ;;  %v22357_v24 = vld [vmem:[%s29999_s5 + $0x1c24] ss:$20 sps:$4 sm:$0xff]  }
 0x9fe   :  { %12529 = vmatprep.subr.bf16.mxu0 %v22372_v50  ;;  %v22363_v50 = vld [vmem:[%s29999_s5 + $0x1bfc] ss:$20 sps:$4 sm:$0xff]  }
 0xa00   :  { %20625 = vmatpush3.bf16.msra.mxu1 %v25269_v38  ;;  %v22307_v38 = vld [vmem:[%s29999_s5 + $0x1b30] ss:$20 sps:$4 sm:$0xff]  }
 0xa01   :  { %12556 = vmatprep.subr.bf16.mxu1 %v22306_v63  ;;  %12530 = vmatpush2.bf16.msra.mxu0 %v22370_v3  ;;  %v22412_v63 = vld [vmem:[%s29999_s5 + $0x1900] ss:$20 sps:$4 sm:$0xff]  }
 0xa02   :  { %12531 = vmatprep.subr.bf16.mxu0 %v22378_v32  ;;  %v22429_v3 = vld [vmem:[%s29999_s5 + $0x1d8c] ss:$20 sps:$4 sm:$0xff]   ;;  %v22367_v32 = vld [vmem:[%s29999_s5 + $0x1bd0] ss:$20 sps:$4 sm:$0xff]  }
 0xa03   :  { %20627 = vmatmul.mubr.msk.bf16.vlgmr.msra.gmra.mxu1 %vm4146_vm3, %v27887_v22  ;;  %v22310_v22 = vld [vmem:[%s29999_s5 + $0x1b08] ss:$20 sps:$4 sm:$0xff]  }
 0xa04   :  { %12557 = vmatpush1.bf16.msra.mxu1 %v22304_v29  ;;  %v22343_v29 = vld [vmem:[%s29999_s5 + $0x1c70] ss:$20 sps:$4 sm:$0xff]  }
 0xa05   :  { %12558 = vmatprep.subr.bf16.mxu1 %v22309_v58  ;;  %12532 = vmatpush2.bf16.msra.mxu0 %v22376_v44  ;;  %v22349_v58 = vld [vmem:[%s29999_s5 + $0x1c48] ss:$20 sps:$4 sm:$0xff]  }
 0xa06   :  { %12533 = vmatprep.subr.bf16.mxu0 %v22384_v39  ;;  %v22373_v44 = vld [vmem:[%s29999_s5 + $0x1ba8] ss:$20 sps:$4 sm:$0xff]   ;;  %v10799_v39 = vpop.f32.mrf.mxu1 }
 0xa08   :  { %12559 = vmatpush1.bf16.msra.mxu1 %v22307_v38  ;;  %v22355_v38 = vld [vmem:[%s29999_s5 + $0x1c20] ss:$20 sps:$4 sm:$0xff]  }
 0xa09   :  { %12560 = vmatprep.subr.bf16.mxu1 %v22312_v12  ;;  %12534 = vmatpush2.bf16.msra.mxu0 %v22382_v55  ;;  %v22361_v12 = vld [vmem:[%s29999_s5 + $0x1bf8] ss:$20 sps:$4 sm:$0xff]  }
 0xa0a   :  { %12535 = vmatprep.subr.bf16.mxu0 %v22390_v30  ;;  %v22387_v55 = vld [vmem:[%s29999_s5 + $0x18e4] ss:$20 sps:$4 sm:$0xff]  }
 0xa0c   :  { %12561 = vmatpush1.bf16.msra.mxu1 %v22310_v22  ;;  %v22369_v22 = vld [vmem:[%s29999_s5 + $0x1bd4] ss:$20 sps:$4 sm:$0xff]  }
 0xa0d   :  { %12562 = vmatprep.subr.bf16.mxu1 %v22315_v43  ;;  %12536 = vmatpush2.bf16.msra.mxu0 %v22388_v5  ;;  %v22375_v43 = vld [vmem:[%s29999_s5 + $0x1bac] ss:$20 sps:$4 sm:$0xff]  }
 0xa0e   :  { %12537 = vmatprep.subr.bf16.mxu0 %v22396_v25 }
 0xa10   :  { %12563 = vmatpush1.bf16.msra.mxu1 %v22313_v33  ;;  %v22381_v33 = vld [vmem:[%s29999_s5 + $0x1b84] ss:$20 sps:$4 sm:$0xff]  }
 0xa11   :  { %12564 = vmatprep.subr.bf16.mxu1 %v22318_v54  ;;  %12538 = vmatpush2.bf16.msra.mxu0 %v22394_v7  ;;  %v22379_v54 = vld [vmem:[%s29999_s5 + $0x1b80] ss:$20 sps:$4 sm:$0xff]  }
 0xa12   :  { %12539 = vmatprep.subr.bf16.mxu0 %v22402_v0 }
 0xa14   :  { %12565 = vmatpush1.bf16.msra.mxu1 %v22316_v35 }
 0xa15   :  { %12566 = vmatprep.subr.bf16.mxu1 %v22321_v59  ;;  %12540 = vmatpush2.bf16.msra.mxu0 %v22400_v6  ;;  %v10842_v59 = vpop.f32.mrf.mxu0 }
 0xa16   :  { %12541 = vmatprep.subr.bf16.mxu0 %v22408_v4  ;;  %v10843_v7 = vadd.f32 %v10842_v59, %v10799_v39  ;;  %v22435_v39 = vld [vmem:[%s29999_s5 + $0x1d64] ss:$20 sps:$4 sm:$0xff]  }
 0xa18   :  { %12567 = vmatpush1.bf16.msra.mxu1 %v22319_v10 }
 0xa19   :  { %12568 = vmatprep.subr.bf16.mxu1 %v22327_v26  ;;  %12542 = vmatpush2.bf16.msra.mxu0 %v22406_v2 }
 0xa1a   :  { %12543 = vmatprep.subr.bf16.mxu0 %v22414_v23 }
 0xa1c   :  { %12569 = vmatpush1.bf16.msra.mxu1 %v22325_v19 }
 0xa1d   :  { %12570 = vmatprep.subr.bf16.mxu1 %v22333_v20  ;;  %12544 = vmatpush2.bf16.msra.mxu0 %v22412_v63 }
 0xa1e   :  { %12603 = vmatprep.subr.bf16.mxu0 %v22429_v3 }
 0xa20   :  { %12571 = vmatpush1.bf16.msra.mxu1 %v22331_v42 }
 0xa21   :  { %12572 = vmatprep.subr.bf16.mxu1 %v22339_v31 }
 0xa24   :  { %12573 = vmatpush2.bf16.msra.mxu1 %v22337_v41 }
 0xa25   :  { %12574 = vmatprep.subr.bf16.mxu1 %v22345_v28 }
 0xa28   :  { %12575 = vmatpush2.bf16.msra.mxu1 %v22343_v29 }
 0xa29   :  { %12576 = vmatprep.subr.bf16.mxu1 %v22351_v27 }
 0xa2c   :  { %12577 = vmatpush2.bf16.msra.mxu1 %v22349_v58 }
 0xa2d   :  { %12578 = vmatprep.subr.bf16.mxu1 %v22357_v24 }
 0xa30   :  { %12579 = vmatpush2.bf16.msra.mxu1 %v22355_v38 }
 0xa31   :  { %12580 = vmatprep.subr.bf16.mxu1 %v22363_v50 }
 0xa34   :  { %12581 = vmatpush2.bf16.msra.mxu1 %v22361_v12 }
 0xa35   :  { %12582 = vmatprep.subr.bf16.mxu1 %v22369_v22 }
 0xa36   :  { %v10922_v42 = vpop.f32.mrf.mxu0 }
 0xa38   :  { %12583 = vmatpush2.bf16.msra.mxu1 %v22367_v32  ;;  %v10924_v4 = vpop.f32.mrf.mxu0 }
 0xa39   :  { %12584 = vmatprep.subr.bf16.mxu1 %v22375_v43  ;;  %v22427_v43 = vld [vmem:[%s29999_s5 + $0x1d88] ss:$20 sps:$4 sm:$0xff]  }
 0xa3c   :  { %12585 = vmatpush2.bf16.msra.mxu1 %v22373_v44 }
 0xa3d   :  { %12586 = vmatprep.subr.bf16.mxu1 %v22381_v33 }
 0xa3e   :  { %v10879_v35 = vpop.f32.mrf.mxu1 }
 0xa3f   :  { %v10880_v30 = vadd.f32 %v10879_v35, %v28018_v56 }
 0xa40   :  { %v10881_v5 = vpop.f32.mrf.mxu1  ;;  %12587 = vmatpush2.bf16.msra.mxu1 %v22379_v54 }
 0xa41   :  { %v28200_v10 = vadd.f32 %v10880_v30, %v27507_v18  ;;  %v10882_v25 = vadd.f32 %v10881_v5, %v28030_v21  ;;  %12642 = vmatprep.subr.bf16.mxu1 %v22387_v55  ;;  %v10926_v18 = vpop.f32.mrf.mxu0  ;;  %v22433_v5 = vld [vmem:[%s29999_s5 + $0x1d60] ss:$20 sps:$4 sm:$0xff]  }
 0xa42   :  { %v10883_v26 = vpop.f32.mrf.mxu1 }
 0xa43   :  { %v28204_v19 = vadd.f32 %v10882_v25, %v27510_v46  ;;  %v10884_v0 = vadd.f32 %v10883_v26, %v28032_v60  ;;  %v10928_v31 = vpop.f32.mrf.mxu0 }
 0xa44   :  { %v10885_v20 = vpop.f32.mrf.mxu1 }
 0xa45   :  { %v28208_v6 = vadd.f32 %v10884_v0, %v27513_v62  ;;  %v28210_v56 = vadd.f32 %v10885_v20, %v10843_v7 }
 0xa4e   :  { %v11008_v2 = vpop.f32.mrf.mxu0 }
 0xa50   :  { %v11010_v21 = vpop.f32.mrf.mxu0 }
 0xa52   :  { %v11012_v41 = vpop.f32.mrf.mxu0 }
 0xa54   :  { %v11014_v23 = vpop.f32.mrf.mxu0 }
 0xa6e   :  { %v20438_v28 = vpop.f32.mrf.mxu0 }
 0xa70   :  { %v20439_v63 = vpop.f32.mrf.mxu0 }
 0xa71   :  { %v28212_v46 = vadd.f32 %v20439_v63, %v20438_v28  ;;  %v22445_v28 = vld [vmem:[%s29999_s5 + $0x1d10] ss:$20 sps:$4 sm:$0xff]   ;;  %v22453_v63 = vld [vmem:[%s29999_s5 + $0x1cec] ss:$20 sps:$4 sm:$0xff]  }
 0xa72   :  { %v20441_v29 = vpop.f32.mrf.mxu0 }
 0xa74   :  { %v20442_v60 = vpop.f32.mrf.mxu0 }
 0xa75   :  { %v28214_v27 = vadd.f32 %v20442_v60, %v20441_v29  ;;  %v22391_v29 = vld [vmem:[%s29999_s5 + $0x18b8] ss:$20 sps:$4 sm:$0xff]   ;;  %v22399_v60 = vld [vmem:[%s29999_s5 + $0x1894] ss:$20 sps:$4 sm:$0xff]  }
 0xa7a   :  { %v11195_v62 = vpop.f32.mrf.mxu0 }
 0xa7c   :  { %v11197_v58 = vpop.f32.mrf.mxu0 }
 0xa7e   :  { %v11199_v24 = vpop.f32.mrf.mxu0 }
 0xa7f   :  { %v10965_v38 = vpop.f32.mrf.mxu1  ;;  %v28216_v12 = vpack.c.bf16 %v11199_v24, %v11195_v62  ;;  %v22451_v62 = vld [vmem:[%s29999_s5 + $0x1ce8] ss:$20 sps:$4 sm:$0xff]   ;;  %v22397_v24 = vld [vmem:[%s29999_s5 + $0x1890] ss:$20 sps:$4 sm:$0xff]  }
 0xa80   :  { %v10966_v50 = vadd.f32 %v10965_v38, %v10922_v42  ;;  %v11201_v3 = vpop.f32.mrf.mxu0  ;;  %v22405_v38 = vld [vmem:[%s29999_s5 + $0x186c] ss:$20 sps:$4 sm:$0xff]  }
 0xa81   :  { %v10967_v22 = vpop.f32.mrf.mxu1  ;;  %v28218_v32 = vpack.c.bf16 %v11201_v3, %v11197_v58  ;;  %v22459_v58 = vld [vmem:[%s29999_s5 + $0x1cc4] ss:$20 sps:$4 sm:$0xff]  }
 0xa82   :  { %v11009_v44 = vadd.f32 %v11008_v2, %v10966_v50  ;;  %v10968_v33 = vadd.f32 %v10967_v22, %v10924_v4  ;;  %v22457_v50 = vld [vmem:[%s29999_s5 + $0x1cc0] ss:$20 sps:$4 sm:$0xff]   ;;  %v22465_v3 = vld [vmem:[%s29999_s5 + $0x1b64] ss:$20 sps:$4 sm:$0xff]   ;;  %v22403_v22 = vld [vmem:[%s29999_s5 + $0x1868] ss:$20 sps:$4 sm:$0xff]  }
 0xa83   :  { %v10969_v54 = vpop.f32.mrf.mxu1  ;;  %12545 = vmatprep.mubr.bf16.mxu0 %v28218_v32 }
 0xa84   :  { %v28228_v55 = vadd.f32 %v11009_v44, %v27575_v40  ;;  %v11011_v35 = vadd.f32 %v11010_v21, %v10968_v33  ;;  %v10970_v30 = vadd.f32 %v10969_v54, %v10926_v18  ;;  %12546 = vmatmul.mubr.bf16.vlgmr.msra.gmra.mxu0 %v28216_v12  ;;  %v22441_v40 = vld [vmem:[%s29999_s5 + $0x1d3c] ss:$20 sps:$4 sm:$0xff]   ;;  %v22409_v44 = vld [vmem:[%s29999_s5 + $0x1840] ss:$20 sps:$4 sm:$0xff]  }
 0xa85   :  { %v10971_v59 = vpop.f32.mrf.mxu1  ;;  %12604 = vmatpush1.bf16.msra.mxu0 %v22427_v43  ;;  %12631 = vmatprep.mubr.bf16.mxu0 %v30023_v13  ;;  %v22411_v43 = vld [vmem:[%s29999_s5 + $0x1844] ss:$20 sps:$4 sm:$0xff]   ;;  %v22417_v33 = vld [vmem:[%s29999_s5 + $0x181c] ss:$20 sps:$4 sm:$0xff]  }
 0xa86   :  { %v28236_v25 = vadd.f32 %v11011_v35, %v27587_v8  ;;  %v11013_v26 = vadd.f32 %v11012_v41, %v10970_v30  ;;  %v10972_v7 = vadd.f32 %v10971_v59, %v10928_v31  ;;  %v11238_v0 = vpop.f32.mrf.mxu0  ;;  %12605 = vmatprep.subr.bf16.mxu0 %v22435_v39  ;;  %v22439_v8 = vld [vmem:[%s29999_s5 + $0x1d38] ss:$20 sps:$4 sm:$0xff]   ;;  %v22447_v31 = vld [vmem:[%s29999_s5 + $0x1d14] ss:$20 sps:$4 sm:$0xff]  }
 0xa87   :  { %v22415_v35 = vld [vmem:[%s29999_s5 + $0x1818] ss:$20 sps:$4 sm:$0xff]   ;;  %v22420_v59 = vld [vmem:[%s29999_s5 + $0x17f4] ss:$20 sps:$4 sm:$0xff]  }
 0xa88   :  { %v28242_v20 = vadd.f32 %v11013_v26, %v27593_v48  ;;  %v28244_v42 = vadd.f32 %v11014_v23, %v10972_v7  ;;  %v11240_v4 = vpop.f32.mrf.mxu0  ;;  %v22385_v48 = vld [vmem:[%s29999_s5 + $0x18e0] ss:$20 sps:$4 sm:$0xff]   ;;  %v22393_v23 = vld [vmem:[%s29999_s5 + $0x18bc] ss:$20 sps:$4 sm:$0xff]  }
 0xa89   :  { %12606 = vmatpush1.bf16.msra.mxu0 %v22433_v5 }
 0xa8a   :  { %v11242_v18 = vpop.f32.mrf.mxu0  ;;  %12607 = vmatprep.subr.bf16.mxu0 %v22441_v40 }
 0xa8b   :  { %v28252_v2 = vpack.c.bf16 %v11242_v18, %v11238_v0  ;;  %v22418_v0 = vld [vmem:[%s29999_s5 + $0x17f0] ss:$20 sps:$4 sm:$0xff]   ;;  %v22421_v18 = vld [vmem:[%s29999_s5 + $0x17c8] ss:$20 sps:$4 sm:$0xff]  }
 0xa8c   :  { %v11244_v21 = vpop.f32.mrf.mxu0 }
 0xa8d   :  { %v28254_v41 = vpack.c.bf16 %v11244_v21, %v11240_v4  ;;  %12608 = vmatpush1.bf16.msra.mxu0 %v22439_v8  ;;  %v22423_v4 = vld [vmem:[%s29999_s5 + $0x17cc] ss:$20 sps:$4 sm:$0xff]  }
 0xa8e   :  { %12609 = vmatprep.subr.bf16.mxu0 %v22447_v31  ;;  %v22424_v31 = vld [vmem:[%s29999_s5 + $0x1a20] ss:$20 sps:$4 sm:$0xff]   ;;  %v22430_v21 = vld [vmem:[%s29999_s5 + $0x19f8] ss:$20 sps:$4 sm:$0xff]  }
 0xa8f   :  { %12588 = vmatprep.mubr.bf16.mxu1 %v28254_v41 }
 0xa90   :  { %12589 = vmatmul.mubr.bf16.vlgmr.msra.gmra.mxu1 %v28252_v2 }
 0xa91   :  { %12643 = vmatpush1.bf16.msra.mxu1 %v22385_v48  ;;  %12674 = vmatprep.mubr.bf16.mxu1 %v28218_v32  ;;  %v22438_v48 = vld [vmem:[%s29999_s5 + $0x19d4] ss:$20 sps:$4 sm:$0xff]  }
 0xa92   :  { %12644 = vmatprep.subr.bf16.mxu1 %v22393_v23  ;;  %12610 = vmatpush1.bf16.msra.mxu0 %v22445_v28  ;;  %v22436_v23 = vld [vmem:[%s29999_s5 + $0x19d0] ss:$20 sps:$4 sm:$0xff]   ;;  %v22444_v28 = vld [vmem:[%s29999_s5 + $0x19ac] ss:$20 sps:$4 sm:$0xff]  }
 0xa93   :  { %12611 = vmatprep.subr.bf16.mxu0 %v22453_v63 }
 0xa95   :  { %12645 = vmatpush1.bf16.msra.mxu1 %v22391_v29 }
 0xa96   :  { %12646 = vmatprep.subr.bf16.mxu1 %v22399_v60  ;;  %12612 = vmatpush1.bf16.msra.mxu0 %v22451_v62  ;;  %v22442_v62 = vld [vmem:[%s29999_s5 + $0x19a8] ss:$20 sps:$4 sm:$0xff]  }
 0xa97   :  { %12613 = vmatprep.subr.bf16.mxu0 %v22459_v58 }
 0xa99   :  { %12647 = vmatpush1.bf16.msra.mxu1 %v22397_v24  ;;  %v22450_v24 = vld [vmem:[%s29999_s5 + $0x1984] ss:$20 sps:$4 sm:$0xff]  }
 0xa9a   :  { %12648 = vmatprep.subr.bf16.mxu1 %v22405_v38  ;;  %12614 = vmatpush1.bf16.msra.mxu0 %v22457_v50 }
 0xa9b   :  { %12685 = vmatprep.subr.bf16.mxu0 %v22465_v3 }
 0xa9d   :  { %12649 = vmatpush1.bf16.msra.mxu1 %v22403_v22  ;;  %v22448_v22 = vld [vmem:[%s29999_s5 + $0x1980] ss:$20 sps:$4 sm:$0xff]  }
 0xa9e   :  { %12650 = vmatprep.subr.bf16.mxu1 %v22411_v43 }
 0xa9f   :  { %v20416_v39 = vpop.f32.mrf.mxu1 }
 0xaa1   :  { %12651 = vmatpush1.bf16.msra.mxu1 %v22409_v44  ;;  %v20417_v54 = vpop.f32.mrf.mxu1  ;;  %v22454_v44 = vld [vmem:[%s29999_s5 + $0x1958] ss:$20 sps:$4 sm:$0xff]  }
 0xaa2   :  { %v20418_v30 = vadd.f32 %v20417_v54, %v20416_v39  ;;  %12652 = vmatprep.subr.bf16.mxu1 %v22417_v33  ;;  %v22462_v33 = vld [vmem:[%s29999_s5 + $0x1934] ss:$20 sps:$4 sm:$0xff]  }
 0xaa3   :  { %v20419_v5 = vpop.f32.mrf.mxu1 }
 0xaa4   :  { %v11093_v26 = vadd.f32 %v28212_v46, %v20418_v30  ;;  %v22426_v46 = vld [vmem:[%s29999_s5 + $0x1a24] ss:$20 sps:$4 sm:$0xff]  }
 0xaa5   :  { %12653 = vmatpush1.bf16.msra.mxu1 %v22415_v35  ;;  %v20420_v7 = vpop.f32.mrf.mxu1  ;;  %v22468_v35 = vld [vmem:[%s29999_s5 + $0x190c] ss:$20 sps:$4 sm:$0xff]  }
 0xaa6   :  { %v20421_v40 = vadd.f32 %v20420_v7, %v20419_v5  ;;  %12654 = vmatprep.subr.bf16.mxu1 %v22420_v59  ;;  %v22463_v59 = vld [vmem:[%s29999_s5 + $0x1b60] ss:$20 sps:$4 sm:$0xff]  }
 0xaa8   :  { %v11096_v8 = vadd.f32 %v28214_v27, %v20421_v40  ;;  %v22432_v27 = vld [vmem:[%s29999_s5 + $0x19fc] ss:$20 sps:$4 sm:$0xff]   ;;  %v22474_v40 = vld [vmem:[%s29999_s5 + $0x1d94] ss:$20 sps:$4 sm:$0xff]  }
 0xaa9   :  { %12655 = vmatpush1.bf16.msra.mxu1 %v22418_v0  ;;  %v22466_v0 = vld [vmem:[%s29999_s5 + $0x1908] ss:$20 sps:$4 sm:$0xff]  }
 0xaaa   :  { %12656 = vmatprep.subr.bf16.mxu1 %v22423_v4  ;;  %v22469_v4 = vld [vmem:[%s29999_s5 + $0x1b38] ss:$20 sps:$4 sm:$0xff]  }
 0xaad   :  { %12657 = vmatpush1.bf16.msra.mxu1 %v22421_v18  ;;  %v22472_v18 = vld [vmem:[%s29999_s5 + $0x1d90] ss:$20 sps:$4 sm:$0xff]  }
 0xaae   :  { %12658 = vmatprep.subr.bf16.mxu1 %v22426_v46  ;;  %v22480_v46 = vld [vmem:[%s29999_s5 + $0x1d6c] ss:$20 sps:$4 sm:$0xff]  }
 0xab1   :  { %12659 = vmatpush2.bf16.msra.mxu1 %v22424_v31  ;;  %v22475_v31 = vld [vmem:[%s29999_s5 + $0x1b10] ss:$20 sps:$4 sm:$0xff]  }
 0xab2   :  { %12660 = vmatprep.subr.bf16.mxu1 %v22432_v27  ;;  %v22483_v27 = vld [vmem:[%s29999_s5 + $0x1aec] ss:$20 sps:$4 sm:$0xff]  }
 0xab5   :  { %12661 = vmatpush2.bf16.msra.mxu1 %v22430_v21  ;;  %v22478_v21 = vld [vmem:[%s29999_s5 + $0x1d68] ss:$20 sps:$4 sm:$0xff]  }
 0xab6   :  { %12662 = vmatprep.subr.bf16.mxu1 %v22438_v48  ;;  %v22486_v48 = vld [vmem:[%s29999_s5 + $0x1d44] ss:$20 sps:$4 sm:$0xff]  }
 0xab7   :  { %v11133_v63 = vpop.f32.mrf.mxu1 }
 0xab8   :  { %v11134_v29 = vadd.f32 %v11133_v63, %v11093_v26  ;;  %v22471_v26 = vld [vmem:[%s29999_s5 + $0x1b3c] ss:$20 sps:$4 sm:$0xff]   ;;  %v22484_v63 = vld [vmem:[%s29999_s5 + $0x1d40] ss:$20 sps:$4 sm:$0xff]  }
 0xab9   :  { %12663 = vmatpush2.bf16.msra.mxu1 %v22436_v23  ;;  %v20618_v60 = vpop.f32.mrf.mxu1  ;;  %v22481_v23 = vld [vmem:[%s29999_s5 + $0x1ae8] ss:$20 sps:$4 sm:$0xff]  }
 0xaba   :  { %v28349_v58 = vadd.f32 %v11134_v29, %v27683_v9  ;;  %12664 = vmatprep.subr.bf16.mxu1 %v22444_v28  ;;  %v22456_v9 = vld [vmem:[%s29999_s5 + $0x195c] ss:$20 sps:$4 sm:$0xff]   ;;  %v22489_v28 = vld [vmem:[%s29999_s5 + $0x1ac4] ss:$20 sps:$4 sm:$0xff]   ;;  %v22487_v60 = vld [vmem:[%s29999_s5 + $0x1ac0] ss:$20 sps:$4 sm:$0xff]  }
 0xabb   :  { %v11136_v38 = vpop.f32.mrf.mxu1  ;;  %v22492_v29 = vld [vmem:[%s29999_s5 + $0x1d1c] ss:$20 sps:$4 sm:$0xff]  }
 0xabc   :  { %v11137_v50 = vadd.f32 %v11136_v38, %v11096_v8  ;;  %v22477_v8 = vld [vmem:[%s29999_s5 + $0x1b14] ss:$20 sps:$4 sm:$0xff]  }
 0xabd   :  { %12665 = vmatpush2.bf16.msra.mxu1 %v22442_v62  ;;  %v20619_v3 = vpop.f32.mrf.mxu1  ;;  %v22495_v62 = vld [vmem:[%s29999_s5 + $0x1a9c] ss:$20 sps:$4 sm:$0xff]   ;;  %v22498_v38 = vld [vmem:[%s29999_s5 + $0x1cf4] ss:$20 sps:$4 sm:$0xff]  }
 0xabe   :  { %v28358_v43 = vadd.f32 %v11137_v50, %v27693_v15  ;;  %12666 = vmatprep.subr.bf16.mxu1 %v22450_v24  ;;  %v22460_v15 = vld [vmem:[%s29999_s5 + $0x1930] ss:$20 sps:$4 sm:$0xff]   ;;  %v22490_v24 = vld [vmem:[%s29999_s5 + $0x1d18] ss:$20 sps:$4 sm:$0xff]   ;;  %v22501_v3 = vld [vmem:[%s29999_s5 + $0x1a74] ss:$20 sps:$4 sm:$0xff]  }
 0xabf   :  { %v22493_v50 = vld [vmem:[%s29999_s5 + $0x1a98] ss:$20 sps:$4 sm:$0xff]  }
 0xac1   :  { %12667 = vmatpush2.bf16.msra.mxu1 %v22448_v22  ;;  %v22496_v22 = vld [vmem:[%s29999_s5 + $0x1cf0] ss:$20 sps:$4 sm:$0xff]  }
 0xac2   :  { %12668 = vmatprep.subr.bf16.mxu1 %v22456_v9  ;;  %v22504_v9 = vld [vmem:[%s29999_s5 + $0x1ccc] ss:$20 sps:$4 sm:$0xff]  }
 0xac3   :  { %v11281_v39 = vpop.f32.mrf.mxu1 }
 0xac5   :  { %12669 = vmatpush2.bf16.msra.mxu1 %v22454_v44  ;;  %v20628_v54 = vpop.f32.mrf.mxu1  ;;  %v22499_v44 = vld [vmem:[%s29999_s5 + $0x1a70] ss:$20 sps:$4 sm:$0xff]  }
 0xac6   :  { %12670 = vmatprep.subr.bf16.mxu1 %v22462_v33  ;;  %v22507_v33 = vld [vmem:[%s29999_s5 + $0x1a4c] ss:$20 sps:$4 sm:$0xff]   ;;  %v22508_v54 = vld [vmem:[%s29999_s5 + $0x1ca8] ss:$20 sps:$4 sm:$0xff]  }
 0xac7   :  { %v11284_v30 = vpop.f32.mrf.mxu1 }
 0xac8   :  { %v28378_v5 = vpack.c.bf16 %v11284_v30, %v11281_v39  ;;  %v22502_v39 = vld [vmem:[%s29999_s5 + $0x1cc8] ss:$20 sps:$4 sm:$0xff]  }
 0xac9   :  { %12671 = vmatpush2.bf16.msra.mxu1 %v22460_v15  ;;  %v20629_v7 = vpop.f32.mrf.mxu1  ;;  %v22505_v15 = vld [vmem:[%s29999_s5 + $0x1a48] ss:$20 sps:$4 sm:$0xff]  }
 0xaca   :  { %19528 = vmatmul.mubr.msk.bf16.vlgmr.msra.gmra.mxu0 %vm4077_vm5, %v28378_v5  ;;  %12672 = vmatprep.subr.bf16.mxu1 %v22468_v35  ;;  %v22512_v35 = vld [vmem:[%s29999_s5 + $0x1ca4] ss:$20 sps:$4 sm:$0xff]   ;;  %v22509_v30 = vld [vmem:[%s29999_s5 + $0x1b68] ss:$20 sps:$4 sm:$0xff]  }
 0xacb   :  { %12686 = vmatpush1.bf16.msra.mxu0 %v22463_v59  ;;  %12717 = vmatprep.mubr.bf16.mxu0 %v28254_v41  ;;  %v22513_v59 = vld [vmem:[%s29999_s5 + $0x1c80] ss:$20 sps:$4 sm:$0xff]   ;;  %v22517_v7 = vld [vmem:[%s29999_s5 + $0x1c7c] ss:$20 sps:$4 sm:$0xff]  }
 0xacc   :  { %12687 = vmatprep.subr.bf16.mxu0 %v22471_v26  ;;  %v22510_v26 = vld [vmem:[%s29999_s5 + $0x1ca0] ss:$20 sps:$4 sm:$0xff]  }
 0xacd   :  { %12673 = vmatpush2.bf16.msra.mxu1 %v22466_v0  ;;  %v22514_v0 = vld [vmem:[%s29999_s5 + $0x1b40] ss:$20 sps:$4 sm:$0xff]  }
 0xace   :  { %12732 = vmatprep.subr.bf16.mxu1 %v22474_v40  ;;  %v22518_v40 = vld [vmem:[%s29999_s5 + $0x1c58] ss:$20 sps:$4 sm:$0xff]  }
 0xacf   :  { %12688 = vmatpush1.bf16.msra.mxu0 %v22469_v4  ;;  %v22515_v4 = vld [vmem:[%s29999_s5 + $0x1c78] ss:$20 sps:$4 sm:$0xff]  }
 0xad0   :  { %12675 = vmatmul.mubr.bf16.vlgmr.msra.gmra.mxu1 %v28216_v12  ;;  %12689 = vmatprep.subr.bf16.mxu0 %v22477_v8  ;;  %v22522_v8 = vld [vmem:[%s29999_s5 + $0x1c54] ss:$20 sps:$4 sm:$0xff]  }
 0xad1   :  { %12733 = vmatpush1.bf16.msra.mxu1 %v22472_v18  ;;  %12760 = vmatprep.mubr.bf16.mxu1 %v30023_v13  ;;  %v22523_v18 = vld [vmem:[%s29999_s5 + $0x1c30] ss:$20 sps:$4 sm:$0xff]  }
 0xad2   :  { %12734 = vmatprep.subr.bf16.mxu1 %v22480_v46  ;;  %v22520_v46 = vld [vmem:[%s29999_s5 + $0x1c50] ss:$20 sps:$4 sm:$0xff]  }
 0xad3   :  { %12690 = vmatpush1.bf16.msra.mxu0 %v22475_v31  ;;  %v22527_v31 = vld [vmem:[%s29999_s5 + $0x1c2c] ss:$20 sps:$4 sm:$0xff]  }
 0xad4   :  { %12691 = vmatprep.subr.bf16.mxu0 %v22483_v27  ;;  %v22524_v27 = vld [vmem:[%s29999_s5 + $0x1af0] ss:$20 sps:$4 sm:$0xff]  }
 0xad5   :  { %12735 = vmatpush1.bf16.msra.mxu1 %v22478_v21  ;;  %v22528_v21 = vld [vmem:[%s29999_s5 + $0x1c08] ss:$20 sps:$4 sm:$0xff]  }
 0xad6   :  { %12736 = vmatprep.subr.bf16.mxu1 %v22486_v48  ;;  %v22525_v48 = vld [vmem:[%s29999_s5 + $0x1c28] ss:$20 sps:$4 sm:$0xff]  }
 0xad7   :  { %12692 = vmatpush1.bf16.msra.mxu0 %v22481_v23  ;;  %v22532_v23 = vld [vmem:[%s29999_s5 + $0x1c04] ss:$20 sps:$4 sm:$0xff]  }
 0xad8   :  { %12693 = vmatprep.subr.bf16.mxu0 %v22489_v28  ;;  %v22529_v28 = vld [vmem:[%s29999_s5 + $0x1ac8] ss:$20 sps:$4 sm:$0xff]  }
 0xad9   :  { %12737 = vmatpush1.bf16.msra.mxu1 %v22484_v63  ;;  %v22533_v63 = vld [vmem:[%s29999_s5 + $0x1be0] ss:$20 sps:$4 sm:$0xff]  }
 0xada   :  { %12738 = vmatprep.subr.bf16.mxu1 %v22492_v29  ;;  %v22530_v29 = vld [vmem:[%s29999_s5 + $0x1c00] ss:$20 sps:$4 sm:$0xff]  }
 0xadb   :  { %12694 = vmatpush1.bf16.msra.mxu0 %v22487_v60  ;;  %v22537_v60 = vld [vmem:[%s29999_s5 + $0x1bdc] ss:$20 sps:$4 sm:$0xff]  }
 0xadc   :  { %12695 = vmatprep.subr.bf16.mxu0 %v22495_v62  ;;  %v22534_v62 = vld [vmem:[%s29999_s5 + $0x1aa0] ss:$20 sps:$4 sm:$0xff]  }
 0xadd   :  { %12739 = vmatpush1.bf16.msra.mxu1 %v22490_v24  ;;  %v22538_v24 = vld [vmem:[%s29999_s5 + $0x1bb8] ss:$20 sps:$4 sm:$0xff]  }
 0xade   :  { %12740 = vmatprep.subr.bf16.mxu1 %v22498_v38  ;;  %v22535_v38 = vld [vmem:[%s29999_s5 + $0x1bd8] ss:$20 sps:$4 sm:$0xff]  }
 0xadf   :  { %12696 = vmatpush1.bf16.msra.mxu0 %v22493_v50  ;;  %v22542_v50 = vld [vmem:[%s29999_s5 + $0x1bb4] ss:$20 sps:$4 sm:$0xff]  }
 0xae0   :  { %12697 = vmatprep.subr.bf16.mxu0 %v22501_v3  ;;  %v22539_v3 = vld [vmem:[%s29999_s5 + $0x1a78] ss:$20 sps:$4 sm:$0xff]  }
 0xae1   :  { %12741 = vmatpush1.bf16.msra.mxu1 %v22496_v22  ;;  %v22543_v22 = vld [vmem:[%s29999_s5 + $0x1b90] ss:$20 sps:$4 sm:$0xff]  }
 0xae2   :  { %12742 = vmatprep.subr.bf16.mxu1 %v22504_v9  ;;  %v22540_v9 = vld [vmem:[%s29999_s5 + $0x1bb0] ss:$20 sps:$4 sm:$0xff]  }
 0xae3   :  { %12698 = vmatpush1.bf16.msra.mxu0 %v22499_v44  ;;  %v22547_v44 = vld [vmem:[%s29999_s5 + $0x1b8c] ss:$20 sps:$4 sm:$0xff]  }
 0xae4   :  { %12699 = vmatprep.subr.bf16.mxu0 %v22507_v33  ;;  %v22544_v33 = vld [vmem:[%s29999_s5 + $0x1a50] ss:$20 sps:$4 sm:$0xff]  }
 0xae5   :  { %12743 = vmatpush1.bf16.msra.mxu1 %v22502_v39  ;;  %v22545_v39 = vld [vmem:[%s29999_s5 + $0x1b88] ss:$20 sps:$4 sm:$0xff]  }
 0xae6   :  { %20477 = vmatprep.subr.bf16.mxu1 %v22508_v54  ;;  %v22548_v54 = vld [vmem:[%s29999_s5 + $0x1a28] ss:$20 sps:$4 sm:$0xff]  }
 0xae7   :  { %12700 = vmatpush1.bf16.msra.mxu0 %v22505_v15  ;;  %v22549_v15 = vld [vmem:[%s29999_s5 + $0x18e8] ss:$20 sps:$4 sm:$0xff]  }
 0xae8   :  { %19529 = vmatmul.mubr.msk.bf16.vlgmr.msra.gmra.mxu1 %vm4077_vm5, %v28378_v5  ;;  %12701 = vmatprep.subr.bf16.mxu0 %v22512_v35  ;;  %v22550_v35 = vld [vmem:[%s29999_s5 + $0x1a00] ss:$20 sps:$4 sm:$0xff]  }
 0xae9   :  { %20478 = vmatpush3.bf16.msra.mxu1 %v22509_v30  ;;  %12844 = vmatprep.mubr.bf16.mxu1 %v28254_v41  ;;  %v22519_v41 = vld [vmem:[%s29999_s5 + $0x1b18] ss:$20 sps:$4 sm:$0xff]   ;;  %v22551_v30 = vld [vmem:[%s29999_s5 + $0x18c0] ss:$20 sps:$4 sm:$0xff]  }
 0xaea   :  { %20479 = vmatprep.subr.bf16.mxu1 %v22513_v59  ;;  %v22552_v59 = vld [vmem:[%s29999_s5 + $0x19d8] ss:$20 sps:$4 sm:$0xff]  }
 0xaeb   :  { %12702 = vmatpush2.bf16.msra.mxu0 %v22510_v26  ;;  %v22553_v26 = vld [vmem:[%s29999_s5 + $0x1898] ss:$20 sps:$4 sm:$0xff]  }
 0xaec   :  { %12703 = vmatprep.subr.bf16.mxu0 %v22517_v7  ;;  %v22556_v7 = vld [vmem:[%s29999_s5 + $0x1988] ss:$20 sps:$4 sm:$0xff]  }
 0xaed   :  { %20480 = vmatpush3.bf16.msra.mxu1 %v22514_v0  ;;  %v22557_v0 = vld [vmem:[%s29999_s5 + $0x1848] ss:$20 sps:$4 sm:$0xff]  }
 0xaee   :  { %20481 = vmatprep.subr.bf16.mxu1 %v22518_v40  ;;  %v22558_v40 = vld [vmem:[%s29999_s5 + $0x1960] ss:$20 sps:$4 sm:$0xff]  }
 0xaef   :  { %12704 = vmatpush2.bf16.msra.mxu0 %v22515_v4  ;;  %v22559_v4 = vld [vmem:[%s29999_s5 + $0x1820] ss:$20 sps:$4 sm:$0xff]  }
 0xaf0   :  { %12705 = vmatprep.subr.bf16.mxu0 %v22522_v8  ;;  %v22560_v8 = vld [vmem:[%s29999_s5 + $0x1938] ss:$20 sps:$4 sm:$0xff]  }
 0xaf1   :  { %20482 = vmatpush3.bf16.msra.mxu1 %v22519_v41  ;;  %v22561_v41 = vld [vmem:[%s29999_s5 + $0x17f8] ss:$20 sps:$4 sm:$0xff]  }
 0xaf2   :  { %20483 = vmatprep.subr.bf16.mxu1 %v22523_v18  ;;  %v22562_v18 = vld [vmem:[%s29999_s5 + $0x1910] ss:$20 sps:$4 sm:$0xff]  }
 0xaf3   :  { %12706 = vmatpush2.bf16.msra.mxu0 %v22520_v46  ;;  %v22563_v46 = vld [vmem:[%s29999_s5 + $0x17d0] ss:$20 sps:$4 sm:$0xff]  }
 0xaf4   :  { %12707 = vmatprep.subr.bf16.mxu0 %v22527_v31  ;;  %v22564_v31 = vld [vmem:[%s29999_s5 + $0x1d98] ss:$20 sps:$4 sm:$0xff]  }
 0xaf5   :  { %20484 = vmatpush3.bf16.msra.mxu1 %v22524_v27  ;;  %v22565_v27 = vld [vmem:[%s29999_s5 + $0x1d70] ss:$20 sps:$4 sm:$0xff]  }
 0xaf6   :  { %20485 = vmatprep.subr.bf16.mxu1 %v22528_v21  ;;  %v22566_v21 = vld [vmem:[%s29999_s5 + $0x1d48] ss:$20 sps:$4 sm:$0xff]  }
 0xaf7   :  { %12708 = vmatpush2.bf16.msra.mxu0 %v22525_v48  ;;  %v22568_v48 = vld [vmem:[%s29999_s5 + $0x1cf8] ss:$20 sps:$4 sm:$0xff]  }
 0xaf8   :  { %12709 = vmatprep.subr.bf16.mxu0 %v22532_v23  ;;  %v22569_v23 = vld [vmem:[%s29999_s5 + $0x1cd0] ss:$20 sps:$4 sm:$0xff]  }
 0xaf9   :  { %20486 = vmatpush3.bf16.msra.mxu1 %v22529_v28 }
 0xafa   :  { %20487 = vmatprep.subr.bf16.mxu1 %v22533_v63 }
 0xafb   :  { %12710 = vmatpush2.bf16.msra.mxu0 %v22530_v29 }
 0xafc   :  { %12711 = vmatprep.subr.bf16.mxu0 %v22537_v60  ;;  %v5973_v60 = vadd.f32 %v26314_v1, %v26292_v47 }
 0xafd   :  { %20488 = vmatpush3.bf16.msra.mxu1 %v22534_v62 }
 0xafe   :  { %20489 = vmatprep.subr.bf16.mxu1 %v22538_v24  ;;  %v6016_v62 = vadd.f32 %v26522_v49, %v5973_v60 }
 0xaff   :  { %12712 = vmatpush2.bf16.msra.mxu0 %v22535_v38 }
 0xb00   :  { %12713 = vmatprep.subr.bf16.mxu0 %v22542_v50  ;;  %v7302_v50 = vadd.f32 %v26756_v36, %v6016_v62 }
 0xb01   :  { %20490 = vmatpush3.bf16.msra.mxu1 %v22539_v3 }
 0xb02   :  { %20491 = vmatprep.subr.bf16.mxu1 %v22543_v22  ;;  %v7345_v3 = vadd.f32 %v26836_v61, %v7302_v50  ;;  %v9089_v22 = vadd.f32 %v27504_v51, %v27499_v17  ;;  %v30026_v50 = vld [vmem:[#allocation12_spill] sm:$0xff] }
 0xb03   :  { %12714 = vmatpush2.bf16.msra.mxu0 %v22540_v9 }
 0xb04   :  { %12715 = vmatprep.subr.bf16.mxu0 %v22547_v44  ;;  %v28657_v44 = vld [vmem:[%s30000_s6] sm:$0x1f]  ;;  %v9132_v47 = vadd.f32 %v27550_v45, %v9089_v22  ;;  %v7388_v61 = vadd.f32 %v26818_v53, %v7345_v3  ;;  %v9218_v3 = vadd.f32 %v27634_v11, %v30026_v50 }
 0xb05   :  { %20492 = vmatpush3.bf16.msra.mxu1 %v22544_v33  ;;  %v12909_v36 = vrot.slane %v28657_v44, %v25077_v16 }
 0xb07   :  { %12716 = vmatpush2.bf16.msra.mxu0 %v22545_v39 }
 0xb08   :  { %12845 = vmatmul.mubr.bf16.vlgmr.msra.gmra.mxu1 %v28252_v2  ;;  %20455 = vmatprep.subr.bf16.mxu0 %v22548_v54 }
 0xb09   :  { %13014 = vmatprep.mubr.bf16.mxu1 %v30023_v13 }
 0xb0a   :  { %12718 = vmatmul.mubr.bf16.vlgmr.msra.gmra.mxu0 %v28252_v2  ;;  %v22554_v2 = vld [vmem:[%s29999_s5 + $0x19b0] ss:$20 sps:$4 sm:$0xff]  }
 0xb0b   :  { %20456 = vmatpush3.bf16.msra.mxu0 %v22549_v15  ;;  %12803 = vmatprep.mubr.bf16.mxu0 %v28218_v32  ;;  %v22555_v32 = vld [vmem:[%s29999_s5 + $0x1870] ss:$20 sps:$4 sm:$0xff]  }
 0xb0c   :  { %20457 = vmatprep.subr.bf16.mxu0 %v22550_v35 }
 0xb0f   :  { %20458 = vmatpush3.bf16.msra.mxu0 %v22551_v30  ;;  %v12913_v30 = vrot.slane %v28657_v44, %v25086_v57 }
 0xb10   :  { %20459 = vmatprep.subr.bf16.mxu0 %v22552_v59  ;;  %v9392_v59 = vadd.f32 %v9132_v47, %v7388_v61  ;;  %v30029_v61 = vld [vmem:[#allocation8_spill] sm:$0xff] }
 0xb13   :  { %20460 = vmatpush3.bf16.msra.mxu0 %v22553_v26 }
 0xb14   :  { %20461 = vmatprep.subr.bf16.mxu0 %v22554_v2 }
 0xb17   :  { %20462 = vmatpush3.bf16.msra.mxu0 %v22555_v32 }
 0xb18   :  { %20463 = vmatprep.subr.bf16.mxu0 %v22556_v7 }
 0xb1b   :  { %20464 = vmatpush3.bf16.msra.mxu0 %v22557_v0  ;;  %v11146_v0 = vadd.f32 %v28210_v56, %v9392_v59 }
 0xb1c   :  { %20465 = vmatprep.subr.bf16.mxu0 %v22558_v40 }
 0xb1f   :  { %20466 = vmatpush3.bf16.msra.mxu0 %v22559_v4 }
 0xb20   :  { %20467 = vmatprep.subr.bf16.mxu0 %v22560_v8 }
 0xb23   :  { %20468 = vmatpush3.bf16.msra.mxu0 %v22561_v41 }
 0xb24   :  { %20469 = vmatprep.subr.bf16.mxu0 %v22562_v18 }
 0xb27   :  { %20470 = vmatpush3.bf16.msra.mxu0 %v22563_v46 }
 0xb28   :  { %20630 = vmatprep.subr.bf16.mxu0 %v30024_v14 }
 0xb2a   :  { %12804 = vmatmul.mubr.bf16.vlgmr.msra.gmra.mxu0 %v28216_v12  ;;  %v22567_v12 = vld [vmem:[%s29999_s5 + $0x1d20] ss:$20 sps:$4 sm:$0xff]  }
 0xb2b   :  { %20631 = vmatpush3.bf16.msra.mxu0 %v22564_v31  ;;  %20642 = vmatprep.mubr.msk.bf16.mxu0 %vm23161_vm4, %v30024_v14 }
 0xb2c   :  { %20632 = vmatprep.subr.bf16.mxu0 %v30024_v14 }
 0xb2f   :  { %20633 = vmatpush3.bf16.msra.mxu0 %v22565_v27 }
 0xb30   :  { %20634 = vmatprep.subr.bf16.mxu0 %v30024_v14 }
 0xb33   :  { %20635 = vmatpush3.bf16.msra.mxu0 %v22566_v21 }
 0xb34   :  { %20636 = vmatprep.subr.bf16.mxu0 %v30024_v14 }
 0xb37   :  { %20637 = vmatpush3.bf16.msra.mxu0 %v22567_v12 }
 0xb38   :  { %20638 = vmatprep.subr.bf16.mxu0 %v30024_v14 }
 0xb3b   :  { %20639 = vmatpush3.bf16.msra.mxu0 %v22568_v48 }
 0xb3c   :  { %20640 = vmatprep.subr.bf16.mxu0 %v30024_v14 }
 0xb3f   :  { %20641 = vmatpush3.bf16.msra.mxu0 %v22569_v23 }
 0xb42   :  { %20643 = vmatmul.mubr.msk.bf16.vlgmr.msra.gmra.mxu0 %vm4077_vm5, %v28378_v5 }
 0xb43   :  { %13214 = vmatprep.mubr.bf16.mxu0 %v30023_v13 }
 0xb44   :  { %v12547_v28 = vpop.f32.mrf.mxu0 }
 0xb46   :  { %v12549_v29 = vpop.f32.mrf.mxu0 }
 0xb48   :  { %v12551_v38 = vpop.f32.mrf.mxu0 }
 0xb4a   :  { %v12553_v9 = vpop.f32.mrf.mxu0 }
 0xb50   :  { %v12590_v63 = vpop.f32.mrf.mxu1 }
 0xb51   :  { %v12591_v33 = vadd.f32 %v12590_v63, %v12547_v28  ;;  %v6102_v63 = vadd.f32 %v26554_v52, %v26365_v34  ;;  %v30030_v34 = vsub.s32 2, %v30029_v61 }
 0xb52   :  { %v12592_v24 = vpop.f32.mrf.mxu1 }
 0xb53   :  { %v12593_v49 = vadd.f32 %v12592_v24, %v12549_v29  ;;  %v6145_v60 = vadd.f32 %v26414_v37, %v6102_v63  ;;  %v30025_v24 = vld [vmem:[#allocation10_spill] sm:$0xff]  ;;  %v12917_v52 = vrot.slane %v28657_v44, %v30030_v34 }
 0xb54   :  { %v12594_v5 = vpop.f32.mrf.mxu1 }
 0xb55   :  { %v12595_v51 = vadd.f32 %v12594_v5, %v12551_v38  ;;  %v7431_v38 = vadd.f32 %v30025_v24, %v6145_v60 }
 0xb56   :  { %v12596_v54 = vpop.f32.mrf.mxu1 }
 0xb57   :  { %v12597_v45 = vadd.f32 %v12596_v54, %v12553_v9  ;;  %v30031_v54 = vld [vmem:[#allocation11_spill] sm:$0xff] }
 0xb8a   :  { %v12633_v1 = vpop.f32.mrf.mxu0 }
 0xb8b   :  { %v12634_v39 = vadd.f32 %v12633_v1, %v12591_v33  ;;  %v30027_v33 = vld [vmem:[#allocation9_spill] sm:$0xff] }
 0xb8c   :  { %v12635_v17 = vpop.f32.mrf.mxu0  ;;  %v7474_v47 = vadd.f32 %v30027_v33, %v7431_v38  ;;  %v30028_v1 = vld [vmem:[#allocation13_spill] sm:$0xff] }
 0xb8d   :  { %v12894_v15 = vadd.f32 %v12634_v39, %v28200_v10  ;;  %v12636_v35 = vadd.f32 %v12635_v17, %v12593_v49  ;;  %v9261_v49 = vadd.f32 %v30028_v1, %v9218_v3 }
 0xb8e   :  { %v12637_v26 = vpop.f32.mrf.mxu0  ;;  %v7517_v17 = vadd.f32 %v30031_v54, %v7474_v47  ;;  %v30033_v47 = vsub.s32 4, %v30029_v61 }
 0xb8f   :  { %v12931_v2 = vadd.f32 %v12909_v36, %v12894_v15  ;;  %v12895_v32 = vadd.f32 %v12636_v35, %v28204_v19  ;;  %v12638_v7 = vadd.f32 %v12637_v26, %v12595_v51  ;;  %v28680_v19 = vld [vmem:[%s30001_s7] sm:$0xf] }
 0xb90   :  { %v12639_v40 = vpop.f32.mrf.mxu0  ;;  %v12676_v56 = vpop.f32.mrf.mxu1  ;;  %v12925_v1 = vrot.slane %v28657_v44, %v30033_v47  ;;  %v22645_v47 = vld [vmem:[%s30002_s8 + $0x3f0] ss:$8 sps:$4 sm:$0xff]  }
 0xb91   :  { %v12941_v53 = vmax.f32 %v12931_v2, 0.0  ;;  %v12932_v4 = vadd.f32 %v12913_v30, %v12895_v32  ;;  %v12899_v8 = vadd.f32 %v12638_v7, %v28208_v6  ;;  %v12640_v41 = vadd.f32 %v12639_v40, %v12597_v45  ;;  %v28685_v6 = vld [vmem:[%s30001_s7 + $0x4] sm:$0xf] }
 0xb92   :  { %v12678_v23 = vpop.f32.mrf.mxu1  ;;  %v9394_v45 = vadd.f32 %v9261_v49, %v7517_v17 }
 0xb93   :  { %v12942_v10 = vmax.f32 %v12932_v4, 0.0  ;;  %v12936_v18 = vadd.f32 %v12909_v36, %v12899_v8  ;;  %v12900_v46 = vadd.f32 %v12640_v41, %v11146_v0 }
 0xb94   :  { %v12680_v28 = vpop.f32.mrf.mxu1 }
 0xb95   :  { %v12946_v31 = vmax.f32 %v12936_v18, 0.0  ;;  %v12937_v27 = vadd.f32 %v12913_v30, %v12900_v46  ;;  %v30032_v30 = vsub.s32 3, %v30029_v61 }
 0xb96   :  { %v12682_v29 = vpop.f32.mrf.mxu1 }
 0xb97   :  { %v12947_v21 = vmax.f32 %v12937_v27, 0.0  ;;  %v28669_v12 = vpack.c.bf16 %v12946_v31, %v12941_v53  ;;  %v12921_v59 = vrot.slane %v28657_v44, %v30032_v30  ;;  %v11148_v53 = vadd.f32 %v28244_v42, %v9394_v45  ;;  %v22585_v30 = vld [vmem:[%s30002_s8 + $0x390] ss:$8 sps:$4 sm:$0xff]   ;;  %v22599_v45 = vld [vmem:[%s30002_s8 + $0x374] ss:$8 sps:$4 sm:$0xff]  }
 0xb99   :  { %v28671_v48 = vpack.c.bf16 %v12947_v21, %v12942_v10 }
 0xb9b   :  { %12996 = vmatprep.subr.bf16.mxu1 %v28671_v48  ;;  %13196 = vmatprep.subr.bf16.mxu0 %v28671_v48 }
 0xb9c   :  { %12997 = vmatpush1.bf16.msra.mxu1 %v28669_v12  ;;  %13197 = vmatpush1.bf16.msra.mxu0 %v28669_v12 }
 0xb9d   :  { %20652 = vmatprep.subr.bf16.mxu0 %v30024_v14 }
 0xb9f   :  { %19531 = vmatmul.mubr.msk.bf16.vlgmr.msra.gmra.mxu1 %vm12978_vm6, %v28680_v19  ;;  %19535 = vmatmul.mubr.msk.bf16.vlgmr.msra.gmra.mxu0 %vm12978_vm6, %v28685_v6 }
 0xba0   :  { %13055 = vmatprep.mubr.bf16.mxu1 %v30023_v13  ;;  %20654 = vmatprep.mubr.msk.bf16.mxu0 %vm23161_vm4, %v30024_v14 }
 0xba8   :  { %v12762_v62 = vpop.f32.mrf.mxu1 }
 0xbaa   :  { %v12764_v22 = vpop.f32.mrf.mxu1 }
 0xbac   :  { %v12766_v51 = vpop.f32.mrf.mxu1 }
 0xbae   :  { %v12768_v4 = vpop.f32.mrf.mxu1 }
 0xbca   :  { %v12719_v5 = vpop.f32.mrf.mxu0 }
 0xbcb   :  { %v12720_v9 = vadd.f32 %v12719_v5, %v12676_v56 }
 0xbcc   :  { %v12721_v39 = vpop.f32.mrf.mxu0 }
 0xbcd   :  { %v12763_v36 = vadd.f32 %v12762_v62, %v12720_v9  ;;  %v12722_v37 = vadd.f32 %v12721_v39, %v12678_v23 }
 0xbce   :  { %v12723_v15 = vpop.f32.mrf.mxu0 }
 0xbcf   :  { %v12896_v11 = vadd.f32 %v12763_v36, %v28228_v55  ;;  %v12765_v35 = vadd.f32 %v12764_v22, %v12722_v37  ;;  %v12724_v26 = vadd.f32 %v12723_v15, %v12680_v28 }
 0xbd0   :  { %v12725_v2 = vpop.f32.mrf.mxu0 }
 0xbd1   :  { %v12933_v32 = vadd.f32 %v12917_v52, %v12896_v11  ;;  %v12897_v7 = vadd.f32 %v12765_v35, %v28236_v25  ;;  %v12767_v0 = vadd.f32 %v12766_v51, %v12724_v26  ;;  %v12726_v40 = vadd.f32 %v12725_v2, %v12682_v29  ;;  %v22591_v26 = vld [vmem:[%s30002_s8 + $0x380] ss:$8 sps:$4 sm:$0xff]   ;;  %v22575_v2 = vld [vmem:[%s30002_s8 + $0x284] ss:$8 sps:$4 sm:$0xff]  }
 0xbd3   :  { %v12943_v8 = vmax.f32 %v12933_v32, 0.0  ;;  %v12934_v41 = vadd.f32 %v12921_v59, %v12897_v7  ;;  %v12901_v55 = vadd.f32 %v12767_v0, %v28242_v20  ;;  %v12769_v10 = vadd.f32 %v12768_v4, %v12726_v40  ;;  %v20493_v20 = vpop.f32.mrf.mxu1  ;;  %v22597_v32 = vld [vmem:[%s30002_s8 + $0x370] ss:$8 sps:$4 sm:$0xff]   ;;  %v22605_v7 = vld [vmem:[%s30002_s8 + $0x364] ss:$8 sps:$4 sm:$0xff]  }
 0xbd4   :  { %v22573_v0 = vld [vmem:[%s30002_s8 + $0x280] ss:$8 sps:$4 sm:$0xff]   ;;  %v22578_v40 = vld [vmem:[%s30002_s8 + $0x274] ss:$8 sps:$4 sm:$0xff]   ;;  %v22576_v4 = vld [vmem:[%s30002_s8 + $0x270] ss:$8 sps:$4 sm:$0xff]  }
 0xbd5   :  { %v12944_v18 = vmax.f32 %v12934_v41, 0.0  ;;  %v12938_v46 = vadd.f32 %v12917_v52, %v12901_v55  ;;  %v12902_v31 = vadd.f32 %v12769_v10, %v11148_v53  ;;  %v20494_v63 = vpop.f32.mrf.mxu1  ;;  %v22603_v53 = vld [vmem:[%s30002_s8 + $0x360] ss:$8 sps:$4 sm:$0xff]   ;;  %v22609_v41 = vld [vmem:[%s30002_s8 + $0x350] ss:$8 sps:$4 sm:$0xff]  }
 0xbd6   :  { %v20495_v38 = vadd.f32 %v20494_v63, %v20493_v20  ;;  %v22617_v55 = vld [vmem:[%s30002_s8 + $0x344] ss:$8 sps:$4 sm:$0xff]   ;;  %v22579_v10 = vld [vmem:[%s30002_s8 + $0x260] ss:$8 sps:$4 sm:$0xff]  }
 0xbd7   :  { %v12948_v27 = vmax.f32 %v12938_v46, 0.0  ;;  %v12939_v21 = vadd.f32 %v12921_v59, %v12902_v31  ;;  %v20496_v60 = vpop.f32.mrf.mxu1  ;;  %v22593_v59 = vld [vmem:[%s30002_s8 + $0x384] ss:$8 sps:$4 sm:$0xff]   ;;  %v22615_v46 = vld [vmem:[%s30002_s8 + $0x340] ss:$8 sps:$4 sm:$0xff]  }
 0xbd8   :  { %v22623_v31 = vld [vmem:[%s30002_s8 + $0x334] ss:$8 sps:$4 sm:$0xff]   ;;  %v22588_v20 = vld [vmem:[%s30002_s8 + $0x240] ss:$8 sps:$4 sm:$0xff]  }
 0xbd9   :  { %v12949_v56 = vmax.f32 %v12939_v21, 0.0  ;;  %v28714_v23 = vpack.c.bf16 %v12948_v27, %v12943_v8  ;;  %v20497_v50 = vpop.f32.mrf.mxu1  ;;  %v22581_v8 = vld [vmem:[%s30002_s8 + $0x264] ss:$8 sps:$4 sm:$0xff]   ;;  %v22582_v27 = vld [vmem:[%s30002_s8 + $0x250] ss:$8 sps:$4 sm:$0xff]  }
 0xbda   :  { %v20498_v9 = vadd.f32 %v20497_v50, %v20496_v60  ;;  %v22590_v21 = vld [vmem:[%s30002_s8 + $0x244] ss:$8 sps:$4 sm:$0xff]   ;;  %v22627_v63 = vld [vmem:[%s30002_s8 + $0x320] ss:$8 sps:$4 sm:$0xff]   ;;  %v22594_v60 = vld [vmem:[%s30002_s8 + $0x230] ss:$8 sps:$4 sm:$0xff]  }
 0xbdb   :  { %v28716_v28 = vpack.c.bf16 %v12949_v56, %v12944_v18  ;;  %v22584_v18 = vld [vmem:[%s30002_s8 + $0x254] ss:$8 sps:$4 sm:$0xff]   ;;  %v22621_v56 = vld [vmem:[%s30002_s8 + $0x330] ss:$8 sps:$4 sm:$0xff]   ;;  %v22600_v50 = vld [vmem:[%s30002_s8 + $0x220] ss:$8 sps:$4 sm:$0xff]  }
 0xbdd   :  { %13037 = vmatprep.subr.bf16.mxu1 %v28716_v28 }
 0xbde   :  { %13038 = vmatpush1.bf16.msra.mxu1 %v28714_v23 }
 0xbdf   :  { %20646 = vmatprep.subr.bf16.mxu1 %v30024_v14 }
 0xbe1   :  { %19532 = vmatmul.mubr.msk.bf16.vlgmr.msra.gmra.mxu1 %vm12978_vm6, %v28680_v19 }
 0xbe2   :  { %20648 = vmatprep.mubr.msk.bf16.mxu1 %vm23161_vm4, %v30024_v14 }
 0xbea   :  { %v20471_v25 = vpop.f32.mrf.mxu0 }
 0xbec   :  { %v20472_v42 = vpop.f32.mrf.mxu0 }
 0xbed   :  { %v20473_v62 = vadd.f32 %v20472_v42, %v20471_v25  ;;  %v22629_v25 = vld [vmem:[%s30002_s8 + $0x324] ss:$8 sps:$4 sm:$0xff]   ;;  %v22596_v42 = vld [vmem:[%s30002_s8 + $0x234] ss:$8 sps:$4 sm:$0xff]  }
 0xbee   :  { %v20474_v29 = vpop.f32.mrf.mxu0 }
 0xbef   :  { %v12847_v22 = vadd.f32 %v20495_v38, %v20473_v62  ;;  %v22602_v62 = vld [vmem:[%s30002_s8 + $0x224] ss:$8 sps:$4 sm:$0xff]  }
 0xbf0   :  { %v20475_v24 = vpop.f32.mrf.mxu0  ;;  %v22641_v38 = vld [vmem:[%s30002_s8 + $0x404] ss:$8 sps:$4 sm:$0xff]  }
 0xbf1   :  { %v20476_v3 = vadd.f32 %v20475_v24, %v20474_v29  ;;  %v22635_v29 = vld [vmem:[%s30002_s8 + $0x414] ss:$8 sps:$4 sm:$0xff]   ;;  %v22633_v24 = vld [vmem:[%s30002_s8 + $0x410] ss:$8 sps:$4 sm:$0xff]  }
 0xbf3   :  { %v12850_v36 = vadd.f32 %v20498_v9, %v20476_v3  ;;  %v22608_v3 = vld [vmem:[%s30002_s8 + $0x314] ss:$8 sps:$4 sm:$0xff]   ;;  %v22606_v9 = vld [vmem:[%s30002_s8 + $0x310] ss:$8 sps:$4 sm:$0xff]  }
 0xc02   :  { %v12887_v5 = vpop.f32.mrf.mxu0 }
 0xc03   :  { %v12888_v33 = vadd.f32 %v12887_v5, %v12847_v22  ;;  %v22639_v22 = vld [vmem:[%s30002_s8 + $0x400] ss:$8 sps:$4 sm:$0xff]   ;;  %v22647_v5 = vld [vmem:[%s30002_s8 + $0x3f4] ss:$8 sps:$4 sm:$0xff]  }
 0xc04   :  { %v20644_v49 = vpop.f32.mrf.mxu0 }
 0xc05   :  { %v12898_v39 = vadd.f32 %v12888_v33, %v28349_v58  ;;  %v22587_v58 = vld [vmem:[%s30002_s8 + $0x394] ss:$8 sps:$4 sm:$0xff]   ;;  %v22614_v33 = vld [vmem:[%s30002_s8 + $0x304] ss:$8 sps:$4 sm:$0xff]   ;;  %v22612_v49 = vld [vmem:[%s30002_s8 + $0x300] ss:$8 sps:$4 sm:$0xff]  }
 0xc06   :  { %v12890_v34 = vpop.f32.mrf.mxu0 }
 0xc07   :  { %v12935_v52 = vadd.f32 %v12925_v1, %v12898_v39  ;;  %v12891_v37 = vadd.f32 %v12890_v34, %v12850_v36  ;;  %v22620_v39 = vld [vmem:[%s30002_s8 + $0x2f4] ss:$8 sps:$4 sm:$0xff]   ;;  %v22651_v36 = vld [vmem:[%s30002_s8 + $0x3e0] ss:$8 sps:$4 sm:$0xff]  }
 0xc08   :  { %v20645_v54 = vpop.f32.mrf.mxu0  ;;  %v22659_v34 = vld [vmem:[%s30002_s8 + $0x3d4] ss:$8 sps:$4 sm:$0xff]  }
 0xc09   :  { %v12945_v17 = vmax.f32 %v12935_v52, 0.0  ;;  %v12903_v51 = vadd.f32 %v12891_v37, %v28358_v43  ;;  %v22572_v43 = vld [vmem:[%s30002_s8 + $0x294] ss:$8 sps:$4 sm:$0xff]   ;;  %v22618_v52 = vld [vmem:[%s30002_s8 + $0x2f0] ss:$8 sps:$4 sm:$0xff]  }
 0xc0a   :  { %v22626_v37 = vld [vmem:[%s30002_s8 + $0x2e4] ss:$8 sps:$4 sm:$0xff]   ;;  %v22657_v54 = vld [vmem:[%s30002_s8 + $0x3d0] ss:$8 sps:$4 sm:$0xff]  }
 0xc0b   :  { %12956 = vst.msk [vmem:[#allocation3 + $0x20] sm:$0xff] %vm12955_vm7, %v12945_v17  ;;  %v12940_v15 = vadd.f32 %v12925_v1, %v12903_v51  ;;  %v22653_v1 = vld [vmem:[%s30002_s8 + $0x3e4] ss:$8 sps:$4 sm:$0xff]   ;;  %v22624_v17 = vld [vmem:[%s30002_s8 + $0x2e0] ss:$8 sps:$4 sm:$0xff]  }
 0xc0c   :  { %v22632_v51 = vld [vmem:[%s30002_s8 + $0x2d4] ss:$8 sps:$4 sm:$0xff]  }
 0xc0d   :  { %v12950_v11 = vmax.f32 %v12940_v15, 0.0  ;;  %v22630_v15 = vld [vmem:[%s30002_s8 + $0x2d0] ss:$8 sps:$4 sm:$0xff]  }
 0xc0f   :  { %12961 = vst.msk [vmem:[#allocation3 + $0x48] sm:$0xff] %vm12955_vm7, %v12950_v11  ;;  %v22638_v11 = vld [vmem:[%s30002_s8 + $0x2c4] ss:$8 sps:$4 sm:$0xff]  }
 0xc12   :  { %v12966_v61 = vld [vmem:[#allocation3 + $0x20] sm:$0xff] }
 0xc16   :  { %v12971_v44 = vld [vmem:[#allocation3 + $0x48] sm:$0xff] }
 0xc17   :  { %v28735_v35 = vpack.c.bf16 %v12971_v44, %v12966_v61  ;;  %v22636_v61 = vld [vmem:[%s30002_s8 + $0x2c0] ss:$8 sps:$4 sm:$0xff]   ;;  %v22644_v44 = vld [vmem:[%s30002_s8 + $0x2b4] ss:$8 sps:$4 sm:$0xff]  }
 0xc19   :  { %20647 = vmatpush3.bf16.msra.mxu1 %v28735_v35  ;;  %20653 = vmatpush3.bf16.msra.mxu0 %v28735_v35 }
 0xc1a   :  { %13237 = vmatprep.subr.bf16.mxu1 %v28716_v28  ;;  %13762 = vmatprep.subr.bf16.mxu0 %v22587_v58  ;;  %v22642_v58 = vld [vmem:[%s30002_s8 + $0x2b0] ss:$8 sps:$4 sm:$0xff]  }
 0xc1c   :  { %20649 = vmatmul.mubr.msk.bf16.vlgmr.msra.gmra.mxu1 %vm12978_vm6, %v28680_v19  ;;  %20655 = vmatmul.mubr.msk.bf16.vlgmr.msra.gmra.mxu0 %vm12978_vm6, %v28685_v6  ;;  %v22570_v19 = vld [vmem:[%s30002_s8 + $0x290] ss:$8 sps:$4 sm:$0xff]  }
 0xc1d   :  { %13238 = vmatpush1.bf16.msra.mxu1 %v28714_v23  ;;  %13255 = vmatprep.mubr.bf16.mxu1 %v30023_v13 }
 0xc1e   :  { %13721 = vmatprep.subr.bf16.mxu1 %v22572_v43  ;;  %13763 = vmatpush1.bf16.msra.mxu0 %v22585_v30  ;;  %v22650_v43 = vld [vmem:[%s30002_s8 + $0x2a4] ss:$8 sps:$4 sm:$0xff]  }
 0xc1f   :  { %13764 = vmatprep.subr.bf16.mxu0 %v22593_v59  ;;  %v22665_v30 = vld [vmem:[%s30002_s8 + $0x3c4] ss:$8 sps:$4 sm:$0xff]   ;;  %v22663_v59 = vld [vmem:[%s30002_s8 + $0x3c0] ss:$8 sps:$4 sm:$0xff]  }
 0xc22   :  { %13765 = vmatpush1.bf16.msra.mxu0 %v22591_v26  ;;  %v22648_v26 = vld [vmem:[%s30002_s8 + $0x2a0] ss:$8 sps:$4 sm:$0xff]  }
 0xc23   :  { %13766 = vmatprep.subr.bf16.mxu0 %v22599_v45  ;;  %v22656_v45 = vld [vmem:[%s30002_s8 + $0x434] ss:$8 sps:$4 sm:$0xff]  }
 0xc24   :  { %19536 = vmatmul.mubr.msk.bf16.vlgmr.msra.gmra.mxu1 %vm12978_vm6, %v28685_v6  ;;  %v22611_v6 = vld [vmem:[%s30002_s8 + $0x354] ss:$8 sps:$4 sm:$0xff]  }
 0xc25   :  { %13722 = vmatpush1.bf16.msra.mxu1 %v22570_v19 }
 0xc26   :  { %13723 = vmatprep.subr.bf16.mxu1 %v22575_v2  ;;  %13767 = vmatpush1.bf16.msra.mxu0 %v22597_v32  ;;  %v22669_v32 = vld [vmem:[%s30002_s8 + $0x3b0] ss:$8 sps:$4 sm:$0xff]  }
 0xc27   :  { %13768 = vmatprep.subr.bf16.mxu0 %v22605_v7  ;;  %v22671_v7 = vld [vmem:[%s30002_s8 + $0x3b4] ss:$8 sps:$4 sm:$0xff]  }
 0xc29   :  { %13724 = vmatpush1.bf16.msra.mxu1 %v22573_v0 }
 0xc2a   :  { %13725 = vmatprep.subr.bf16.mxu1 %v22578_v40  ;;  %13769 = vmatpush1.bf16.msra.mxu0 %v22603_v53 }
 0xc2b   :  { %13770 = vmatprep.subr.bf16.mxu0 %v22611_v6 }
 0xc2d   :  { %13726 = vmatpush1.bf16.msra.mxu1 %v22576_v4  ;;  %v22654_v4 = vld [vmem:[%s30002_s8 + $0x430] ss:$8 sps:$4 sm:$0xff]  }
 0xc2e   :  { %13727 = vmatprep.subr.bf16.mxu1 %v22581_v8  ;;  %13771 = vmatpush1.bf16.msra.mxu0 %v22609_v41 }
 0xc2f   :  { %13772 = vmatprep.subr.bf16.mxu0 %v22617_v55  ;;  %v22662_v55 = vld [vmem:[%s30002_s8 + $0x424] ss:$8 sps:$4 sm:$0xff]  }
 0xc31   :  { %13728 = vmatpush1.bf16.msra.mxu1 %v22579_v10  ;;  %v22677_v10 = vld [vmem:[%s30002_s8 + $0x3a4] ss:$8 sps:$4 sm:$0xff]  }
 0xc32   :  { %13729 = vmatprep.subr.bf16.mxu1 %v22584_v18  ;;  %13773 = vmatpush1.bf16.msra.mxu0 %v22615_v46 }
 0xc33   :  { %13774 = vmatprep.subr.bf16.mxu0 %v22623_v31  ;;  %v22675_v31 = vld [vmem:[%s30002_s8 + $0x3a0] ss:$8 sps:$4 sm:$0xff]  }
 0xc35   :  { %13730 = vmatpush1.bf16.msra.mxu1 %v22582_v27  ;;  %v22660_v27 = vld [vmem:[%s30002_s8 + $0x420] ss:$8 sps:$4 sm:$0xff]  }
 0xc36   :  { %13731 = vmatprep.subr.bf16.mxu1 %v22590_v21  ;;  %13775 = vmatpush1.bf16.msra.mxu0 %v22621_v56  ;;  %v22668_v21 = vld [vmem:[%s30002_s8 + $0x174] ss:$8 sps:$4 sm:$0xff]  }
 0xc37   :  { %13776 = vmatprep.subr.bf16.mxu0 %v22629_v25  ;;  %v22683_v56 = vld [vmem:[%s30002_s8 + $0x74] ss:$8 sps:$4 sm:$0xff]  }
 0xc39   :  { %13732 = vmatpush1.bf16.msra.mxu1 %v22588_v20 }
 0xc3a   :  { %13733 = vmatprep.subr.bf16.mxu1 %v22596_v42  ;;  %13777 = vmatpush1.bf16.msra.mxu0 %v22627_v63 }
 0xc3b   :  { %13778 = vmatprep.subr.bf16.mxu0 %v22635_v29 }
 0xc3d   :  { %13734 = vmatpush1.bf16.msra.mxu1 %v22594_v60 }
 0xc3e   :  { %13735 = vmatprep.subr.bf16.mxu1 %v22602_v62  ;;  %13779 = vmatpush2.bf16.msra.mxu0 %v22633_v24  ;;  %v22666_v62 = vld [vmem:[%s30002_s8 + $0x170] ss:$8 sps:$4 sm:$0xff]  }
 0xc3f   :  { %13780 = vmatprep.subr.bf16.mxu0 %v22641_v38  ;;  %v22674_v38 = vld [vmem:[%s30002_s8 + $0x164] ss:$8 sps:$4 sm:$0xff]  }
 0xc41   :  { %13736 = vmatpush1.bf16.msra.mxu1 %v22600_v50 }
 0xc42   :  { %13737 = vmatprep.subr.bf16.mxu1 %v22608_v3  ;;  %13781 = vmatpush2.bf16.msra.mxu0 %v22639_v22 }
 0xc43   :  { %13782 = vmatprep.subr.bf16.mxu0 %v22647_v5 }
 0xc45   :  { %13738 = vmatpush2.bf16.msra.mxu1 %v22606_v9  ;;  %v22672_v9 = vld [vmem:[%s30002_s8 + $0x160] ss:$8 sps:$4 sm:$0xff]  }
 0xc46   :  { %13739 = vmatprep.subr.bf16.mxu1 %v22614_v33  ;;  %13783 = vmatpush2.bf16.msra.mxu0 %v22645_v47  ;;  %v22680_v47 = vld [vmem:[%s30002_s8 + $0x154] ss:$8 sps:$4 sm:$0xff]  }
 0xc47   :  { %13784 = vmatprep.subr.bf16.mxu0 %v22653_v1 }
 0xc49   :  { %13740 = vmatpush2.bf16.msra.mxu1 %v22612_v49 }
 0xc4a   :  { %13741 = vmatprep.subr.bf16.mxu1 %v22620_v39  ;;  %13785 = vmatpush2.bf16.msra.mxu0 %v22651_v36  ;;  %v22678_v36 = vld [vmem:[%s30002_s8 + $0x150] ss:$8 sps:$4 sm:$0xff]  }
 0xc4b   :  { %13786 = vmatprep.subr.bf16.mxu0 %v22659_v34  ;;  %v22686_v34 = vld [vmem:[%s30002_s8 + $0x144] ss:$8 sps:$4 sm:$0xff]  }
 0xc4d   :  { %13742 = vmatpush2.bf16.msra.mxu1 %v22618_v52 }
 0xc4e   :  { %13743 = vmatprep.subr.bf16.mxu1 %v22626_v37  ;;  %13787 = vmatpush2.bf16.msra.mxu0 %v22657_v54  ;;  %v22681_v54 = vld [vmem:[%s30002_s8 + $0x70] ss:$8 sps:$4 sm:$0xff]  }
 0xc4f   :  { %13788 = vmatprep.subr.bf16.mxu0 %v22665_v30  ;;  %v22690_v30 = vld [vmem:[%s30002_s8 + $0x130] ss:$8 sps:$4 sm:$0xff]  }
 0xc51   :  { %13744 = vmatpush2.bf16.msra.mxu1 %v22624_v17 }
 0xc52   :  { %13745 = vmatprep.subr.bf16.mxu1 %v22632_v51  ;;  %13789 = vmatpush2.bf16.msra.mxu0 %v22663_v59  ;;  %v22695_v59 = vld [vmem:[%s30002_s8 + $0x54] ss:$8 sps:$4 sm:$0xff]  }
 0xc53   :  { %13790 = vmatprep.subr.bf16.mxu0 %v22671_v7  ;;  %v22704_v7 = vld [vmem:[%s30002_s8 + $0x114] ss:$8 sps:$4 sm:$0xff]  }
 0xc55   :  { %13746 = vmatpush2.bf16.msra.mxu1 %v22630_v15  ;;  %v22684_v15 = vld [vmem:[%s30002_s8 + $0x140] ss:$8 sps:$4 sm:$0xff]  }
 0xc56   :  { %13747 = vmatprep.subr.bf16.mxu1 %v22638_v11  ;;  %13791 = vmatpush2.bf16.msra.mxu0 %v22669_v32  ;;  %v22689_v11 = vld [vmem:[%s30002_s8 + $0x64] ss:$8 sps:$4 sm:$0xff]  }
 0xc57   :  { %13792 = vmatprep.subr.bf16.mxu0 %v22677_v10  ;;  %v22701_v32 = vld [vmem:[%s30002_s8 + $0x44] ss:$8 sps:$4 sm:$0xff]   ;;  %v22711_v10 = vld [vmem:[%s30002_s8 + $0x20] ss:$8 sps:$4 sm:$0xff]  }
 0xc59   :  { %13748 = vmatpush2.bf16.msra.mxu1 %v22636_v61 }
 0xc5a   :  { %13749 = vmatprep.subr.bf16.mxu1 %v22644_v44  ;;  %13793 = vmatpush2.bf16.msra.mxu0 %v22675_v31  ;;  %v22692_v44 = vld [vmem:[%s30002_s8 + $0x134] ss:$8 sps:$4 sm:$0xff]   ;;  %v22722_v31 = vld [vmem:[%s30002_s8 + $0x1e4] ss:$8 sps:$4 sm:$0xff]  }
 0xc5b   :  { %14187 = vmatprep.subr.bf16.mxu0 %v22683_v56  ;;  %v22725_v56 = vld [vmem:[%s30002_s8 + $0x4] ss:$8 sps:$4 sm:$0xff]  }
 0xc5d   :  { %13750 = vmatpush2.bf16.msra.mxu1 %v22642_v58 }
 0xc5e   :  { %13751 = vmatprep.subr.bf16.mxu1 %v22650_v43  ;;  %v22687_v43 = vld [vmem:[%s30002_s8 + $0x60] ss:$8 sps:$4 sm:$0xff]  }
 0xc5f   :  { %v28928_v19 = vpop.f32.mrf.mxu1  ;;  %v13216_v2 = vpop.f32.mrf.mxu0 }
 0xc60   :  { %v13304_v40 = vpack.c.bf16 %v13216_v2, %v13216_v2  ;;  %v22696_v2 = vld [vmem:[%s30002_s8 + $0x120] ss:$8 sps:$4 sm:$0xff]  }
 0xc61   :  { %v28936_v0 = vpop.f32.mrf.mxu1  ;;  %v13218_v53 = vpop.f32.mrf.mxu0  ;;  %13752 = vmatpush2.bf16.msra.mxu1 %v22648_v26  ;;  %v22698_v26 = vld [vmem:[%s30002_s8 + $0x124] ss:$8 sps:$4 sm:$0xff]  }
 0xc62   :  { %v13305_v6 = vpack.c.bf16 %v13218_v53, %v13218_v53  ;;  %13815 = vmatprep.subr.bf16.mxu1 %v22656_v45  ;;  %v13105_v61 = vpack.c.bf16 %v28936_v0, %v28936_v0  ;;  %v22693_v45 = vld [vmem:[%s30002_s8 + $0x50] ss:$8 sps:$4 sm:$0xff]   ;;  %v22699_v0 = vld [vmem:[%s30002_s8 + $0x40] ss:$8 sps:$4 sm:$0xff]   ;;  %v22707_v53 = vld [vmem:[%s30002_s8 + $0x34] ss:$8 sps:$4 sm:$0xff]  }
 0xc63   :  { %v13020_v8 = vpop.f32.mrf.mxu1  ;;  %v13220_v41 = vpop.f32.mrf.mxu0 }
 0xc64   :  { %13753 = vmatprep.mubr.bf16.mxu1 %v13305_v6  ;;  %v22710_v6 = vld [vmem:[%s30002_s8 + $0x104] ss:$8 sps:$4 sm:$0xff]   ;;  %v22708_v8 = vld [vmem:[%s30002_s8 + $0x100] ss:$8 sps:$4 sm:$0xff]  }
 0xc65   :  { %v13021_v18 = vpop.f32.mrf.mxu1  ;;  %13754 = vmatmul.mubr.bf16.vlgmr.msra.gmra.mxu1 %v13304_v40  ;;  %v13221_v46 = vpop.f32.mrf.mxu0  ;;  %v22702_v40 = vld [vmem:[%s30002_s8 + $0x110] ss:$8 sps:$4 sm:$0xff]   ;;  %v22713_v41 = vld [vmem:[%s30002_s8 + $0x24] ss:$8 sps:$4 sm:$0xff]  }
 0xc66   :  { %13816 = vmatpush1.bf16.msra.mxu1 %v22654_v4  ;;  %13835 = vmatprep.mubr.bf16.mxu1 %v30023_v13  ;;  %v22705_v4 = vld [vmem:[%s30002_s8 + $0x30] ss:$8 sps:$4 sm:$0xff]   ;;  %v22719_v46 = vld [vmem:[%s30002_s8 + $0x14] ss:$8 sps:$4 sm:$0xff]  }
 0xc67   :  { %13817 = vmatprep.subr.bf16.mxu1 %v22662_v55  ;;  %v22716_v55 = vld [vmem:[%s30002_s8 + $0x1f4] ss:$8 sps:$4 sm:$0xff]   ;;  %v22714_v18 = vld [vmem:[%s30002_s8 + $0x1f0] ss:$8 sps:$4 sm:$0xff]  }
 0xc6a   :  { %13818 = vmatpush1.bf16.msra.mxu1 %v22660_v27  ;;  %v22717_v27 = vld [vmem:[%s30002_s8 + $0x10] ss:$8 sps:$4 sm:$0xff]  }
 0xc6b   :  { %14228 = vmatprep.subr.bf16.mxu1 %v22668_v21  ;;  %v22720_v21 = vld [vmem:[%s30002_s8 + $0x1e0] ss:$8 sps:$4 sm:$0xff]  }
 0xca1   :  { %v28960_v25 = vpop.f32.mrf.mxu1 }
 0xca3   :  { %v13059_v20 = vpop.f32.mrf.mxu1 }
 0xca4   :  { %v13107_v50 = vpack.c.bf16 %v13059_v20, %v13059_v20  ;;  %v22728_v20 = vld [vmem:[%s30002_s8 + $0x1d4] ss:$8 sps:$4 sm:$0xff]  }
 0xca5   :  { %v13061_v42 = vpop.f32.mrf.mxu1 }
 0xca6   :  { %v22723_v42 = vld [vmem:[%s30002_s8] ss:$8 sps:$4 sm:$0xff]  }
 0xca7   :  { %v13062_v63 = vpop.f32.mrf.mxu1 }
 0xca8   :  { %v22726_v63 = vld [vmem:[%s30002_s8 + $0x1d0] ss:$8 sps:$4 sm:$0xff]  }
 0xcdc   :  { %v28962_v29 = vpop.f32.mrf.mxu1  ;;  %v13298_v60 = vpop.f32.mrf.mxu0 }
 0xcdd   :  { %v13308_v24 = vpack.c.bf16 %v13298_v60, %v13298_v60  ;;  %v22731_v60 = vld [vmem:[%s30002_s8 + $0xf4] ss:$8 sps:$4 sm:$0xff]  }
 0xcde   :  { %v20650_v3 = vpop.f32.mrf.mxu1  ;;  %v20656_v22 = vpop.f32.mrf.mxu0 }
 0xcdf   :  { %19674 = vmatmul.mubr.msk.bf16.vlgmr.msra.gmra.mxu1 %vm12955_vm7, %v13308_v24  ;;  %v22729_v24 = vld [vmem:[%s30002_s8 + $0xf0] ss:$8 sps:$4 sm:$0xff]   ;;  %v22740_v3 = vld [vmem:[%s30002_s8 + $0x1b4] ss:$8 sps:$4 sm:$0xff]   ;;  %v22735_v22 = vld [vmem:[%s30002_s8 + $0xe0] ss:$8 sps:$4 sm:$0xff]  }
 0xce0   :  { %14229 = vmatpush1.bf16.msra.mxu1 %v22666_v62  ;;  %v13101_v5 = vpop.f32.mrf.mxu1  ;;  %14260 = vmatprep.mubr.bf16.mxu1 %v13107_v50  ;;  %v13301_v33 = vpop.f32.mrf.mxu0  ;;  %v22734_v62 = vld [vmem:[%s30002_s8 + $0x1c4] ss:$8 sps:$4 sm:$0xff]  }
 0xce1   :  { %14230 = vmatprep.subr.bf16.mxu1 %v22674_v38  ;;  %v22732_v38 = vld [vmem:[%s30002_s8 + $0x1c0] ss:$8 sps:$4 sm:$0xff]   ;;  %v22737_v50 = vld [vmem:[%s30002_s8 + $0xe4] ss:$8 sps:$4 sm:$0xff]   ;;  %v22738_v5 = vld [vmem:[%s30002_s8 + $0x1b0] ss:$8 sps:$4 sm:$0xff]  }
 0xce2   :  { %v20651_v1 = vpop.f32.mrf.mxu1  ;;  %v20657_v49 = vpop.f32.mrf.mxu0  ;;  %v22746_v33 = vld [vmem:[%s30002_s8 + $0x1a4] ss:$8 sps:$4 sm:$0xff]  }
 0xce3   :  { %v22744_v1 = vld [vmem:[%s30002_s8 + $0x1a0] ss:$8 sps:$4 sm:$0xff]   ;;  %v22749_v49 = vld [vmem:[%s30002_s8 + $0xc4] ss:$8 sps:$4 sm:$0xff]  }
 0xce4   :  { %14231 = vmatpush1.bf16.msra.mxu1 %v22672_v9  ;;  %v13257_v39 = vpop.f32.mrf.mxu1  ;;  %v22743_v9 = vld [vmem:[%s30002_s8 + $0xd4] ss:$8 sps:$4 sm:$0xff]  }
 0xce5   :  { %14232 = vmatprep.subr.bf16.mxu1 %v22680_v47  ;;  %v13306_v17 = vpack.c.bf16 %v13257_v39, %v13257_v39  ;;  %v22741_v47 = vld [vmem:[%s30002_s8 + $0xd0] ss:$8 sps:$4 sm:$0xff]   ;;  %v22752_v39 = vld [vmem:[%s30002_s8 + $0x194] ss:$8 sps:$4 sm:$0xff]  }
 0xce6   :  { %v13259_v52 = vpop.f32.mrf.mxu1 }
 0xce7   :  { %v13307_v37 = vpack.c.bf16 %v13259_v52, %v13259_v52  ;;  %v22755_v52 = vld [vmem:[%s30002_s8 + $0xb4] ss:$8 sps:$4 sm:$0xff]  }
 0xce8   :  { %14233 = vmatpush1.bf16.msra.mxu1 %v22678_v36  ;;  %v13261_v51 = vpop.f32.mrf.mxu1  ;;  %v22747_v36 = vld [vmem:[%s30002_s8 + $0xc0] ss:$8 sps:$4 sm:$0xff]  }
 0xce9   :  { %13794 = vmatprep.mubr.bf16.mxu0 %v13307_v37  ;;  %14234 = vmatprep.subr.bf16.mxu1 %v22686_v34  ;;  %v22750_v34 = vld [vmem:[%s30002_s8 + $0x190] ss:$8 sps:$4 sm:$0xff]   ;;  %v22758_v37 = vld [vmem:[%s30002_s8 + $0x184] ss:$8 sps:$4 sm:$0xff]  }
 0xcea   :  { %v13262_v58 = vpop.f32.mrf.mxu1  ;;  %13795 = vmatmul.mubr.bf16.vlgmr.msra.gmra.mxu0 %v13306_v17  ;;  %v22756_v17 = vld [vmem:[%s30002_s8 + $0x180] ss:$8 sps:$4 sm:$0xff]   ;;  %v22761_v51 = vld [vmem:[%s30002_s8 + $0xa4] ss:$8 sps:$4 sm:$0xff]  }
 0xceb   :  { %14188 = vmatpush1.bf16.msra.mxu0 %v22681_v54  ;;  %14219 = vmatprep.mubr.bf16.mxu0 %v13105_v61  ;;  %v22753_v54 = vld [vmem:[%s30002_s8 + $0xb0] ss:$8 sps:$4 sm:$0xff]   ;;  %v13106_v61 = vpack.c.bf16 %v28960_v25, %v28960_v25  ;;  %v22767_v58 = vld [vmem:[%s30002_s8 + $0x84] ss:$8 sps:$4 sm:$0xff]   ;;  %v22765_v25 = vld [vmem:[%s30002_s8 + $0x80] ss:$8 sps:$4 sm:$0xff]  }
 0xcec   :  { %14235 = vmatpush1.bf16.msra.mxu1 %v22684_v15  ;;  %14189 = vmatprep.subr.bf16.mxu0 %v22689_v11  ;;  %v22759_v15 = vld [vmem:[%s30002_s8 + $0xa0] ss:$8 sps:$4 sm:$0xff]   ;;  %v22764_v11 = vld [vmem:[%s30002_s8 + $0x94] ss:$8 sps:$4 sm:$0xff]  }
 0xced   :  { %14236 = vmatprep.subr.bf16.mxu1 %v22692_v44  ;;  %v22762_v44 = vld [vmem:[%s30002_s8 + $0x90] ss:$8 sps:$4 sm:$0xff]  }
 0xcef   :  { %14190 = vmatpush1.bf16.msra.mxu0 %v22687_v43  ;;  %v19744_v43 = vld [vmem:[%s30001_s7 + $0x8] sm:$0xf] }
 0xcf0   :  { %14237 = vmatpush1.bf16.msra.mxu1 %v22690_v30  ;;  %14191 = vmatprep.subr.bf16.mxu0 %v22695_v59  ;;  %v22770_v30 = vld [vmem:[%s30002_s8 + $0x214] ss:$8 sps:$4 sm:$0xff]  }
 0xcf1   :  { %14238 = vmatprep.subr.bf16.mxu1 %v22698_v26  ;;  %v22776_v59 = vld [vmem:[%s30002_s8 + $0x5b4] ss:$8 sps:$4 sm:$0xff]  }
 0xcf3   :  { %14192 = vmatpush1.bf16.msra.mxu0 %v22693_v45  ;;  %v22768_v45 = vld [vmem:[%s30002_s8 + $0x210] ss:$8 sps:$4 sm:$0xff]  }
 0xcf4   :  { %14239 = vmatpush1.bf16.msra.mxu1 %v22696_v2  ;;  %14193 = vmatprep.subr.bf16.mxu0 %v22701_v32  ;;  %v13104_v32 = vpack.c.bf16 %v28928_v19, %v28928_v19 }
 0xcf5   :  { %14240 = vmatprep.subr.bf16.mxu1 %v22704_v7  ;;  %v22773_v7 = vld [vmem:[%s30002_s8 + $0x204] ss:$8 sps:$4 sm:$0xff]  }
 0xcf7   :  { %14194 = vmatpush1.bf16.msra.mxu0 %v22699_v0 }
 0xcf8   :  { %14241 = vmatpush1.bf16.msra.mxu1 %v22702_v40  ;;  %14195 = vmatprep.subr.bf16.mxu0 %v22707_v53  ;;  %v22771_v40 = vld [vmem:[%s30002_s8 + $0x200] ss:$8 sps:$4 sm:$0xff]   ;;  %v22774_v53 = vld [vmem:[%s30002_s8 + $0x5b0] ss:$8 sps:$4 sm:$0xff]  }
 0xcf9   :  { %14242 = vmatprep.subr.bf16.mxu1 %v22710_v6  ;;  %v22779_v6 = vld [vmem:[%s30002_s8 + $0x5a4] ss:$8 sps:$4 sm:$0xff]  }
 0xcfb   :  { %14196 = vmatpush1.bf16.msra.mxu0 %v22705_v4  ;;  %v13108_v4 = vpack.c.bf16 %v28962_v29, %v28962_v29  ;;  %v22780_v29 = vld [vmem:[%s30002_s8 + $0x590] ss:$8 sps:$4 sm:$0xff]  }
 0xcfc   :  { %14243 = vmatpush1.bf16.msra.mxu1 %v22708_v8  ;;  %14197 = vmatprep.subr.bf16.mxu0 %v22713_v41  ;;  %v22777_v8 = vld [vmem:[%s30002_s8 + $0x5a0] ss:$8 sps:$4 sm:$0xff]   ;;  %v22824_v41 = vld [vmem:[%s30002_s8 + $0x4b4] ss:$8 sps:$4 sm:$0xff]  }
 0xcfd   :  { %14244 = vmatprep.subr.bf16.mxu1 %v22716_v55  ;;  %v22782_v55 = vld [vmem:[%s30002_s8 + $0x594] ss:$8 sps:$4 sm:$0xff]  }
 0xcff   :  { %14198 = vmatpush1.bf16.msra.mxu0 %v22711_v10  ;;  %v22785_v10 = vld [vmem:[%s30002_s8 + $0x584] ss:$8 sps:$4 sm:$0xff]  }
 0xd00   :  { %14245 = vmatpush2.bf16.msra.mxu1 %v22714_v18  ;;  %14199 = vmatprep.subr.bf16.mxu0 %v22719_v46  ;;  %v22822_v18 = vld [vmem:[%s30002_s8 + $0x4b0] ss:$8 sps:$4 sm:$0xff]   ;;  %v22783_v46 = vld [vmem:[%s30002_s8 + $0x580] ss:$8 sps:$4 sm:$0xff]  }
 0xd01   :  { %14246 = vmatprep.subr.bf16.mxu1 %v22722_v31  ;;  %v22827_v31 = vld [vmem:[%s30002_s8 + $0x4a4] ss:$8 sps:$4 sm:$0xff]  }
 0xd03   :  { %14200 = vmatpush1.bf16.msra.mxu0 %v22717_v27  ;;  %v22788_v27 = vld [vmem:[%s30002_s8 + $0x574] ss:$8 sps:$4 sm:$0xff]  }
 0xd04   :  { %14247 = vmatpush2.bf16.msra.mxu1 %v22720_v21  ;;  %14201 = vmatprep.subr.bf16.mxu0 %v22725_v56  ;;  %v22825_v21 = vld [vmem:[%s30002_s8 + $0x4a0] ss:$8 sps:$4 sm:$0xff]   ;;  %v22786_v56 = vld [vmem:[%s30002_s8 + $0x570] ss:$8 sps:$4 sm:$0xff]  }
 0xd05   :  { %14248 = vmatprep.subr.bf16.mxu1 %v22728_v20  ;;  %v22830_v20 = vld [vmem:[%s30002_s8 + $0x494] ss:$8 sps:$4 sm:$0xff]  }
 0xd07   :  { %14202 = vmatpush1.bf16.msra.mxu0 %v22723_v42  ;;  %v22791_v42 = vld [vmem:[%s30002_s8 + $0x564] ss:$8 sps:$4 sm:$0xff]  }
 0xd08   :  { %14249 = vmatpush2.bf16.msra.mxu1 %v22726_v63  ;;  %14203 = vmatprep.subr.bf16.mxu0 %v22731_v60  ;;  %v22828_v63 = vld [vmem:[%s30002_s8 + $0x490] ss:$8 sps:$4 sm:$0xff]   ;;  %v22789_v60 = vld [vmem:[%s30002_s8 + $0x560] ss:$8 sps:$4 sm:$0xff]  }
 0xd09   :  { %14250 = vmatprep.subr.bf16.mxu1 %v22734_v62  ;;  %v22833_v62 = vld [vmem:[%s30002_s8 + $0x484] ss:$8 sps:$4 sm:$0xff]  }
 0xd0b   :  { %14204 = vmatpush2.bf16.msra.mxu0 %v22729_v24  ;;  %v22794_v24 = vld [vmem:[%s30002_s8 + $0x554] ss:$8 sps:$4 sm:$0xff]  }
 0xd0c   :  { %14251 = vmatpush2.bf16.msra.mxu1 %v22732_v38  ;;  %14205 = vmatprep.subr.bf16.mxu0 %v22737_v50  ;;  %v22831_v38 = vld [vmem:[%s30002_s8 + $0x480] ss:$8 sps:$4 sm:$0xff]   ;;  %v22792_v50 = vld [vmem:[%s30002_s8 + $0x550] ss:$8 sps:$4 sm:$0xff]  }
 0xd0d   :  { %14252 = vmatprep.subr.bf16.mxu1 %v22740_v3  ;;  %v22836_v3 = vld [vmem:[%s30002_s8 + $0x474] ss:$8 sps:$4 sm:$0xff]  }
 0xd0f   :  { %14206 = vmatpush2.bf16.msra.mxu0 %v22735_v22  ;;  %v22797_v22 = vld [vmem:[%s30002_s8 + $0x544] ss:$8 sps:$4 sm:$0xff]  }
 0xd10   :  { %14253 = vmatpush2.bf16.msra.mxu1 %v22738_v5  ;;  %14207 = vmatprep.subr.bf16.mxu0 %v22743_v9  ;;  %v22834_v5 = vld [vmem:[%s30002_s8 + $0x470] ss:$8 sps:$4 sm:$0xff]   ;;  %v22795_v9 = vld [vmem:[%s30002_s8 + $0x540] ss:$8 sps:$4 sm:$0xff]  }
 0xd11   :  { %14254 = vmatprep.subr.bf16.mxu1 %v22746_v33  ;;  %v22839_v33 = vld [vmem:[%s30002_s8 + $0x464] ss:$8 sps:$4 sm:$0xff]  }
 0xd13   :  { %14208 = vmatpush2.bf16.msra.mxu0 %v22741_v47  ;;  %v22800_v47 = vld [vmem:[%s30002_s8 + $0x634] ss:$8 sps:$4 sm:$0xff]  }
 0xd14   :  { %14255 = vmatpush2.bf16.msra.mxu1 %v22744_v1  ;;  %14209 = vmatprep.subr.bf16.mxu0 %v22749_v49  ;;  %v22837_v1 = vld [vmem:[%s30002_s8 + $0x460] ss:$8 sps:$4 sm:$0xff]   ;;  %v22798_v49 = vld [vmem:[%s30002_s8 + $0x630] ss:$8 sps:$4 sm:$0xff]  }
 0xd15   :  { %14256 = vmatprep.subr.bf16.mxu1 %v22752_v39  ;;  %v22842_v39 = vld [vmem:[%s30002_s8 + $0x454] ss:$8 sps:$4 sm:$0xff]  }
 0xd17   :  { %14210 = vmatpush2.bf16.msra.mxu0 %v22747_v36  ;;  %v22803_v36 = vld [vmem:[%s30002_s8 + $0x624] ss:$8 sps:$4 sm:$0xff]  }
 0xd18   :  { %14257 = vmatpush2.bf16.msra.mxu1 %v22750_v34  ;;  %14211 = vmatprep.subr.bf16.mxu0 %v22755_v52  ;;  %v22840_v34 = vld [vmem:[%s30002_s8 + $0x450] ss:$8 sps:$4 sm:$0xff]   ;;  %v22801_v52 = vld [vmem:[%s30002_s8 + $0x620] ss:$8 sps:$4 sm:$0xff]  }
 0xd19   :  { %14258 = vmatprep.subr.bf16.mxu1 %v22758_v37  ;;  %v22845_v37 = vld [vmem:[%s30002_s8 + $0x444] ss:$8 sps:$4 sm:$0xff]  }
 0xd1b   :  { %14212 = vmatpush2.bf16.msra.mxu0 %v22753_v54  ;;  %v22806_v54 = vld [vmem:[%s30002_s8 + $0x614] ss:$8 sps:$4 sm:$0xff]  }
 0xd1c   :  { %14259 = vmatpush2.bf16.msra.mxu1 %v22756_v17  ;;  %14213 = vmatprep.subr.bf16.mxu0 %v22761_v51  ;;  %v22843_v17 = vld [vmem:[%s30002_s8 + $0x440] ss:$8 sps:$4 sm:$0xff]   ;;  %v22804_v51 = vld [vmem:[%s30002_s8 + $0x610] ss:$8 sps:$4 sm:$0xff]  }
 0xd1d   :  { %14329 = vmatprep.subr.bf16.mxu1 %v28671_v48 }
 0xd1f   :  { %14214 = vmatpush2.bf16.msra.mxu0 %v22759_v15  ;;  %14261 = vmatmul.mubr.bf16.vlgmr.msra.gmra.mxu1 %v13106_v61  ;;  %v22848_v15 = vld [vmem:[%s30002_s8 + $0x534] ss:$8 sps:$4 sm:$0xff]   ;;  %v22846_v61 = vld [vmem:[%s30002_s8 + $0x530] ss:$8 sps:$4 sm:$0xff]  }
 0xd20   :  { %14330 = vmatpush1.bf16.msra.mxu1 %v28669_v12  ;;  %14215 = vmatprep.subr.bf16.mxu0 %v22764_v11  ;;  %v22809_v11 = vld [vmem:[%s30002_s8 + $0x604] ss:$8 sps:$4 sm:$0xff]  }
 0xd21   :  { %14347 = vmatprep.mubr.bf16.mxu1 %v30023_v13  ;;  %20658 = vmatprep.subr.bf16.mxu1 %v30024_v14 }
 0xd23   :  { %14216 = vmatpush2.bf16.msra.mxu0 %v22762_v44  ;;  %v22807_v44 = vld [vmem:[%s30002_s8 + $0x600] ss:$8 sps:$4 sm:$0xff]  }
 0xd24   :  { %14217 = vmatprep.subr.bf16.mxu0 %v22767_v58  ;;  %v22851_v58 = vld [vmem:[%s30002_s8 + $0x524] ss:$8 sps:$4 sm:$0xff]  }
 0xd25   :  { %v29168_v26 = vpop.f32.mrf.mxu1 }
 0xd27   :  { %14218 = vmatpush2.bf16.msra.mxu0 %v22765_v25  ;;  %19745 = vmatmul.mubr.msk.bf16.vlgmr.msra.gmra.mxu1 %vm12978_vm6, %v19744_v43  ;;  %v29174_v2 = vpop.f32.mrf.mxu1  ;;  %v22812_v25 = vld [vmem:[%s30002_s8 + $0x5f4] ss:$8 sps:$4 sm:$0xff]  }
 0xd28   :  { %20659 = vmatpush3.bf16.msra.mxu1 %v28735_v35  ;;  %14281 = vmatprep.subr.bf16.mxu0 %v22770_v30  ;;  %v22810_v30 = vld [vmem:[%s30002_s8 + $0x5f0] ss:$8 sps:$4 sm:$0xff]  }
 0xd29   :  { %20660 = vmatprep.mubr.msk.bf16.mxu1 %vm23161_vm4, %v30024_v14  ;;  %14895 = vmatprep.subr.bf16.mxu1 %v22776_v59  ;;  %v13759_v0 = vpop.f32.mrf.mxu1  ;;  %v22854_v59 = vld [vmem:[%s30002_s8 + $0x514] ss:$8 sps:$4 sm:$0xff]  }
 0xd2a   :  { %14220 = vmatmul.mubr.bf16.vlgmr.msra.gmra.mxu0 %v13104_v32  ;;  %v22852_v32 = vld [vmem:[%s30002_s8 + $0x510] ss:$8 sps:$4 sm:$0xff]   ;;  %v22857_v0 = vld [vmem:[%s30002_s8 + $0x504] ss:$8 sps:$4 sm:$0xff]  }
 0xd2b   :  { %14282 = vmatpush1.bf16.msra.mxu0 %v22768_v45  ;;  %14301 = vmatprep.mubr.bf16.mxu0 %v30023_v13  ;;  %v13760_v19 = vpop.f32.mrf.mxu1  ;;  %v22815_v45 = vld [vmem:[%s30002_s8 + $0x5e4] ss:$8 sps:$4 sm:$0xff]  }
 0xd2c   :  { %14283 = vmatprep.subr.bf16.mxu0 %v22773_v7  ;;  %v22813_v7 = vld [vmem:[%s30002_s8 + $0x5e0] ss:$8 sps:$4 sm:$0xff]  }
 0xd2d   :  { %v22855_v19 = vld [vmem:[%s30002_s8 + $0x500] ss:$8 sps:$4 sm:$0xff]  }
 0xd2f   :  { %14284 = vmatpush1.bf16.msra.mxu0 %v22771_v40  ;;  %20661 = vmatmul.mubr.msk.bf16.vlgmr.msra.gmra.mxu1 %vm12978_vm6, %v19744_v43  ;;  %v22818_v40 = vld [vmem:[%s30002_s8 + $0x5d4] ss:$8 sps:$4 sm:$0xff]  }
 0xd30   :  { %14896 = vmatpush1.bf16.msra.mxu1 %v22774_v53  ;;  %14370 = vmatprep.subr.bf16.mxu0 %v28716_v28  ;;  %v22816_v53 = vld [vmem:[%s30002_s8 + $0x5d0] ss:$8 sps:$4 sm:$0xff]  }
 0xd31   :  { %14897 = vmatprep.subr.bf16.mxu1 %v22779_v6  ;;  %v22860_v6 = vld [vmem:[%s30002_s8 + $0x4f4] ss:$8 sps:$4 sm:$0xff]  }
 0xd32   :  { %19743 = vmatmul.mubr.msk.bf16.vlgmr.msra.gmra.mxu0 %vm12955_vm7, %v13108_v4  ;;  %v22821_v4 = vld [vmem:[%s30002_s8 + $0x5c4] ss:$8 sps:$4 sm:$0xff]  }
 0xd33   :  { %14371 = vmatpush1.bf16.msra.mxu0 %v28714_v23  ;;  %14388 = vmatprep.mubr.bf16.mxu0 %v30023_v13 }
 0xd34   :  { %14898 = vmatpush1.bf16.msra.mxu1 %v22777_v8  ;;  %14854 = vmatprep.subr.bf16.mxu0 %v22824_v41  ;;  %v22858_v8 = vld [vmem:[%s30002_s8 + $0x4f0] ss:$8 sps:$4 sm:$0xff]   ;;  %v22819_v41 = vld [vmem:[%s30002_s8 + $0x5c0] ss:$8 sps:$4 sm:$0xff]  }
 0xd35   :  { %14899 = vmatprep.subr.bf16.mxu1 %v22782_v55  ;;  %v22863_v55 = vld [vmem:[%s30002_s8 + $0x4e4] ss:$8 sps:$4 sm:$0xff]  }
 0xd38   :  { %14900 = vmatpush1.bf16.msra.mxu1 %v22780_v29  ;;  %v22861_v29 = vld [vmem:[%s30002_s8 + $0x4e0] ss:$8 sps:$4 sm:$0xff]  }
 0xd39   :  { %14901 = vmatprep.subr.bf16.mxu1 %v22785_v10  ;;  %v22866_v10 = vld [vmem:[%s30002_s8 + $0x4d4] ss:$8 sps:$4 sm:$0xff]  }
 0xd3a   :  { %19746 = vmatmul.mubr.msk.bf16.vlgmr.msra.gmra.mxu0 %vm12978_vm6, %v19744_v43  ;;  %v22849_v43 = vld [vmem:[%s30002_s8 + $0x520] ss:$8 sps:$4 sm:$0xff]  }
 0xd3b   :  { %14855 = vmatpush1.bf16.msra.mxu0 %v22822_v18  ;;  %v22864_v18 = vld [vmem:[%s30002_s8 + $0x4d0] ss:$8 sps:$4 sm:$0xff]  }
 0xd3c   :  { %14902 = vmatpush1.bf16.msra.mxu1 %v22783_v46  ;;  %14856 = vmatprep.subr.bf16.mxu0 %v22827_v31  ;;  %v22869_v46 = vld [vmem:[%s30002_s8 + $0x4c4] ss:$8 sps:$4 sm:$0xff]   ;;  %v22867_v31 = vld [vmem:[%s30002_s8 + $0x4c0] ss:$8 sps:$4 sm:$0xff]  }
 0xd3d   :  { %14903 = vmatprep.subr.bf16.mxu1 %v22788_v27  ;;  %v22872_v27 = vld [vmem:[%s30002_s8 + $0x654] ss:$8 sps:$4 sm:$0xff]  }
 0xd3f   :  { %14857 = vmatpush1.bf16.msra.mxu0 %v22825_v21 }
 0xd40   :  { %14904 = vmatpush1.bf16.msra.mxu1 %v22786_v56  ;;  %14858 = vmatprep.subr.bf16.mxu0 %v22830_v20 }
 0xd41   :  { %14905 = vmatprep.subr.bf16.mxu1 %v22791_v42 }
 0xd43   :  { %14859 = vmatpush1.bf16.msra.mxu0 %v22828_v63 }
 0xd44   :  { %14906 = vmatpush1.bf16.msra.mxu1 %v22789_v60  ;;  %14860 = vmatprep.subr.bf16.mxu0 %v22833_v62 }
 0xd45   :  { %14907 = vmatprep.subr.bf16.mxu1 %v22794_v24 }
 0xd47   :  { %14861 = vmatpush1.bf16.msra.mxu0 %v22831_v38 }
 0xd48   :  { %14908 = vmatpush1.bf16.msra.mxu1 %v22792_v50  ;;  %14862 = vmatprep.subr.bf16.mxu0 %v22836_v3 }
 0xd49   :  { %14909 = vmatprep.subr.bf16.mxu1 %v22797_v22 }
 0xd4b   :  { %14863 = vmatpush1.bf16.msra.mxu0 %v22834_v5 }
 0xd4c   :  { %14910 = vmatpush1.bf16.msra.mxu1 %v22795_v9  ;;  %14864 = vmatprep.subr.bf16.mxu0 %v22839_v33 }
 0xd4d   :  { %14911 = vmatprep.subr.bf16.mxu1 %v22800_v47 }
 0xd4f   :  { %14865 = vmatpush1.bf16.msra.mxu0 %v22837_v1 }
 0xd50   :  { %14912 = vmatpush2.bf16.msra.mxu1 %v22798_v49  ;;  %14866 = vmatprep.subr.bf16.mxu0 %v22842_v39 }
 0xd51   :  { %14913 = vmatprep.subr.bf16.mxu1 %v22803_v36 }
 0xd53   :  { %14867 = vmatpush1.bf16.msra.mxu0 %v22840_v34 }
 0xd54   :  { %14914 = vmatpush2.bf16.msra.mxu1 %v22801_v52  ;;  %14868 = vmatprep.subr.bf16.mxu0 %v22845_v37 }
 0xd55   :  { %14915 = vmatprep.subr.bf16.mxu1 %v22806_v54 }
 0xd57   :  { %14869 = vmatpush1.bf16.msra.mxu0 %v22843_v17 }
 0xd58   :  { %14916 = vmatpush2.bf16.msra.mxu1 %v22804_v51  ;;  %14870 = vmatprep.subr.bf16.mxu0 %v22848_v15 }
 0xd59   :  { %14917 = vmatprep.subr.bf16.mxu1 %v22809_v11 }
 0xd5b   :  { %14871 = vmatpush2.bf16.msra.mxu0 %v22846_v61  ;;  %v22873_v61 = vld [vmem:[%s30002_s8 + $0x640] ss:$8 sps:$4 sm:$0xff]  }
 0xd5c   :  { %14918 = vmatpush2.bf16.msra.mxu1 %v22807_v44  ;;  %14872 = vmatprep.subr.bf16.mxu0 %v22851_v58 }
 0xd5d   :  { %14919 = vmatprep.subr.bf16.mxu1 %v22812_v25 }
 0xd5f   :  { %14873 = vmatpush2.bf16.msra.mxu0 %v22849_v43 }
 0xd60   :  { %14920 = vmatpush2.bf16.msra.mxu1 %v22810_v30  ;;  %14874 = vmatprep.subr.bf16.mxu0 %v22854_v59 }
 0xd61   :  { %14921 = vmatprep.subr.bf16.mxu1 %v22815_v45 }
 0xd63   :  { %14875 = vmatpush2.bf16.msra.mxu0 %v22852_v32 }
 0xd64   :  { %14922 = vmatpush2.bf16.msra.mxu1 %v22813_v7  ;;  %14876 = vmatprep.subr.bf16.mxu0 %v22857_v0  ;;  %v22926_v7 = vld [vmem:[%s30002_s8 + $0x6d4] ss:$8 sps:$4 sm:$0xff]  }
 0xd65   :  { %14923 = vmatprep.subr.bf16.mxu1 %v22818_v40 }
 0xd67   :  { %14877 = vmatpush2.bf16.msra.mxu0 %v22855_v19 }
 0xd68   :  { %14924 = vmatpush2.bf16.msra.mxu1 %v22816_v53  ;;  %14878 = vmatprep.subr.bf16.mxu0 %v22860_v6 }
 0xd69   :  { %14925 = vmatprep.subr.bf16.mxu1 %v22821_v4 }
 0xd6b   :  { %14879 = vmatpush2.bf16.msra.mxu0 %v22858_v8  ;;  %v19885_v8 = vld [vmem:[%s30001_s7 + $0xc] sm:$0xf] }
 0xd6c   :  { %14926 = vmatpush2.bf16.msra.mxu1 %v22819_v41  ;;  %14880 = vmatprep.subr.bf16.mxu0 %v22863_v55  ;;  %v22924_v41 = vld [vmem:[%s30002_s8 + $0x6d0] ss:$8 sps:$4 sm:$0xff]   ;;  %v22929_v55 = vld [vmem:[%s30002_s8 + $0x6c4] ss:$8 sps:$4 sm:$0xff]  }
 0xd6d   :  { %14998 = vmatprep.subr.bf16.mxu1 %v28671_v48 }
 0xd6f   :  { %14881 = vmatpush2.bf16.msra.mxu0 %v22861_v29 }
 0xd70   :  { %14882 = vmatprep.subr.bf16.mxu0 %v22866_v10 }
 0xd73   :  { %14883 = vmatpush2.bf16.msra.mxu0 %v22864_v18 }
 0xd74   :  { %14884 = vmatprep.subr.bf16.mxu0 %v22869_v46 }
 0xd77   :  { %14885 = vmatpush2.bf16.msra.mxu0 %v22867_v31  ;;  %v22927_v31 = vld [vmem:[%s30002_s8 + $0x6c0] ss:$8 sps:$4 sm:$0xff]  }
 0xd78   :  { %14948 = vmatprep.subr.bf16.mxu0 %v22872_v27  ;;  %v22932_v27 = vld [vmem:[%s30002_s8 + $0x6b4] ss:$8 sps:$4 sm:$0xff]  }
 0xd9f   :  { %v13837_v21 = vpop.f32.mrf.mxu1 }
 0xda1   :  { %v13839_v56 = vpop.f32.mrf.mxu1 }
 0xda3   :  { %v13841_v20 = vpop.f32.mrf.mxu1 }
 0xda4   :  { %v22935_v20 = vld [vmem:[%s30002_s8 + $0x6a4] ss:$8 sps:$4 sm:$0xff]  }
 0xda5   :  { %v13842_v42 = vpop.f32.mrf.mxu1 }
 0xda6   :  { %v22878_v42 = vld [vmem:[%s30002_s8 + $0x7d4] ss:$8 sps:$4 sm:$0xff]  }
 0xdaa   :  { %v13796_v63 = vpop.f32.mrf.mxu0 }
 0xdab   :  { %v13797_v60 = vadd.f32 %v13796_v63, %v29168_v26  ;;  %v22870_v26 = vld [vmem:[%s30002_s8 + $0x650] ss:$8 sps:$4 sm:$0xff]   ;;  %v22933_v63 = vld [vmem:[%s30002_s8 + $0x6a0] ss:$8 sps:$4 sm:$0xff]  }
 0xdac   :  { %v13798_v62 = vpop.f32.mrf.mxu0 }
 0xdad   :  { %v13799_v24 = vadd.f32 %v13798_v62, %v29174_v2  ;;  %v13838_v38 = vadd.f32 %v13837_v21, %v13797_v60  ;;  %v22875_v2 = vld [vmem:[%s30002_s8 + $0x644] ss:$8 sps:$4 sm:$0xff]   ;;  %v22938_v60 = vld [vmem:[%s30002_s8 + $0x694] ss:$8 sps:$4 sm:$0xff]   ;;  %v22936_v62 = vld [vmem:[%s30002_s8 + $0x690] ss:$8 sps:$4 sm:$0xff]  }
 0xdae   :  { %v13800_v50 = vpop.f32.mrf.mxu0 }
 0xdaf   :  { %v13840_v3 = vadd.f32 %v13839_v56, %v13799_v24  ;;  %v22930_v56 = vld [vmem:[%s30002_s8 + $0x6b0] ss:$8 sps:$4 sm:$0xff]   ;;  %v22941_v24 = vld [vmem:[%s30002_s8 + $0x684] ss:$8 sps:$4 sm:$0xff]  }
 0xdb0   :  { %v13801_v22 = vpop.f32.mrf.mxu0  ;;  %v22881_v50 = vld [vmem:[%s30002_s8 + $0x7c4] ss:$8 sps:$4 sm:$0xff]  }
 0xdb1   :  { %v22944_v22 = vld [vmem:[%s30002_s8 + $0x674] ss:$8 sps:$4 sm:$0xff]  }
 0xddf   :  { %v14262_v5 = vpop.f32.mrf.mxu1 }
 0xde1   :  { %v14264_v9 = vpop.f32.mrf.mxu1 }
 0xde3   :  { %v14266_v33 = vpop.f32.mrf.mxu1 }
 0xde4   :  { %v22942_v33 = vld [vmem:[%s30002_s8 + $0x670] ss:$8 sps:$4 sm:$0xff]  }
 0xde5   :  { %v14267_v47 = vpop.f32.mrf.mxu1 }
 0xde6   :  { %v22947_v47 = vld [vmem:[%s30002_s8 + $0x664] ss:$8 sps:$4 sm:$0xff]  }
 0xde7   :  { %v14349_v1 = vpop.f32.mrf.mxu1 }
 0xde8   :  { %v14437_v49 = vpack.c.bf16 %v14349_v1, %v14349_v1  ;;  %v22882_v1 = vld [vmem:[%s30002_s8 + $0x7b0] ss:$8 sps:$4 sm:$0xff]  }
 0xde9   :  { %v14351_v39 = vpop.f32.mrf.mxu1 }
 0xdea   :  { %v14438_v36 = vpack.c.bf16 %v14351_v39, %v14351_v39  ;;  %v14221_v34 = vpop.f32.mrf.mxu0  ;;  %v22945_v39 = vld [vmem:[%s30002_s8 + $0x660] ss:$8 sps:$4 sm:$0xff]  }
 0xdeb   :  { %v14222_v52 = vadd.f32 %v14221_v34, %v13838_v38  ;;  %v14353_v37 = vpop.f32.mrf.mxu1  ;;  %v22876_v38 = vld [vmem:[%s30002_s8 + $0x7d0] ss:$8 sps:$4 sm:$0xff]   ;;  %v22890_v34 = vld [vmem:[%s30002_s8 + $0x794] ss:$8 sps:$4 sm:$0xff]  }
 0xdec   :  { %v14223_v54 = vpop.f32.mrf.mxu0  ;;  %14886 = vmatprep.mubr.bf16.mxu0 %v14438_v36  ;;  %v22885_v36 = vld [vmem:[%s30002_s8 + $0x7a0] ss:$8 sps:$4 sm:$0xff]  }
 0xded   :  { %v14224_v17 = vadd.f32 %v14223_v54, %v13840_v3  ;;  %14887 = vmatmul.mubr.bf16.vlgmr.msra.gmra.mxu0 %v14437_v49  ;;  %v14354_v51 = vpop.f32.mrf.mxu1  ;;  %v14263_v15 = vadd.f32 %v14262_v5, %v14222_v52  ;;  %v22939_v3 = vld [vmem:[%s30002_s8 + $0x680] ss:$8 sps:$4 sm:$0xff]   ;;  %v22887_v49 = vld [vmem:[%s30002_s8 + $0x7a4] ss:$8 sps:$4 sm:$0xff]   ;;  %v22894_v54 = vld [vmem:[%s30002_s8 + $0x770] ss:$8 sps:$4 sm:$0xff]  }
 0xdee   :  { %14949 = vmatpush1.bf16.msra.mxu0 %v22870_v26  ;;  %v14225_v11 = vpop.f32.mrf.mxu0  ;;  %14968 = vmatprep.mubr.bf16.mxu0 %v30023_v13  ;;  %v22879_v5 = vld [vmem:[%s30002_s8 + $0x7c0] ss:$8 sps:$4 sm:$0xff]   ;;  %v22888_v26 = vld [vmem:[%s30002_s8 + $0x790] ss:$8 sps:$4 sm:$0xff]   ;;  %v22893_v52 = vld [vmem:[%s30002_s8 + $0x784] ss:$8 sps:$4 sm:$0xff]  }
 0xdef   :  { %14950 = vmatprep.subr.bf16.mxu0 %v22875_v2  ;;  %v14431_v44 = vpop.f32.mrf.mxu1  ;;  %v14265_v58 = vadd.f32 %v14264_v9, %v14224_v17  ;;  %v22884_v9 = vld [vmem:[%s30002_s8 + $0x7b4] ss:$8 sps:$4 sm:$0xff]   ;;  %v22891_v37 = vld [vmem:[%s30002_s8 + $0x780] ss:$8 sps:$4 sm:$0xff]   ;;  %v22899_v17 = vld [vmem:[%s30002_s8 + $0x764] ss:$8 sps:$4 sm:$0xff]  }
 0xdf0   :  { %v14226_v25 = vpop.f32.mrf.mxu0  ;;  %v14441_v43 = vpack.c.bf16 %v14431_v44, %v14431_v44  ;;  %v22896_v2 = vld [vmem:[%s30002_s8 + $0x774] ss:$8 sps:$4 sm:$0xff]   ;;  %v22897_v51 = vld [vmem:[%s30002_s8 + $0x760] ss:$8 sps:$4 sm:$0xff]   ;;  %v22948_v44 = vld [vmem:[%s30002_s8 + $0x750] ss:$8 sps:$4 sm:$0xff]  }
 0xdf1   :  { %v20662_v30 = vpop.f32.mrf.mxu1  ;;  %v22950_v11 = vld [vmem:[%s30002_s8 + $0x754] ss:$8 sps:$4 sm:$0xff]   ;;  %v22953_v25 = vld [vmem:[%s30002_s8 + $0x744] ss:$8 sps:$4 sm:$0xff]  }
 0xdf2   :  { %14951 = vmatpush1.bf16.msra.mxu0 %v22873_v61  ;;  %v14303_v59 = vpop.f32.mrf.mxu0  ;;  %v22900_v61 = vld [vmem:[%s30002_s8 + $0x850] ss:$8 sps:$4 sm:$0xff]   ;;  %v22951_v30 = vld [vmem:[%s30002_s8 + $0x740] ss:$8 sps:$4 sm:$0xff]  }
 0xdf3   :  { %v29401_v45 = vadd.f32 %v14303_v59, %v14263_v15  ;;  %15039 = vmatprep.subr.bf16.mxu0 %v28716_v28  ;;  %v14434_v32 = vpop.f32.mrf.mxu1  ;;  %v22902_v15 = vld [vmem:[%s30002_s8 + $0x854] ss:$8 sps:$4 sm:$0xff]  }
 0xdf4   :  { %v14305_v0 = vpop.f32.mrf.mxu0  ;;  %v22908_v59 = vld [vmem:[%s30002_s8 + $0x834] ss:$8 sps:$4 sm:$0xff]  }
 0xdf5   :  { %v29407_v40 = vadd.f32 %v14305_v0, %v14265_v58  ;;  %19884 = vmatmul.mubr.msk.bf16.vlgmr.msra.gmra.mxu0 %vm12955_vm7, %v14441_v43  ;;  %v20663_v19 = vpop.f32.mrf.mxu1  ;;  %v22905_v58 = vld [vmem:[%s30002_s8 + $0x844] ss:$8 sps:$4 sm:$0xff]   ;;  %v22903_v43 = vld [vmem:[%s30002_s8 + $0x840] ss:$8 sps:$4 sm:$0xff]   ;;  %v22956_v32 = vld [vmem:[%s30002_s8 + $0x734] ss:$8 sps:$4 sm:$0xff]  }
 0xdf6   :  { %15040 = vmatpush1.bf16.msra.mxu0 %v28714_v23  ;;  %v14307_v53 = vpop.f32.mrf.mxu0  ;;  %15057 = vmatprep.mubr.bf16.mxu0 %v30023_v13  ;;  %v22954_v0 = vld [vmem:[%s30002_s8 + $0x730] ss:$8 sps:$4 sm:$0xff]   ;;  %v22911_v19 = vld [vmem:[%s30002_s8 + $0x824] ss:$8 sps:$4 sm:$0xff]  }
 0xdf7   :  { %15523 = vmatprep.subr.bf16.mxu0 %v22926_v7  ;;  %v22906_v7 = vld [vmem:[%s30002_s8 + $0x830] ss:$8 sps:$4 sm:$0xff]   ;;  %v22959_v53 = vld [vmem:[%s30002_s8 + $0x724] ss:$8 sps:$4 sm:$0xff]  }
 0xdf8   :  { %v14308_v6 = vpop.f32.mrf.mxu0 }
 0xdf9   :  { %v22909_v6 = vld [vmem:[%s30002_s8 + $0x820] ss:$8 sps:$4 sm:$0xff]  }
 0xdfa   :  { %v14390_v4 = vpop.f32.mrf.mxu0 }
 0xdfb   :  { %v14439_v18 = vpack.c.bf16 %v14390_v4, %v14390_v4  ;;  %v22957_v4 = vld [vmem:[%s30002_s8 + $0x720] ss:$8 sps:$4 sm:$0xff]  }
 0xdfc   :  { %v14392_v29 = vpop.f32.mrf.mxu0 }
 0xdfd   :  { %v14440_v10 = vpack.c.bf16 %v14392_v29, %v14392_v29  ;;  %19887 = vmatmul.mubr.msk.bf16.vlgmr.msra.gmra.mxu0 %vm12978_vm6, %v19885_v8  ;;  %v22960_v29 = vld [vmem:[%s30002_s8 + $0x710] ss:$8 sps:$4 sm:$0xff]  }
 0xdfe   :  { %v14394_v46 = vpop.f32.mrf.mxu0  ;;  %15524 = vmatpush1.bf16.msra.mxu0 %v22924_v41  ;;  %v22962_v41 = vld [vmem:[%s30002_s8 + $0x714] ss:$8 sps:$4 sm:$0xff]  }
 0xdff   :  { %14927 = vmatprep.mubr.bf16.mxu1 %v14440_v10  ;;  %15525 = vmatprep.subr.bf16.mxu0 %v22929_v55  ;;  %v22912_v55 = vld [vmem:[%s30002_s8 + $0x810] ss:$8 sps:$4 sm:$0xff]   ;;  %v22917_v10 = vld [vmem:[%s30002_s8 + $0x804] ss:$8 sps:$4 sm:$0xff]   ;;  %v22915_v46 = vld [vmem:[%s30002_s8 + $0x800] ss:$8 sps:$4 sm:$0xff]  }
 0xe00   :  { %v14395_v21 = vpop.f32.mrf.mxu0  ;;  %14928 = vmatmul.mubr.bf16.vlgmr.msra.gmra.mxu1 %v14439_v18  ;;  %v22965_v18 = vld [vmem:[%s30002_s8 + $0x704] ss:$8 sps:$4 sm:$0xff]  }
 0xe01   :  { %14999 = vmatpush1.bf16.msra.mxu1 %v28669_v12  ;;  %15016 = vmatprep.mubr.bf16.mxu1 %v30023_v13  ;;  %v22968_v21 = vld [vmem:[%s30002_s8 + $0x6f4] ss:$8 sps:$4 sm:$0xff]  }
 0xe02   :  { %20664 = vmatprep.subr.bf16.mxu1 %v30024_v14  ;;  %15526 = vmatpush1.bf16.msra.mxu0 %v22927_v31  ;;  %v22963_v31 = vld [vmem:[%s30002_s8 + $0x700] ss:$8 sps:$4 sm:$0xff]  }
 0xe03   :  { %15527 = vmatprep.subr.bf16.mxu0 %v22932_v27  ;;  %v22920_v27 = vld [vmem:[%s30002_s8 + $0x7f4] ss:$8 sps:$4 sm:$0xff]  }
 0xe06   :  { %15528 = vmatpush1.bf16.msra.mxu0 %v22930_v56  ;;  %v22918_v56 = vld [vmem:[%s30002_s8 + $0x7f0] ss:$8 sps:$4 sm:$0xff]  }
 0xe07   :  { %15529 = vmatprep.subr.bf16.mxu0 %v22935_v20  ;;  %v22966_v20 = vld [vmem:[%s30002_s8 + $0x6f0] ss:$8 sps:$4 sm:$0xff]  }
 0xe08   :  { %19886 = vmatmul.mubr.msk.bf16.vlgmr.msra.gmra.mxu1 %vm12978_vm6, %v19885_v8 }
 0xe09   :  { %20665 = vmatpush3.bf16.msra.mxu1 %v28735_v35  ;;  %20666 = vmatprep.mubr.msk.bf16.mxu1 %vm23161_vm4, %v30024_v14 }
 0xe0a   :  { %15564 = vmatprep.subr.bf16.mxu1 %v22878_v42  ;;  %15530 = vmatpush1.bf16.msra.mxu0 %v22933_v63  ;;  %v22923_v42 = vld [vmem:[%s30002_s8 + $0x7e4] ss:$8 sps:$4 sm:$0xff]  }
 0xe0b   :  { %15531 = vmatprep.subr.bf16.mxu0 %v22938_v60  ;;  %v22971_v63 = vld [vmem:[%s30002_s8 + $0x6e4] ss:$8 sps:$4 sm:$0xff]   ;;  %v22921_v60 = vld [vmem:[%s30002_s8 + $0x7e0] ss:$8 sps:$4 sm:$0xff]  }
 0xe0e   :  { %15532 = vmatpush1.bf16.msra.mxu0 %v22936_v62  ;;  %v22969_v62 = vld [vmem:[%s30002_s8 + $0x6e0] ss:$8 sps:$4 sm:$0xff]  }
 0xe0f   :  { %15533 = vmatprep.subr.bf16.mxu0 %v22941_v24  ;;  %v22974_v24 = vld [vmem:[%s30002_s8 + $0x874] ss:$8 sps:$4 sm:$0xff]  }
 0xe10   :  { %20667 = vmatmul.mubr.msk.bf16.vlgmr.msra.gmra.mxu1 %vm12978_vm6, %v19885_v8  ;;  %v22914_v8 = vld [vmem:[%s30002_s8 + $0x814] ss:$8 sps:$4 sm:$0xff]  }
 0xe11   :  { %15565 = vmatpush1.bf16.msra.mxu1 %v22876_v38 }
 0xe12   :  { %15566 = vmatprep.subr.bf16.mxu1 %v22881_v50  ;;  %15534 = vmatpush1.bf16.msra.mxu0 %v22939_v3 }
 0xe13   :  { %15535 = vmatprep.subr.bf16.mxu0 %v22944_v22 }
 0xe15   :  { %15567 = vmatpush1.bf16.msra.mxu1 %v22879_v5 }
 0xe16   :  { %15568 = vmatprep.subr.bf16.mxu1 %v22884_v9  ;;  %15536 = vmatpush1.bf16.msra.mxu0 %v22942_v33 }
 0xe17   :  { %15537 = vmatprep.subr.bf16.mxu0 %v22947_v47 }
 0xe19   :  { %15569 = vmatpush1.bf16.msra.mxu1 %v22882_v1 }
 0xe1a   :  { %15570 = vmatprep.subr.bf16.mxu1 %v22887_v49  ;;  %15538 = vmatpush1.bf16.msra.mxu0 %v22945_v39 }
 0xe1b   :  { %15539 = vmatprep.subr.bf16.mxu0 %v22950_v11 }
 0xe1d   :  { %15571 = vmatpush1.bf16.msra.mxu1 %v22885_v36 }
 0xe1e   :  { %15572 = vmatprep.subr.bf16.mxu1 %v22890_v34  ;;  %15540 = vmatpush2.bf16.msra.mxu0 %v22948_v44 }
 0xe1f   :  { %15541 = vmatprep.subr.bf16.mxu0 %v22953_v25 }
 0xe21   :  { %15573 = vmatpush1.bf16.msra.mxu1 %v22888_v26 }
 0xe22   :  { %15574 = vmatprep.subr.bf16.mxu1 %v22893_v52  ;;  %15542 = vmatpush2.bf16.msra.mxu0 %v22951_v30 }
 0xe23   :  { %15543 = vmatprep.subr.bf16.mxu0 %v22956_v32 }
 0xe25   :  { %15575 = vmatpush1.bf16.msra.mxu1 %v22891_v37 }
 0xe26   :  { %15576 = vmatprep.subr.bf16.mxu1 %v22896_v2  ;;  %15544 = vmatpush2.bf16.msra.mxu0 %v22954_v0  ;;  %v22990_v0 = vld [vmem:[%s30002_s8 + $0x9f0] ss:$8 sps:$4 sm:$0xff]  }
 0xe27   :  { %15545 = vmatprep.subr.bf16.mxu0 %v22959_v53 }
 0xe29   :  { %15577 = vmatpush1.bf16.msra.mxu1 %v22894_v54 }
 0xe2a   :  { %15578 = vmatprep.subr.bf16.mxu1 %v22899_v17  ;;  %15546 = vmatpush2.bf16.msra.mxu0 %v22957_v4  ;;  %v22980_v4 = vld [vmem:[%s30002_s8 + $0x8f4] ss:$8 sps:$4 sm:$0xff]  }
 0xe2b   :  { %15547 = vmatprep.subr.bf16.mxu0 %v22962_v41  ;;  %v23004_v41 = vld [vmem:[%s30002_s8 + $0x9d4] ss:$8 sps:$4 sm:$0xff]  }
 0xe2d   :  { %15579 = vmatpush1.bf16.msra.mxu1 %v22897_v51 }
 0xe2e   :  { %15580 = vmatprep.subr.bf16.mxu1 %v22902_v15  ;;  %15548 = vmatpush2.bf16.msra.mxu0 %v22960_v29  ;;  %v23010_v29 = vld [vmem:[%s30002_s8 + $0x9c4] ss:$8 sps:$4 sm:$0xff]  }
 0xe2f   :  { %15549 = vmatprep.subr.bf16.mxu0 %v22965_v18  ;;  %v23008_v18 = vld [vmem:[%s30002_s8 + $0x9c0] ss:$8 sps:$4 sm:$0xff]  }
 0xe31   :  { %15581 = vmatpush2.bf16.msra.mxu1 %v22900_v61 }
 0xe32   :  { %15582 = vmatprep.subr.bf16.mxu1 %v22905_v58  ;;  %15550 = vmatpush2.bf16.msra.mxu0 %v22963_v31  ;;  %v20026_v58 = vld [vmem:[%s30001_s7 + $0x10] sm:$0xf]  ;;  %v22981_v31 = vld [vmem:[%s30002_s8 + $0x8e0] ss:$8 sps:$4 sm:$0xff]  }
 0xe33   :  { %15551 = vmatprep.subr.bf16.mxu0 %v22968_v21  ;;  %v23014_v21 = vld [vmem:[%s30002_s8 + $0x9b0] ss:$8 sps:$4 sm:$0xff]  }
 0xe35   :  { %15583 = vmatpush2.bf16.msra.mxu1 %v22903_v43 }
 0xe36   :  { %15584 = vmatprep.subr.bf16.mxu1 %v22908_v59  ;;  %15552 = vmatpush2.bf16.msra.mxu0 %v22966_v20  ;;  %v22977_v59 = vld [vmem:[%s30002_s8 + $0x864] ss:$8 sps:$4 sm:$0xff]   ;;  %v22984_v20 = vld [vmem:[%s30002_s8 + $0x8d0] ss:$8 sps:$4 sm:$0xff]  }
 0xe37   :  { %15553 = vmatprep.subr.bf16.mxu0 %v22971_v63  ;;  %v23020_v63 = vld [vmem:[%s30002_s8 + $0x9a0] ss:$8 sps:$4 sm:$0xff]  }
 0xe39   :  { %15585 = vmatpush2.bf16.msra.mxu1 %v22906_v7  ;;  %v22975_v7 = vld [vmem:[%s30002_s8 + $0x860] ss:$8 sps:$4 sm:$0xff]  }
 0xe3a   :  { %15586 = vmatprep.subr.bf16.mxu1 %v22911_v19  ;;  %15554 = vmatpush2.bf16.msra.mxu0 %v22969_v62  ;;  %v22987_v62 = vld [vmem:[%s30002_s8 + $0x8c0] ss:$8 sps:$4 sm:$0xff]  }
 0xe3b   :  { %15617 = vmatprep.subr.bf16.mxu0 %v22974_v24  ;;  %v22995_v24 = vld [vmem:[%s30002_s8 + $0x8b4] ss:$8 sps:$4 sm:$0xff]  }
 0xe3d   :  { %15587 = vmatpush2.bf16.msra.mxu1 %v22909_v6 }
 0xe3e   :  { %15588 = vmatprep.subr.bf16.mxu1 %v22914_v8  ;;  %v22996_v8 = vld [vmem:[%s30002_s8 + $0x9e0] ss:$8 sps:$4 sm:$0xff]  }
 0xe41   :  { %15589 = vmatpush2.bf16.msra.mxu1 %v22912_v55 }
 0xe42   :  { %15590 = vmatprep.subr.bf16.mxu1 %v22917_v10  ;;  %v22978_v10 = vld [vmem:[%s30002_s8 + $0x8f0] ss:$8 sps:$4 sm:$0xff]  }
 0xe45   :  { %15591 = vmatpush2.bf16.msra.mxu1 %v22915_v46  ;;  %v23016_v46 = vld [vmem:[%s30002_s8 + $0x9b4] ss:$8 sps:$4 sm:$0xff]  }
 0xe46   :  { %15592 = vmatprep.subr.bf16.mxu1 %v22920_v27  ;;  %v22986_v27 = vld [vmem:[%s30002_s8 + $0x8d4] ss:$8 sps:$4 sm:$0xff]  }
 0xe49   :  { %15593 = vmatpush2.bf16.msra.mxu1 %v22918_v56  ;;  %v23022_v56 = vld [vmem:[%s30002_s8 + $0x9a4] ss:$8 sps:$4 sm:$0xff]  }
 0xe4a   :  { %15594 = vmatprep.subr.bf16.mxu1 %v22923_v42  ;;  %v22989_v42 = vld [vmem:[%s30002_s8 + $0x8c4] ss:$8 sps:$4 sm:$0xff]  }
 0xe4d   :  { %15595 = vmatpush2.bf16.msra.mxu1 %v22921_v60  ;;  %v23028_v60 = vld [vmem:[%s30002_s8 + $0x994] ss:$8 sps:$4 sm:$0xff]  }
 0xe4e   :  { %15667 = vmatprep.subr.bf16.mxu1 %v28671_v48 }
 0xead   :  { %v14888_v38 = vpop.f32.mrf.mxu0 }
 0xeaf   :  { %v14890_v50 = vpop.f32.mrf.mxu0 }
 0xeb1   :  { %v14892_v3 = vpop.f32.mrf.mxu0 }
 0xeb2   :  { %v22993_v3 = vld [vmem:[%s30002_s8 + $0x8b0] ss:$8 sps:$4 sm:$0xff]  }
 0xeb3   :  { %v14893_v22 = vpop.f32.mrf.mxu0 }
 0xeb4   :  { %v23001_v22 = vld [vmem:[%s30002_s8 + $0x8a4] ss:$8 sps:$4 sm:$0xff]  }
 0xeb5   :  { %v14970_v5 = vpop.f32.mrf.mxu0 }
 0xeb7   :  { %v14972_v9 = vpop.f32.mrf.mxu0 }
 0xeb9   :  { %v14974_v33 = vpop.f32.mrf.mxu0 }
 0xeba   :  { %v22999_v33 = vld [vmem:[%s30002_s8 + $0x8a0] ss:$8 sps:$4 sm:$0xff]  }
 0xebb   :  { %v14975_v47 = vpop.f32.mrf.mxu0 }
 0xebc   :  { %v23007_v47 = vld [vmem:[%s30002_s8 + $0x894] ss:$8 sps:$4 sm:$0xff]  }
 0xebd   :  { %v15059_v1 = vpop.f32.mrf.mxu0 }
 0xebe   :  { %v15108_v49 = vpack.c.bf16 %v15059_v1, %v15059_v1  ;;  %v23038_v1 = vld [vmem:[%s30002_s8 + $0xa70] ss:$8 sps:$4 sm:$0xff]  }
 0xebf   :  { %v15061_v39 = vpop.f32.mrf.mxu0 }
 0xec0   :  { %v15109_v36 = vpack.c.bf16 %v15061_v39, %v15061_v39  ;;  %v14929_v34 = vpop.f32.mrf.mxu1  ;;  %v23013_v39 = vld [vmem:[%s30002_s8 + $0x884] ss:$8 sps:$4 sm:$0xff]  }
 0xec1   :  { %v14930_v26 = vadd.f32 %v14929_v34, %v14888_v38  ;;  %v15063_v52 = vpop.f32.mrf.mxu0  ;;  %v23026_v38 = vld [vmem:[%s30002_s8 + $0x990] ss:$8 sps:$4 sm:$0xff]   ;;  %v23019_v34 = vld [vmem:[%s30002_s8 + $0x974] ss:$8 sps:$4 sm:$0xff]  }
 0xec2   :  { %v14931_v37 = vpop.f32.mrf.mxu1  ;;  %15596 = vmatprep.mubr.bf16.mxu1 %v15109_v36  ;;  %v23011_v36 = vld [vmem:[%s30002_s8 + $0x880] ss:$8 sps:$4 sm:$0xff]   ;;  %v23025_v52 = vld [vmem:[%s30002_s8 + $0x964] ss:$8 sps:$4 sm:$0xff]  }
 0xec3   :  { %v14971_v2 = vadd.f32 %v14970_v5, %v14930_v26  ;;  %v14932_v48 = vadd.f32 %v14931_v37, %v14890_v50  ;;  %15597 = vmatmul.mubr.bf16.vlgmr.msra.gmra.mxu1 %v15108_v49  ;;  %v15064_v54 = vpop.f32.mrf.mxu0  ;;  %v23034_v50 = vld [vmem:[%s30002_s8 + $0x984] ss:$8 sps:$4 sm:$0xff]   ;;  %v23032_v5 = vld [vmem:[%s30002_s8 + $0x980] ss:$8 sps:$4 sm:$0xff]   ;;  %v23005_v49 = vld [vmem:[%s30002_s8 + $0x890] ss:$8 sps:$4 sm:$0xff]  }
 0xec4   :  { %15668 = vmatpush1.bf16.msra.mxu1 %v28669_v12  ;;  %v14933_v17 = vpop.f32.mrf.mxu1  ;;  %15685 = vmatprep.mubr.bf16.mxu1 %v30023_v13  ;;  %v22992_v12 = vld [vmem:[%s30002_s8 + $0x9f4] ss:$8 sps:$4 sm:$0xff]   ;;  %v23017_v26 = vld [vmem:[%s30002_s8 + $0x970] ss:$8 sps:$4 sm:$0xff]   ;;  %v23023_v37 = vld [vmem:[%s30002_s8 + $0x960] ss:$8 sps:$4 sm:$0xff]  }
 0xec5   :  { %v14973_v51 = vadd.f32 %v14972_v9, %v14932_v48  ;;  %20670 = vmatprep.subr.bf16.mxu1 %v30024_v14  ;;  %v29621_v15 = vadd.f32 %v14971_v2, %v29401_v45  ;;  %v22972_v45 = vld [vmem:[%s30002_s8 + $0x870] ss:$8 sps:$4 sm:$0xff]   ;;  %v23040_v9 = vld [vmem:[%s30002_s8 + $0xa74] ss:$8 sps:$4 sm:$0xff]   ;;  %v23044_v54 = vld [vmem:[%s30002_s8 + $0xa60] ss:$8 sps:$4 sm:$0xff]  }
 0xec6   :  { %v14934_v11 = vpop.f32.mrf.mxu1  ;;  %v23031_v2 = vld [vmem:[%s30002_s8 + $0x954] ss:$8 sps:$4 sm:$0xff]   ;;  %v23029_v48 = vld [vmem:[%s30002_s8 + $0x950] ss:$8 sps:$4 sm:$0xff]   ;;  %v23046_v17 = vld [vmem:[%s30002_s8 + $0xa64] ss:$8 sps:$4 sm:$0xff]  }
 0xec7   :  { %v29624_v61 = vadd.f32 %v14973_v51, %v29407_v40  ;;  %v23037_v51 = vld [vmem:[%s30002_s8 + $0x944] ss:$8 sps:$4 sm:$0xff]   ;;  %v23035_v11 = vld [vmem:[%s30002_s8 + $0x940] ss:$8 sps:$4 sm:$0xff]  }
 0xec8   :  { %v15018_v44 = vpop.f32.mrf.mxu1 }
 0xec9   :  { %v15106_v30 = vpack.c.bf16 %v15018_v44, %v15018_v44  ;;  %v23050_v44 = vld [vmem:[%s30002_s8 + $0xa50] ss:$8 sps:$4 sm:$0xff]  }
 0xeca   :  { %v15020_v25 = vpop.f32.mrf.mxu1 }
 0xecb   :  { %v15107_v43 = vpack.c.bf16 %v15020_v25, %v15020_v25  ;;  %20027 = vmatmul.mubr.msk.bf16.vlgmr.msra.gmra.mxu1 %vm12978_vm6, %v20026_v58  ;;  %v23041_v25 = vld [vmem:[%s30002_s8 + $0x930] ss:$8 sps:$4 sm:$0xff]  }
 0xecc   :  { %20671 = vmatpush3.bf16.msra.mxu1 %v28735_v35  ;;  %v15022_v40 = vpop.f32.mrf.mxu1  ;;  %20672 = vmatprep.mubr.msk.bf16.mxu1 %vm23161_vm4, %v30024_v14  ;;  %v22998_v14 = vld [vmem:[%s30002_s8 + $0x9e4] ss:$8 sps:$4 sm:$0xff]  }
 0xecd   :  { %15555 = vmatprep.mubr.bf16.mxu0 %v15107_v43  ;;  %16233 = vmatprep.subr.bf16.mxu1 %v22992_v12  ;;  %v23043_v12 = vld [vmem:[%s30002_s8 + $0x934] ss:$8 sps:$4 sm:$0xff]   ;;  %v23049_v43 = vld [vmem:[%s30002_s8 + $0x924] ss:$8 sps:$4 sm:$0xff]  }
 0xece   :  { %v15023_v32 = vpop.f32.mrf.mxu1  ;;  %15556 = vmatmul.mubr.bf16.vlgmr.msra.gmra.mxu0 %v15106_v30  ;;  %v23058_v30 = vld [vmem:[%s30002_s8 + $0xa44] ss:$8 sps:$4 sm:$0xff]   ;;  %v23055_v40 = vld [vmem:[%s30002_s8 + $0x914] ss:$8 sps:$4 sm:$0xff]  }
 0xecf   :  { %15618 = vmatpush1.bf16.msra.mxu0 %v22972_v45  ;;  %15637 = vmatprep.mubr.bf16.mxu0 %v30023_v13  ;;  %v23047_v45 = vld [vmem:[%s30002_s8 + $0x920] ss:$8 sps:$4 sm:$0xff]   ;;  %v23053_v32 = vld [vmem:[%s30002_s8 + $0x910] ss:$8 sps:$4 sm:$0xff]  }
 0xed0   :  { %v15100_v35 = vpop.f32.mrf.mxu1  ;;  %15619 = vmatprep.subr.bf16.mxu0 %v22977_v59  ;;  %v23056_v59 = vld [vmem:[%s30002_s8 + $0xa40] ss:$8 sps:$4 sm:$0xff]  }
 0xed1   :  { %v15110_v19 = vpack.c.bf16 %v15100_v35, %v15100_v35  ;;  %v23061_v35 = vld [vmem:[%s30002_s8 + $0x904] ss:$8 sps:$4 sm:$0xff]  }
 0xed2   :  { %v20668_v53 = vpop.f32.mrf.mxu1 }
 0xed3   :  { %15620 = vmatpush1.bf16.msra.mxu0 %v22975_v7  ;;  %20673 = vmatmul.mubr.msk.bf16.vlgmr.msra.gmra.mxu1 %vm12978_vm6, %v20026_v58  ;;  %v23064_v7 = vld [vmem:[%s30002_s8 + $0xa34] ss:$8 sps:$4 sm:$0xff]   ;;  %v23065_v53 = vld [vmem:[%s30002_s8 + $0xa20] ss:$8 sps:$4 sm:$0xff]  }
 0xed4   :  { %15708 = vmatprep.subr.bf16.mxu0 %v28716_v28  ;;  %v15103_v6 = vpop.f32.mrf.mxu1  ;;  %16234 = vmatpush1.bf16.msra.mxu1 %v22990_v0  ;;  %v23002_v28 = vld [vmem:[%s30002_s8 + $0x9d0] ss:$8 sps:$4 sm:$0xff]  }
 0xed5   :  { %16235 = vmatprep.subr.bf16.mxu1 %v22998_v14  ;;  %v23062_v0 = vld [vmem:[%s30002_s8 + $0xa30] ss:$8 sps:$4 sm:$0xff]   ;;  %v23059_v14 = vld [vmem:[%s30002_s8 + $0x900] ss:$8 sps:$4 sm:$0xff]   ;;  %v23070_v6 = vld [vmem:[%s30002_s8 + $0xa94] ss:$8 sps:$4 sm:$0xff]  }
 0xed6   :  { %v20669_v55 = vpop.f32.mrf.mxu1  ;;  %20025 = vmatmul.mubr.msk.bf16.vlgmr.msra.gmra.mxu0 %vm12955_vm7, %v15110_v19  ;;  %v23067_v19 = vld [vmem:[%s30002_s8 + $0xa24] ss:$8 sps:$4 sm:$0xff]  }
 0xed7   :  { %15709 = vmatpush1.bf16.msra.mxu0 %v28714_v23  ;;  %15726 = vmatprep.mubr.bf16.mxu0 %v30023_v13  ;;  %v22983_v23 = vld [vmem:[%s30002_s8 + $0x8e4] ss:$8 sps:$4 sm:$0xff]   ;;  %v23077_v55 = vld [vmem:[%s30002_s8 + $0xa00] ss:$8 sps:$4 sm:$0xff]  }
 0xed8   :  { %16192 = vmatprep.subr.bf16.mxu0 %v22980_v4  ;;  %16236 = vmatpush1.bf16.msra.mxu1 %v22996_v8  ;;  %v23073_v4 = vld [vmem:[%s30002_s8 + $0xa14] ss:$8 sps:$4 sm:$0xff]   ;;  %v23071_v8 = vld [vmem:[%s30002_s8 + $0xa10] ss:$8 sps:$4 sm:$0xff]  }
 0xed9   :  { %16237 = vmatprep.subr.bf16.mxu1 %v23004_v41  ;;  %v23079_v41 = vld [vmem:[%s30002_s8 + $0xa04] ss:$8 sps:$4 sm:$0xff]  }
 0xedc   :  { %16238 = vmatpush1.bf16.msra.mxu1 %v23002_v28 }
 0xedd   :  { %16239 = vmatprep.subr.bf16.mxu1 %v23010_v29 }
 0xede   :  { %20028 = vmatmul.mubr.msk.bf16.vlgmr.msra.gmra.mxu0 %vm12978_vm6, %v20026_v58  ;;  %v23052_v58 = vld [vmem:[%s30002_s8 + $0xa54] ss:$8 sps:$4 sm:$0xff]  }
 0xedf   :  { %16193 = vmatpush1.bf16.msra.mxu0 %v22978_v10 }
 0xee0   :  { %16194 = vmatprep.subr.bf16.mxu0 %v22983_v23  ;;  %16240 = vmatpush1.bf16.msra.mxu1 %v23008_v18 }
 0xee1   :  { %16241 = vmatprep.subr.bf16.mxu1 %v23016_v46 }
 0xee3   :  { %16195 = vmatpush1.bf16.msra.mxu0 %v22981_v31 }
 0xee4   :  { %16196 = vmatprep.subr.bf16.mxu0 %v22986_v27  ;;  %16242 = vmatpush1.bf16.msra.mxu1 %v23014_v21 }
 0xee5   :  { %16243 = vmatprep.subr.bf16.mxu1 %v23022_v56  ;;  %v23068_v56 = vld [vmem:[%s30002_s8 + $0xa90] ss:$8 sps:$4 sm:$0xff]  }
 0xee7   :  { %16197 = vmatpush1.bf16.msra.mxu0 %v22984_v20 }
 0xee8   :  { %16198 = vmatprep.subr.bf16.mxu0 %v22989_v42  ;;  %16244 = vmatpush1.bf16.msra.mxu1 %v23020_v63  ;;  %v23076_v63 = vld [vmem:[%s30002_s8 + $0xa84] ss:$8 sps:$4 sm:$0xff]  }
 0xee9   :  { %16245 = vmatprep.subr.bf16.mxu1 %v23028_v60 }
 0xeeb   :  { %16199 = vmatpush1.bf16.msra.mxu0 %v22987_v62 }
 0xeec   :  { %16200 = vmatprep.subr.bf16.mxu0 %v22995_v24  ;;  %16246 = vmatpush1.bf16.msra.mxu1 %v23026_v38 }
 0xeed   :  { %16247 = vmatprep.subr.bf16.mxu1 %v23034_v50  ;;  %v23074_v50 = vld [vmem:[%s30002_s8 + $0xa80] ss:$8 sps:$4 sm:$0xff]  }
 0xeef   :  { %16201 = vmatpush1.bf16.msra.mxu0 %v22993_v3 }
 0xef0   :  { %16202 = vmatprep.subr.bf16.mxu0 %v23001_v22  ;;  %16248 = vmatpush1.bf16.msra.mxu1 %v23032_v5 }
 0xef1   :  { %16249 = vmatprep.subr.bf16.mxu1 %v23040_v9 }
 0xef3   :  { %16203 = vmatpush1.bf16.msra.mxu0 %v22999_v33 }
 0xef4   :  { %16204 = vmatprep.subr.bf16.mxu0 %v23007_v47  ;;  %16250 = vmatpush2.bf16.msra.mxu1 %v23038_v1 }
 0xef5   :  { %16251 = vmatprep.subr.bf16.mxu1 %v23046_v17 }
 0xef7   :  { %16205 = vmatpush1.bf16.msra.mxu0 %v23005_v49 }
 0xef8   :  { %16206 = vmatprep.subr.bf16.mxu0 %v23013_v39  ;;  %16252 = vmatpush2.bf16.msra.mxu1 %v23044_v54 }
 0xef9   :  { %16253 = vmatprep.subr.bf16.mxu1 %v23052_v58 }
 0xefb   :  { %16207 = vmatpush1.bf16.msra.mxu0 %v23011_v36 }
 0xefc   :  { %16208 = vmatprep.subr.bf16.mxu0 %v23019_v34  ;;  %16254 = vmatpush2.bf16.msra.mxu1 %v23050_v44 }
 0xefd   :  { %16255 = vmatprep.subr.bf16.mxu1 %v23058_v30 }
 0xeff   :  { %16209 = vmatpush2.bf16.msra.mxu0 %v23017_v26 }
 0xf00   :  { %16210 = vmatprep.subr.bf16.mxu0 %v23025_v52  ;;  %16256 = vmatpush2.bf16.msra.mxu1 %v23056_v59 }
 0xf01   :  { %16257 = vmatprep.subr.bf16.mxu1 %v23064_v7 }
 0xf03   :  { %16211 = vmatpush2.bf16.msra.mxu0 %v23023_v37 }
 0xf04   :  { %16212 = vmatprep.subr.bf16.mxu0 %v23031_v2  ;;  %16258 = vmatpush2.bf16.msra.mxu1 %v23062_v0 }
 0xf05   :  { %16259 = vmatprep.subr.bf16.mxu1 %v23067_v19 }
 0xf07   :  { %16213 = vmatpush2.bf16.msra.mxu0 %v23029_v48 }
 0xf08   :  { %16214 = vmatprep.subr.bf16.mxu0 %v23037_v51  ;;  %16260 = vmatpush2.bf16.msra.mxu1 %v23065_v53 }
 0xf09   :  { %16261 = vmatprep.subr.bf16.mxu1 %v23073_v4 }
 0xf0b   :  { %16215 = vmatpush2.bf16.msra.mxu0 %v23035_v11 }
 0xf0c   :  { %16216 = vmatprep.subr.bf16.mxu0 %v23043_v12  ;;  %16262 = vmatpush2.bf16.msra.mxu1 %v23071_v8 }
 0xf0d   :  { %16263 = vmatprep.subr.bf16.mxu1 %v23079_v41 }
 0xf0f   :  { %16217 = vmatpush2.bf16.msra.mxu0 %v23041_v25 }
 0xf10   :  { %16218 = vmatprep.subr.bf16.mxu0 %v23049_v43  ;;  %16264 = vmatpush2.bf16.msra.mxu1 %v23077_v55 }
 0xf13   :  { %16219 = vmatpush2.bf16.msra.mxu0 %v23047_v45 }
 0xf14   :  { %16220 = vmatprep.subr.bf16.mxu0 %v23055_v40  ;;  %v16317_v40 = vld [vmem:[%s30003_s9] sm:$0x3] }
 0xf17   :  { %16221 = vmatpush2.bf16.msra.mxu0 %v23053_v32 }
 0xf18   :  { %16222 = vmatprep.subr.bf16.mxu0 %v23061_v35  ;;  %v16322_v35 = vrot.slane %v16317_v40, %v25077_v16 }
 0xf1b   :  { %16223 = vmatpush2.bf16.msra.mxu0 %v23059_v14 }
 0xf1c   :  { %16286 = vmatprep.subr.bf16.mxu0 %v23070_v6  ;;  %v16326_v6 = vrot.slane %v16317_v40, %v25086_v57  ;;  %v16339_v57 = vld [vmem:[%s30004_s10] sm:$0x1] }
 0xf1d   :  { %v20230_v40 = vld [vmem:[%s30006_s12] ss:$0 sm:$0xff] }
 0xf83   :  { %v15598_v28 = vpop.f32.mrf.mxu1 }
 0xf85   :  { %v15600_v29 = vpop.f32.mrf.mxu1 }
 0xf87   :  { %v15602_v10 = vpop.f32.mrf.mxu1 }
 0xf89   :  { %v15603_v23 = vpop.f32.mrf.mxu1 }
 0xf8b   :  { %v15687_v18 = vpop.f32.mrf.mxu1 }
 0xf8c   :  { %v15775_v46 = vpack.c.bf16 %v15687_v18, %v15687_v18 }
 0xf8d   :  { %v15689_v31 = vpop.f32.mrf.mxu1 }
 0xf8e   :  { %v15557_v27 = vpop.f32.mrf.mxu0  ;;  %v15776_v21 = vpack.c.bf16 %v15689_v31, %v15689_v31  ;;  %v23080_v31 = vld [vmem:[%s30005_s11 + $0xa8] sm:$0xff]  }
 0xf8f   :  { %v15599_v20 = vadd.f32 %v15598_v28, %v15557_v27  ;;  %v15691_v42 = vpop.f32.mrf.mxu1  ;;  %v23081_v27 = vld [vmem:[%s30005_s11 + $0x38] sm:$0xff]  }
 0xf90   :  { %v15559_v60 = vpop.f32.mrf.mxu0  ;;  %16224 = vmatprep.mubr.bf16.mxu0 %v15776_v21  ;;  %v23082_v21 = vld [vmem:[%s30005_s11 + $0xa0] sm:$0xff]   ;;  %v23085_v42 = vld [vmem:[%s30005_s11 + $0x28] sm:$0xff]  }
 0xf91   :  { %v15601_v62 = vadd.f32 %v15600_v29, %v15559_v60  ;;  %16225 = vmatmul.mubr.bf16.vlgmr.msra.gmra.mxu0 %v15775_v46  ;;  %v15692_v24 = vpop.f32.mrf.mxu1  ;;  %v20169_v46 = vld [vmem:[%s30004_s10 + $0x1] sm:$0x1] }
 0xf92   :  { %v15561_v38 = vpop.f32.mrf.mxu0  ;;  %16287 = vmatpush1.bf16.msra.mxu0 %v23068_v56  ;;  %16306 = vmatprep.mubr.bf16.mxu0 %v30023_v13  ;;  %v23083_v56 = vld [vmem:[%s30005_s11 + $0x30] sm:$0xff]   ;;  %v23087_v60 = vld [vmem:[%s30005_s11 + $0x20] sm:$0xff]   ;;  %v23089_v24 = vld [vmem:[%s30005_s11 + $0x18] sm:$0xff]  }
 0xf93   :  { %16288 = vmatprep.subr.bf16.mxu0 %v23076_v63  ;;  %v15769_v3 = vpop.f32.mrf.mxu1  ;;  %v23086_v63 = vld [vmem:[%s30005_s11 + $0x90] sm:$0xff]   ;;  %v23090_v38 = vld [vmem:[%s30005_s11 + $0x80] sm:$0xff]  }
 0xf94   :  { %v15562_v22 = vpop.f32.mrf.mxu0  ;;  %v15779_v5 = vpack.c.bf16 %v15769_v3, %v15769_v3  ;;  %v23092_v3 = vld [vmem:[%s30005_s11 + $0x78] sm:$0xff]  }
 0xf95   :  { %v20674_v9 = vpop.f32.mrf.mxu1  ;;  %v23093_v22 = vld [vmem:[%s30005_s11 + $0x8] sm:$0xff]  }
 0xf96   :  { %v15639_v33 = vpop.f32.mrf.mxu0  ;;  %16289 = vmatpush1.bf16.msra.mxu0 %v23074_v50  ;;  %v23091_v50 = vld [vmem:[%s30005_s11 + $0x10] sm:$0xff]   ;;  %v23095_v9 = vld [vmem:[%s30005_s11] sm:$0xff]  }
 0xf97   :  { %v15640_v47 = vadd.f32 %v15639_v33, %v15599_v20  ;;  %v15772_v1 = vpop.f32.mrf.mxu1  ;;  %v23084_v20 = vld [vmem:[%s30005_s11 + $0x98] sm:$0xff]  }
 0xf98   :  { %v15641_v49 = vpop.f32.mrf.mxu0  ;;  %v23096_v33 = vld [vmem:[%s30005_s11 + $0xd8] sm:$0xff]   ;;  %v23098_v1 = vld [vmem:[%s30005_s11 + $0xd0] sm:$0xff]  }
 0xf99   :  { %v15646_v39 = vadd.f32 %v15640_v47, %v29621_v15  ;;  %v15642_v36 = vadd.f32 %v15641_v49, %v15601_v62  ;;  %20166 = vmatmul.mubr.msk.bf16.vlgmr.msra.gmra.mxu0 %vm12955_vm7, %v15779_v5  ;;  %v20675_v34 = vpop.f32.mrf.mxu1  ;;  %v23088_v62 = vld [vmem:[%s30005_s11 + $0x88] sm:$0xff]   ;;  %v23094_v5 = vld [vmem:[%s30005_s11 + $0x70] sm:$0xff]   ;;  %v23099_v49 = vld [vmem:[%s30005_s11 + $0x60] sm:$0xff]  }
 0xf9a   :  { %v15643_v26 = vpop.f32.mrf.mxu0  ;;  %16458 = vmatprep.mubr.bf16.mxu0 %v30023_v13  ;;  %v23097_v47 = vld [vmem:[%s30005_s11 + $0x68] sm:$0xff]   ;;  %v23102_v34 = vld [vmem:[%s30005_s11 + $0xc0] sm:$0xff]  }
 0xf9b   :  { %v15647_v52 = vadd.f32 %v15642_v36, %v29624_v61  ;;  %v23101_v36 = vld [vmem:[%s30005_s11 + $0x58] sm:$0xff]   ;;  %v23103_v26 = vld [vmem:[%s30005_s11 + $0x50] sm:$0xff]  }
 0xf9c   :  { %v15644_v37 = vpop.f32.mrf.mxu0 }
 0xf9d   :  { %v23105_v37 = vld [vmem:[%s30005_s11 + $0x48] sm:$0xff]  }
 0xf9e   :  { %v15728_v2 = vpop.f32.mrf.mxu0 }
 0xf9f   :  { %v15777_v17 = vpack.c.bf16 %v15728_v2, %v15728_v2  ;;  %v23106_v2 = vld [vmem:[%s30005_s11 + $0xb0] sm:$0xff]  }
 0xfa0   :  { %v15730_v48 = vpop.f32.mrf.mxu0 }
 0xfa1   :  { %v15778_v54 = vpack.c.bf16 %v15730_v48, %v15730_v48  ;;  %v23107_v48 = vld [vmem:[%s30005_s11 + $0x40] sm:$0xff]  }
 0xfa2   :  { %v15732_v51 = vpop.f32.mrf.mxu0 }
 0xfa3   :  { %16265 = vmatprep.mubr.bf16.mxu1 %v15778_v54 }
 0xfa4   :  { %v15733_v11 = vpop.f32.mrf.mxu0  ;;  %16266 = vmatmul.mubr.bf16.vlgmr.msra.gmra.mxu1 %v15777_v17 }
 0xfa5   :  { %16382 = vmatprep.mubr.bf16.mxu1 %v30023_v13 }
0x1051   :  { %v16226_v15 = vpop.f32.mrf.mxu0 }
0x1053   :  { %v16228_v44 = vpop.f32.mrf.mxu0 }
0x1055   :  { %v16230_v58 = vpop.f32.mrf.mxu0 }
0x1057   :  { %v16231_v12 = vpop.f32.mrf.mxu0 }
0x1059   :  { %v16308_v25 = vpop.f32.mrf.mxu0 }
0x105b   :  { %v16310_v43 = vpop.f32.mrf.mxu0 }
0x105d   :  { %v16312_v45 = vpop.f32.mrf.mxu0 }
0x105f   :  { %v16313_v30 = vpop.f32.mrf.mxu0 }
0x1064   :  { %v16267_v61 = vpop.f32.mrf.mxu1 }
0x1065   :  { %v16268_v59 = vadd.f32 %v16267_v61, %v16226_v15 }
0x1066   :  { %v16269_v32 = vpop.f32.mrf.mxu1 }
0x1067   :  { %v16309_v7 = vadd.f32 %v16308_v25, %v16268_v59  ;;  %v16270_v0 = vadd.f32 %v16269_v32, %v16228_v44 }
0x1068   :  { %v16271_v14 = vpop.f32.mrf.mxu1 }
0x1069   :  { %v16315_v19 = vadd.f32 %v16309_v7, %v15646_v39  ;;  %v16311_v53 = vadd.f32 %v16310_v43, %v16270_v0  ;;  %v23100_v39 = vld [vmem:[%s30005_s11 + $0xc8] sm:$0xff]  }
0x106a   :  { %v16272_v4 = vpop.f32.mrf.mxu1 }
0x106b   :  { %v16329_v8 = vadd.f32 %v16322_v35, %v16315_v19  ;;  %v16316_v41 = vadd.f32 %v16311_v53, %v15647_v52  ;;  %v23104_v52 = vld [vmem:[%s30005_s11 + $0xb8] sm:$0xff]  }
0x106d   :  { %v16331_v55 = vmax.f32 %v16329_v8, 0.0  ;;  %v16330_v28 = vadd.f32 %v16326_v6, %v16316_v41 }
0x106f   :  { %v16332_v29 = vmax.f32 %v16330_v28, 0.0  ;;  %v16337_v10 = vpack.c.bf16 %v16331_v55, %v16331_v55 }
0x1071   :  { %16334 = vst.msk [vmem:[#allocation4 + $0x8] sm:$0xff] %vm4077_vm5, %v16332_v29  ;;  %v16345_v16 = vsel %vm4150_vm2, %v16337_v10, 0 }
0x1078   :  { %v16336_v23 = vld [vmem:[#allocation4 + $0x8] sm:$0xff] }
0x1079   :  { %v16338_v18 = vpack.c.bf16 %v16336_v23, %v16336_v23 }
0x107b   :  { %20167 = vmatprep.subr.msk.bf16.mxu1 %vm4150_vm2, %v16338_v18  ;;  %20170 = vmatprep.subr.msk.bf16.mxu0 %vm4150_vm2, %v16338_v18 }
0x107c   :  { %16365 = vmatpush1.bf16.msra.mxu1 %v16345_v16  ;;  %16441 = vmatpush1.bf16.msra.mxu0 %v16345_v16 }
0x107d   :  { %16585 = vmatprep.subr.bf16.mxu1 %v30023_v13  ;;  %16712 = vmatprep.subr.bf16.mxu0 %v30023_v13 }
0x107f   :  { %20168 = vmatmul.mubr.msk.bf16.vlgmr.msra.gmra.mxu1 %vm16340_vm8, %v16339_v57  ;;  %20171 = vmatmul.mubr.msk.bf16.vlgmr.msra.gmra.mxu0 %vm16340_vm8, %v20169_v46 }
0x1080   :  { %16586 = vmatpush1.bf16.msra.mxu1 %v23080_v31  ;;  %16713 = vmatpush1.bf16.msra.mxu0 %v23081_v27 }
0x1081   :  { %16587 = vmatprep.subr.bf16.mxu1 %v30023_v13  ;;  %16714 = vmatprep.subr.bf16.mxu0 %v30023_v13 }
0x1084   :  { %16588 = vmatpush1.bf16.msra.mxu1 %v23082_v21  ;;  %16715 = vmatpush1.bf16.msra.mxu0 %v23083_v56 }
0x1085   :  { %16589 = vmatprep.subr.bf16.mxu1 %v30023_v13  ;;  %16716 = vmatprep.subr.bf16.mxu0 %v30023_v13 }
0x1088   :  { %16590 = vmatpush1.bf16.msra.mxu1 %v23084_v20  ;;  %16717 = vmatpush1.bf16.msra.mxu0 %v23085_v42 }
0x1089   :  { %16591 = vmatprep.subr.bf16.mxu1 %v30023_v13  ;;  %16718 = vmatprep.subr.bf16.mxu0 %v30023_v13 }
0x108c   :  { %16592 = vmatpush1.bf16.msra.mxu1 %v23086_v63  ;;  %16719 = vmatpush1.bf16.msra.mxu0 %v23087_v60 }
0x108d   :  { %16593 = vmatprep.subr.bf16.mxu1 %v30023_v13  ;;  %16720 = vmatprep.subr.bf16.mxu0 %v30023_v13 }
0x1090   :  { %16594 = vmatpush1.bf16.msra.mxu1 %v23088_v62  ;;  %16721 = vmatpush1.bf16.msra.mxu0 %v23089_v24 }
0x1091   :  { %16595 = vmatprep.subr.bf16.mxu1 %v30023_v13  ;;  %16722 = vmatprep.subr.bf16.mxu0 %v30023_v13 }
0x1094   :  { %16596 = vmatpush1.bf16.msra.mxu1 %v23090_v38  ;;  %16723 = vmatpush1.bf16.msra.mxu0 %v23091_v50 }
0x1095   :  { %16597 = vmatprep.subr.bf16.mxu1 %v30023_v13  ;;  %16724 = vmatprep.subr.bf16.mxu0 %v30023_v13 }
0x1098   :  { %16598 = vmatpush1.bf16.msra.mxu1 %v23092_v3  ;;  %16725 = vmatpush1.bf16.msra.mxu0 %v23093_v22 }
0x1099   :  { %16599 = vmatprep.subr.bf16.mxu1 %v30023_v13  ;;  %16726 = vmatprep.subr.bf16.mxu0 %v30023_v13 }
0x109c   :  { %16600 = vmatpush1.bf16.msra.mxu1 %v23094_v5  ;;  %16727 = vmatpush1.bf16.msra.mxu0 %v23095_v9 }
0x109d   :  { %16605 = vmatprep.subr.bf16.mxu1 %v30023_v13  ;;  %16732 = vmatprep.subr.bf16.mxu0 %v30023_v13 }
0x10a0   :  { %16606 = vmatpush2.bf16.msra.mxu1 %v23096_v33  ;;  %16733 = vmatpush2.bf16.msra.mxu0 %v23097_v47 }
0x10a1   :  { %16607 = vmatprep.subr.bf16.mxu1 %v30023_v13  ;;  %16734 = vmatprep.subr.bf16.mxu0 %v30023_v13 }
0x10a4   :  { %16608 = vmatpush2.bf16.msra.mxu1 %v23098_v1  ;;  %16735 = vmatpush2.bf16.msra.mxu0 %v23099_v49 }
0x10a5   :  { %16609 = vmatprep.subr.bf16.mxu1 %v30023_v13  ;;  %16736 = vmatprep.subr.bf16.mxu0 %v30023_v13 }
0x10a8   :  { %16610 = vmatpush2.bf16.msra.mxu1 %v23100_v39  ;;  %16737 = vmatpush2.bf16.msra.mxu0 %v23101_v36 }
0x10a9   :  { %16611 = vmatprep.subr.bf16.mxu1 %v30023_v13  ;;  %16738 = vmatprep.subr.bf16.mxu0 %v30023_v13 }
0x10ac   :  { %16612 = vmatpush2.bf16.msra.mxu1 %v23102_v34  ;;  %16739 = vmatpush2.bf16.msra.mxu0 %v23103_v26 }
0x10ad   :  { %16613 = vmatprep.subr.bf16.mxu1 %v30023_v13  ;;  %16740 = vmatprep.subr.bf16.mxu0 %v30023_v13 }
0x10b0   :  { %16614 = vmatpush2.bf16.msra.mxu1 %v23104_v52  ;;  %16741 = vmatpush2.bf16.msra.mxu0 %v23105_v37 }
0x10b1   :  { %16615 = vmatprep.subr.bf16.mxu1 %v30023_v13  ;;  %16742 = vmatprep.subr.bf16.mxu0 %v30023_v13 }
0x10b4   :  { %16616 = vmatpush2.bf16.msra.mxu1 %v23106_v2  ;;  %16743 = vmatpush2.bf16.msra.mxu0 %v23107_v48 }
0x113f   :  { %v16384_v54 = vpop.f32.mrf.mxu1  ;;  %v16460_v17 = vpop.f32.mrf.mxu0 }
0x1140   :  { %v16391_v58 = vpack.c.bf16 %v16384_v54, %v16384_v54  ;;  %v16467_v12 = vpack.c.bf16 %v16460_v17, %v16460_v17 }
0x1141   :  { %v16386_v51 = vpop.f32.mrf.mxu1  ;;  %v16462_v11 = vpop.f32.mrf.mxu0 }
0x1142   :  { %v16392_v15 = vpack.c.bf16 %v16386_v51, %v16386_v51  ;;  %v16468_v44 = vpack.c.bf16 %v16462_v11, %v16462_v11 }
0x1143   :  { %v16388_v25 = vpop.f32.mrf.mxu1  ;;  %v16464_v13 = vpop.f32.mrf.mxu0 }
0x1144   :  { %20214 = vmatprep.mubr.msk.bf16.mxu1 %vm4077_vm5, %v16468_v44  ;;  %20229 = vmatprep.mubr.msk.bf16.mxu0 %vm4077_vm5, %v16392_v15 }
0x1145   :  { %v16389_v43 = vpop.f32.mrf.mxu1  ;;  %v16465_v45 = vpop.f32.mrf.mxu0  ;;  %16618 = vmatmul.mubr.bf16.vlgmr.msra.gmra.mxu1 %v16467_v12  ;;  %16745 = vmatmul.mubr.bf16.vlgmr.msra.gmra.mxu0 %v16391_v58 }
0x1205   :  { %v16619_v30 = vpop.f32.mrf.mxu1  ;;  %v16746_v61 = vpop.f32.mrf.mxu0 }
0x1206   :  { %v16747_v59 = vadd.f32 %v16746_v61, %v16619_v30 }
0x1207   :  { %v16621_v32 = vpop.f32.mrf.mxu1  ;;  %v16748_v7 = vpop.f32.mrf.mxu0 }
0x1208   :  { %v16759_v35 = vadd.f32 %v20230_v40, %v16747_v59 }
0x1209   :  { %v16622_v0 = vpop.f32.mrf.mxu1  ;;  %v16749_v14 = vpop.f32.mrf.mxu0 }
0x120a   :  { %16761 = vst.msk [vmem:[#allocation5] sm:$0x3] %vm16760_vm9, %v16759_v35 }
0x120b   :  { %v16623_v19 = vpop.f32.mrf.mxu1  ;;  %v16750_v53 = vpop.f32.mrf.mxu0 }
0x120c   :  { %23148 = shalt.err (!%p23145_p4)
}
0x120d   :  { %16771 = dma.vmem_to_hbm [thread:$0]  %s16769_s4, 32, %s30007_s13, [#allocation6]  }
0x120e   :  { %23157 = dma.done.wait [#allocation6], 32  }
0x120f   :  { %23158 = vsyncadd [#allocation6], 4294967264 }
0x1210   :  { %16775 = vsyncpa [#allocation6], 1 }

</bundles_post_ra>
